<compile_context>
chip_gen: v5e
topology: v5e:2x2
jax: 0.10.0
libtpu: 0.0.40
codegen_flags: <defaults>
</compile_context>

<pallas_src>
import jax
import jax.numpy as jnp
import numpy as np
from jax import lax
from jax.experimental import pallas as pl
from jax.experimental.pallas import tpu as pltpu

# Model dims mirroring the PyTorch module (vocab shrunk for the synthetic demo).
VOCAB = 1000        # nn.Embedding(100000, 256) -> smaller vocab, same embed dim
EMBED = 256
HIDDEN = 128
OUT = 1024          # output_shape default
NUM_LAYERS = 2      # implemented explicitly as two stacked LSTM cells


def text_feature_kernel(emb_ref, w_ih1_ref, w_hh1_ref, b1_ref,
                        w_ih2_ref, w_hh2_ref, b2_ref,
                        wl_hbm_ref, bl_ref, out_ref,
                        ih1_vmem, wl_vmem, wl_sem):
    Bp = out_ref.shape[0]
    TB = emb_ref.shape[0]            # T * Bp (time-major, batch-padded, flattened)
    T = TB // Bp
    H = HIDDEN

    # Kick off the 2 MiB w_lin HBM->VMEM DMA now; it is first needed only at the step-0
    # output accumulation, so it overlaps the hoisted ih1 matmul + LSTM step 0.
    wl_cp = pltpu.make_async_copy(wl_hbm_ref, wl_vmem, wl_sem)
    wl_cp.start()

    # Hoisted layer-1 input-to-hidden matmul for all T steps at once, bias folded in.
    ih1_vmem[...] = (
        jnp.dot(emb_ref[...], w_ih1_ref[...], preferred_element_type=jnp.float32)
        + jnp.broadcast_to(b1_ref[...], (TB, 4 * H)))

    # Recurrent weights / biases hoisted out of the time loop.
    w_hh1 = w_hh1_ref[...]                                   # (H, 4H)  bf16
    w_ih2 = w_ih2_ref[...]                                   # (H, 4H)  bf16
    w_hh2 = w_hh2_ref[...]                                   # (H, 4H)  bf16
    b2b = jnp.broadcast_to(b2_ref[...], (Bp, 4 * H))         # (Bp, 4H) f32

    # Final Linear runs as a per-step K-split accumulation; seed with its bias.
    out_acc = jnp.broadcast_to(bl_ref[...], (Bp, OUT))       # (Bp, OUT) f32

    zero = jnp.zeros((Bp, H), jnp.float32)
    h1, c1, h2, c2 = zero, zero, zero, zero

    def sig(x):
        # 0.5*tanh(0.5*x)+0.5 == sigmoid(x): one EUP op instead of exp + reciprocal.
        return 0.5 * jnp.tanh(0.5 * x) + 0.5

    # Fully unrolled (T is small and static); recurrent state stays in vregs.
    # TODO(synk): lax.fori_loop + streamed w_lin tiles for T >= 32.
    for t in range(T):
        # ---- layer 1: only the serial hh matmul is left on the recurrent chain ----
        g1 = ih1_vmem[t * Bp:(t + 1) * Bp, :] + jnp.dot(
            h1.astype(jnp.bfloat16), w_hh1, preferred_element_type=jnp.float32)
        i1 = sig(g1[:, 0 * H:1 * H])
        f1 = sig(g1[:, 1 * H:2 * H])
        gg1 = jnp.tanh(g1[:, 2 * H:3 * H])
        o1 = sig(g1[:, 3 * H:4 * H])
        c1 = f1 * c1 + i1 * gg1
        h1 = o1 * jnp.tanh(c1)

        # ---- layer 2: two small dots, no lane-concat (input h1_t is serial) ----
        h1b = h1.astype(jnp.bfloat16)
        g2 = (jnp.dot(h1b, w_ih2, preferred_element_type=jnp.float32)
              + jnp.dot(h2.astype(jnp.bfloat16), w_hh2, preferred_element_type=jnp.float32)
              + b2b)
        i2 = sig(g2[:, 0 * H:1 * H])
        f2 = sig(g2[:, 1 * H:2 * H])
        gg2 = jnp.tanh(g2[:, 2 * H:3 * H])
        o2 = sig(g2[:, 3 * H:4 * H])
        c2 = f2 * c2 + i2 * gg2
        h2 = o2 * jnp.tanh(c2)

        # ---- final Linear, K-split: off the recurrent chain, hidden under next step ----
        if t == 0:
            wl_cp.wait()   # first (and only) gate on the w_lin DMA
        out_acc = out_acc + jnp.dot(
            h2.astype(jnp.bfloat16), wl_vmem[t * H:(t + 1) * H, :],
            preferred_element_type=jnp.float32)

    out_ref[...] = out_acc.astype(out_ref.dtype)


def text_feature_extraction(tokens, params):
    B, T = tokens.shape
    # Pad batch to 16 (bf16 sublane packing). TODO(synk): for large B use 128/256-row
    # grid blocks with dimension_semantics=("parallel",) so both v7x TCs are used.
    Bp = max(16, ((B + 15) // 16) * 16)

    # Embedding gather is glue (data-dependent row lookup) and stays in plain JAX.
    # Gather time-major directly, cast to bf16 BEFORE padding, flatten so the layer-1
    # ih matmul is a single (T*Bp, EMBED) @ (EMBED, 4H).
    emb = params["embedding"][tokens.T].astype(jnp.bfloat16)          # (T, B, E)
    emb = jnp.pad(emb, ((0, 0), (0, Bp - B), (0, 0)))                 # (T, Bp, E)
    emb2d = emb.reshape(T * Bp, EMBED)

    vmem = pl.BlockSpec(memory_space=pltpu.MemorySpace.VMEM)
    out = pl.pallas_call(
        text_feature_kernel,
        out_shape=jax.ShapeDtypeStruct((Bp, OUT), jnp.float32),
        in_specs=[vmem, vmem, vmem, vmem, vmem, vmem, vmem,
                  pl.BlockSpec(memory_space=pl.ANY),   # w_lin stays in HBM; manual DMA
                  vmem],
        out_specs=vmem,
        scratch_shapes=[
            pltpu.VMEM((T * Bp, 4 * HIDDEN), jnp.float32),    # hoisted ih1 (+ b1)
            pltpu.VMEM((T * HIDDEN, OUT), jnp.bfloat16),      # w_lin staging buffer
            pltpu.SemaphoreType.DMA(()),
        ],
        compiler_params=pltpu.CompilerParams(
            # ~3 MiB resident footprint; headroom so moderately larger T still compiles
            # on v5e's 16 MiB scoped default and v7x's 64 MiB physical VMEM.
            vmem_limit_bytes=32 * 1024 * 1024,
        ),
    )(emb2d,
      params["w_ih1"].astype(jnp.bfloat16), params["w_hh1"].astype(jnp.bfloat16),
      params["b1"],
      params["w_ih2"].astype(jnp.bfloat16), params["w_hh2"].astype(jnp.bfloat16),
      params["b2"],
      params["w_lin"].astype(jnp.bfloat16), params["b_lin"])
    return out[:B]


def init_params(key, T):
    ks = jax.random.split(key, 11)
    s = 1.0 / np.sqrt(HIDDEN)

    def u(k, shape, scale):
        return jax.random.uniform(k, shape, jnp.float32, -scale, scale)

    embedding = jax.random.normal(ks[0], (VOCAB, EMBED), jnp.float32) * 0.1
    # PyTorch stores weight_ih_l* as (4H, in) / weight_hh_l* as (4H, H); we keep the
    # transposed forms (in, 4H) / (H, 4H) separately (ih hoisted, hh in-loop), and the
    # two bias vectors per layer are pre-summed.
    w_ih1 = u(ks[1], (EMBED, 4 * HIDDEN), s)
    w_hh1 = u(ks[2], (HIDDEN, 4 * HIDDEN), s)
    b1 = u(ks[3], (1, 4 * HIDDEN), s) + u(ks[4], (1, 4 * HIDDEN), s)
    w_ih2 = u(ks[5], (HIDDEN, 4 * HIDDEN), s)
    w_hh2 = u(ks[6], (HIDDEN, 4 * HIDDEN), s)
    b2 = u(ks[7], (1, 4 * HIDDEN), s) + u(ks[8], (1, 4 * HIDDEN), s)
    sl = 1.0 / np.sqrt(T * HIDDEN)
    w_lin = u(ks[9], (T * HIDDEN, OUT), sl)   # LazyLinear weight, stored transposed
    b_lin = u(ks[10], (1, OUT), sl)
    return dict(embedding=embedding,
                w_ih1=w_ih1, w_hh1=w_hh1, b1=b1,
                w_ih2=w_ih2, w_hh2=w_hh2, b2=b2,
                w_lin=w_lin, b_lin=b_lin)


def reference(tokens, p):
    """Pure-JAX f32 (HIGHEST-precision) reference of the PyTorch forward pass."""
    x = p["embedding"][tokens]                                   # (B, T, E)
    B = x.shape[0]

    def run_layer(seq, w_ih, w_hh, b):
        def cell(carry, x_t):
            h, c = carry
            g = (jnp.dot(x_t, w_ih, precision=lax.Precision.HIGHEST)
                 + jnp.dot(h, w_hh, precision=lax.Precision.HIGHEST) + b[0])
            i = jax.nn.sigmoid(g[:, :HIDDEN])
            f = jax.nn.sigmoid(g[:, HIDDEN:2 * HIDDEN])
            gg = jnp.tanh(g[:, 2 * HIDDEN:3 * HIDDEN])
            o = jax.nn.sigmoid(g[:, 3 * HIDDEN:])
            c = f * c + i * gg
            h = o * jnp.tanh(c)
            return (h, c), h

        init = (jnp.zeros((B, HIDDEN), jnp.float32), jnp.zeros((B, HIDDEN), jnp.float32))
        _, hs = lax.scan(cell, init, jnp.transpose(seq, (1, 0, 2)))
        return jnp.transpose(hs, (1, 0, 2))

    h1 = run_layer(x, p["w_ih1"], p["w_hh1"], p["b1"])
    h2 = run_layer(h1, p["w_ih2"], p["w_hh2"], p["b2"])
    flat = h2.reshape(B, -1)                                     # x.reshape(x.size(0), -1)
    return jnp.dot(flat, p["w_lin"], precision=lax.Precision.HIGHEST) + p["b_lin"][0]


if __name__ == "__main__":
    key = jax.random.PRNGKey(0)
    B, T = 2, 8
    kp, kt = jax.random.split(key)
    params = init_params(kp, T)
    tokens = jax.random.randint(kt, (B, T), 0, VOCAB, dtype=jnp.int32)

    out = text_feature_extraction(tokens, params)
    out = jax.block_until_ready(out)
    assert out.shape == (B, OUT)

    ref = reference(tokens, params)
    # Kernel runs bf16-input / f32-accumulate matmuls; reference is full-f32 HIGHEST,
    # so tolerance is loosened accordingly.
    np.testing.assert_allclose(np.asarray(out), np.asarray(ref), rtol=2e-2, atol=2e-2)
    print("KERNEL_OK")
</pallas_src>

<mosaic_0001>
module attributes {stable_mosaic.version = 11 : i64} {
  func.func @text_feature_kernel(%arg0: memref<128x256xbf16, #tpu.memory_space<vmem>>, %arg1: memref<256x512xbf16, #tpu.memory_space<vmem>>, %arg2: memref<128x512xbf16, #tpu.memory_space<vmem>>, %arg3: memref<1x512xf32, #tpu.memory_space<vmem>>, %arg4: memref<128x512xbf16, #tpu.memory_space<vmem>>, %arg5: memref<128x512xbf16, #tpu.memory_space<vmem>>, %arg6: memref<1x512xf32, #tpu.memory_space<vmem>>, %arg7: memref<1024x1024xbf16, #tpu.memory_space<any>>, %arg8: memref<1x1024xf32, #tpu.memory_space<vmem>>, %arg9: memref<16x1024xf32, #tpu.memory_space<vmem>>, %arg10: memref<128x512xf32, #tpu.memory_space<vmem>>, %arg11: memref<1024x1024xbf16, #tpu.memory_space<vmem>>, %arg12: memref<!tpu.dma_semaphore, #tpu.memory_space<semaphore_mem>>) attributes {dimension_semantics = [], scalar_prefetch = 0 : i64, scratch_operands = 3 : i64, tpu.core_type = #tpu.core_type<tc>} {
    tpu.enqueue_dma source(%arg7 : memref<1024x1024xbf16, #tpu.memory_space<any>>) target(%arg11 : memref<1024x1024xbf16, #tpu.memory_space<vmem>>) target_semaphore(%arg12 : memref<!tpu.dma_semaphore, #tpu.memory_space<semaphore_mem>>)
    %c0 = arith.constant 0 : index
    %c0_0 = arith.constant 0 : index
    %0 = vector.load %arg0[%c0, %c0_0] : memref<128x256xbf16, #tpu.memory_space<vmem>>, vector<128x256xbf16>
    %c0_1 = arith.constant 0 : index
    %c0_2 = arith.constant 0 : index
    %1 = vector.load %arg1[%c0_1, %c0_2] : memref<256x512xbf16, #tpu.memory_space<vmem>>, vector<256x512xbf16>
    %cst = arith.constant dense<0.000000e+00> : vector<128x512xf32>
    %2 = tpu.matmul %0, %1, %cst {dimension_numbers = #tpu.dot_dimension_numbers<[1], [0], [0], [1], [0, 0, 1, 1], [], []>} : vector<128x256xbf16>, vector<256x512xbf16>, vector<128x512xf32> -> vector<128x512xf32>
    %c0_3 = arith.constant 0 : index
    %c0_4 = arith.constant 0 : index
    %3 = vector.load %arg3[%c0_3, %c0_4] : memref<1x512xf32, #tpu.memory_space<vmem>>, vector<1x512xf32>
    %4 = vector.shape_cast %3 : vector<1x512xf32> to vector<1x512xf32>
    %5 = vector.broadcast %4 : vector<1x512xf32> to vector<128x512xf32>
    %6 = arith.addf %2, %5 : vector<128x512xf32>
    %c0_5 = arith.constant 0 : index
    %c0_6 = arith.constant 0 : index
    %7 = vector.load %arg10[%c0_5, %c0_6] : memref<128x512xf32, #tpu.memory_space<vmem>>, vector<128x512xf32>
    tpu.vector_store %arg10[%c0_5, %c0_6], %6 {strides = array<i32>} : memref<128x512xf32, #tpu.memory_space<vmem>>, vector<128x512xf32>,
    %c0_7 = arith.constant 0 : index
    %c0_8 = arith.constant 0 : index
    %8 = vector.load %arg2[%c0_7, %c0_8] : memref<128x512xbf16, #tpu.memory_space<vmem>>, vector<128x512xbf16>
    %c0_9 = arith.constant 0 : index
    %c0_10 = arith.constant 0 : index
    %9 = vector.load %arg4[%c0_9, %c0_10] : memref<128x512xbf16, #tpu.memory_space<vmem>>, vector<128x512xbf16>
    %c0_11 = arith.constant 0 : index
    %c0_12 = arith.constant 0 : index
    %10 = vector.load %arg5[%c0_11, %c0_12] : memref<128x512xbf16, #tpu.memory_space<vmem>>, vector<128x512xbf16>
    %c0_13 = arith.constant 0 : index
    %c0_14 = arith.constant 0 : index
    %11 = vector.load %arg6[%c0_13, %c0_14] : memref<1x512xf32, #tpu.memory_space<vmem>>, vector<1x512xf32>
    %12 = vector.shape_cast %11 : vector<1x512xf32> to vector<1x512xf32>
    %13 = vector.broadcast %12 : vector<1x512xf32> to vector<16x512xf32>
    %c0_15 = arith.constant 0 : index
    %c0_16 = arith.constant 0 : index
    %14 = vector.load %arg8[%c0_15, %c0_16] : memref<1x1024xf32, #tpu.memory_space<vmem>>, vector<1x1024xf32>
    %15 = vector.shape_cast %14 : vector<1x1024xf32> to vector<1x1024xf32>
    %16 = vector.broadcast %15 : vector<1x1024xf32> to vector<16x1024xf32>
    %cst_17 = arith.constant 0.000000e+00 : f32
    %17 = vector.broadcast %cst_17 : f32 to vector<16x128xf32>
    %c0_18 = arith.constant 0 : index
    %c0_19 = arith.constant 0 : index
    %18 = vector.load %arg10[%c0_18, %c0_19] : memref<128x512xf32, #tpu.memory_space<vmem>>, vector<16x512xf32>
    %19 = arith.truncf %17 : vector<16x128xf32> to vector<16x128xbf16>
    %cst_20 = arith.constant dense<0.000000e+00> : vector<16x512xf32>
    %20 = tpu.matmul %19, %8, %cst_20 {dimension_numbers = #tpu.dot_dimension_numbers<[1], [0], [0], [1], [0, 0, 1, 1], [], []>} : vector<16x128xbf16>, vector<128x512xbf16>, vector<16x512xf32> -> vector<16x512xf32>
    %21 = arith.addf %18, %20 : vector<16x512xf32>
    %22 = vector.extract_strided_slice %21 {offsets = [0, 0], sizes = [16, 128], strides = [1, 1]} : vector<16x512xf32> to vector<16x128xf32>
    %cst_21 = arith.constant 5.000000e-01 : f32
    %23 = vector.broadcast %cst_21 : f32 to vector<16x128xf32>
    %24 = arith.mulf %23, %22 : vector<16x128xf32>
    %25 = math.tanh %24 : vector<16x128xf32>
    %cst_22 = arith.constant 5.000000e-01 : f32
    %26 = vector.broadcast %cst_22 : f32 to vector<16x128xf32>
    %27 = arith.mulf %26, %25 : vector<16x128xf32>
    %cst_23 = arith.constant 5.000000e-01 : f32
    %28 = vector.broadcast %cst_23 : f32 to vector<16x128xf32>
    %29 = arith.addf %27, %28 : vector<16x128xf32>
    %30 = vector.extract_strided_slice %21 {offsets = [0, 128], sizes = [16, 128], strides = [1, 1]} : vector<16x512xf32> to vector<16x128xf32>
    %cst_24 = arith.constant 5.000000e-01 : f32
    %31 = vector.broadcast %cst_24 : f32 to vector<16x128xf32>
    %32 = arith.mulf %31, %30 : vector<16x128xf32>
    %33 = math.tanh %32 : vector<16x128xf32>
    %cst_25 = arith.constant 5.000000e-01 : f32
    %34 = vector.broadcast %cst_25 : f32 to vector<16x128xf32>
    %35 = arith.mulf %34, %33 : vector<16x128xf32>
    %cst_26 = arith.constant 5.000000e-01 : f32
    %36 = vector.broadcast %cst_26 : f32 to vector<16x128xf32>
    %37 = arith.addf %35, %36 : vector<16x128xf32>
    %38 = vector.extract_strided_slice %21 {offsets = [0, 256], sizes = [16, 128], strides = [1, 1]} : vector<16x512xf32> to vector<16x128xf32>
    %39 = math.tanh %38 : vector<16x128xf32>
    %40 = vector.extract_strided_slice %21 {offsets = [0, 384], sizes = [16, 128], strides = [1, 1]} : vector<16x512xf32> to vector<16x128xf32>
    %cst_27 = arith.constant 5.000000e-01 : f32
    %41 = vector.broadcast %cst_27 : f32 to vector<16x128xf32>
    %42 = arith.mulf %41, %40 : vector<16x128xf32>
    %43 = math.tanh %42 : vector<16x128xf32>
    %cst_28 = arith.constant 5.000000e-01 : f32
    %44 = vector.broadcast %cst_28 : f32 to vector<16x128xf32>
    %45 = arith.mulf %44, %43 : vector<16x128xf32>
    %cst_29 = arith.constant 5.000000e-01 : f32
    %46 = vector.broadcast %cst_29 : f32 to vector<16x128xf32>
    %47 = arith.addf %45, %46 : vector<16x128xf32>
    %48 = arith.mulf %37, %17 : vector<16x128xf32>
    %49 = arith.mulf %29, %39 : vector<16x128xf32>
    %50 = arith.addf %48, %49 : vector<16x128xf32>
    %51 = math.tanh %50 : vector<16x128xf32>
    %52 = arith.mulf %47, %51 : vector<16x128xf32>
    %53 = arith.truncf %52 : vector<16x128xf32> to vector<16x128xbf16>
    %cst_30 = arith.constant dense<0.000000e+00> : vector<16x512xf32>
    %54 = tpu.matmul %53, %9, %cst_30 {dimension_numbers = #tpu.dot_dimension_numbers<[1], [0], [0], [1], [0, 0, 1, 1], [], []>} : vector<16x128xbf16>, vector<128x512xbf16>, vector<16x512xf32> -> vector<16x512xf32>
    %55 = arith.truncf %17 : vector<16x128xf32> to vector<16x128xbf16>
    %cst_31 = arith.constant dense<0.000000e+00> : vector<16x512xf32>
    %56 = tpu.matmul %55, %10, %cst_31 {dimension_numbers = #tpu.dot_dimension_numbers<[1], [0], [0], [1], [0, 0, 1, 1], [], []>} : vector<16x128xbf16>, vector<128x512xbf16>, vector<16x512xf32> -> vector<16x512xf32>
    %57 = arith.addf %54, %56 : vector<16x512xf32>
    %58 = arith.addf %57, %13 : vector<16x512xf32>
    %59 = vector.extract_strided_slice %58 {offsets = [0, 0], sizes = [16, 128], strides = [1, 1]} : vector<16x512xf32> to vector<16x128xf32>
    %cst_32 = arith.constant 5.000000e-01 : f32
    %60 = vector.broadcast %cst_32 : f32 to vector<16x128xf32>
    %61 = arith.mulf %60, %59 : vector<16x128xf32>
    %62 = math.tanh %61 : vector<16x128xf32>
    %cst_33 = arith.constant 5.000000e-01 : f32
    %63 = vector.broadcast %cst_33 : f32 to vector<16x128xf32>
    %64 = arith.mulf %63, %62 : vector<16x128xf32>
    %cst_34 = arith.constant 5.000000e-01 : f32
    %65 = vector.broadcast %cst_34 : f32 to vector<16x128xf32>
    %66 = arith.addf %64, %65 : vector<16x128xf32>
    %67 = vector.extract_strided_slice %58 {offsets = [0, 128], sizes = [16, 128], strides = [1, 1]} : vector<16x512xf32> to vector<16x128xf32>
    %cst_35 = arith.constant 5.000000e-01 : f32
    %68 = vector.broadcast %cst_35 : f32 to vector<16x128xf32>
    %69 = arith.mulf %68, %67 : vector<16x128xf32>
    %70 = math.tanh %69 : vector<16x128xf32>
    %cst_36 = arith.constant 5.000000e-01 : f32
    %71 = vector.broadcast %cst_36 : f32 to vector<16x128xf32>
    %72 = arith.mulf %71, %70 : vector<16x128xf32>
    %cst_37 = arith.constant 5.000000e-01 : f32
    %73 = vector.broadcast %cst_37 : f32 to vector<16x128xf32>
    %74 = arith.addf %72, %73 : vector<16x128xf32>
    %75 = vector.extract_strided_slice %58 {offsets = [0, 256], sizes = [16, 128], strides = [1, 1]} : vector<16x512xf32> to vector<16x128xf32>
    %76 = math.tanh %75 : vector<16x128xf32>
    %77 = vector.extract_strided_slice %58 {offsets = [0, 384], sizes = [16, 128], strides = [1, 1]} : vector<16x512xf32> to vector<16x128xf32>
    %cst_38 = arith.constant 5.000000e-01 : f32
    %78 = vector.broadcast %cst_38 : f32 to vector<16x128xf32>
    %79 = arith.mulf %78, %77 : vector<16x128xf32>
    %80 = math.tanh %79 : vector<16x128xf32>
    %cst_39 = arith.constant 5.000000e-01 : f32
    %81 = vector.broadcast %cst_39 : f32 to vector<16x128xf32>
    %82 = arith.mulf %81, %80 : vector<16x128xf32>
    %cst_40 = arith.constant 5.000000e-01 : f32
    %83 = vector.broadcast %cst_40 : f32 to vector<16x128xf32>
    %84 = arith.addf %82, %83 : vector<16x128xf32>
    %85 = arith.mulf %74, %17 : vector<16x128xf32>
    %86 = arith.mulf %66, %76 : vector<16x128xf32>
    %87 = arith.addf %85, %86 : vector<16x128xf32>
    %88 = math.tanh %87 : vector<16x128xf32>
    %89 = arith.mulf %84, %88 : vector<16x128xf32>
    tpu.wait_dma2 semaphore(%arg12 : memref<!tpu.dma_semaphore, #tpu.memory_space<semaphore_mem>>) src(%arg7 : memref<1024x1024xbf16, #tpu.memory_space<any>>) dst(%arg11 : memref<1024x1024xbf16, #tpu.memory_space<vmem>>)
    %90 = arith.truncf %89 : vector<16x128xf32> to vector<16x128xbf16>
    %c0_41 = arith.constant 0 : index
    %c0_42 = arith.constant 0 : index
    %91 = vector.load %arg11[%c0_41, %c0_42] : memref<1024x1024xbf16, #tpu.memory_space<vmem>>, vector<128x1024xbf16>
    %cst_43 = arith.constant dense<0.000000e+00> : vector<16x1024xf32>
    %92 = tpu.matmul %90, %91, %cst_43 {dimension_numbers = #tpu.dot_dimension_numbers<[1], [0], [0], [1], [0, 0, 1, 1], [], []>} : vector<16x128xbf16>, vector<128x1024xbf16>, vector<16x1024xf32> -> vector<16x1024xf32>
    %93 = arith.addf %16, %92 : vector<16x1024xf32>
    %c16 = arith.constant 16 : index
    %c0_44 = arith.constant 0 : index
    %94 = vector.load %arg10[%c16, %c0_44] : memref<128x512xf32, #tpu.memory_space<vmem>>, vector<16x512xf32>
    %95 = arith.truncf %52 : vector<16x128xf32> to vector<16x128xbf16>
    %cst_45 = arith.constant dense<0.000000e+00> : vector<16x512xf32>
    %96 = tpu.matmul %95, %8, %cst_45 {dimension_numbers = #tpu.dot_dimension_numbers<[1], [0], [0], [1], [0, 0, 1, 1], [], []>} : vector<16x128xbf16>, vector<128x512xbf16>, vector<16x512xf32> -> vector<16x512xf32>
    %97 = arith.addf %94, %96 : vector<16x512xf32>
    %98 = vector.extract_strided_slice %97 {offsets = [0, 0], sizes = [16, 128], strides = [1, 1]} : vector<16x512xf32> to vector<16x128xf32>
    %cst_46 = arith.constant 5.000000e-01 : f32
    %99 = vector.broadcast %cst_46 : f32 to vector<16x128xf32>
    %100 = arith.mulf %99, %98 : vector<16x128xf32>
    %101 = math.tanh %100 : vector<16x128xf32>
    %cst_47 = arith.constant 5.000000e-01 : f32
    %102 = vector.broadcast %cst_47 : f32 to vector<16x128xf32>
    %103 = arith.mulf %102, %101 : vector<16x128xf32>
    %cst_48 = arith.constant 5.000000e-01 : f32
    %104 = vector.broadcast %cst_48 : f32 to vector<16x128xf32>
    %105 = arith.addf %103, %104 : vector<16x128xf32>
    %106 = vector.extract_strided_slice %97 {offsets = [0, 128], sizes = [16, 128], strides = [1, 1]} : vector<16x512xf32> to vector<16x128xf32>
    %cst_49 = arith.constant 5.000000e-01 : f32
    %107 = vector.broadcast %cst_49 : f32 to vector<16x128xf32>
    %108 = arith.mulf %107, %106 : vector<16x128xf32>
    %109 = math.tanh %108 : vector<16x128xf32>
    %cst_50 = arith.constant 5.000000e-01 : f32
    %110 = vector.broadcast %cst_50 : f32 to vector<16x128xf32>
    %111 = arith.mulf %110, %109 : vector<16x128xf32>
    %cst_51 = arith.constant 5.000000e-01 : f32
    %112 = vector.broadcast %cst_51 : f32 to vector<16x128xf32>
    %113 = arith.addf %111, %112 : vector<16x128xf32>
    %114 = vector.extract_strided_slice %97 {offsets = [0, 256], sizes = [16, 128], strides = [1, 1]} : vector<16x512xf32> to vector<16x128xf32>
    %115 = math.tanh %114 : vector<16x128xf32>
    %116 = vector.extract_strided_slice %97 {offsets = [0, 384], sizes = [16, 128], strides = [1, 1]} : vector<16x512xf32> to vector<16x128xf32>
    %cst_52 = arith.constant 5.000000e-01 : f32
    %117 = vector.broadcast %cst_52 : f32 to vector<16x128xf32>
    %118 = arith.mulf %117, %116 : vector<16x128xf32>
    %119 = math.tanh %118 : vector<16x128xf32>
    %cst_53 = arith.constant 5.000000e-01 : f32
    %120 = vector.broadcast %cst_53 : f32 to vector<16x128xf32>
    %121 = arith.mulf %120, %119 : vector<16x128xf32>
    %cst_54 = arith.constant 5.000000e-01 : f32
    %122 = vector.broadcast %cst_54 : f32 to vector<16x128xf32>
    %123 = arith.addf %121, %122 : vector<16x128xf32>
    %124 = arith.mulf %113, %50 : vector<16x128xf32>
    %125 = arith.mulf %105, %115 : vector<16x128xf32>
    %126 = arith.addf %124, %125 : vector<16x128xf32>
    %127 = math.tanh %126 : vector<16x128xf32>
    %128 = arith.mulf %123, %127 : vector<16x128xf32>
    %129 = arith.truncf %128 : vector<16x128xf32> to vector<16x128xbf16>
    %cst_55 = arith.constant dense<0.000000e+00> : vector<16x512xf32>
    %130 = tpu.matmul %129, %9, %cst_55 {dimension_numbers = #tpu.dot_dimension_numbers<[1], [0], [0], [1], [0, 0, 1, 1], [], []>} : vector<16x128xbf16>, vector<128x512xbf16>, vector<16x512xf32> -> vector<16x512xf32>
    %131 = arith.truncf %89 : vector<16x128xf32> to vector<16x128xbf16>
    %cst_56 = arith.constant dense<0.000000e+00> : vector<16x512xf32>
    %132 = tpu.matmul %131, %10, %cst_56 {dimension_numbers = #tpu.dot_dimension_numbers<[1], [0], [0], [1], [0, 0, 1, 1], [], []>} : vector<16x128xbf16>, vector<128x512xbf16>, vector<16x512xf32> -> vector<16x512xf32>
    %133 = arith.addf %130, %132 : vector<16x512xf32>
    %134 = arith.addf %133, %13 : vector<16x512xf32>
    %135 = vector.extract_strided_slice %134 {offsets = [0, 0], sizes = [16, 128], strides = [1, 1]} : vector<16x512xf32> to vector<16x128xf32>
    %cst_57 = arith.constant 5.000000e-01 : f32
    %136 = vector.broadcast %cst_57 : f32 to vector<16x128xf32>
    %137 = arith.mulf %136, %135 : vector<16x128xf32>
    %138 = math.tanh %137 : vector<16x128xf32>
    %cst_58 = arith.constant 5.000000e-01 : f32
    %139 = vector.broadcast %cst_58 : f32 to vector<16x128xf32>
    %140 = arith.mulf %139, %138 : vector<16x128xf32>
    %cst_59 = arith.constant 5.000000e-01 : f32
    %141 = vector.broadcast %cst_59 : f32 to vector<16x128xf32>
    %142 = arith.addf %140, %141 : vector<16x128xf32>
    %143 = vector.extract_strided_slice %134 {offsets = [0, 128], sizes = [16, 128], strides = [1, 1]} : vector<16x512xf32> to vector<16x128xf32>
    %cst_60 = arith.constant 5.000000e-01 : f32
    %144 = vector.broadcast %cst_60 : f32 to vector<16x128xf32>
    %145 = arith.mulf %144, %143 : vector<16x128xf32>
    %146 = math.tanh %145 : vector<16x128xf32>
    %cst_61 = arith.constant 5.000000e-01 : f32
    %147 = vector.broadcast %cst_61 : f32 to vector<16x128xf32>
    %148 = arith.mulf %147, %146 : vector<16x128xf32>
    %cst_62 = arith.constant 5.000000e-01 : f32
    %149 = vector.broadcast %cst_62 : f32 to vector<16x128xf32>
    %150 = arith.addf %148, %149 : vector<16x128xf32>
    %151 = vector.extract_strided_slice %134 {offsets = [0, 256], sizes = [16, 128], strides = [1, 1]} : vector<16x512xf32> to vector<16x128xf32>
    %152 = math.tanh %151 : vector<16x128xf32>
    %153 = vector.extract_strided_slice %134 {offsets = [0, 384], sizes = [16, 128], strides = [1, 1]} : vector<16x512xf32> to vector<16x128xf32>
    %cst_63 = arith.constant 5.000000e-01 : f32
    %154 = vector.broadcast %cst_63 : f32 to vector<16x128xf32>
    %155 = arith.mulf %154, %153 : vector<16x128xf32>
    %156 = math.tanh %155 : vector<16x128xf32>
    %cst_64 = arith.constant 5.000000e-01 : f32
    %157 = vector.broadcast %cst_64 : f32 to vector<16x128xf32>
    %158 = arith.mulf %157, %156 : vector<16x128xf32>
    %cst_65 = arith.constant 5.000000e-01 : f32
    %159 = vector.broadcast %cst_65 : f32 to vector<16x128xf32>
    %160 = arith.addf %158, %159 : vector<16x128xf32>
    %161 = arith.mulf %150, %87 : vector<16x128xf32>
    %162 = arith.mulf %142, %152 : vector<16x128xf32>
    %163 = arith.addf %161, %162 : vector<16x128xf32>
    %164 = math.tanh %163 : vector<16x128xf32>
    %165 = arith.mulf %160, %164 : vector<16x128xf32>
    %166 = arith.truncf %165 : vector<16x128xf32> to vector<16x128xbf16>
    %c128 = arith.constant 128 : index
    %c0_66 = arith.constant 0 : index
    %167 = vector.load %arg11[%c128, %c0_66] : memref<1024x1024xbf16, #tpu.memory_space<vmem>>, vector<128x1024xbf16>
    %cst_67 = arith.constant dense<0.000000e+00> : vector<16x1024xf32>
    %168 = tpu.matmul %166, %167, %cst_67 {dimension_numbers = #tpu.dot_dimension_numbers<[1], [0], [0], [1], [0, 0, 1, 1], [], []>} : vector<16x128xbf16>, vector<128x1024xbf16>, vector<16x1024xf32> -> vector<16x1024xf32>
    %169 = arith.addf %93, %168 : vector<16x1024xf32>
    %c32 = arith.constant 32 : index
    %c0_68 = arith.constant 0 : index
    %170 = vector.load %arg10[%c32, %c0_68] : memref<128x512xf32, #tpu.memory_space<vmem>>, vector<16x512xf32>
    %171 = arith.truncf %128 : vector<16x128xf32> to vector<16x128xbf16>
    %cst_69 = arith.constant dense<0.000000e+00> : vector<16x512xf32>
    %172 = tpu.matmul %171, %8, %cst_69 {dimension_numbers = #tpu.dot_dimension_numbers<[1], [0], [0], [1], [0, 0, 1, 1], [], []>} : vector<16x128xbf16>, vector<128x512xbf16>, vector<16x512xf32> -> vector<16x512xf32>
    %173 = arith.addf %170, %172 : vector<16x512xf32>
    %174 = vector.extract_strided_slice %173 {offsets = [0, 0], sizes = [16, 128], strides = [1, 1]} : vector<16x512xf32> to vector<16x128xf32>
    %cst_70 = arith.constant 5.000000e-01 : f32
    %175 = vector.broadcast %cst_70 : f32 to vector<16x128xf32>
    %176 = arith.mulf %175, %174 : vector<16x128xf32>
    %177 = math.tanh %176 : vector<16x128xf32>
    %cst_71 = arith.constant 5.000000e-01 : f32
    %178 = vector.broadcast %cst_71 : f32 to vector<16x128xf32>
    %179 = arith.mulf %178, %177 : vector<16x128xf32>
    %cst_72 = arith.constant 5.000000e-01 : f32
    %180 = vector.broadcast %cst_72 : f32 to vector<16x128xf32>
    %181 = arith.addf %179, %180 : vector<16x128xf32>
    %182 = vector.extract_strided_slice %173 {offsets = [0, 128], sizes = [16, 128], strides = [1, 1]} : vector<16x512xf32> to vector<16x128xf32>
    %cst_73 = arith.constant 5.000000e-01 : f32
    %183 = vector.broadcast %cst_73 : f32 to vector<16x128xf32>
    %184 = arith.mulf %183, %182 : vector<16x128xf32>
    %185 = math.tanh %184 : vector<16x128xf32>
    %cst_74 = arith.constant 5.000000e-01 : f32
    %186 = vector.broadcast %cst_74 : f32 to vector<16x128xf32>
    %187 = arith.mulf %186, %185 : vector<16x128xf32>
    %cst_75 = arith.constant 5.000000e-01 : f32
    %188 = vector.broadcast %cst_75 : f32 to vector<16x128xf32>
    %189 = arith.addf %187, %188 : vector<16x128xf32>
    %190 = vector.extract_strided_slice %173 {offsets = [0, 256], sizes = [16, 128], strides = [1, 1]} : vector<16x512xf32> to vector<16x128xf32>
    %191 = math.tanh %190 : vector<16x128xf32>
    %192 = vector.extract_strided_slice %173 {offsets = [0, 384], sizes = [16, 128], strides = [1, 1]} : vector<16x512xf32> to vector<16x128xf32>
    %cst_76 = arith.constant 5.000000e-01 : f32
    %193 = vector.broadcast %cst_76 : f32 to vector<16x128xf32>
    %194 = arith.mulf %193, %192 : vector<16x128xf32>
    %195 = math.tanh %194 : vector<16x128xf32>
    %cst_77 = arith.constant 5.000000e-01 : f32
    %196 = vector.broadcast %cst_77 : f32 to vector<16x128xf32>
    %197 = arith.mulf %196, %195 : vector<16x128xf32>
    %cst_78 = arith.constant 5.000000e-01 : f32
    %198 = vector.broadcast %cst_78 : f32 to vector<16x128xf32>
    %199 = arith.addf %197, %198 : vector<16x128xf32>
    %200 = arith.mulf %189, %126 : vector<16x128xf32>
    %201 = arith.mulf %181, %191 : vector<16x128xf32>
    %202 = arith.addf %200, %201 : vector<16x128xf32>
    %203 = math.tanh %202 : vector<16x128xf32>
    %204 = arith.mulf %199, %203 : vector<16x128xf32>
    %205 = arith.truncf %204 : vector<16x128xf32> to vector<16x128xbf16>
    %cst_79 = arith.constant dense<0.000000e+00> : vector<16x512xf32>
    %206 = tpu.matmul %205, %9, %cst_79 {dimension_numbers = #tpu.dot_dimension_numbers<[1], [0], [0], [1], [0, 0, 1, 1], [], []>} : vector<16x128xbf16>, vector<128x512xbf16>, vector<16x512xf32> -> vector<16x512xf32>
    %207 = arith.truncf %165 : vector<16x128xf32> to vector<16x128xbf16>
    %cst_80 = arith.constant dense<0.000000e+00> : vector<16x512xf32>
    %208 = tpu.matmul %207, %10, %cst_80 {dimension_numbers = #tpu.dot_dimension_numbers<[1], [0], [0], [1], [0, 0, 1, 1], [], []>} : vector<16x128xbf16>, vector<128x512xbf16>, vector<16x512xf32> -> vector<16x512xf32>
    %209 = arith.addf %206, %208 : vector<16x512xf32>
    %210 = arith.addf %209, %13 : vector<16x512xf32>
    %211 = vector.extract_strided_slice %210 {offsets = [0, 0], sizes = [16, 128], strides = [1, 1]} : vector<16x512xf32> to vector<16x128xf32>
    %cst_81 = arith.constant 5.000000e-01 : f32
    %212 = vector.broadcast %cst_81 : f32 to vector<16x128xf32>
    %213 = arith.mulf %212, %211 : vector<16x128xf32>
    %214 = math.tanh %213 : vector<16x128xf32>
    %cst_82 = arith.constant 5.000000e-01 : f32
    %215 = vector.broadcast %cst_82 : f32 to vector<16x128xf32>
    %216 = arith.mulf %215, %214 : vector<16x128xf32>
    %cst_83 = arith.constant 5.000000e-01 : f32
    %217 = vector.broadcast %cst_83 : f32 to vector<16x128xf32>
    %218 = arith.addf %216, %217 : vector<16x128xf32>
    %219 = vector.extract_strided_slice %210 {offsets = [0, 128], sizes = [16, 128], strides = [1, 1]} : vector<16x512xf32> to vector<16x128xf32>
    %cst_84 = arith.constant 5.000000e-01 : f32
    %220 = vector.broadcast %cst_84 : f32 to vector<16x128xf32>
    %221 = arith.mulf %220, %219 : vector<16x128xf32>
    %222 = math.tanh %221 : vector<16x128xf32>
    %cst_85 = arith.constant 5.000000e-01 : f32
    %223 = vector.broadcast %cst_85 : f32 to vector<16x128xf32>
    %224 = arith.mulf %223, %222 : vector<16x128xf32>
    %cst_86 = arith.constant 5.000000e-01 : f32
    %225 = vector.broadcast %cst_86 : f32 to vector<16x128xf32>
    %226 = arith.addf %224, %225 : vector<16x128xf32>
    %227 = vector.extract_strided_slice %210 {offsets = [0, 256], sizes = [16, 128], strides = [1, 1]} : vector<16x512xf32> to vector<16x128xf32>
    %228 = math.tanh %227 : vector<16x128xf32>
    %229 = vector.extract_strided_slice %210 {offsets = [0, 384], sizes = [16, 128], strides = [1, 1]} : vector<16x512xf32> to vector<16x128xf32>
    %cst_87 = arith.constant 5.000000e-01 : f32
    %230 = vector.broadcast %cst_87 : f32 to vector<16x128xf32>
    %231 = arith.mulf %230, %229 : vector<16x128xf32>
    %232 = math.tanh %231 : vector<16x128xf32>
    %cst_88 = arith.constant 5.000000e-01 : f32
    %233 = vector.broadcast %cst_88 : f32 to vector<16x128xf32>
    %234 = arith.mulf %233, %232 : vector<16x128xf32>
    %cst_89 = arith.constant 5.000000e-01 : f32
    %235 = vector.broadcast %cst_89 : f32 to vector<16x128xf32>
    %236 = arith.addf %234, %235 : vector<16x128xf32>
    %237 = arith.mulf %226, %163 : vector<16x128xf32>
    %238 = arith.mulf %218, %228 : vector<16x128xf32>
    %239 = arith.addf %237, %238 : vector<16x128xf32>
    %240 = math.tanh %239 : vector<16x128xf32>
    %241 = arith.mulf %236, %240 : vector<16x128xf32>
    %242 = arith.truncf %241 : vector<16x128xf32> to vector<16x128xbf16>
    %c256 = arith.constant 256 : index
    %c0_90 = arith.constant 0 : index
    %243 = vector.load %arg11[%c256, %c0_90] : memref<1024x1024xbf16, #tpu.memory_space<vmem>>, vector<128x1024xbf16>
    %cst_91 = arith.constant dense<0.000000e+00> : vector<16x1024xf32>
    %244 = tpu.matmul %242, %243, %cst_91 {dimension_numbers = #tpu.dot_dimension_numbers<[1], [0], [0], [1], [0, 0, 1, 1], [], []>} : vector<16x128xbf16>, vector<128x1024xbf16>, vector<16x1024xf32> -> vector<16x1024xf32>
    %245 = arith.addf %169, %244 : vector<16x1024xf32>
    %c48 = arith.constant 48 : index
    %c0_92 = arith.constant 0 : index
    %246 = vector.load %arg10[%c48, %c0_92] : memref<128x512xf32, #tpu.memory_space<vmem>>, vector<16x512xf32>
    %247 = arith.truncf %204 : vector<16x128xf32> to vector<16x128xbf16>
    %cst_93 = arith.constant dense<0.000000e+00> : vector<16x512xf32>
    %248 = tpu.matmul %247, %8, %cst_93 {dimension_numbers = #tpu.dot_dimension_numbers<[1], [0], [0], [1], [0, 0, 1, 1], [], []>} : vector<16x128xbf16>, vector<128x512xbf16>, vector<16x512xf32> -> vector<16x512xf32>
    %249 = arith.addf %246, %248 : vector<16x512xf32>
    %250 = vector.extract_strided_slice %249 {offsets = [0, 0], sizes = [16, 128], strides = [1, 1]} : vector<16x512xf32> to vector<16x128xf32>
    %cst_94 = arith.constant 5.000000e-01 : f32
    %251 = vector.broadcast %cst_94 : f32 to vector<16x128xf32>
    %252 = arith.mulf %251, %250 : vector<16x128xf32>
    %253 = math.tanh %252 : vector<16x128xf32>
    %cst_95 = arith.constant 5.000000e-01 : f32
    %254 = vector.broadcast %cst_95 : f32 to vector<16x128xf32>
    %255 = arith.mulf %254, %253 : vector<16x128xf32>
    %cst_96 = arith.constant 5.000000e-01 : f32
    %256 = vector.broadcast %cst_96 : f32 to vector<16x128xf32>
    %257 = arith.addf %255, %256 : vector<16x128xf32>
    %258 = vector.extract_strided_slice %249 {offsets = [0, 128], sizes = [16, 128], strides = [1, 1]} : vector<16x512xf32> to vector<16x128xf32>
    %cst_97 = arith.constant 5.000000e-01 : f32
    %259 = vector.broadcast %cst_97 : f32 to vector<16x128xf32>
    %260 = arith.mulf %259, %258 : vector<16x128xf32>
    %261 = math.tanh %260 : vector<16x128xf32>
    %cst_98 = arith.constant 5.000000e-01 : f32
    %262 = vector.broadcast %cst_98 : f32 to vector<16x128xf32>
    %263 = arith.mulf %262, %261 : vector<16x128xf32>
    %cst_99 = arith.constant 5.000000e-01 : f32
    %264 = vector.broadcast %cst_99 : f32 to vector<16x128xf32>
    %265 = arith.addf %263, %264 : vector<16x128xf32>
    %266 = vector.extract_strided_slice %249 {offsets = [0, 256], sizes = [16, 128], strides = [1, 1]} : vector<16x512xf32> to vector<16x128xf32>
    %267 = math.tanh %266 : vector<16x128xf32>
    %268 = vector.extract_strided_slice %249 {offsets = [0, 384], sizes = [16, 128], strides = [1, 1]} : vector<16x512xf32> to vector<16x128xf32>
    %cst_100 = arith.constant 5.000000e-01 : f32
    %269 = vector.broadcast %cst_100 : f32 to vector<16x128xf32>
    %270 = arith.mulf %269, %268 : vector<16x128xf32>
    %271 = math.tanh %270 : vector<16x128xf32>
    %cst_101 = arith.constant 5.000000e-01 : f32
    %272 = vector.broadcast %cst_101 : f32 to vector<16x128xf32>
    %273 = arith.mulf %272, %271 : vector<16x128xf32>
    %cst_102 = arith.constant 5.000000e-01 : f32
    %274 = vector.broadcast %cst_102 : f32 to vector<16x128xf32>
    %275 = arith.addf %273, %274 : vector<16x128xf32>
    %276 = arith.mulf %265, %202 : vector<16x128xf32>
    %277 = arith.mulf %257, %267 : vector<16x128xf32>
    %278 = arith.addf %276, %277 : vector<16x128xf32>
    %279 = math.tanh %278 : vector<16x128xf32>
    %280 = arith.mulf %275, %279 : vector<16x128xf32>
    %281 = arith.truncf %280 : vector<16x128xf32> to vector<16x128xbf16>
    %cst_103 = arith.constant dense<0.000000e+00> : vector<16x512xf32>
    %282 = tpu.matmul %281, %9, %cst_103 {dimension_numbers = #tpu.dot_dimension_numbers<[1], [0], [0], [1], [0, 0, 1, 1], [], []>} : vector<16x128xbf16>, vector<128x512xbf16>, vector<16x512xf32> -> vector<16x512xf32>
    %283 = arith.truncf %241 : vector<16x128xf32> to vector<16x128xbf16>
    %cst_104 = arith.constant dense<0.000000e+00> : vector<16x512xf32>
    %284 = tpu.matmul %283, %10, %cst_104 {dimension_numbers = #tpu.dot_dimension_numbers<[1], [0], [0], [1], [0, 0, 1, 1], [], []>} : vector<16x128xbf16>, vector<128x512xbf16>, vector<16x512xf32> -> vector<16x512xf32>
    %285 = arith.addf %282, %284 : vector<16x512xf32>
    %286 = arith.addf %285, %13 : vector<16x512xf32>
    %287 = vector.extract_strided_slice %286 {offsets = [0, 0], sizes = [16, 128], strides = [1, 1]} : vector<16x512xf32> to vector<16x128xf32>
    %cst_105 = arith.constant 5.000000e-01 : f32
    %288 = vector.broadcast %cst_105 : f32 to vector<16x128xf32>
    %289 = arith.mulf %288, %287 : vector<16x128xf32>
    %290 = math.tanh %289 : vector<16x128xf32>
    %cst_106 = arith.constant 5.000000e-01 : f32
    %291 = vector.broadcast %cst_106 : f32 to vector<16x128xf32>
    %292 = arith.mulf %291, %290 : vector<16x128xf32>
    %cst_107 = arith.constant 5.000000e-01 : f32
    %293 = vector.broadcast %cst_107 : f32 to vector<16x128xf32>
    %294 = arith.addf %292, %293 : vector<16x128xf32>
    %295 = vector.extract_strided_slice %286 {offsets = [0, 128], sizes = [16, 128], strides = [1, 1]} : vector<16x512xf32> to vector<16x128xf32>
    %cst_108 = arith.constant 5.000000e-01 : f32
    %296 = vector.broadcast %cst_108 : f32 to vector<16x128xf32>
    %297 = arith.mulf %296, %295 : vector<16x128xf32>
    %298 = math.tanh %297 : vector<16x128xf32>
    %cst_109 = arith.constant 5.000000e-01 : f32
    %299 = vector.broadcast %cst_109 : f32 to vector<16x128xf32>
    %300 = arith.mulf %299, %298 : vector<16x128xf32>
    %cst_110 = arith.constant 5.000000e-01 : f32
    %301 = vector.broadcast %cst_110 : f32 to vector<16x128xf32>
    %302 = arith.addf %300, %301 : vector<16x128xf32>
    %303 = vector.extract_strided_slice %286 {offsets = [0, 256], sizes = [16, 128], strides = [1, 1]} : vector<16x512xf32> to vector<16x128xf32>
    %304 = math.tanh %303 : vector<16x128xf32>
    %305 = vector.extract_strided_slice %286 {offsets = [0, 384], sizes = [16, 128], strides = [1, 1]} : vector<16x512xf32> to vector<16x128xf32>
    %cst_111 = arith.constant 5.000000e-01 : f32
    %306 = vector.broadcast %cst_111 : f32 to vector<16x128xf32>
    %307 = arith.mulf %306, %305 : vector<16x128xf32>
    %308 = math.tanh %307 : vector<16x128xf32>
    %cst_112 = arith.constant 5.000000e-01 : f32
    %309 = vector.broadcast %cst_112 : f32 to vector<16x128xf32>
    %310 = arith.mulf %309, %308 : vector<16x128xf32>
    %cst_113 = arith.constant 5.000000e-01 : f32
    %311 = vector.broadcast %cst_113 : f32 to vector<16x128xf32>
    %312 = arith.addf %310, %311 : vector<16x128xf32>
    %313 = arith.mulf %302, %239 : vector<16x128xf32>
    %314 = arith.mulf %294, %304 : vector<16x128xf32>
    %315 = arith.addf %313, %314 : vector<16x128xf32>
    %316 = math.tanh %315 : vector<16x128xf32>
    %317 = arith.mulf %312, %316 : vector<16x128xf32>
    %318 = arith.truncf %317 : vector<16x128xf32> to vector<16x128xbf16>
    %c384 = arith.constant 384 : index
    %c0_114 = arith.constant 0 : index
    %319 = vector.load %arg11[%c384, %c0_114] : memref<1024x1024xbf16, #tpu.memory_space<vmem>>, vector<128x1024xbf16>
    %cst_115 = arith.constant dense<0.000000e+00> : vector<16x1024xf32>
    %320 = tpu.matmul %318, %319, %cst_115 {dimension_numbers = #tpu.dot_dimension_numbers<[1], [0], [0], [1], [0, 0, 1, 1], [], []>} : vector<16x128xbf16>, vector<128x1024xbf16>, vector<16x1024xf32> -> vector<16x1024xf32>
    %321 = arith.addf %245, %320 : vector<16x1024xf32>
    %c64 = arith.constant 64 : index
    %c0_116 = arith.constant 0 : index
    %322 = vector.load %arg10[%c64, %c0_116] : memref<128x512xf32, #tpu.memory_space<vmem>>, vector<16x512xf32>
    %323 = arith.truncf %280 : vector<16x128xf32> to vector<16x128xbf16>
    %cst_117 = arith.constant dense<0.000000e+00> : vector<16x512xf32>
    %324 = tpu.matmul %323, %8, %cst_117 {dimension_numbers = #tpu.dot_dimension_numbers<[1], [0], [0], [1], [0, 0, 1, 1], [], []>} : vector<16x128xbf16>, vector<128x512xbf16>, vector<16x512xf32> -> vector<16x512xf32>
    %325 = arith.addf %322, %324 : vector<16x512xf32>
    %326 = vector.extract_strided_slice %325 {offsets = [0, 0], sizes = [16, 128], strides = [1, 1]} : vector<16x512xf32> to vector<16x128xf32>
    %cst_118 = arith.constant 5.000000e-01 : f32
    %327 = vector.broadcast %cst_118 : f32 to vector<16x128xf32>
    %328 = arith.mulf %327, %326 : vector<16x128xf32>
    %329 = math.tanh %328 : vector<16x128xf32>
    %cst_119 = arith.constant 5.000000e-01 : f32
    %330 = vector.broadcast %cst_119 : f32 to vector<16x128xf32>
    %331 = arith.mulf %330, %329 : vector<16x128xf32>
    %cst_120 = arith.constant 5.000000e-01 : f32
    %332 = vector.broadcast %cst_120 : f32 to vector<16x128xf32>
    %333 = arith.addf %331, %332 : vector<16x128xf32>
    %334 = vector.extract_strided_slice %325 {offsets = [0, 128], sizes = [16, 128], strides = [1, 1]} : vector<16x512xf32> to vector<16x128xf32>
    %cst_121 = arith.constant 5.000000e-01 : f32
    %335 = vector.broadcast %cst_121 : f32 to vector<16x128xf32>
    %336 = arith.mulf %335, %334 : vector<16x128xf32>
    %337 = math.tanh %336 : vector<16x128xf32>
    %cst_122 = arith.constant 5.000000e-01 : f32
    %338 = vector.broadcast %cst_122 : f32 to vector<16x128xf32>
    %339 = arith.mulf %338, %337 : vector<16x128xf32>
    %cst_123 = arith.constant 5.000000e-01 : f32
    %340 = vector.broadcast %cst_123 : f32 to vector<16x128xf32>
    %341 = arith.addf %339, %340 : vector<16x128xf32>
    %342 = vector.extract_strided_slice %325 {offsets = [0, 256], sizes = [16, 128], strides = [1, 1]} : vector<16x512xf32> to vector<16x128xf32>
    %343 = math.tanh %342 : vector<16x128xf32>
    %344 = vector.extract_strided_slice %325 {offsets = [0, 384], sizes = [16, 128], strides = [1, 1]} : vector<16x512xf32> to vector<16x128xf32>
    %cst_124 = arith.constant 5.000000e-01 : f32
    %345 = vector.broadcast %cst_124 : f32 to vector<16x128xf32>
    %346 = arith.mulf %345, %344 : vector<16x128xf32>
    %347 = math.tanh %346 : vector<16x128xf32>
    %cst_125 = arith.constant 5.000000e-01 : f32
    %348 = vector.broadcast %cst_125 : f32 to vector<16x128xf32>
    %349 = arith.mulf %348, %347 : vector<16x128xf32>
    %cst_126 = arith.constant 5.000000e-01 : f32
    %350 = vector.broadcast %cst_126 : f32 to vector<16x128xf32>
    %351 = arith.addf %349, %350 : vector<16x128xf32>
    %352 = arith.mulf %341, %278 : vector<16x128xf32>
    %353 = arith.mulf %333, %343 : vector<16x128xf32>
    %354 = arith.addf %352, %353 : vector<16x128xf32>
    %355 = math.tanh %354 : vector<16x128xf32>
    %356 = arith.mulf %351, %355 : vector<16x128xf32>
    %357 = arith.truncf %356 : vector<16x128xf32> to vector<16x128xbf16>
    %cst_127 = arith.constant dense<0.000000e+00> : vector<16x512xf32>
    %358 = tpu.matmul %357, %9, %cst_127 {dimension_numbers = #tpu.dot_dimension_numbers<[1], [0], [0], [1], [0, 0, 1, 1], [], []>} : vector<16x128xbf16>, vector<128x512xbf16>, vector<16x512xf32> -> vector<16x512xf32>
    %359 = arith.truncf %317 : vector<16x128xf32> to vector<16x128xbf16>
    %cst_128 = arith.constant dense<0.000000e+00> : vector<16x512xf32>
    %360 = tpu.matmul %359, %10, %cst_128 {dimension_numbers = #tpu.dot_dimension_numbers<[1], [0], [0], [1], [0, 0, 1, 1], [], []>} : vector<16x128xbf16>, vector<128x512xbf16>, vector<16x512xf32> -> vector<16x512xf32>
    %361 = arith.addf %358, %360 : vector<16x512xf32>
    %362 = arith.addf %361, %13 : vector<16x512xf32>
    %363 = vector.extract_strided_slice %362 {offsets = [0, 0], sizes = [16, 128], strides = [1, 1]} : vector<16x512xf32> to vector<16x128xf32>
    %cst_129 = arith.constant 5.000000e-01 : f32
    %364 = vector.broadcast %cst_129 : f32 to vector<16x128xf32>
    %365 = arith.mulf %364, %363 : vector<16x128xf32>
    %366 = math.tanh %365 : vector<16x128xf32>
    %cst_130 = arith.constant 5.000000e-01 : f32
    %367 = vector.broadcast %cst_130 : f32 to vector<16x128xf32>
    %368 = arith.mulf %367, %366 : vector<16x128xf32>
    %cst_131 = arith.constant 5.000000e-01 : f32
    %369 = vector.broadcast %cst_131 : f32 to vector<16x128xf32>
    %370 = arith.addf %368, %369 : vector<16x128xf32>
    %371 = vector.extract_strided_slice %362 {offsets = [0, 128], sizes = [16, 128], strides = [1, 1]} : vector<16x512xf32> to vector<16x128xf32>
    %cst_132 = arith.constant 5.000000e-01 : f32
    %372 = vector.broadcast %cst_132 : f32 to vector<16x128xf32>
    %373 = arith.mulf %372, %371 : vector<16x128xf32>
    %374 = math.tanh %373 : vector<16x128xf32>
    %cst_133 = arith.constant 5.000000e-01 : f32
    %375 = vector.broadcast %cst_133 : f32 to vector<16x128xf32>
    %376 = arith.mulf %375, %374 : vector<16x128xf32>
    %cst_134 = arith.constant 5.000000e-01 : f32
    %377 = vector.broadcast %cst_134 : f32 to vector<16x128xf32>
    %378 = arith.addf %376, %377 : vector<16x128xf32>
    %379 = vector.extract_strided_slice %362 {offsets = [0, 256], sizes = [16, 128], strides = [1, 1]} : vector<16x512xf32> to vector<16x128xf32>
    %380 = math.tanh %379 : vector<16x128xf32>
    %381 = vector.extract_strided_slice %362 {offsets = [0, 384], sizes = [16, 128], strides = [1, 1]} : vector<16x512xf32> to vector<16x128xf32>
    %cst_135 = arith.constant 5.000000e-01 : f32
    %382 = vector.broadcast %cst_135 : f32 to vector<16x128xf32>
    %383 = arith.mulf %382, %381 : vector<16x128xf32>
    %384 = math.tanh %383 : vector<16x128xf32>
    %cst_136 = arith.constant 5.000000e-01 : f32
    %385 = vector.broadcast %cst_136 : f32 to vector<16x128xf32>
    %386 = arith.mulf %385, %384 : vector<16x128xf32>
    %cst_137 = arith.constant 5.000000e-01 : f32
    %387 = vector.broadcast %cst_137 : f32 to vector<16x128xf32>
    %388 = arith.addf %386, %387 : vector<16x128xf32>
    %389 = arith.mulf %378, %315 : vector<16x128xf32>
    %390 = arith.mulf %370, %380 : vector<16x128xf32>
    %391 = arith.addf %389, %390 : vector<16x128xf32>
    %392 = math.tanh %391 : vector<16x128xf32>
    %393 = arith.mulf %388, %392 : vector<16x128xf32>
    %394 = arith.truncf %393 : vector<16x128xf32> to vector<16x128xbf16>
    %c512 = arith.constant 512 : index
    %c0_138 = arith.constant 0 : index
    %395 = vector.load %arg11[%c512, %c0_138] : memref<1024x1024xbf16, #tpu.memory_space<vmem>>, vector<128x1024xbf16>
    %cst_139 = arith.constant dense<0.000000e+00> : vector<16x1024xf32>
    %396 = tpu.matmul %394, %395, %cst_139 {dimension_numbers = #tpu.dot_dimension_numbers<[1], [0], [0], [1], [0, 0, 1, 1], [], []>} : vector<16x128xbf16>, vector<128x1024xbf16>, vector<16x1024xf32> -> vector<16x1024xf32>
    %397 = arith.addf %321, %396 : vector<16x1024xf32>
    %c80 = arith.constant 80 : index
    %c0_140 = arith.constant 0 : index
    %398 = vector.load %arg10[%c80, %c0_140] : memref<128x512xf32, #tpu.memory_space<vmem>>, vector<16x512xf32>
    %399 = arith.truncf %356 : vector<16x128xf32> to vector<16x128xbf16>
    %cst_141 = arith.constant dense<0.000000e+00> : vector<16x512xf32>
    %400 = tpu.matmul %399, %8, %cst_141 {dimension_numbers = #tpu.dot_dimension_numbers<[1], [0], [0], [1], [0, 0, 1, 1], [], []>} : vector<16x128xbf16>, vector<128x512xbf16>, vector<16x512xf32> -> vector<16x512xf32>
    %401 = arith.addf %398, %400 : vector<16x512xf32>
    %402 = vector.extract_strided_slice %401 {offsets = [0, 0], sizes = [16, 128], strides = [1, 1]} : vector<16x512xf32> to vector<16x128xf32>
    %cst_142 = arith.constant 5.000000e-01 : f32
    %403 = vector.broadcast %cst_142 : f32 to vector<16x128xf32>
    %404 = arith.mulf %403, %402 : vector<16x128xf32>
    %405 = math.tanh %404 : vector<16x128xf32>
    %cst_143 = arith.constant 5.000000e-01 : f32
    %406 = vector.broadcast %cst_143 : f32 to vector<16x128xf32>
    %407 = arith.mulf %406, %405 : vector<16x128xf32>
    %cst_144 = arith.constant 5.000000e-01 : f32
    %408 = vector.broadcast %cst_144 : f32 to vector<16x128xf32>
    %409 = arith.addf %407, %408 : vector<16x128xf32>
    %410 = vector.extract_strided_slice %401 {offsets = [0, 128], sizes = [16, 128], strides = [1, 1]} : vector<16x512xf32> to vector<16x128xf32>
    %cst_145 = arith.constant 5.000000e-01 : f32
    %411 = vector.broadcast %cst_145 : f32 to vector<16x128xf32>
    %412 = arith.mulf %411, %410 : vector<16x128xf32>
    %413 = math.tanh %412 : vector<16x128xf32>
    %cst_146 = arith.constant 5.000000e-01 : f32
    %414 = vector.broadcast %cst_146 : f32 to vector<16x128xf32>
    %415 = arith.mulf %414, %413 : vector<16x128xf32>
    %cst_147 = arith.constant 5.000000e-01 : f32
    %416 = vector.broadcast %cst_147 : f32 to vector<16x128xf32>
    %417 = arith.addf %415, %416 : vector<16x128xf32>
    %418 = vector.extract_strided_slice %401 {offsets = [0, 256], sizes = [16, 128], strides = [1, 1]} : vector<16x512xf32> to vector<16x128xf32>
    %419 = math.tanh %418 : vector<16x128xf32>
    %420 = vector.extract_strided_slice %401 {offsets = [0, 384], sizes = [16, 128], strides = [1, 1]} : vector<16x512xf32> to vector<16x128xf32>
    %cst_148 = arith.constant 5.000000e-01 : f32
    %421 = vector.broadcast %cst_148 : f32 to vector<16x128xf32>
    %422 = arith.mulf %421, %420 : vector<16x128xf32>
    %423 = math.tanh %422 : vector<16x128xf32>
    %cst_149 = arith.constant 5.000000e-01 : f32
    %424 = vector.broadcast %cst_149 : f32 to vector<16x128xf32>
    %425 = arith.mulf %424, %423 : vector<16x128xf32>
    %cst_150 = arith.constant 5.000000e-01 : f32
    %426 = vector.broadcast %cst_150 : f32 to vector<16x128xf32>
    %427 = arith.addf %425, %426 : vector<16x128xf32>
    %428 = arith.mulf %417, %354 : vector<16x128xf32>
    %429 = arith.mulf %409, %419 : vector<16x128xf32>
    %430 = arith.addf %428, %429 : vector<16x128xf32>
    %431 = math.tanh %430 : vector<16x128xf32>
    %432 = arith.mulf %427, %431 : vector<16x128xf32>
    %433 = arith.truncf %432 : vector<16x128xf32> to vector<16x128xbf16>
    %cst_151 = arith.constant dense<0.000000e+00> : vector<16x512xf32>
    %434 = tpu.matmul %433, %9, %cst_151 {dimension_numbers = #tpu.dot_dimension_numbers<[1], [0], [0], [1], [0, 0, 1, 1], [], []>} : vector<16x128xbf16>, vector<128x512xbf16>, vector<16x512xf32> -> vector<16x512xf32>
    %435 = arith.truncf %393 : vector<16x128xf32> to vector<16x128xbf16>
    %cst_152 = arith.constant dense<0.000000e+00> : vector<16x512xf32>
    %436 = tpu.matmul %435, %10, %cst_152 {dimension_numbers = #tpu.dot_dimension_numbers<[1], [0], [0], [1], [0, 0, 1, 1], [], []>} : vector<16x128xbf16>, vector<128x512xbf16>, vector<16x512xf32> -> vector<16x512xf32>
    %437 = arith.addf %434, %436 : vector<16x512xf32>
    %438 = arith.addf %437, %13 : vector<16x512xf32>
    %439 = vector.extract_strided_slice %438 {offsets = [0, 0], sizes = [16, 128], strides = [1, 1]} : vector<16x512xf32> to vector<16x128xf32>
    %cst_153 = arith.constant 5.000000e-01 : f32
    %440 = vector.broadcast %cst_153 : f32 to vector<16x128xf32>
    %441 = arith.mulf %440, %439 : vector<16x128xf32>
    %442 = math.tanh %441 : vector<16x128xf32>
    %cst_154 = arith.constant 5.000000e-01 : f32
    %443 = vector.broadcast %cst_154 : f32 to vector<16x128xf32>
    %444 = arith.mulf %443, %442 : vector<16x128xf32>
    %cst_155 = arith.constant 5.000000e-01 : f32
    %445 = vector.broadcast %cst_155 : f32 to vector<16x128xf32>
    %446 = arith.addf %444, %445 : vector<16x128xf32>
    %447 = vector.extract_strided_slice %438 {offsets = [0, 128], sizes = [16, 128], strides = [1, 1]} : vector<16x512xf32> to vector<16x128xf32>
    %cst_156 = arith.constant 5.000000e-01 : f32
    %448 = vector.broadcast %cst_156 : f32 to vector<16x128xf32>
    %449 = arith.mulf %448, %447 : vector<16x128xf32>
    %450 = math.tanh %449 : vector<16x128xf32>
    %cst_157 = arith.constant 5.000000e-01 : f32
    %451 = vector.broadcast %cst_157 : f32 to vector<16x128xf32>
    %452 = arith.mulf %451, %450 : vector<16x128xf32>
    %cst_158 = arith.constant 5.000000e-01 : f32
    %453 = vector.broadcast %cst_158 : f32 to vector<16x128xf32>
    %454 = arith.addf %452, %453 : vector<16x128xf32>
    %455 = vector.extract_strided_slice %438 {offsets = [0, 256], sizes = [16, 128], strides = [1, 1]} : vector<16x512xf32> to vector<16x128xf32>
    %456 = math.tanh %455 : vector<16x128xf32>
    %457 = vector.extract_strided_slice %438 {offsets = [0, 384], sizes = [16, 128], strides = [1, 1]} : vector<16x512xf32> to vector<16x128xf32>
    %cst_159 = arith.constant 5.000000e-01 : f32
    %458 = vector.broadcast %cst_159 : f32 to vector<16x128xf32>
    %459 = arith.mulf %458, %457 : vector<16x128xf32>
    %460 = math.tanh %459 : vector<16x128xf32>
    %cst_160 = arith.constant 5.000000e-01 : f32
    %461 = vector.broadcast %cst_160 : f32 to vector<16x128xf32>
    %462 = arith.mulf %461, %460 : vector<16x128xf32>
    %cst_161 = arith.constant 5.000000e-01 : f32
    %463 = vector.broadcast %cst_161 : f32 to vector<16x128xf32>
    %464 = arith.addf %462, %463 : vector<16x128xf32>
    %465 = arith.mulf %454, %391 : vector<16x128xf32>
    %466 = arith.mulf %446, %456 : vector<16x128xf32>
    %467 = arith.addf %465, %466 : vector<16x128xf32>
    %468 = math.tanh %467 : vector<16x128xf32>
    %469 = arith.mulf %464, %468 : vector<16x128xf32>
    %470 = arith.truncf %469 : vector<16x128xf32> to vector<16x128xbf16>
    %c640 = arith.constant 640 : index
    %c0_162 = arith.constant 0 : index
    %471 = vector.load %arg11[%c640, %c0_162] : memref<1024x1024xbf16, #tpu.memory_space<vmem>>, vector<128x1024xbf16>
    %cst_163 = arith.constant dense<0.000000e+00> : vector<16x1024xf32>
    %472 = tpu.matmul %470, %471, %cst_163 {dimension_numbers = #tpu.dot_dimension_numbers<[1], [0], [0], [1], [0, 0, 1, 1], [], []>} : vector<16x128xbf16>, vector<128x1024xbf16>, vector<16x1024xf32> -> vector<16x1024xf32>
    %473 = arith.addf %397, %472 : vector<16x1024xf32>
    %c96 = arith.constant 96 : index
    %c0_164 = arith.constant 0 : index
    %474 = vector.load %arg10[%c96, %c0_164] : memref<128x512xf32, #tpu.memory_space<vmem>>, vector<16x512xf32>
    %475 = arith.truncf %432 : vector<16x128xf32> to vector<16x128xbf16>
    %cst_165 = arith.constant dense<0.000000e+00> : vector<16x512xf32>
    %476 = tpu.matmul %475, %8, %cst_165 {dimension_numbers = #tpu.dot_dimension_numbers<[1], [0], [0], [1], [0, 0, 1, 1], [], []>} : vector<16x128xbf16>, vector<128x512xbf16>, vector<16x512xf32> -> vector<16x512xf32>
    %477 = arith.addf %474, %476 : vector<16x512xf32>
    %478 = vector.extract_strided_slice %477 {offsets = [0, 0], sizes = [16, 128], strides = [1, 1]} : vector<16x512xf32> to vector<16x128xf32>
    %cst_166 = arith.constant 5.000000e-01 : f32
    %479 = vector.broadcast %cst_166 : f32 to vector<16x128xf32>
    %480 = arith.mulf %479, %478 : vector<16x128xf32>
    %481 = math.tanh %480 : vector<16x128xf32>
    %cst_167 = arith.constant 5.000000e-01 : f32
    %482 = vector.broadcast %cst_167 : f32 to vector<16x128xf32>
    %483 = arith.mulf %482, %481 : vector<16x128xf32>
    %cst_168 = arith.constant 5.000000e-01 : f32
    %484 = vector.broadcast %cst_168 : f32 to vector<16x128xf32>
    %485 = arith.addf %483, %484 : vector<16x128xf32>
    %486 = vector.extract_strided_slice %477 {offsets = [0, 128], sizes = [16, 128], strides = [1, 1]} : vector<16x512xf32> to vector<16x128xf32>
    %cst_169 = arith.constant 5.000000e-01 : f32
    %487 = vector.broadcast %cst_169 : f32 to vector<16x128xf32>
    %488 = arith.mulf %487, %486 : vector<16x128xf32>
    %489 = math.tanh %488 : vector<16x128xf32>
    %cst_170 = arith.constant 5.000000e-01 : f32
    %490 = vector.broadcast %cst_170 : f32 to vector<16x128xf32>
    %491 = arith.mulf %490, %489 : vector<16x128xf32>
    %cst_171 = arith.constant 5.000000e-01 : f32
    %492 = vector.broadcast %cst_171 : f32 to vector<16x128xf32>
    %493 = arith.addf %491, %492 : vector<16x128xf32>
    %494 = vector.extract_strided_slice %477 {offsets = [0, 256], sizes = [16, 128], strides = [1, 1]} : vector<16x512xf32> to vector<16x128xf32>
    %495 = math.tanh %494 : vector<16x128xf32>
    %496 = vector.extract_strided_slice %477 {offsets = [0, 384], sizes = [16, 128], strides = [1, 1]} : vector<16x512xf32> to vector<16x128xf32>
    %cst_172 = arith.constant 5.000000e-01 : f32
    %497 = vector.broadcast %cst_172 : f32 to vector<16x128xf32>
    %498 = arith.mulf %497, %496 : vector<16x128xf32>
    %499 = math.tanh %498 : vector<16x128xf32>
    %cst_173 = arith.constant 5.000000e-01 : f32
    %500 = vector.broadcast %cst_173 : f32 to vector<16x128xf32>
    %501 = arith.mulf %500, %499 : vector<16x128xf32>
    %cst_174 = arith.constant 5.000000e-01 : f32
    %502 = vector.broadcast %cst_174 : f32 to vector<16x128xf32>
    %503 = arith.addf %501, %502 : vector<16x128xf32>
    %504 = arith.mulf %493, %430 : vector<16x128xf32>
    %505 = arith.mulf %485, %495 : vector<16x128xf32>
    %506 = arith.addf %504, %505 : vector<16x128xf32>
    %507 = math.tanh %506 : vector<16x128xf32>
    %508 = arith.mulf %503, %507 : vector<16x128xf32>
    %509 = arith.truncf %508 : vector<16x128xf32> to vector<16x128xbf16>
    %cst_175 = arith.constant dense<0.000000e+00> : vector<16x512xf32>
    %510 = tpu.matmul %509, %9, %cst_175 {dimension_numbers = #tpu.dot_dimension_numbers<[1], [0], [0], [1], [0, 0, 1, 1], [], []>} : vector<16x128xbf16>, vector<128x512xbf16>, vector<16x512xf32> -> vector<16x512xf32>
    %511 = arith.truncf %469 : vector<16x128xf32> to vector<16x128xbf16>
    %cst_176 = arith.constant dense<0.000000e+00> : vector<16x512xf32>
    %512 = tpu.matmul %511, %10, %cst_176 {dimension_numbers = #tpu.dot_dimension_numbers<[1], [0], [0], [1], [0, 0, 1, 1], [], []>} : vector<16x128xbf16>, vector<128x512xbf16>, vector<16x512xf32> -> vector<16x512xf32>
    %513 = arith.addf %510, %512 : vector<16x512xf32>
    %514 = arith.addf %513, %13 : vector<16x512xf32>
    %515 = vector.extract_strided_slice %514 {offsets = [0, 0], sizes = [16, 128], strides = [1, 1]} : vector<16x512xf32> to vector<16x128xf32>
    %cst_177 = arith.constant 5.000000e-01 : f32
    %516 = vector.broadcast %cst_177 : f32 to vector<16x128xf32>
    %517 = arith.mulf %516, %515 : vector<16x128xf32>
    %518 = math.tanh %517 : vector<16x128xf32>
    %cst_178 = arith.constant 5.000000e-01 : f32
    %519 = vector.broadcast %cst_178 : f32 to vector<16x128xf32>
    %520 = arith.mulf %519, %518 : vector<16x128xf32>
    %cst_179 = arith.constant 5.000000e-01 : f32
    %521 = vector.broadcast %cst_179 : f32 to vector<16x128xf32>
    %522 = arith.addf %520, %521 : vector<16x128xf32>
    %523 = vector.extract_strided_slice %514 {offsets = [0, 128], sizes = [16, 128], strides = [1, 1]} : vector<16x512xf32> to vector<16x128xf32>
    %cst_180 = arith.constant 5.000000e-01 : f32
    %524 = vector.broadcast %cst_180 : f32 to vector<16x128xf32>
    %525 = arith.mulf %524, %523 : vector<16x128xf32>
    %526 = math.tanh %525 : vector<16x128xf32>
    %cst_181 = arith.constant 5.000000e-01 : f32
    %527 = vector.broadcast %cst_181 : f32 to vector<16x128xf32>
    %528 = arith.mulf %527, %526 : vector<16x128xf32>
    %cst_182 = arith.constant 5.000000e-01 : f32
    %529 = vector.broadcast %cst_182 : f32 to vector<16x128xf32>
    %530 = arith.addf %528, %529 : vector<16x128xf32>
    %531 = vector.extract_strided_slice %514 {offsets = [0, 256], sizes = [16, 128], strides = [1, 1]} : vector<16x512xf32> to vector<16x128xf32>
    %532 = math.tanh %531 : vector<16x128xf32>
    %533 = vector.extract_strided_slice %514 {offsets = [0, 384], sizes = [16, 128], strides = [1, 1]} : vector<16x512xf32> to vector<16x128xf32>
    %cst_183 = arith.constant 5.000000e-01 : f32
    %534 = vector.broadcast %cst_183 : f32 to vector<16x128xf32>
    %535 = arith.mulf %534, %533 : vector<16x128xf32>
    %536 = math.tanh %535 : vector<16x128xf32>
    %cst_184 = arith.constant 5.000000e-01 : f32
    %537 = vector.broadcast %cst_184 : f32 to vector<16x128xf32>
    %538 = arith.mulf %537, %536 : vector<16x128xf32>
    %cst_185 = arith.constant 5.000000e-01 : f32
    %539 = vector.broadcast %cst_185 : f32 to vector<16x128xf32>
    %540 = arith.addf %538, %539 : vector<16x128xf32>
    %541 = arith.mulf %530, %467 : vector<16x128xf32>
    %542 = arith.mulf %522, %532 : vector<16x128xf32>
    %543 = arith.addf %541, %542 : vector<16x128xf32>
    %544 = math.tanh %543 : vector<16x128xf32>
    %545 = arith.mulf %540, %544 : vector<16x128xf32>
    %546 = arith.truncf %545 : vector<16x128xf32> to vector<16x128xbf16>
    %c768 = arith.constant 768 : index
    %c0_186 = arith.constant 0 : index
    %547 = vector.load %arg11[%c768, %c0_186] : memref<1024x1024xbf16, #tpu.memory_space<vmem>>, vector<128x1024xbf16>
    %cst_187 = arith.constant dense<0.000000e+00> : vector<16x1024xf32>
    %548 = tpu.matmul %546, %547, %cst_187 {dimension_numbers = #tpu.dot_dimension_numbers<[1], [0], [0], [1], [0, 0, 1, 1], [], []>} : vector<16x128xbf16>, vector<128x1024xbf16>, vector<16x1024xf32> -> vector<16x1024xf32>
    %549 = arith.addf %473, %548 : vector<16x1024xf32>
    %c112 = arith.constant 112 : index
    %c0_188 = arith.constant 0 : index
    %550 = vector.load %arg10[%c112, %c0_188] : memref<128x512xf32, #tpu.memory_space<vmem>>, vector<16x512xf32>
    %551 = arith.truncf %508 : vector<16x128xf32> to vector<16x128xbf16>
    %cst_189 = arith.constant dense<0.000000e+00> : vector<16x512xf32>
    %552 = tpu.matmul %551, %8, %cst_189 {dimension_numbers = #tpu.dot_dimension_numbers<[1], [0], [0], [1], [0, 0, 1, 1], [], []>} : vector<16x128xbf16>, vector<128x512xbf16>, vector<16x512xf32> -> vector<16x512xf32>
    %553 = arith.addf %550, %552 : vector<16x512xf32>
    %554 = vector.extract_strided_slice %553 {offsets = [0, 0], sizes = [16, 128], strides = [1, 1]} : vector<16x512xf32> to vector<16x128xf32>
    %cst_190 = arith.constant 5.000000e-01 : f32
    %555 = vector.broadcast %cst_190 : f32 to vector<16x128xf32>
    %556 = arith.mulf %555, %554 : vector<16x128xf32>
    %557 = math.tanh %556 : vector<16x128xf32>
    %cst_191 = arith.constant 5.000000e-01 : f32
    %558 = vector.broadcast %cst_191 : f32 to vector<16x128xf32>
    %559 = arith.mulf %558, %557 : vector<16x128xf32>
    %cst_192 = arith.constant 5.000000e-01 : f32
    %560 = vector.broadcast %cst_192 : f32 to vector<16x128xf32>
    %561 = arith.addf %559, %560 : vector<16x128xf32>
    %562 = vector.extract_strided_slice %553 {offsets = [0, 128], sizes = [16, 128], strides = [1, 1]} : vector<16x512xf32> to vector<16x128xf32>
    %cst_193 = arith.constant 5.000000e-01 : f32
    %563 = vector.broadcast %cst_193 : f32 to vector<16x128xf32>
    %564 = arith.mulf %563, %562 : vector<16x128xf32>
    %565 = math.tanh %564 : vector<16x128xf32>
    %cst_194 = arith.constant 5.000000e-01 : f32
    %566 = vector.broadcast %cst_194 : f32 to vector<16x128xf32>
    %567 = arith.mulf %566, %565 : vector<16x128xf32>
    %cst_195 = arith.constant 5.000000e-01 : f32
    %568 = vector.broadcast %cst_195 : f32 to vector<16x128xf32>
    %569 = arith.addf %567, %568 : vector<16x128xf32>
    %570 = vector.extract_strided_slice %553 {offsets = [0, 256], sizes = [16, 128], strides = [1, 1]} : vector<16x512xf32> to vector<16x128xf32>
    %571 = math.tanh %570 : vector<16x128xf32>
    %572 = vector.extract_strided_slice %553 {offsets = [0, 384], sizes = [16, 128], strides = [1, 1]} : vector<16x512xf32> to vector<16x128xf32>
    %cst_196 = arith.constant 5.000000e-01 : f32
    %573 = vector.broadcast %cst_196 : f32 to vector<16x128xf32>
    %574 = arith.mulf %573, %572 : vector<16x128xf32>
    %575 = math.tanh %574 : vector<16x128xf32>
    %cst_197 = arith.constant 5.000000e-01 : f32
    %576 = vector.broadcast %cst_197 : f32 to vector<16x128xf32>
    %577 = arith.mulf %576, %575 : vector<16x128xf32>
    %cst_198 = arith.constant 5.000000e-01 : f32
    %578 = vector.broadcast %cst_198 : f32 to vector<16x128xf32>
    %579 = arith.addf %577, %578 : vector<16x128xf32>
    %580 = arith.mulf %569, %506 : vector<16x128xf32>
    %581 = arith.mulf %561, %571 : vector<16x128xf32>
    %582 = arith.addf %580, %581 : vector<16x128xf32>
    %583 = math.tanh %582 : vector<16x128xf32>
    %584 = arith.mulf %579, %583 : vector<16x128xf32>
    %585 = arith.truncf %584 : vector<16x128xf32> to vector<16x128xbf16>
    %cst_199 = arith.constant dense<0.000000e+00> : vector<16x512xf32>
    %586 = tpu.matmul %585, %9, %cst_199 {dimension_numbers = #tpu.dot_dimension_numbers<[1], [0], [0], [1], [0, 0, 1, 1], [], []>} : vector<16x128xbf16>, vector<128x512xbf16>, vector<16x512xf32> -> vector<16x512xf32>
    %587 = arith.truncf %545 : vector<16x128xf32> to vector<16x128xbf16>
    %cst_200 = arith.constant dense<0.000000e+00> : vector<16x512xf32>
    %588 = tpu.matmul %587, %10, %cst_200 {dimension_numbers = #tpu.dot_dimension_numbers<[1], [0], [0], [1], [0, 0, 1, 1], [], []>} : vector<16x128xbf16>, vector<128x512xbf16>, vector<16x512xf32> -> vector<16x512xf32>
    %589 = arith.addf %586, %588 : vector<16x512xf32>
    %590 = arith.addf %589, %13 : vector<16x512xf32>
    %591 = vector.extract_strided_slice %590 {offsets = [0, 0], sizes = [16, 128], strides = [1, 1]} : vector<16x512xf32> to vector<16x128xf32>
    %cst_201 = arith.constant 5.000000e-01 : f32
    %592 = vector.broadcast %cst_201 : f32 to vector<16x128xf32>
    %593 = arith.mulf %592, %591 : vector<16x128xf32>
    %594 = math.tanh %593 : vector<16x128xf32>
    %cst_202 = arith.constant 5.000000e-01 : f32
    %595 = vector.broadcast %cst_202 : f32 to vector<16x128xf32>
    %596 = arith.mulf %595, %594 : vector<16x128xf32>
    %cst_203 = arith.constant 5.000000e-01 : f32
    %597 = vector.broadcast %cst_203 : f32 to vector<16x128xf32>
    %598 = arith.addf %596, %597 : vector<16x128xf32>
    %599 = vector.extract_strided_slice %590 {offsets = [0, 128], sizes = [16, 128], strides = [1, 1]} : vector<16x512xf32> to vector<16x128xf32>
    %cst_204 = arith.constant 5.000000e-01 : f32
    %600 = vector.broadcast %cst_204 : f32 to vector<16x128xf32>
    %601 = arith.mulf %600, %599 : vector<16x128xf32>
    %602 = math.tanh %601 : vector<16x128xf32>
    %cst_205 = arith.constant 5.000000e-01 : f32
    %603 = vector.broadcast %cst_205 : f32 to vector<16x128xf32>
    %604 = arith.mulf %603, %602 : vector<16x128xf32>
    %cst_206 = arith.constant 5.000000e-01 : f32
    %605 = vector.broadcast %cst_206 : f32 to vector<16x128xf32>
    %606 = arith.addf %604, %605 : vector<16x128xf32>
    %607 = vector.extract_strided_slice %590 {offsets = [0, 256], sizes = [16, 128], strides = [1, 1]} : vector<16x512xf32> to vector<16x128xf32>
    %608 = math.tanh %607 : vector<16x128xf32>
    %609 = vector.extract_strided_slice %590 {offsets = [0, 384], sizes = [16, 128], strides = [1, 1]} : vector<16x512xf32> to vector<16x128xf32>
    %cst_207 = arith.constant 5.000000e-01 : f32
    %610 = vector.broadcast %cst_207 : f32 to vector<16x128xf32>
    %611 = arith.mulf %610, %609 : vector<16x128xf32>
    %612 = math.tanh %611 : vector<16x128xf32>
    %cst_208 = arith.constant 5.000000e-01 : f32
    %613 = vector.broadcast %cst_208 : f32 to vector<16x128xf32>
    %614 = arith.mulf %613, %612 : vector<16x128xf32>
    %cst_209 = arith.constant 5.000000e-01 : f32
    %615 = vector.broadcast %cst_209 : f32 to vector<16x128xf32>
    %616 = arith.addf %614, %615 : vector<16x128xf32>
    %617 = arith.mulf %606, %543 : vector<16x128xf32>
    %618 = arith.mulf %598, %608 : vector<16x128xf32>
    %619 = arith.addf %617, %618 : vector<16x128xf32>
    %620 = math.tanh %619 : vector<16x128xf32>
    %621 = arith.mulf %616, %620 : vector<16x128xf32>
    %622 = arith.truncf %621 : vector<16x128xf32> to vector<16x128xbf16>
    %c896 = arith.constant 896 : index
    %c0_210 = arith.constant 0 : index
    %623 = vector.load %arg11[%c896, %c0_210] : memref<1024x1024xbf16, #tpu.memory_space<vmem>>, vector<128x1024xbf16>
    %cst_211 = arith.constant dense<0.000000e+00> : vector<16x1024xf32>
    %624 = tpu.matmul %622, %623, %cst_211 {dimension_numbers = #tpu.dot_dimension_numbers<[1], [0], [0], [1], [0, 0, 1, 1], [], []>} : vector<16x128xbf16>, vector<128x1024xbf16>, vector<16x1024xf32> -> vector<16x1024xf32>
    %625 = arith.addf %549, %624 : vector<16x1024xf32>
    %c0_212 = arith.constant 0 : index
    %c0_213 = arith.constant 0 : index
    %626 = vector.load %arg9[%c0_212, %c0_213] : memref<16x1024xf32, #tpu.memory_space<vmem>>, vector<16x1024xf32>
    tpu.vector_store %arg9[%c0_212, %c0_213], %625 {strides = array<i32>} : memref<16x1024xf32, #tpu.memory_space<vmem>>, vector<16x1024xf32>,
    return
  }
}

</mosaic_0001>

<bundles_post_ra>
// kernel: tpu_custom_call.1
= control target key start
LH: loop header
LB: loop body
LE: loop exit
PB: predicated region body
PF: predicated region fallthrough
CT: control target
= control target key end

     0   :  { %14 = vsyncpa [#allocation6], 0  ;;  %s14366_s0 = inlined_call_operand.hbm [shape: bf16[128,256], index: 0, kind: input, shape index: {}]   ;;  %s14367_s1 = inlined_call_operand.hbm [shape: bf16[256,512], index: 1, kind: input, shape index: {}]   ;;  %s14368_s2 = inlined_call_operand.hbm [shape: bf16[128,512], index: 2, kind: input, shape index: {}]   ;;  %s14369_s3 = inlined_call_operand.hbm [shape: f32[1,512], index: 3, kind: input, shape index: {}]   ;;  %s14370_s4 = inlined_call_operand.hbm [shape: bf16[128,512], index: 4, kind: input, shape index: {}]   ;;  %s14371_s5 = inlined_call_operand.hbm [shape: bf16[128,512], index: 5, kind: input, shape index: {}]   ;;  %s14372_s6 = inlined_call_operand.hbm [shape: f32[1,512], index: 6, kind: input, shape index: {}]   ;;  %s14373_s7 = inlined_call_operand.hbm [shape: bf16[1024,1024], index: 7, kind: input, shape index: {}]   ;;  %s14374_s8 = inlined_call_operand.hbm [shape: f32[1,1024], index: 8, kind: input, shape index: {}]   ;;  %s14375_s9 = inlined_call_operand.hbm [shape: f32[16,1024], index: 9, kind: output, shape index: {}]  }
   0x1   :  { %15 = vsyncpa [#allocation9], 0 }
   0x2   :  { %16 = vsyncpa [#allocation12], 0 }
   0x3   :  { %17 = vsyncpa [#allocation15], 0 }
   0x4   :  { %18 = vsyncpa [#allocation18], 0  ;;  %s37_s11 = sshll.u32 %s14367_s1, 4  ;;  %s38_s11 = int_to_ptr.hbm [resolvable:$true] %s37_s11 }
   0x5   :  { %19 = vsyncpa [#allocation7], 0  ;;  %s12019_s12 = smov [#allocation8]   ;;  %s64_s16 = sshll.u32 %s14369_s3, 4  ;;  %s65_s16 = int_to_ptr.hbm [resolvable:$true] %s64_s16 }
   0x6   :  { %s39_s13 = sshll.u32 %s12019_s12, 4  ;;  %s12020_s17 = smov 256   ;;  %s40_s13 = int_to_ptr.vmem [resolvable:$true] %s39_s13 }
   0x7   :  { %s12021_s18 = smov 16   ;;  %s12022_s19 = smov [#allocation11]  }
   0x8   :  { %45 = dma.hbm_to_vmem [thread:$0]  %s38_s11, 8192, %s40_s13, [#allocation9], %s12020_s17, %s12020_s17, %s12021_s18  }
   0x9   :  { %s66_s20 = sshll.u32 %s12022_s19, 4  ;;  %s87_s22 = sshll.u32 %s14371_s5, 4  ;;  %s67_s20 = int_to_ptr.vmem [resolvable:$true] %s66_s20  ;;  %s88_s22 = int_to_ptr.hbm [resolvable:$true] %s87_s22 }
   0xa   :  { %69 = dma.hbm_to_vmem [thread:$0]  %s65_s16, 64, %s67_s20, [#allocation12]  }
   0xb   :  { %s24_s3 = sshll.u32 %s14366_s0, 4  ;;  %s12023_s25 = smov [#allocation14]   ;;  %s25_s3 = int_to_ptr.hbm [resolvable:$true] %s24_s3 }
   0xc   :  { %s89_s26 = sshll.u32 %s12023_s25, 4  ;;  %s12024_s27 = smov [#allocation5]   ;;  %s90_s26 = int_to_ptr.vmem [resolvable:$true] %s89_s26 }
   0xd   :  { %95 = dma.hbm_to_vmem [thread:$0]  %s88_s22, 4096, %s90_s26, [#allocation15], %s12020_s17, %s12020_s17, %s12021_s18  }
   0xe   :  { %s26_s28 = sshll.u32 %s12024_s27, 4  ;;  %s12025_s29 = smov 128   ;;  %s27_s28 = int_to_ptr.vmem [resolvable:$true] %s26_s28 }
   0xf   :  { %s12026_s5 = smov 8   ;;  %s50_s11 = sshll.u32 %s14368_s2, 4  ;;  %s51_s11 = int_to_ptr.hbm [resolvable:$true] %s50_s11 }
  0x10   :  { %32 = dma.hbm_to_vmem [thread:$0]  %s25_s3, 2048, %s27_s28, [#allocation6], %s12025_s29, %s12025_s29, %s12026_s5  }
  0x11   :  { %s12027_s0 = smov [#allocation10]   ;;  %s74_s15 = sshll.u32 %s14370_s4, 4  ;;  %s75_s15 = int_to_ptr.hbm [resolvable:$true] %s74_s15 }
  0x12   :  { %s52_s12 = sshll.u32 %s12027_s0, 4  ;;  %s12028_s16 = smov [#allocation13]   ;;  %s53_s12 = int_to_ptr.vmem [resolvable:$true] %s52_s12 }
  0x13   :  { %58 = dma.hbm_to_vmem [thread:$0]  %s51_s11, 4096, %s53_s12, [#allocation9], %s12020_s17, %s12020_s17, %s12021_s18  }
  0x14   :  { %s76_s19 = sshll.u32 %s12028_s16, 4  ;;  %s101_s1 = sshll.u32 %s14372_s6, 4  ;;  %s77_s19 = int_to_ptr.vmem [resolvable:$true] %s76_s19  ;;  %s102_s1 = int_to_ptr.hbm [resolvable:$true] %s101_s1 }
  0x15   :  { %82 = dma.hbm_to_vmem [thread:$0]  %s75_s15, 4096, %s77_s19, [#allocation12], %s12020_s17, %s12020_s17, %s12021_s18  }
  0x16   :  { %s112_s4 = sshll.u32 %s14374_s8, 4  ;;  %s12029_s23 = smov [#allocation16]   ;;  %s113_s4 = int_to_ptr.hbm [resolvable:$true] %s112_s4 }
  0x17   :  { %s103_s24 = sshll.u32 %s12029_s23, 4  ;;  %s12030_s3 = smov [#allocation17]   ;;  %s104_s24 = int_to_ptr.vmem [resolvable:$true] %s103_s24 }
  0x18   :  { %106 = dma.hbm_to_vmem [thread:$0]  %s102_s1, 64, %s104_s24, [#allocation15]  }
  0x19   :  { %s114_s25 = sshll.u32 %s12030_s3, 4  ;;  %s115_s25 = int_to_ptr.vmem [resolvable:$true] %s114_s25 }
  0x1a   :  { %117 = dma.hbm_to_vmem [thread:$0]  %s113_s4, 128, %s115_s25, [#allocation18]  }
  0x1b   :  { %12005 = dma.done.wait [#allocation6], 2048  }
  0x1c   :  { %12006 = vsyncadd [#allocation6], 4294965248 }
  0x1d   :  { %12007 = dma.done.wait [#allocation9], 12288  }
  0x1e   :  { %12008 = vsyncadd [#allocation9], 4294955008 }
  0x1f   :  { %12009 = dma.done.wait [#allocation12], 4160  }
  0x20   :  { %12010 = vsyncadd [#allocation12], 4294963136 }
  0x21   :  { %12011 = dma.done.wait [#allocation15], 4160  }
  0x22   :  { %12012 = vsyncadd [#allocation15], 4294963136 }
  0x23   :  { %12013 = dma.done.wait [#allocation18], 128  }
  0x24   :  { %12014 = vsyncadd [#allocation18], 4294967168  ;;  %v12122_v0 = vld [vmem:[#allocation17] sm:$0xff]  ;;  %v8165_v1 = vld [vmem:[#allocation8 + $0xe0] sm:$0xf]  ;;  %s158_s17 = sshll.u32 %s14373_s7, 4  ;;  %s159_s17 = int_to_ptr.hbm [resolvable:$true] %s158_s17 }
  0x25   :  { %14556 = vst [vmem:[#allocation31_spill] sm:$0xff] %v12122_v0  ;;  %v10786_v2 = vld [vmem:[#allocation8 + $0xec] sm:$0xf0]  ;;  %v8293_v7 = vld [vmem:[#allocation8 + $0x1e0] sm:$0xf]  ;;  %s12032_s18 = smov [#allocation3]  }
  0x26   :  { %v10818_v12 = vld [vmem:[#allocation8 + $0x1ec] sm:$0xf0]  ;;  %v8166_v13 = vor.u32 %v10786_v2, %v8165_v1  ;;  %v10784_v15 = vld [vmem:[#allocation8 + $0xe4] sm:$0xf]  ;;  %v8167_v16 = vld [vmem:[#allocation8 + $0xf0] sm:$0xf0] }
  0x27   :  { %v8294_v14 = vor.u32 %v10818_v12, %v8293_v7  ;;  %v10816_v17 = vld [vmem:[#allocation8 + $0x1e4] sm:$0xf]  ;;  %v8170_v18 = vor.u32 %v10784_v15, %v8167_v16  ;;  %v8295_v19 = vld [vmem:[#allocation8 + $0x1f0] sm:$0xf0]  ;;  %v8149_v20 = vld [vmem:[#allocation8 + $0xc0] sm:$0xf] }
  0x28   :  { %v10782_v21 = vld [vmem:[#allocation8 + $0xcc] sm:$0xf0]  ;;  %654 = vmatpush.bf16.msra.mxu0 %v8166_v13  ;;  %v8298_v22 = vor.u32 %v10816_v17, %v8295_v19  ;;  %v8277_v24 = vld [vmem:[#allocation8 + $0x1c0] sm:$0xf]  ;;  %v10780_v26 = vld [vmem:[#allocation8 + $0xc4] sm:$0xf] }
  0x29   :  { %703 = vmatpush.bf16.msra.mxu1 %v8294_v14  ;;  %v8150_v23 = vor.u32 %v10782_v21, %v8149_v20  ;;  %v10814_v25 = vld [vmem:[#allocation8 + $0x1cc] sm:$0xf0]  ;;  %752 = vmatpush.bf16.msra.mxu2 %v8170_v18  ;;  %v8151_v28 = vld [vmem:[#allocation8 + $0xd0] sm:$0xf0]  ;;  %v10812_v29 = vld [vmem:[#allocation8 + $0x1c4] sm:$0xf] }
  0x2a   :  { %v8278_v27 = vor.u32 %v10814_v25, %v8277_v24  ;;  %v8279_v30 = vld [vmem:[#allocation8 + $0x1d0] sm:$0xf0]  ;;  %801 = vmatpush.bf16.msra.mxu3 %v8298_v22  ;;  %v8154_v31 = vor.u32 %v10780_v26, %v8151_v28  ;;  %v8133_v33 = vld [vmem:[#allocation8 + $0xa0] sm:$0xf]  ;;  %v10778_v34 = vld [vmem:[#allocation8 + $0xac] sm:$0xf0] }
  0x2b   :  { %v8282_v32 = vor.u32 %v10812_v29, %v8279_v30  ;;  %v8261_v35 = vld [vmem:[#allocation8 + $0x1a0] sm:$0xf]  ;;  %v10810_v36 = vld [vmem:[#allocation8 + $0x1ac] sm:$0xf0]  ;;  %v10776_v37 = vld [vmem:[#allocation8 + $0xa4] sm:$0xf]  ;;  %v8134_v39 = vor.u32 %v10778_v34, %v8133_v33 }
  0x2c   :  { %v8135_v38 = vld [vmem:[#allocation8 + $0xb0] sm:$0xf0]  ;;  %655 = vmatpush.bf16.msra.mxu0 %v8150_v23  ;;  %v8262_v40 = vor.u32 %v10810_v36, %v8261_v35  ;;  %v10808_v41 = vld [vmem:[#allocation8 + $0x1a4] sm:$0xf]  ;;  %v8117_v43 = vld [vmem:[#allocation8 + $0x80] sm:$0xf] }
  0x2d   :  { %704 = vmatpush.bf16.msra.mxu1 %v8278_v27  ;;  %v8263_v42 = vld [vmem:[#allocation8 + $0x1b0] sm:$0xf0]  ;;  %753 = vmatpush.bf16.msra.mxu2 %v8154_v31  ;;  %v8138_v44 = vor.u32 %v10776_v37, %v8135_v38  ;;  %v10774_v45 = vld [vmem:[#allocation8 + $0x8c] sm:$0xf0]  ;;  %v8245_v46 = vld [vmem:[#allocation8 + $0x180] sm:$0xf] }
  0x2e   :  { %v10806_v47 = vld [vmem:[#allocation8 + $0x18c] sm:$0xf0]  ;;  %802 = vmatpush.bf16.msra.mxu3 %v8282_v32  ;;  %v8266_v48 = vor.u32 %v10808_v41, %v8263_v42  ;;  %v10772_v49 = vld [vmem:[#allocation8 + $0x84] sm:$0xf]  ;;  %v8119_v50 = vld [vmem:[#allocation8 + $0x90] sm:$0xf0]  ;;  %v8118_v53 = vor.u32 %v10774_v45, %v8117_v43 }
  0x2f   :  { %v10804_v51 = vld [vmem:[#allocation8 + $0x184] sm:$0xf]  ;;  %v8247_v52 = vld [vmem:[#allocation8 + $0x190] sm:$0xf0]  ;;  %v8246_v54 = vor.u32 %v10806_v47, %v8245_v46  ;;  %v8101_v55 = vld [vmem:[#allocation8 + $0x60] sm:$0xf]  ;;  %v8122_v56 = vor.u32 %v10772_v49, %v8119_v50 }
  0x30   :  { %656 = vmatpush.bf16.msra.mxu0 %v8134_v39  ;;  %v10770_v57 = vld [vmem:[#allocation8 + $0x6c] sm:$0xf0]  ;;  %v8229_v58 = vld [vmem:[#allocation8 + $0x160] sm:$0xf]  ;;  %v8250_v60 = vor.u32 %v10804_v51, %v8247_v52  ;;  %v10768_v61 = vld [vmem:[#allocation8 + $0x64] sm:$0xf] }
  0x31   :  { %705 = vmatpush.bf16.msra.mxu1 %v8262_v40  ;;  %754 = vmatpush.bf16.msra.mxu2 %v8138_v44  ;;  %v10802_v59 = vld [vmem:[#allocation8 + $0x16c] sm:$0xf0]  ;;  %v8103_v62 = vld [vmem:[#allocation8 + $0x70] sm:$0xf0]  ;;  %v10800_v63 = vld [vmem:[#allocation8 + $0x164] sm:$0xf]  ;;  %v8102_v2 = vor.u32 %v10770_v57, %v8101_v55 }
  0x32   :  { %803 = vmatpush.bf16.msra.mxu3 %v8266_v48  ;;  %v8231_v1 = vld [vmem:[#allocation8 + $0x170] sm:$0xf0]  ;;  %v8230_v7 = vor.u32 %v10802_v59, %v8229_v58  ;;  %v8085_v12 = vld [vmem:[#allocation8 + $0x40] sm:$0xf]  ;;  %v8106_v13 = vor.u32 %v10768_v61, %v8103_v62  ;;  %v10766_v14 = vld [vmem:[#allocation8 + $0x4c] sm:$0xf0] }
  0x33   :  { %v8213_v15 = vld [vmem:[#allocation8 + $0x140] sm:$0xf]  ;;  %v10798_v16 = vld [vmem:[#allocation8 + $0x14c] sm:$0xf0]  ;;  %v8234_v17 = vor.u32 %v10800_v63, %v8231_v1  ;;  %v10764_v18 = vld [vmem:[#allocation8 + $0x44] sm:$0xf]  ;;  %v8086_v22 = vor.u32 %v10766_v14, %v8085_v12 }
  0x34   :  { %657 = vmatpush.bf16.msra.mxu0 %v8118_v53  ;;  %v8087_v19 = vld [vmem:[#allocation8 + $0x50] sm:$0xf0]  ;;  %v10796_v20 = vld [vmem:[#allocation8 + $0x144] sm:$0xf]  ;;  %v8214_v23 = vor.u32 %v10798_v16, %v8213_v15  ;;  %v8069_v24 = vld [vmem:[#allocation8 + $0x20] sm:$0xf] }
  0x35   :  { %706 = vmatpush.bf16.msra.mxu1 %v8246_v54  ;;  %755 = vmatpush.bf16.msra.mxu2 %v8122_v56  ;;  %v8215_v21 = vld [vmem:[#allocation8 + $0x150] sm:$0xf0]  ;;  %v8090_v25 = vor.u32 %v10764_v18, %v8087_v19  ;;  %v10762_v26 = vld [vmem:[#allocation8 + $0x2c] sm:$0xf0]  ;;  %v8197_v27 = vld [vmem:[#allocation8 + $0x120] sm:$0xf] }
  0x36   :  { %804 = vmatpush.bf16.msra.mxu3 %v8250_v60  ;;  %v10794_v28 = vld [vmem:[#allocation8 + $0x12c] sm:$0xf0]  ;;  %v8218_v29 = vor.u32 %v10796_v20, %v8215_v21  ;;  %v10760_v30 = vld [vmem:[#allocation8 + $0x24] sm:$0xf]  ;;  %v8071_v31 = vld [vmem:[#allocation8 + $0x30] sm:$0xf0]  ;;  %v8070_v35 = vor.u32 %v10762_v26, %v8069_v24 }
  0x37   :  { %v10792_v32 = vld [vmem:[#allocation8 + $0x124] sm:$0xf]  ;;  %v8199_v33 = vld [vmem:[#allocation8 + $0x130] sm:$0xf0]  ;;  %v8053_v34 = vld [vmem:[#allocation8] sm:$0xf]  ;;  %v8198_v36 = vor.u32 %v10794_v28, %v8197_v27  ;;  %v8074_v40 = vor.u32 %v10760_v30, %v8071_v31 }
  0x38   :  { %658 = vmatpush.bf16.msra.mxu0 %v8102_v2  ;;  %v10758_v37 = vld [vmem:[#allocation8 + $0xc] sm:$0xf0]  ;;  %v8181_v38 = vld [vmem:[#allocation8 + $0x100] sm:$0xf]  ;;  %v10756_v41 = vld [vmem:[#allocation8 + $0x4] sm:$0xf]  ;;  %v8202_v44 = vor.u32 %v10792_v32, %v8199_v33 }
  0x39   :  { %707 = vmatpush.bf16.msra.mxu1 %v8230_v7  ;;  %756 = vmatpush.bf16.msra.mxu2 %v8106_v13  ;;  %v10790_v39 = vld [vmem:[#allocation8 + $0x10c] sm:$0xf0]  ;;  %v8055_v42 = vld [vmem:[#allocation8 + $0x10] sm:$0xf0]  ;;  %v10788_v43 = vld [vmem:[#allocation8 + $0x104] sm:$0xf]  ;;  %v8054_v51 = vor.u32 %v10758_v37, %v8053_v34 }
  0x3a   :  { %805 = vmatpush.bf16.msra.mxu3 %v8234_v17  ;;  %v8183_v45 = vld [vmem:[#allocation8 + $0x110] sm:$0xf0]  ;;  %v8173_v46 = vld [vmem:[#allocation8 + $0xe8] sm:$0xf]  ;;  %v10787_v47 = vld [vmem:[#allocation8 + $0xf4] sm:$0xf0]  ;;  %v8182_v52 = vor.u32 %v10790_v39, %v8181_v38  ;;  %v8058_v56 = vor.u32 %v10756_v41, %v8055_v42 }
  0x3b   :  { %v7989_v48 = vld [vmem:[#allocation5] sm:$0xf]  ;;  %v8301_v49 = vld [vmem:[#allocation8 + $0x1e8] sm:$0xf]  ;;  %v10819_v50 = vld [vmem:[#allocation8 + $0x1f4] sm:$0xf0]  ;;  %v8174_v57 = vor.u32 %v10787_v47, %v8173_v46  ;;  %v8186_v60 = vor.u32 %v10788_v43, %v8183_v45 }
  0x3c   :  { %659 = vmatpush.bf16.msra.mxu0 %v8086_v22  ;;  %v10741_v53 = vld [vmem:[#allocation5 + $0x4] sm:$0xf0]  ;;  %v10740_v54 = vld [vmem:[#allocation5 + $0x4] sm:$0xf]  ;;  %v7991_v55 = vld [vmem:[#allocation5 + $0x8] sm:$0xf0]  ;;  %v8302_v61 = vor.u32 %v10819_v50, %v8301_v49 }
  0x3d   :  { %708 = vmatpush.bf16.msra.mxu1 %v8214_v23  ;;  %757 = vmatpush.bf16.msra.mxu2 %v8090_v25  ;;  %v10817_v58 = vld [vmem:[#allocation8 + $0x1ec] sm:$0xf]  ;;  %v8303_v59 = vld [vmem:[#allocation8 + $0x1f8] sm:$0xf0]  ;;  %v8157_v1 = vld [vmem:[#allocation8 + $0xc8] sm:$0xf]  ;;  %v12132_v2 = vor.u32 %v10741_v53, %v7989_v48  ;;  %v12134_v7 = vor.u32 %v10740_v54, %v7991_v55 }
  0x3e   :  { %806 = vmatpush.bf16.msra.mxu3 %v8218_v29  ;;  %v10785_v62 = vld [vmem:[#allocation8 + $0xec] sm:$0xf]  ;;  %v8175_v63 = vld [vmem:[#allocation8 + $0xf8] sm:$0xf0]  ;;  %v10783_v12 = vld [vmem:[#allocation8 + $0xd4] sm:$0xf0]  ;;  %v8306_v15 = vor.u32 %v10817_v58, %v8303_v59 }
  0x3f   :  { %v8285_v13 = vld [vmem:[#allocation8 + $0x1c8] sm:$0xf]  ;;  %v10815_v14 = vld [vmem:[#allocation8 + $0x1d4] sm:$0xf0]  ;;  %v8178_v16 = vor.u32 %v10785_v62, %v8175_v63  ;;  %v10813_v17 = vld [vmem:[#allocation8 + $0x1cc] sm:$0xf]  ;;  %v8158_v19 = vor.u32 %v10783_v12, %v8157_v1 }
  0x40   :  { %660 = vmatpush.bf16.msra.mxu0 %v8070_v35  ;;  %v8287_v18 = vld [vmem:[#allocation8 + $0x1d8] sm:$0xf0]  ;;  %v8286_v20 = vor.u32 %v10815_v14, %v8285_v13  ;;  %v10781_v21 = vld [vmem:[#allocation8 + $0xcc] sm:$0xf]  ;;  %v8141_v25 = vld [vmem:[#allocation8 + $0xa8] sm:$0xf] }
  0x41   :  { %709 = vmatpush.bf16.msra.mxu1 %v8198_v36  ;;  %758 = vmatpush.bf16.msra.mxu2 %v8074_v40  ;;  %v8159_v22 = vld [vmem:[#allocation8 + $0xd8] sm:$0xf0]  ;;  %v8290_v23 = vor.u32 %v10813_v17, %v8287_v18  ;;  %v10779_v26 = vld [vmem:[#allocation8 + $0xb4] sm:$0xf0]  ;;  %v8269_v27 = vld [vmem:[#allocation8 + $0x1a8] sm:$0xf] }
  0x42   :  { %807 = vmatpush.bf16.msra.mxu3 %v8202_v44  ;;  %v8162_v24 = vor.u32 %v10781_v21, %v8159_v22  ;;  %v8142_v28 = vor.u32 %v10779_v26, %v8141_v25  ;;  %v10811_v29 = vld [vmem:[#allocation8 + $0x1b4] sm:$0xf0]  ;;  %v10777_v30 = vld [vmem:[#allocation8 + $0xac] sm:$0xf]  ;;  %v8143_v31 = vld [vmem:[#allocation8 + $0xb8] sm:$0xf0] }
  0x43   :  { %v8270_v32 = vor.u32 %v10811_v29, %v8269_v27  ;;  %v10809_v33 = vld [vmem:[#allocation8 + $0x1ac] sm:$0xf]  ;;  %v8271_v34 = vld [vmem:[#allocation8 + $0x1b8] sm:$0xf0]  ;;  %v8146_v36 = vor.u32 %v10777_v30, %v8143_v31  ;;  %v7997_v37 = vld [vmem:[#allocation5 + $0x10] sm:$0xf] }
  0x44   :  { %661 = vmatpush.bf16.msra.mxu0 %v8054_v51  ;;  %v8274_v35 = vor.u32 %v10809_v33, %v8271_v34  ;;  %v10743_v38 = vld [vmem:[#allocation5 + $0x14] sm:$0xf0]  ;;  %v10742_v39 = vld [vmem:[#allocation5 + $0x14] sm:$0xf]  ;;  %v7999_v40 = vld [vmem:[#allocation5 + $0x18] sm:$0xf0] }
  0x45   :  { %710 = vmatpush.bf16.msra.mxu1 %v8182_v52  ;;  %759 = vmatpush.bf16.msra.mxu2 %v8058_v56  ;;  %v12140_v41 = vor.u32 %v10743_v38, %v7997_v37  ;;  %v12142_v42 = vor.u32 %v10742_v39, %v7999_v40  ;;  %v8125_v43 = vld [vmem:[#allocation8 + $0x88] sm:$0xf]  ;;  %v10775_v44 = vld [vmem:[#allocation8 + $0x94] sm:$0xf0]  ;;  %v10773_v48 = vld [vmem:[#allocation8 + $0x8c] sm:$0xf] }
  0x46   :  { %808 = vmatpush.bf16.msra.mxu3 %v8186_v60  ;;  %v8253_v45 = vld [vmem:[#allocation8 + $0x188] sm:$0xf]  ;;  %v8126_v46 = vor.u32 %v10775_v44, %v8125_v43  ;;  %v10807_v47 = vld [vmem:[#allocation8 + $0x194] sm:$0xf0]  ;;  %v8127_v49 = vld [vmem:[#allocation8 + $0x98] sm:$0xf0] }
  0x47   :  { %662 = vmatmul.bf16.vlgmr.msra.gmra.mxu0 %v12132_v2  ;;  %v8254_v50 = vor.u32 %v10807_v47, %v8253_v45  ;;  %v8130_v51 = vor.u32 %v10773_v48, %v8127_v49  ;;  %v10805_v52 = vld [vmem:[#allocation8 + $0x18c] sm:$0xf]  ;;  %v8255_v53 = vld [vmem:[#allocation8 + $0x198] sm:$0xf0]  ;;  %v8005_v55 = vld [vmem:[#allocation5 + $0x20] sm:$0xf] }
  0x48   :  { %850 = vmatpush.bf16.msrb.mxu0 %v8174_v57  ;;  %711 = vmatmul.bf16.vlgmr.msra.gmra.mxu1 %v12134_v7  ;;  %v8258_v54 = vor.u32 %v10805_v52, %v8255_v53  ;;  %v10745_v56 = vld [vmem:[#allocation5 + $0x24] sm:$0xf0]  ;;  %v10744_v57 = vld [vmem:[#allocation5 + $0x24] sm:$0xf]  ;;  %v8007_v58 = vld [vmem:[#allocation5 + $0x28] sm:$0xf0] }
  0x49   :  { %899 = vmatpush.bf16.msrb.mxu1 %v8302_v61  ;;  %760 = vmatmul.bf16.vlgmr.msra.gmra.mxu2 %v12132_v2  ;;  %v12148_v59 = vor.u32 %v10745_v56, %v8005_v55  ;;  %v12150_v60 = vor.u32 %v10744_v57, %v8007_v58  ;;  %v8109_v61 = vld [vmem:[#allocation8 + $0x68] sm:$0xf]  ;;  %v10771_v62 = vld [vmem:[#allocation8 + $0x74] sm:$0xf0]  ;;  %v10769_v13 = vld [vmem:[#allocation8 + $0x6c] sm:$0xf] }
  0x4a   :  { %997 = vmatpush.bf16.msrb.mxu3 %v8306_v15  ;;  %948 = vmatpush.bf16.msrb.mxu2 %v8178_v16  ;;  %v8237_v63 = vld [vmem:[#allocation8 + $0x168] sm:$0xf]  ;;  %v8110_v1 = vor.u32 %v10771_v62, %v8109_v61  ;;  %v10803_v12 = vld [vmem:[#allocation8 + $0x174] sm:$0xf0]  ;;  %v8111_v14 = vld [vmem:[#allocation8 + $0x78] sm:$0xf0] }
  0x4b   :  { %809 = vmatmul.bf16.vlgmr.msra.gmra.mxu3 %v12134_v7  ;;  %v8238_v15 = vor.u32 %v10803_v12, %v8237_v63  ;;  %v8114_v16 = vor.u32 %v10769_v13, %v8111_v14  ;;  %v10801_v17 = vld [vmem:[#allocation8 + $0x16c] sm:$0xf]  ;;  %v8239_v18 = vld [vmem:[#allocation8 + $0x178] sm:$0xf0]  ;;  %v10747_v21 = vld [vmem:[#allocation5 + $0x34] sm:$0xf0] }
  0x4c   :  { %851 = vmatpush.bf16.msrb.mxu0 %v8158_v19  ;;  %v8242_v19 = vor.u32 %v10801_v17, %v8239_v18  ;;  %v10746_v22 = vld [vmem:[#allocation5 + $0x34] sm:$0xf]  ;;  %v8093_v26 = vld [vmem:[#allocation8 + $0x48] sm:$0xf]  ;;  %v10767_v27 = vld [vmem:[#allocation8 + $0x54] sm:$0xf0] }
  0x4d   :  { %900 = vmatpush.bf16.msrb.mxu1 %v8286_v20  ;;  %v8013_v20 = vld [vmem:[#allocation5 + $0x30] sm:$0xf]  ;;  %v8094_v29 = vor.u32 %v10767_v27, %v8093_v26  ;;  %v10799_v30 = vld [vmem:[#allocation8 + $0x154] sm:$0xf0]  ;;  %v10765_v31 = vld [vmem:[#allocation8 + $0x4c] sm:$0xf] }
  0x4e   :  { %998 = vmatpush.bf16.msrb.mxu3 %v8290_v23  ;;  %949 = vmatpush.bf16.msrb.mxu2 %v8162_v24  ;;  %v8015_v23 = vld [vmem:[#allocation5 + $0x38] sm:$0xf0]  ;;  %v12156_v24 = vor.u32 %v10747_v21, %v8013_v20  ;;  %v8021_v38 = vld [vmem:[#allocation5 + $0x40] sm:$0xf]  ;;  %v10749_v39 = vld [vmem:[#allocation5 + $0x44] sm:$0xf0] }
  0x4f   :  { %v12158_v25 = vor.u32 %v10746_v22, %v8015_v23  ;;  %v10748_v40 = vld [vmem:[#allocation5 + $0x44] sm:$0xf]  ;;  %v8023_v43 = vld [vmem:[#allocation5 + $0x48] sm:$0xf0]  ;;  %v12164_v44 = vor.u32 %v10749_v39, %v8021_v38  ;;  %v10763_v47 = vld [vmem:[#allocation8 + $0x34] sm:$0xf0] }
  0x50   :  { %852 = vmatpush.bf16.msrb.mxu0 %v8142_v28  ;;  %v8221_v28 = vld [vmem:[#allocation8 + $0x148] sm:$0xf]  ;;  %v12166_v45 = vor.u32 %v10748_v40, %v8023_v43  ;;  %v8079_v52 = vld [vmem:[#allocation8 + $0x38] sm:$0xf0]  ;;  %v10793_v55 = vld [vmem:[#allocation8 + $0x12c] sm:$0xf] }
  0x51   :  { %901 = vmatpush.bf16.msrb.mxu1 %v8270_v32  ;;  %v8095_v32 = vld [vmem:[#allocation8 + $0x58] sm:$0xf0]  ;;  %v8222_v33 = vor.u32 %v10799_v30, %v8221_v28  ;;  %v8205_v48 = vld [vmem:[#allocation8 + $0x128] sm:$0xf]  ;;  %v8029_v58 = vld [vmem:[#allocation5 + $0x50] sm:$0xf] }
  0x52   :  { %999 = vmatpush.bf16.msrb.mxu3 %v8274_v35  ;;  %950 = vmatpush.bf16.msrb.mxu2 %v8146_v36  ;;  %v8098_v34 = vor.u32 %v10765_v31, %v8095_v32  ;;  %v10797_v35 = vld [vmem:[#allocation8 + $0x14c] sm:$0xf]  ;;  %v8223_v36 = vld [vmem:[#allocation8 + $0x158] sm:$0xf0]  ;;  %v10751_v61 = vld [vmem:[#allocation5 + $0x54] sm:$0xf0] }
  0x53   :  { %v8226_v37 = vor.u32 %v10797_v35, %v8223_v36  ;;  %v8207_v56 = vld [vmem:[#allocation8 + $0x138] sm:$0xf0]  ;;  %v10750_v62 = vld [vmem:[#allocation5 + $0x54] sm:$0xf]  ;;  %v8061_v13 = vld [vmem:[#allocation8 + $0x8] sm:$0xf] }
  0x54   :  { %853 = vmatpush.bf16.msrb.mxu0 %v8126_v46  ;;  %v8077_v46 = vld [vmem:[#allocation8 + $0x28] sm:$0xf]  ;;  %v8210_v57 = vor.u32 %v10793_v55, %v8207_v56  ;;  %v8031_v63 = vld [vmem:[#allocation5 + $0x58] sm:$0xf0]  ;;  %v10759_v14 = vld [vmem:[#allocation8 + $0x14] sm:$0xf0] }
  0x55   :  { %902 = vmatpush.bf16.msrb.mxu1 %v8254_v50  ;;  %v8078_v49 = vor.u32 %v10763_v47, %v8077_v46  ;;  %v10795_v50 = vld [vmem:[#allocation8 + $0x134] sm:$0xf0]  ;;  %v12174_v12 = vor.u32 %v10750_v62, %v8031_v63  ;;  %v10757_v18 = vld [vmem:[#allocation8 + $0xc] sm:$0xf]  ;;  %v8191_v23 = vld [vmem:[#allocation8 + $0x118] sm:$0xf0] }
  0x56   :  { %951 = vmatpush.bf16.msrb.mxu2 %v8130_v51  ;;  %1000 = vmatpush.bf16.msrb.mxu3 %v8258_v54  ;;  %v10761_v51 = vld [vmem:[#allocation8 + $0x2c] sm:$0xf]  ;;  %v8206_v53 = vor.u32 %v10795_v50, %v8205_v48  ;;  %v10791_v17 = vld [vmem:[#allocation8 + $0x114] sm:$0xf0]  ;;  %v8037_v27 = vld [vmem:[#allocation5 + $0x60] sm:$0xf] }
  0x57   :  { %667 = vmatmul.bf16.gmra.mxu0 %v12140_v41  ;;  %v8082_v54 = vor.u32 %v10761_v51, %v8079_v52  ;;  %v10789_v22 = vld [vmem:[#allocation8 + $0x10c] sm:$0xf]  ;;  %v10753_v28 = vld [vmem:[#allocation5 + $0x64] sm:$0xf0]  ;;  %v10848_v35 = vld [vmem:[#allocation10 + $0xe4] sm:$0xf] }
  0x58   :  { %716 = vmatmul.bf16.gmra.mxu1 %v12142_v42  ;;  %854 = vmatpush.bf16.msrb.mxu0 %v8110_v1  ;;  %v12172_v1 = vor.u32 %v10751_v61, %v8029_v58  ;;  %v8194_v26 = vor.u32 %v10789_v22, %v8191_v23  ;;  %v8039_v30 = vld [vmem:[#allocation5 + $0x68] sm:$0xf0]  ;;  %v12180_v31 = vor.u32 %v10753_v28, %v8037_v27  ;;  %v8429_v38 = vld [vmem:[#allocation10 + $0xe8] sm:$0xf]  ;;  %v10851_v39 = vld [vmem:[#allocation10 + $0xf4] sm:$0xf0] }
  0x59   :  { %765 = vmatmul.bf16.gmra.mxu2 %v12140_v41  ;;  %903 = vmatpush.bf16.msrb.mxu1 %v8238_v15  ;;  %v8189_v15 = vld [vmem:[#allocation8 + $0x108] sm:$0xf]  ;;  %v12192_v43 = vor.u32 %v10851_v39, %v8429_v38  ;;  %v8045_v46 = vld [vmem:[#allocation5 + $0x70] sm:$0xf]  ;;  %v10849_v47 = vld [vmem:[#allocation10 + $0xec] sm:$0xf] }
  0x5a   :  { %952 = vmatpush.bf16.msrb.mxu2 %v8114_v16  ;;  %1001 = vmatpush.bf16.msrb.mxu3 %v8242_v19  ;;  %v8062_v16 = vor.u32 %v10759_v14, %v8061_v13  ;;  %v8063_v19 = vld [vmem:[#allocation8 + $0x18] sm:$0xf0]  ;;  %v8190_v20 = vor.u32 %v10791_v17, %v8189_v15  ;;  %v10754_v50 = vld [vmem:[#allocation5 + $0x74] sm:$0xf]  ;;  %v8405_v55 = vld [vmem:[#allocation10 + $0xc0] sm:$0xf] }
  0x5b   :  { %814 = vmatmul.bf16.gmra.mxu3 %v12142_v42  ;;  %v8066_v21 = vor.u32 %v10757_v18, %v8063_v19  ;;  %v8431_v48 = vld [vmem:[#allocation10 + $0xf8] sm:$0xf0]  ;;  %v10846_v56 = vld [vmem:[#allocation10 + $0xcc] sm:$0xf0]  ;;  %v8407_v61 = vld [vmem:[#allocation10 + $0xd0] sm:$0xf0] }
  0x5c   :  { %855 = vmatpush.bf16.msrb.mxu0 %v8094_v29  ;;  %v10752_v29 = vld [vmem:[#allocation5 + $0x64] sm:$0xf]  ;;  %v8047_v51 = vld [vmem:[#allocation5 + $0x78] sm:$0xf0]  ;;  %v12197_v52 = vor.u32 %v10849_v47, %v8431_v48  ;;  %v12208_v58 = vor.u32 %v10846_v56, %v8405_v55  ;;  %v8413_v62 = vld [vmem:[#allocation10 + $0xc8] sm:$0xf] }
  0x5d   :  { %904 = vmatpush.bf16.msrb.mxu1 %v8222_v33  ;;  %v12182_v32 = vor.u32 %v10752_v29, %v8039_v30  ;;  %v8421_v33 = vld [vmem:[#allocation10 + $0xe0] sm:$0xf]  ;;  %v10847_v63 = vld [vmem:[#allocation10 + $0xd4] sm:$0xf0]  ;;  %v8415_v17 = vld [vmem:[#allocation10 + $0xd8] sm:$0xf0] }
  0x5e   :  { %953 = vmatpush.bf16.msrb.mxu2 %v8098_v34  ;;  %1002 = vmatpush.bf16.msrb.mxu3 %v8226_v37  ;;  %v10850_v34 = vld [vmem:[#allocation10 + $0xec] sm:$0xf0]  ;;  %v8423_v37 = vld [vmem:[#allocation10 + $0xf0] sm:$0xf0]  ;;  %v12212_v14 = vor.u32 %v10847_v63, %v8413_v62  ;;  %v12217_v15 = vld [vmem:[#allocation11] sm:$0xf] }
  0x5f   :  { %v12188_v36 = vor.u32 %v10850_v34, %v8421_v33  ;;  %v12190_v40 = vor.u32 %v10848_v35, %v8423_v37  ;;  %v12222_v19 = vperm.slane %v12217_v15, 0  ;;  %v8389_v27 = vld [vmem:[#allocation10 + $0xa0] sm:$0xf]  ;;  %v10842_v28 = vld [vmem:[#allocation10 + $0xac] sm:$0xf0]  ;;  %s160_s26 = sshll.u32 %s12032_s18, 4  ;;  %s161_s26 = int_to_ptr.vmem [resolvable:$true] %s160_s26 }
  0x60   :  { %856 = vmatpush.bf16.msrb.mxu0 %v8078_v49  ;;  %v10755_v49 = vld [vmem:[#allocation5 + $0x74] sm:$0xf0]  ;;  %v10840_v29 = vld [vmem:[#allocation10 + $0xa4] sm:$0xf]  ;;  %v12235_v30 = vor.u32 %v10842_v28, %v8389_v27  ;;  %v8391_v33 = vld [vmem:[#allocation10 + $0xb0] sm:$0xf0] }
  0x61   :  { %905 = vmatpush.bf16.msrb.mxu1 %v8206_v53  ;;  %v12200_v53 = vor.u32 %v10755_v49, %v8045_v46  ;;  %v8397_v34 = vld [vmem:[#allocation10 + $0xa8] sm:$0xf]  ;;  %v10843_v35 = vld [vmem:[#allocation10 + $0xb4] sm:$0xf0]  ;;  %v12237_v38 = vor.u32 %v10840_v29, %v8391_v33  ;;  %v8399_v55 = vld [vmem:[#allocation10 + $0xb8] sm:$0xf0] }
  0x62   :  { %954 = vmatpush.bf16.msrb.mxu2 %v8082_v54  ;;  %1003 = vmatpush.bf16.msrb.mxu3 %v8210_v57  ;;  %v12202_v54 = vor.u32 %v10754_v50, %v8047_v51  ;;  %v10844_v57 = vld [vmem:[#allocation10 + $0xc4] sm:$0xf]  ;;  %v12239_v39 = vor.u32 %v10843_v35, %v8397_v34  ;;  %v10841_v51 = vld [vmem:[#allocation10 + $0xac] sm:$0xf]  ;;  %v10838_v27 = vld [vmem:[#allocation10 + $0x8c] sm:$0xf0] }
  0x63   :  { %v12210_v13 = vor.u32 %v10844_v57, %v8407_v61  ;;  %v12250_v56 = vor.u32 %v10841_v51, %v8399_v55  ;;  %v10836_v28 = vld [vmem:[#allocation10 + $0x84] sm:$0xf]  ;;  %v8375_v33 = vld [vmem:[#allocation10 + $0x90] sm:$0xf0]  ;;  %v8381_v34 = vld [vmem:[#allocation10 + $0x88] sm:$0xf] }
  0x64   :  { %857 = vmatpush.bf16.msrb.mxu0 %v8062_v16  ;;  %v10845_v16 = vld [vmem:[#allocation10 + $0xcc] sm:$0xf]  ;;  %v10839_v35 = vld [vmem:[#allocation10 + $0x94] sm:$0xf0]  ;;  %163 = dma.hbm_to_vmem [thread:$0]  %s159_s17, 65536, %s161_s26, [#allocation4] }
  0x65   :  { %906 = vmatpush.bf16.msrb.mxu1 %v8190_v20  ;;  %v12219_v18 = vor.u32 %v10845_v16, %v8415_v17 }
  0x66   :  { %955 = vmatpush.bf16.msrb.mxu2 %v8066_v21  ;;  %1004 = vmatpush.bf16.msrb.mxu3 %v8194_v26  ;;  %v12232_v26 = vperm.slane %v12217_v15, 1 }
  0x67   :  { %672 = vmatmul.bf16.gmra.mxu0 %v12148_v59 }
  0x68   :  { %721 = vmatmul.bf16.gmra.mxu1 %v12150_v60  ;;  %1402 = vmatpush.bf16.msra.mxu0 %v12188_v36 }
  0x69   :  { %770 = vmatmul.bf16.gmra.mxu2 %v12148_v59  ;;  %1416 = vmatpush.bf16.msra.mxu1 %v12190_v40 }
  0x6a   :  { %1430 = vmatpush.bf16.msra.mxu2 %v12192_v43  ;;  %1444 = vmatpush.bf16.msra.mxu3 %v12197_v52 }
  0x6b   :  { %819 = vmatmul.bf16.gmra.mxu3 %v12150_v60 }
  0x6c   :  { %1403 = vmatpush.bf16.msra.mxu0 %v12208_v58 }
  0x6d   :  { %1417 = vmatpush.bf16.msra.mxu1 %v12210_v13 }
  0x6e   :  { %1431 = vmatpush.bf16.msra.mxu2 %v12212_v14  ;;  %1445 = vmatpush.bf16.msra.mxu3 %v12219_v18 }
  0x70   :  { %1404 = vmatpush.bf16.msra.mxu0 %v12235_v30 }
  0x71   :  { %1418 = vmatpush.bf16.msra.mxu1 %v12237_v38 }
  0x72   :  { %1432 = vmatpush.bf16.msra.mxu2 %v12239_v39  ;;  %1446 = vmatpush.bf16.msra.mxu3 %v12250_v56 }
  0x77   :  { %677 = vmatmul.bf16.gmra.mxu0 %v12156_v24 }
  0x78   :  { %726 = vmatmul.bf16.gmra.mxu1 %v12158_v25 }
  0x79   :  { %775 = vmatmul.bf16.gmra.mxu2 %v12156_v24 }
  0x7b   :  { %824 = vmatmul.bf16.gmra.mxu3 %v12158_v25 }
  0x87   :  { %682 = vmatmul.bf16.gmra.mxu0 %v12164_v44 }
  0x88   :  { %731 = vmatmul.bf16.gmra.mxu1 %v12166_v45 }
  0x89   :  { %780 = vmatmul.bf16.gmra.mxu2 %v12164_v44 }
  0x8b   :  { %829 = vmatmul.bf16.gmra.mxu3 %v12166_v45 }
  0x97   :  { %687 = vmatmul.bf16.gmra.mxu0 %v12172_v1 }
  0x98   :  { %736 = vmatmul.bf16.gmra.mxu1 %v12174_v12 }
  0x99   :  { %785 = vmatmul.bf16.gmra.mxu2 %v12172_v1 }
  0x9b   :  { %834 = vmatmul.bf16.gmra.mxu3 %v12174_v12 }
  0xa7   :  { %692 = vmatmul.bf16.gmra.mxu0 %v12180_v31 }
  0xa8   :  { %741 = vmatmul.bf16.gmra.mxu1 %v12182_v32 }
  0xa9   :  { %790 = vmatmul.bf16.gmra.mxu2 %v12180_v31 }
  0xab   :  { %839 = vmatmul.bf16.gmra.mxu3 %v12182_v32 }
  0xb7   :  { %697 = vmatmul.bf16.gmra.mxu0 %v12200_v53 }
  0xb8   :  { %746 = vmatmul.bf16.gmra.mxu1 %v12202_v54 }
  0xb9   :  { %795 = vmatmul.bf16.gmra.mxu2 %v12200_v53 }
  0xbb   :  { %844 = vmatmul.bf16.gmra.mxu3 %v12202_v54 }
  0xc4   :  { %v663_v20 = vpop.f32.mrf.mxu0 }
  0xc5   :  { %v712_v21 = vpop.f32.mrf.mxu1  ;;  %v664_v22 = vadd.f32 %v663_v20, %v12222_v19 }
  0xc7   :  { %v12226_v23 = vadd.f32 %v712_v21, %v664_v22  ;;  %858 = vmatmul.bf16.vlgmr.msrb.gmra.mxu0 %v12132_v2  ;;  %v8373_v22 = vld [vmem:[#allocation10 + $0x80] sm:$0xf] }
  0xc8   :  { %907 = vmatmul.bf16.vlgmr.msrb.gmra.mxu1 %v12134_v7  ;;  %v12263_v29 = vor.u32 %v10838_v27, %v8373_v22 }
  0xc9   :  { %956 = vmatmul.bf16.vlgmr.msrb.gmra.mxu2 %v12132_v2 }
  0xca   :  { %1405 = vmatpush.bf16.msra.mxu0 %v12263_v29 }
  0xcb   :  { %1005 = vmatmul.bf16.vlgmr.msrb.gmra.mxu3 %v12134_v7 }
  0xcc   :  { %v761_v37 = vpop.f32.mrf.mxu2  ;;  %v665_v47 = vpop.f32.mrf.mxu0 }
  0xcd   :  { %v762_v2 = vadd.f32 %v761_v37, %v12232_v26  ;;  %v666_v7 = vadd.f32 %v665_v47, %v12222_v19  ;;  %v714_v48 = vpop.f32.mrf.mxu1 }
  0xce   :  { %v810_v46 = vpop.f32.mrf.mxu3 }
  0xcf   :  { %v12246_v49 = vadd.f32 %v810_v46, %v762_v2  ;;  %v12248_v50 = vadd.f32 %v714_v48, %v666_v7  ;;  %v12265_v2 = vor.u32 %v10836_v28, %v8375_v33  ;;  %v12267_v46 = vor.u32 %v10839_v35, %v8381_v34  ;;  %v8357_v35 = vld [vmem:[#allocation10 + $0x60] sm:$0xf] }
  0xd1   :  { %1419 = vmatpush.bf16.msra.mxu1 %v12265_v2  ;;  %1433 = vmatpush.bf16.msra.mxu2 %v12267_v46 }
  0xd4   :  { %v763_v57 = vpop.f32.mrf.mxu2  ;;  %v668_v63 = vpop.f32.mrf.mxu0 }
  0xd5   :  { %v764_v61 = vadd.f32 %v763_v57, %v12232_v26  ;;  %v669_v16 = vadd.f32 %v668_v63, %v12222_v19  ;;  %v717_v17 = vpop.f32.mrf.mxu1  ;;  %v10837_v57 = vld [vmem:[#allocation10 + $0x8c] sm:$0xf] }
  0xd6   :  { %v812_v62 = vpop.f32.mrf.mxu3 }
  0xd7   :  { %v12255_v20 = vadd.f32 %v812_v62, %v764_v61  ;;  %v12257_v21 = vadd.f32 %v717_v17, %v669_v16  ;;  %863 = vmatmul.bf16.gmra.mxu0 %v12140_v41  ;;  %v8383_v61 = vld [vmem:[#allocation10 + $0x98] sm:$0xf0] }
  0xd8   :  { %912 = vmatmul.bf16.gmra.mxu1 %v12142_v42  ;;  %v12278_v62 = vor.u32 %v10837_v57, %v8383_v61 }
  0xd9   :  { %14557 = vst [vmem:[#allocation32_spill] sm:$0xff] %v12257_v21  ;;  %961 = vmatmul.bf16.gmra.mxu2 %v12140_v41  ;;  %v8525_v21 = vld [vmem:[#allocation14 + $0xa8] sm:$0xf] }
  0xda   :  { %1447 = vmatpush.bf16.msra.mxu3 %v12278_v62 }
  0xdb   :  { %1010 = vmatmul.bf16.gmra.mxu3 %v12142_v42 }
  0xdc   :  { %v766_v37 = vpop.f32.mrf.mxu2  ;;  %v670_v48 = vpop.f32.mrf.mxu0 }
  0xdd   :  { %v767_v47 = vadd.f32 %v766_v37, %v12232_v26  ;;  %v671_v41 = vadd.f32 %v670_v48, %v12222_v19  ;;  %v719_v42 = vpop.f32.mrf.mxu1  ;;  %v10834_v37 = vld [vmem:[#allocation10 + $0x6c] sm:$0xf0]  ;;  %v8359_v48 = vld [vmem:[#allocation10 + $0x70] sm:$0xf0] }
  0xde   :  { %v815_v7 = vpop.f32.mrf.mxu3 }
  0xdf   :  { %v12274_v51 = vadd.f32 %v815_v7, %v767_v47  ;;  %v12276_v55 = vadd.f32 %v719_v42, %v671_v41  ;;  %v10832_v47 = vld [vmem:[#allocation10 + $0x64] sm:$0xf]  ;;  %v12291_v7 = vor.u32 %v10834_v37, %v8357_v35  ;;  %v8365_v41 = vld [vmem:[#allocation10 + $0x68] sm:$0xf]  ;;  %v10835_v42 = vld [vmem:[#allocation10 + $0x74] sm:$0xf0] }
  0xe0   :  { %v12293_v61 = vor.u32 %v10832_v47, %v8359_v48  ;;  %v10833_v35 = vld [vmem:[#allocation10 + $0x6c] sm:$0xf]  ;;  %v8367_v37 = vld [vmem:[#allocation10 + $0x78] sm:$0xf0] }
  0xe1   :  { %14558 = vst [vmem:[#allocation33_spill] sm:$0xff] %v12274_v51  ;;  %1406 = vmatpush.bf16.msra.mxu0 %v12291_v7  ;;  %v12306_v47 = vor.u32 %v10833_v35, %v8367_v37  ;;  %v8343_v37 = vld [vmem:[#allocation10 + $0x50] sm:$0xf0] }
  0xe2   :  { %14559 = vst [vmem:[#allocation34_spill] sm:$0xff] %v12276_v55  ;;  %1420 = vmatpush.bf16.msra.mxu1 %v12293_v61  ;;  %v8543_v55 = vld [vmem:[#allocation14 + $0xd8] sm:$0xf0] }
  0xe3   :  { %1448 = vmatpush.bf16.msra.mxu3 %v12306_v47 }
  0xe4   :  { %v768_v63 = vpop.f32.mrf.mxu2  ;;  %v673_v22 = vpop.f32.mrf.mxu0 }
  0xe5   :  { %v769_v16 = vadd.f32 %v768_v63, %v12232_v26  ;;  %v674_v27 = vadd.f32 %v673_v22, %v12222_v19  ;;  %v722_v28 = vpop.f32.mrf.mxu1  ;;  %v12295_v63 = vor.u32 %v10835_v42, %v8365_v41 }
  0xe6   :  { %v817_v17 = vpop.f32.mrf.mxu3 }
  0xe7   :  { %v12283_v33 = vadd.f32 %v817_v17, %v769_v16  ;;  %v12285_v34 = vadd.f32 %v722_v28, %v674_v27  ;;  %868 = vmatmul.bf16.gmra.mxu0 %v12148_v59  ;;  %1434 = vmatpush.bf16.msra.mxu2 %v12295_v63 }
  0xe8   :  { %917 = vmatmul.bf16.gmra.mxu1 %v12150_v60 }
  0xe9   :  { %14560 = vst [vmem:[#allocation35_spill] sm:$0xff] %v12283_v33  ;;  %966 = vmatmul.bf16.gmra.mxu2 %v12148_v59 }
  0xea   :  { %14561 = vst [vmem:[#allocation36_spill] sm:$0xff] %v12285_v34 }
  0xeb   :  { %1015 = vmatmul.bf16.gmra.mxu3 %v12150_v60 }
  0xec   :  { %v771_v57 = vpop.f32.mrf.mxu2  ;;  %v675_v22 = vpop.f32.mrf.mxu0 }
  0xed   :  { %v772_v16 = vadd.f32 %v771_v57, %v12232_v26  ;;  %v676_v59 = vadd.f32 %v675_v22, %v12222_v19  ;;  %v724_v60 = vpop.f32.mrf.mxu1 }
  0xee   :  { %v820_v17 = vpop.f32.mrf.mxu3 }
  0xef   :  { %v12302_v27 = vadd.f32 %v820_v17, %v772_v16  ;;  %v12304_v28 = vadd.f32 %v724_v60, %v676_v59  ;;  %v8341_v17 = vld [vmem:[#allocation10 + $0x40] sm:$0xf]  ;;  %v10830_v59 = vld [vmem:[#allocation10 + $0x4c] sm:$0xf0]  ;;  %v10828_v60 = vld [vmem:[#allocation10 + $0x44] sm:$0xf] }
  0xf0   :  { %v12319_v35 = vor.u32 %v10830_v59, %v8341_v17 }
  0xf1   :  { %14562 = vst [vmem:[#allocation37_spill] sm:$0xff] %v12302_v27 }
  0xf2   :  { %14563 = vst [vmem:[#allocation38_spill] sm:$0xff] %v12304_v28  ;;  %1407 = vmatpush.bf16.msra.mxu0 %v12319_v35 }
  0xf4   :  { %v773_v48 = vpop.f32.mrf.mxu2  ;;  %v678_v57 = vpop.f32.mrf.mxu0 }
  0xf5   :  { %v774_v41 = vadd.f32 %v773_v48, %v12232_v26  ;;  %v679_v22 = vadd.f32 %v678_v57, %v12222_v19  ;;  %v727_v11 = vpop.f32.mrf.mxu1  ;;  %v8349_v48 = vld [vmem:[#allocation10 + $0x48] sm:$0xf]  ;;  %v10831_v57 = vld [vmem:[#allocation10 + $0x54] sm:$0xf0] }
  0xf6   :  { %v822_v42 = vpop.f32.mrf.mxu3 }
  0xf7   :  { %v12311_v10 = vadd.f32 %v822_v42, %v774_v41  ;;  %v12313_v16 = vadd.f32 %v727_v11, %v679_v22  ;;  %873 = vmatmul.bf16.gmra.mxu0 %v12156_v24  ;;  %v12321_v42 = vor.u32 %v10828_v60, %v8343_v37  ;;  %v12323_v11 = vor.u32 %v10831_v57, %v8349_v48  ;;  %v10829_v60 = vld [vmem:[#allocation10 + $0x4c] sm:$0xf]  ;;  %v8351_v37 = vld [vmem:[#allocation10 + $0x58] sm:$0xf0] }
  0xf8   :  { %922 = vmatmul.bf16.gmra.mxu1 %v12158_v25  ;;  %v12334_v48 = vor.u32 %v10829_v60, %v8351_v37  ;;  %v8327_v37 = vld [vmem:[#allocation10 + $0x30] sm:$0xf0] }
  0xf9   :  { %14564 = vst [vmem:[#allocation39_spill] sm:$0xff] %v12311_v10  ;;  %971 = vmatmul.bf16.gmra.mxu2 %v12156_v24  ;;  %1421 = vmatpush.bf16.msra.mxu1 %v12321_v42 }
  0xfa   :  { %14565 = vst [vmem:[#allocation40_spill] sm:$0xff] %v12313_v16  ;;  %1435 = vmatpush.bf16.msra.mxu2 %v12323_v11  ;;  %1449 = vmatpush.bf16.msra.mxu3 %v12334_v48 }
  0xfb   :  { %1020 = vmatmul.bf16.gmra.mxu3 %v12158_v25 }
  0xfc   :  { %v776_v41 = vpop.f32.mrf.mxu2  ;;  %v680_v8 = vpop.f32.mrf.mxu0 }
  0xfd   :  { %v777_v22 = vadd.f32 %v776_v41, %v12232_v26  ;;  %v681_v24 = vadd.f32 %v680_v8, %v12222_v19  ;;  %v729_v25 = vpop.f32.mrf.mxu1 }
  0xfe   :  { %v825_v9 = vpop.f32.mrf.mxu3 }
  0xff   :  { %v12330_v17 = vadd.f32 %v825_v9, %v777_v22  ;;  %v12332_v59 = vadd.f32 %v729_v25, %v681_v24  ;;  %v8325_v22 = vld [vmem:[#allocation10 + $0x20] sm:$0xf]  ;;  %v10826_v24 = vld [vmem:[#allocation10 + $0x2c] sm:$0xf0]  ;;  %v10824_v25 = vld [vmem:[#allocation10 + $0x24] sm:$0xf] }
 0x100   :  { %v12347_v60 = vor.u32 %v10826_v24, %v8325_v22 }
 0x101   :  { %14566 = vst [vmem:[#allocation41_spill] sm:$0xff] %v12330_v17 }
 0x102   :  { %14567 = vst [vmem:[#allocation42_spill] sm:$0xff] %v12332_v59  ;;  %1408 = vmatpush.bf16.msra.mxu0 %v12347_v60 }
 0x104   :  { %v778_v57 = vpop.f32.mrf.mxu2  ;;  %v683_v8 = vpop.f32.mrf.mxu0 }
 0x105   :  { %v779_v41 = vadd.f32 %v778_v57, %v12232_v26  ;;  %v684_v5 = vadd.f32 %v683_v8, %v12222_v19  ;;  %v732_v4 = vpop.f32.mrf.mxu1  ;;  %v8333_v57 = vld [vmem:[#allocation10 + $0x28] sm:$0xf]  ;;  %v10827_v8 = vld [vmem:[#allocation10 + $0x34] sm:$0xf0] }
 0x106   :  { %v827_v6 = vpop.f32.mrf.mxu3 }
 0x107   :  { %v12339_v3 = vadd.f32 %v827_v6, %v779_v41  ;;  %v12341_v9 = vadd.f32 %v732_v4, %v684_v5  ;;  %878 = vmatmul.bf16.gmra.mxu0 %v12164_v44  ;;  %v12349_v41 = vor.u32 %v10824_v25, %v8327_v37  ;;  %v12351_v4 = vor.u32 %v10827_v8, %v8333_v57  ;;  %v10825_v25 = vld [vmem:[#allocation10 + $0x2c] sm:$0xf]  ;;  %v8335_v37 = vld [vmem:[#allocation10 + $0x38] sm:$0xf0] }
 0x108   :  { %927 = vmatmul.bf16.gmra.mxu1 %v12166_v45  ;;  %v12362_v57 = vor.u32 %v10825_v25, %v8335_v37  ;;  %v8311_v37 = vld [vmem:[#allocation10 + $0x10] sm:$0xf0] }
 0x109   :  { %14568 = vst [vmem:[#allocation43_spill] sm:$0xff] %v12339_v3  ;;  %976 = vmatmul.bf16.gmra.mxu2 %v12164_v44  ;;  %1422 = vmatpush.bf16.msra.mxu1 %v12349_v41 }
 0x10a   :  { %14569 = vst [vmem:[#allocation44_spill] sm:$0xff] %v12341_v9  ;;  %1436 = vmatpush.bf16.msra.mxu2 %v12351_v4  ;;  %1450 = vmatpush.bf16.msra.mxu3 %v12362_v57 }
 0x10b   :  { %1025 = vmatmul.bf16.gmra.mxu3 %v12166_v45 }
 0x10c   :  { %v781_v6 = vpop.f32.mrf.mxu2  ;;  %v685_v3 = vpop.f32.mrf.mxu0 }
 0x10d   :  { %v782_v5 = vadd.f32 %v781_v6, %v12232_v26  ;;  %v686_v44 = vadd.f32 %v685_v3, %v12222_v19  ;;  %v734_v45 = vpop.f32.mrf.mxu1 }
 0x10e   :  { %v830_v9 = vpop.f32.mrf.mxu3 }
 0x10f   :  { %v12358_v22 = vadd.f32 %v830_v9, %v782_v5  ;;  %v12360_v24 = vadd.f32 %v734_v45, %v686_v44  ;;  %v8309_v5 = vld [vmem:[#allocation10] sm:$0xf]  ;;  %v10822_v44 = vld [vmem:[#allocation10 + $0xc] sm:$0xf0]  ;;  %v10820_v45 = vld [vmem:[#allocation10 + $0x4] sm:$0xf] }
 0x110   :  { %v12375_v25 = vor.u32 %v10822_v44, %v8309_v5 }
 0x111   :  { %14570 = vst [vmem:[#allocation45_spill] sm:$0xff] %v12358_v22 }
 0x112   :  { %14571 = vst [vmem:[#allocation46_spill] sm:$0xff] %v12360_v24  ;;  %1409 = vmatpush.bf16.msra.mxu0 %v12375_v25 }
 0x113   :  { %14574 = vst [vmem:[#allocation49_spill] sm:$0xff] %v12375_v25 }
 0x114   :  { %v783_v8 = vpop.f32.mrf.mxu2  ;;  %v688_v3 = vpop.f32.mrf.mxu0 }
 0x115   :  { %v784_v6 = vadd.f32 %v783_v8, %v12232_v26  ;;  %v689_v17 = vadd.f32 %v688_v3, %v12222_v19  ;;  %v737_v16 = vpop.f32.mrf.mxu1  ;;  %v8317_v8 = vld [vmem:[#allocation10 + $0x8] sm:$0xf]  ;;  %v10823_v3 = vld [vmem:[#allocation10 + $0x14] sm:$0xf0] }
 0x116   :  { %v832_v59 = vpop.f32.mrf.mxu3 }
 0x117   :  { %v12367_v10 = vadd.f32 %v832_v59, %v784_v6  ;;  %v12369_v9 = vadd.f32 %v737_v16, %v689_v17  ;;  %883 = vmatmul.bf16.gmra.mxu0 %v12172_v1  ;;  %v12377_v6 = vor.u32 %v10820_v45, %v8311_v37  ;;  %v12379_v16 = vor.u32 %v10823_v3, %v8317_v8  ;;  %v10821_v45 = vld [vmem:[#allocation10 + $0xc] sm:$0xf]  ;;  %v8319_v37 = vld [vmem:[#allocation10 + $0x18] sm:$0xf0] }
 0x118   :  { %932 = vmatmul.bf16.gmra.mxu1 %v12174_v12  ;;  %v12390_v8 = vor.u32 %v10821_v45, %v8319_v37 }
 0x119   :  { %14572 = vst [vmem:[#allocation47_spill] sm:$0xff] %v12367_v10  ;;  %981 = vmatmul.bf16.gmra.mxu2 %v12172_v1  ;;  %1423 = vmatpush.bf16.msra.mxu1 %v12377_v6 }
 0x11a   :  { %14573 = vst [vmem:[#allocation48_spill] sm:$0xff] %v12369_v9  ;;  %1437 = vmatpush.bf16.msra.mxu2 %v12379_v16  ;;  %1451 = vmatpush.bf16.msra.mxu3 %v12390_v8 }
 0x11b   :  { %1030 = vmatmul.bf16.gmra.mxu3 %v12174_v12  ;;  %14575 = vst [vmem:[#allocation50_spill] sm:$0xff] %v12377_v6 }
 0x11c   :  { %v786_v59 = vpop.f32.mrf.mxu2  ;;  %14576 = vst [vmem:[#allocation51_spill] sm:$0xff] %v12379_v16  ;;  %v690_v10 = vpop.f32.mrf.mxu0 }
 0x11d   :  { %v787_v17 = vadd.f32 %v786_v59, %v12232_v26  ;;  %v691_v1 = vadd.f32 %v690_v10, %v12222_v19  ;;  %v739_v12 = vpop.f32.mrf.mxu1  ;;  %14579 = vst [vmem:[#allocation54_spill] sm:$0xff] %v12390_v8 }
 0x11e   :  { %v835_v9 = vpop.f32.mrf.mxu3 }
 0x11f   :  { %v12386_v5 = vadd.f32 %v835_v9, %v787_v17  ;;  %v12388_v44 = vadd.f32 %v739_v12, %v691_v1 }
 0x121   :  { %14577 = vst [vmem:[#allocation52_spill] sm:$0xff] %v12386_v5 }
 0x122   :  { %14578 = vst [vmem:[#allocation53_spill] sm:$0xff] %v12388_v44 }
 0x124   :  { %v788_v3 = vpop.f32.mrf.mxu2  ;;  %v693_v10 = vpop.f32.mrf.mxu0 }
 0x125   :  { %v789_v59 = vadd.f32 %v788_v3, %v12232_v26  ;;  %v694_v22 = vadd.f32 %v693_v10, %v12222_v19  ;;  %v742_v28 = vpop.f32.mrf.mxu1 }
 0x126   :  { %v837_v24 = vpop.f32.mrf.mxu3 }
 0x127   :  { %v12395_v27 = vadd.f32 %v837_v24, %v789_v59  ;;  %v12397_v9 = vadd.f32 %v742_v28, %v694_v22  ;;  %888 = vmatmul.bf16.gmra.mxu0 %v12180_v31 }
 0x128   :  { %937 = vmatmul.bf16.gmra.mxu1 %v12182_v32 }
 0x129   :  { %14580 = vst [vmem:[#allocation55_spill] sm:$0xff] %v12395_v27  ;;  %986 = vmatmul.bf16.gmra.mxu2 %v12180_v31 }
 0x12a   :  { %14581 = vst [vmem:[#allocation56_spill] sm:$0xff] %v12397_v9 }
 0x12b   :  { %1035 = vmatmul.bf16.gmra.mxu3 %v12182_v32 }
 0x12c   :  { %v791_v17 = vpop.f32.mrf.mxu2  ;;  %v695_v45 = vpop.f32.mrf.mxu0 }
 0x12d   :  { %v792_v1 = vadd.f32 %v791_v17, %v12232_v26  ;;  %v696_v37 = vadd.f32 %v695_v45, %v12222_v19  ;;  %v744_v3 = vpop.f32.mrf.mxu1 }
 0x12e   :  { %v840_v12 = vpop.f32.mrf.mxu3 }
 0x12f   :  { %v12405_v24 = vadd.f32 %v840_v12, %v792_v1  ;;  %v12407_v28 = vadd.f32 %v744_v3, %v696_v37 }
 0x131   :  { %14582 = vst [vmem:[#allocation57_spill] sm:$0xff] %v12405_v24 }
 0x132   :  { %14583 = vst [vmem:[#allocation58_spill] sm:$0xff] %v12407_v28 }
 0x134   :  { %v793_v22 = vpop.f32.mrf.mxu2  ;;  %v698_v9 = vpop.f32.mrf.mxu0 }
 0x135   :  { %v794_v59 = vadd.f32 %v793_v22, %v12232_v26  ;;  %v699_v31 = vadd.f32 %v698_v9, %v12222_v19  ;;  %v747_v32 = vpop.f32.mrf.mxu1 }
 0x136   :  { %v842_v10 = vpop.f32.mrf.mxu3 }
 0x137   :  { %v12411_v27 = vadd.f32 %v842_v10, %v794_v59  ;;  %v12413_v17 = vadd.f32 %v747_v32, %v699_v31  ;;  %893 = vmatmul.bf16.gmra.mxu0 %v12200_v53  ;;  %v12426_v10 = vperm.slane %v12217_v15, 2 }
 0x138   :  { %942 = vmatmul.bf16.gmra.mxu1 %v12202_v54 }
 0x139   :  { %14584 = vst [vmem:[#allocation59_spill] sm:$0xff] %v12411_v27  ;;  %991 = vmatmul.bf16.gmra.mxu2 %v12200_v53 }
 0x13a   :  { %14585 = vst [vmem:[#allocation60_spill] sm:$0xff] %v12413_v17 }
 0x13b   :  { %1040 = vmatmul.bf16.gmra.mxu3 %v12202_v54 }
 0x13c   :  { %v796_v1 = vpop.f32.mrf.mxu2  ;;  %v700_v37 = vpop.f32.mrf.mxu0 }
 0x13d   :  { %v797_v12 = vadd.f32 %v796_v1, %v12232_v26  ;;  %v701_v9 = vadd.f32 %v700_v37, %v12222_v19  ;;  %v749_v3 = vpop.f32.mrf.mxu1  ;;  %v14376_v19 = vmov 0  }
 0x13e   :  { %v845_v45 = vpop.f32.mrf.mxu3 }
 0x13f   :  { %v12421_v22 = vadd.f32 %v845_v45, %v797_v12  ;;  %v12423_v59 = vadd.f32 %v749_v3, %v701_v9  ;;  %v12438_v12 = vperm.slane %v12217_v15, 3 }
 0x141   :  { %14586 = vst [vmem:[#allocation61_spill] sm:$0xff] %v12421_v22 }
 0x142   :  { %14587 = vst [vmem:[#allocation62_spill] sm:$0xff] %v12423_v59 }
 0x144   :  { %v798_v31 = vpop.f32.mrf.mxu2  ;;  %v859_v54 = vpop.f32.mrf.mxu0 }
 0x145   :  { %v799_v53 = vadd.f32 %v798_v31, %v12232_v26  ;;  %v860_v17 = vadd.f32 %v859_v54, %v12426_v10  ;;  %v908_v1 = vpop.f32.mrf.mxu1 }
 0x146   :  { %v847_v32 = vpop.f32.mrf.mxu3 }
 0x147   :  { %v12430_v27 = vadd.f32 %v847_v32, %v799_v53  ;;  %v12432_v28 = vadd.f32 %v908_v1, %v860_v17  ;;  %1410 = vmatmul.bf16.vlgmr.msra.gmra.mxu0 %v14376_v19 }
 0x148   :  { %1424 = vmatmul.bf16.vlgmr.msra.gmra.mxu1 %v14376_v19 }
 0x149   :  { %14588 = vst [vmem:[#allocation63_spill] sm:$0xff] %v12430_v27  ;;  %1438 = vmatmul.bf16.vlgmr.msra.gmra.mxu2 %v14376_v19 }
 0x14b   :  { %1452 = vmatmul.bf16.vlgmr.msra.gmra.mxu3 %v14376_v19 }
 0x14c   :  { %v957_v26 = vpop.f32.mrf.mxu2  ;;  %v861_v9 = vpop.f32.mrf.mxu0 }
 0x14d   :  { %v958_v45 = vadd.f32 %v957_v26, %v12438_v12  ;;  %v862_v17 = vadd.f32 %v861_v9, %v12426_v10  ;;  %v910_v3 = vpop.f32.mrf.mxu1 }
 0x14e   :  { %v1006_v37 = vpop.f32.mrf.mxu3 }
 0x14f   :  { %v12443_v31 = vadd.f32 %v1006_v37, %v958_v45  ;;  %v12445_v53 = vadd.f32 %v910_v3, %v862_v17 }
 0x154   :  { %v959_v32 = vpop.f32.mrf.mxu2  ;;  %v864_v15 = vpop.f32.mrf.mxu0 }
 0x155   :  { %v960_v54 = vadd.f32 %v959_v32, %v12438_v12  ;;  %v865_v27 = vadd.f32 %v864_v15, %v12426_v10  ;;  %v913_v19 = vpop.f32.mrf.mxu1 }
 0x156   :  { %v1008_v1 = vpop.f32.mrf.mxu3 }
 0x157   :  { %v12449_v59 = vadd.f32 %v1008_v1, %v960_v54  ;;  %v12451_v26 = vadd.f32 %v913_v19, %v865_v27 }
 0x159   :  { %14589 = vst [vmem:[#allocation64_spill] sm:$0xff] %v12451_v26 }
 0x15c   :  { %v962_v22 = vpop.f32.mrf.mxu2  ;;  %v866_v45 = vpop.f32.mrf.mxu0 }
 0x15d   :  { %v963_v9 = vadd.f32 %v962_v22, %v12438_v12  ;;  %v867_v37 = vadd.f32 %v866_v45, %v12426_v10  ;;  %v915_v17 = vpop.f32.mrf.mxu1 }
 0x15e   :  { %v1011_v24 = vpop.f32.mrf.mxu3 }
 0x15f   :  { %v12455_v3 = vadd.f32 %v1011_v24, %v963_v9  ;;  %v12457_v32 = vadd.f32 %v915_v17, %v867_v37 }
 0x161   :  { %14590 = vst [vmem:[#allocation65_spill] sm:$0xff] %v12455_v3 }
 0x162   :  { %14591 = vst [vmem:[#allocation66_spill] sm:$0xff] %v12457_v32 }
 0x164   :  { %v964_v44 = vpop.f32.mrf.mxu2  ;;  %v869_v54 = vpop.f32.mrf.mxu0 }
 0x165   :  { %v965_v15 = vadd.f32 %v964_v44, %v12438_v12  ;;  %v870_v27 = vadd.f32 %v869_v54, %v12426_v10  ;;  %v918_v19 = vpop.f32.mrf.mxu1 }
 0x166   :  { %v1013_v5 = vpop.f32.mrf.mxu3 }
 0x167   :  { %v12461_v1 = vadd.f32 %v1013_v5, %v965_v15  ;;  %v12463_v22 = vadd.f32 %v918_v19, %v870_v27 }
 0x169   :  { %14592 = vst [vmem:[#allocation67_spill] sm:$0xff] %v12461_v1 }
 0x16a   :  { %14593 = vst [vmem:[#allocation68_spill] sm:$0xff] %v12463_v22 }
 0x16c   :  { %v967_v34 = vpop.f32.mrf.mxu2  ;;  %v871_v24 = vpop.f32.mrf.mxu0 }
 0x16d   :  { %v968_v45 = vadd.f32 %v967_v34, %v12438_v12  ;;  %v872_v9 = vadd.f32 %v871_v24, %v12426_v10  ;;  %v920_v37 = vpop.f32.mrf.mxu1 }
 0x16e   :  { %v1016_v0 = vpop.f32.mrf.mxu3 }
 0x16f   :  { %v12467_v17 = vadd.f32 %v1016_v0, %v968_v45  ;;  %v12469_v44 = vadd.f32 %v920_v37, %v872_v9 }
 0x171   :  { %14594 = vst [vmem:[#allocation69_spill] sm:$0xff] %v12467_v17 }
 0x172   :  { %14595 = vst [vmem:[#allocation70_spill] sm:$0xff] %v12469_v44 }
 0x174   :  { %v969_v32 = vpop.f32.mrf.mxu2  ;;  %v874_v5 = vpop.f32.mrf.mxu0 }
 0x175   :  { %v970_v54 = vadd.f32 %v969_v32, %v12438_v12  ;;  %v875_v15 = vadd.f32 %v874_v5, %v12426_v10  ;;  %v923_v27 = vpop.f32.mrf.mxu1 }
 0x176   :  { %v1018_v33 = vpop.f32.mrf.mxu3 }
 0x177   :  { %v12473_v19 = vadd.f32 %v1018_v33, %v970_v54  ;;  %v12475_v34 = vadd.f32 %v923_v27, %v875_v15 }
 0x179   :  { %14596 = vst [vmem:[#allocation71_spill] sm:$0xff] %v12473_v19 }
 0x17a   :  { %14597 = vst [vmem:[#allocation72_spill] sm:$0xff] %v12475_v34 }
 0x17c   :  { %v972_v22 = vpop.f32.mrf.mxu2  ;;  %v876_v0 = vpop.f32.mrf.mxu0 }
 0x17d   :  { %v973_v24 = vadd.f32 %v972_v22, %v12438_v12  ;;  %v877_v45 = vadd.f32 %v876_v0, %v12426_v10  ;;  %v925_v9 = vpop.f32.mrf.mxu1 }
 0x17e   :  { %v1021_v1 = vpop.f32.mrf.mxu3 }
 0x17f   :  { %v12479_v37 = vadd.f32 %v1021_v1, %v973_v24  ;;  %v12481_v32 = vadd.f32 %v925_v9, %v877_v45 }
 0x181   :  { %14598 = vst [vmem:[#allocation73_spill] sm:$0xff] %v12479_v37  ;;  %v10912_v37 = vld [vmem:[#allocation14 + $0xe4] sm:$0xf] }
 0x182   :  { %14599 = vst [vmem:[#allocation74_spill] sm:$0xff] %v12481_v32  ;;  %v10914_v32 = vld [vmem:[#allocation14 + $0xec] sm:$0xf0] }
 0x184   :  { %v974_v44 = vpop.f32.mrf.mxu2  ;;  %v879_v33 = vpop.f32.mrf.mxu0 }
 0x185   :  { %v975_v5 = vadd.f32 %v974_v44, %v12438_v12  ;;  %v880_v54 = vadd.f32 %v879_v33, %v12426_v10  ;;  %v928_v15 = vpop.f32.mrf.mxu1  ;;  %v8549_v44 = vld [vmem:[#allocation14 + $0xe0] sm:$0xf] }
 0x186   :  { %v1023_v17 = vpop.f32.mrf.mxu3  ;;  %v12495_v33 = vor.u32 %v10914_v32, %v8549_v44  ;;  %v10910_v32 = vld [vmem:[#allocation14 + $0xcc] sm:$0xf0]  ;;  %v8541_v44 = vld [vmem:[#allocation14 + $0xc8] sm:$0xf] }
 0x187   :  { %v12485_v27 = vadd.f32 %v1023_v17, %v975_v5  ;;  %v12487_v22 = vadd.f32 %v928_v15, %v880_v54  ;;  %v8551_v17 = vld [vmem:[#allocation14 + $0xf0] sm:$0xf0]  ;;  %v8557_v5 = vld [vmem:[#allocation14 + $0xe8] sm:$0xf]  ;;  %v10915_v54 = vld [vmem:[#allocation14 + $0xf4] sm:$0xf0] }
 0x188   :  { %14604 = vst [vmem:[#allocation79_spill] sm:$0xff] %v12495_v33  ;;  %v12497_v15 = vor.u32 %v10912_v37, %v8551_v17  ;;  %1663 = vmatpush.bf16.msrb.mxu0 %v12495_v33  ;;  %v10911_v17 = vld [vmem:[#allocation14 + $0xd4] sm:$0xf0] }
 0x189   :  { %14600 = vst [vmem:[#allocation75_spill] sm:$0xff] %v12485_v27  ;;  %v8559_v27 = vld [vmem:[#allocation14 + $0xf8] sm:$0xf0] }
 0x18a   :  { %14601 = vst [vmem:[#allocation76_spill] sm:$0xff] %v12487_v22  ;;  %v10913_v22 = vld [vmem:[#allocation14 + $0xec] sm:$0xf]  ;;  %1677 = vmatpush.bf16.msrb.mxu1 %v12497_v15 }
 0x18b   :  { %14605 = vst [vmem:[#allocation80_spill] sm:$0xff] %v12497_v15 }
 0x18c   :  { %v977_v34 = vpop.f32.mrf.mxu2  ;;  %v881_v1 = vpop.f32.mrf.mxu0 }
 0x18d   :  { %v978_v0 = vadd.f32 %v977_v34, %v12438_v12  ;;  %v882_v24 = vadd.f32 %v881_v1, %v12426_v10  ;;  %v930_v45 = vpop.f32.mrf.mxu1  ;;  %v12499_v34 = vor.u32 %v10915_v54, %v8557_v5  ;;  %v10908_v1 = vld [vmem:[#allocation14 + $0xc4] sm:$0xf] }
 0x18e   :  { %v1026_v19 = vpop.f32.mrf.mxu3 }
 0x18f   :  { %v12491_v9 = vadd.f32 %v1026_v19, %v978_v0  ;;  %v12493_v3 = vadd.f32 %v930_v45, %v882_v24  ;;  %14606 = vst [vmem:[#allocation81_spill] sm:$0xff] %v12499_v34  ;;  %v12502_v19 = vor.u32 %v10913_v22, %v8559_v27  ;;  %1691 = vmatpush.bf16.msrb.mxu2 %v12499_v34  ;;  %v8533_v0 = vld [vmem:[#allocation14 + $0xc0] sm:$0xf]  ;;  %v8535_v45 = vld [vmem:[#allocation14 + $0xd0] sm:$0xf0] }
 0x190   :  { %v12507_v37 = vor.u32 %v10910_v32, %v8533_v0  ;;  %v12510_v22 = vor.u32 %v10908_v1, %v8535_v45  ;;  %v10906_v1 = vld [vmem:[#allocation14 + $0xac] sm:$0xf0]  ;;  %v10904_v45 = vld [vmem:[#allocation14 + $0xa4] sm:$0xf]  ;;  %v8679_v34 = vld [vmem:[#allocation13 + $0xf0] sm:$0xf0] }
 0x191   :  { %14602 = vst [vmem:[#allocation77_spill] sm:$0xff] %v12491_v9  ;;  %1705 = vmatpush.bf16.msrb.mxu3 %v12502_v19  ;;  %v10909_v9 = vld [vmem:[#allocation14 + $0xcc] sm:$0xf] }
 0x192   :  { %14603 = vst [vmem:[#allocation78_spill] sm:$0xff] %v12493_v3  ;;  %v12512_v3 = vor.u32 %v10911_v17, %v8541_v44  ;;  %1664 = vmatpush.bf16.msrb.mxu0 %v12507_v37  ;;  %v12516_v0 = vor.u32 %v10909_v9, %v8543_v55  ;;  %1678 = vmatpush.bf16.msrb.mxu1 %v12510_v22 }
 0x193   :  { %14607 = vst [vmem:[#allocation82_spill] sm:$0xff] %v12502_v19 }
 0x194   :  { %v979_v24 = vpop.f32.mrf.mxu2  ;;  %14608 = vst [vmem:[#allocation83_spill] sm:$0xff] %v12507_v37  ;;  %v884_v27 = vpop.f32.mrf.mxu0  ;;  %1692 = vmatpush.bf16.msrb.mxu2 %v12512_v3  ;;  %v10907_v37 = vld [vmem:[#allocation14 + $0xb4] sm:$0xf0] }
 0x195   :  { %v980_v5 = vadd.f32 %v979_v24, %v12438_v12  ;;  %14609 = vst [vmem:[#allocation84_spill] sm:$0xff] %v12510_v22  ;;  %v885_v26 = vadd.f32 %v884_v27, %v12426_v10  ;;  %v933_v51 = vpop.f32.mrf.mxu1  ;;  %v8517_v24 = vld [vmem:[#allocation14 + $0xa0] sm:$0xf]  ;;  %1706 = vmatpush.bf16.msrb.mxu3 %v12516_v0  ;;  %v8519_v27 = vld [vmem:[#allocation14 + $0xb0] sm:$0xf0]  ;;  %v12529_v9 = vor.u32 %v10907_v37, %v8525_v21 }
 0x196   :  { %v1028_v54 = vpop.f32.mrf.mxu3  ;;  %14610 = vst [vmem:[#allocation85_spill] sm:$0xff] %v12512_v3  ;;  %v12525_v17 = vor.u32 %v10906_v1, %v8517_v24  ;;  %v12527_v55 = vor.u32 %v10904_v45, %v8519_v27  ;;  %v10900_v24 = vld [vmem:[#allocation14 + $0x84] sm:$0xf]  ;;  %v8503_v21 = vld [vmem:[#allocation14 + $0x90] sm:$0xf0] }
 0x197   :  { %14611 = vst [vmem:[#allocation86_spill] sm:$0xff] %v12516_v0  ;;  %v12518_v32 = vadd.f32 %v1028_v54, %v980_v5  ;;  %v12522_v44 = vadd.f32 %v933_v51, %v885_v26  ;;  %v10905_v5 = vld [vmem:[#allocation14 + $0xac] sm:$0xf]  ;;  %v8527_v54 = vld [vmem:[#allocation14 + $0xb8] sm:$0xf0] }
 0x198   :  { %14614 = vst [vmem:[#allocation89_spill] sm:$0xff] %v12525_v17  ;;  %1665 = vmatpush.bf16.msrb.mxu0 %v12525_v17  ;;  %1679 = vmatpush.bf16.msrb.mxu1 %v12527_v55  ;;  %v8501_v51 = vld [vmem:[#allocation14 + $0x80] sm:$0xf]  ;;  %v10902_v26 = vld [vmem:[#allocation14 + $0x8c] sm:$0xf0] }
 0x199   :  { %14612 = vst [vmem:[#allocation87_spill] sm:$0xff] %v12518_v32  ;;  %v12532_v32 = vor.u32 %v10905_v5, %v8527_v54  ;;  %1693 = vmatpush.bf16.msrb.mxu2 %v12529_v9  ;;  %v12537_v45 = vor.u32 %v10902_v26, %v8501_v51  ;;  %v8509_v37 = vld [vmem:[#allocation14 + $0x88] sm:$0xf]  ;;  %v10903_v27 = vld [vmem:[#allocation14 + $0x94] sm:$0xf0]  ;;  %v12540_v54 = vor.u32 %v10900_v24, %v8503_v21 }
 0x19a   :  { %14613 = vst [vmem:[#allocation88_spill] sm:$0xff] %v12522_v44  ;;  %v8511_v0 = vld [vmem:[#allocation14 + $0x98] sm:$0xf0]  ;;  %v10898_v24 = vld [vmem:[#allocation14 + $0x6c] sm:$0xf0] }
 0x19b   :  { %14615 = vst [vmem:[#allocation90_spill] sm:$0xff] %v12527_v55  ;;  %1707 = vmatpush.bf16.msrb.mxu3 %v12532_v32  ;;  %v12542_v55 = vor.u32 %v10903_v27, %v8509_v37  ;;  %v10896_v21 = vld [vmem:[#allocation14 + $0x64] sm:$0xf] }
 0x19c   :  { %14616 = vst [vmem:[#allocation91_spill] sm:$0xff] %v12529_v9  ;;  %v982_v1 = vpop.f32.mrf.mxu2  ;;  %v886_v5 = vpop.f32.mrf.mxu0  ;;  %v10901_v9 = vld [vmem:[#allocation14 + $0x8c] sm:$0xf]  ;;  %1666 = vmatpush.bf16.msrb.mxu0 %v12537_v45  ;;  %1680 = vmatpush.bf16.msrb.mxu1 %v12540_v54 }
 0x19d   :  { %14617 = vst [vmem:[#allocation92_spill] sm:$0xff] %v12532_v32  ;;  %v983_v44 = vadd.f32 %v982_v1, %v12438_v12  ;;  %v887_v3 = vadd.f32 %v886_v5, %v12426_v10  ;;  %v935_v22 = vpop.f32.mrf.mxu1  ;;  %v12546_v51 = vor.u32 %v10901_v9, %v8511_v0  ;;  %1694 = vmatpush.bf16.msrb.mxu2 %v12542_v55  ;;  %v8485_v1 = vld [vmem:[#allocation14 + $0x60] sm:$0xf]  ;;  %v8487_v5 = vld [vmem:[#allocation14 + $0x70] sm:$0xf0] }
 0x19e   :  { %14618 = vst [vmem:[#allocation93_spill] sm:$0xff] %v12537_v45  ;;  %v1031_v17 = vpop.f32.mrf.mxu3  ;;  %v12555_v27 = vor.u32 %v10898_v24, %v8485_v1  ;;  %v8493_v32 = vld [vmem:[#allocation14 + $0x68] sm:$0xf]  ;;  %v10899_v45 = vld [vmem:[#allocation14 + $0x74] sm:$0xf0]  ;;  %v12557_v0 = vor.u32 %v10896_v21, %v8487_v5 }
 0x19f   :  { %14619 = vst [vmem:[#allocation94_spill] sm:$0xff] %v12540_v54  ;;  %v12548_v26 = vadd.f32 %v1031_v17, %v983_v44  ;;  %v12552_v37 = vadd.f32 %v935_v22, %v887_v3  ;;  %1708 = vmatpush.bf16.msrb.mxu3 %v12546_v51  ;;  %v12559_v44 = vor.u32 %v10899_v45, %v8493_v32  ;;  %v10897_v17 = vld [vmem:[#allocation14 + $0x6c] sm:$0xf]  ;;  %v8495_v9 = vld [vmem:[#allocation14 + $0x78] sm:$0xf0] }
 0x1a0   :  { %14620 = vst [vmem:[#allocation95_spill] sm:$0xff] %v12542_v55  ;;  %1667 = vmatpush.bf16.msrb.mxu0 %v12555_v27  ;;  %1681 = vmatpush.bf16.msrb.mxu1 %v12557_v0  ;;  %v8469_v3 = vld [vmem:[#allocation14 + $0x40] sm:$0xf]  ;;  %v10894_v22 = vld [vmem:[#allocation14 + $0x4c] sm:$0xf0] }
 0x1a1   :  { %14621 = vst [vmem:[#allocation96_spill] sm:$0xff] %v12546_v51  ;;  %1695 = vmatpush.bf16.msrb.mxu2 %v12559_v44  ;;  %v10892_v1 = vld [vmem:[#allocation14 + $0x44] sm:$0xf]  ;;  %v12567_v21 = vor.u32 %v10894_v22, %v8469_v3  ;;  %v8471_v32 = vld [vmem:[#allocation14 + $0x50] sm:$0xf0] }
 0x1a2   :  { %14622 = vst [vmem:[#allocation97_spill] sm:$0xff] %v12548_v26  ;;  %v12562_v26 = vor.u32 %v10897_v17, %v8495_v9  ;;  %v8477_v45 = vld [vmem:[#allocation14 + $0x48] sm:$0xf]  ;;  %v10895_v5 = vld [vmem:[#allocation14 + $0x54] sm:$0xf0]  ;;  %v12570_v9 = vor.u32 %v10892_v1, %v8471_v32 }
 0x1a3   :  { %14623 = vst [vmem:[#allocation98_spill] sm:$0xff] %v12552_v37  ;;  %v8479_v51 = vld [vmem:[#allocation14 + $0x58] sm:$0xf0]  ;;  %v10890_v1 = vld [vmem:[#allocation14 + $0x2c] sm:$0xf0] }
 0x1a4   :  { %14624 = vst [vmem:[#allocation99_spill] sm:$0xff] %v12555_v27  ;;  %v984_v24 = vpop.f32.mrf.mxu2  ;;  %1709 = vmatpush.bf16.msrb.mxu3 %v12562_v26  ;;  %v889_v17 = vpop.f32.mrf.mxu0  ;;  %1668 = vmatpush.bf16.msrb.mxu0 %v12567_v21  ;;  %v10888_v32 = vld [vmem:[#allocation14 + $0x24] sm:$0xf] }
 0x1a5   :  { %14625 = vst [vmem:[#allocation100_spill] sm:$0xff] %v12557_v0  ;;  %v985_v37 = vadd.f32 %v984_v24, %v12438_v12  ;;  %v12572_v0 = vor.u32 %v10895_v5, %v8477_v45  ;;  %v890_v55 = vadd.f32 %v889_v17, %v12426_v10  ;;  %v938_v54 = vpop.f32.mrf.mxu1  ;;  %1682 = vmatpush.bf16.msrb.mxu1 %v12570_v9  ;;  %v8453_v24 = vld [vmem:[#allocation14 + $0x20] sm:$0xf]  ;;  %v8455_v17 = vld [vmem:[#allocation14 + $0x30] sm:$0xf0] }
 0x1a6   :  { %14626 = vst [vmem:[#allocation101_spill] sm:$0xff] %v12559_v44  ;;  %v1033_v27 = vpop.f32.mrf.mxu3  ;;  %v10893_v44 = vld [vmem:[#allocation14 + $0x4c] sm:$0xf]  ;;  %v12585_v5 = vor.u32 %v10890_v1, %v8453_v24  ;;  %v10884_v24 = vld [vmem:[#allocation14 + $0x4] sm:$0xf] }
 0x1a7   :  { %14627 = vst [vmem:[#allocation102_spill] sm:$0xff] %v12562_v26  ;;  %v12576_v3 = vor.u32 %v10893_v44, %v8479_v51  ;;  %v12578_v22 = vadd.f32 %v1033_v27, %v985_v37  ;;  %1696 = vmatpush.bf16.msrb.mxu2 %v12572_v0  ;;  %v12582_v45 = vadd.f32 %v938_v54, %v890_v55  ;;  %v8461_v26 = vld [vmem:[#allocation14 + $0x28] sm:$0xf]  ;;  %v10889_v27 = vld [vmem:[#allocation14 + $0x2c] sm:$0xf] }
 0x1a8   :  { %14628 = vst [vmem:[#allocation103_spill] sm:$0xff] %v12567_v21  ;;  %v10891_v21 = vld [vmem:[#allocation14 + $0x34] sm:$0xf0]  ;;  %v12587_v51 = vor.u32 %v10888_v32, %v8455_v17  ;;  %v8463_v44 = vld [vmem:[#allocation14 + $0x38] sm:$0xf0]  ;;  %1669 = vmatpush.bf16.msrb.mxu0 %v12585_v5 }
 0x1a9   :  { %14629 = vst [vmem:[#allocation104_spill] sm:$0xff] %v12570_v9  ;;  %1710 = vmatpush.bf16.msrb.mxu3 %v12576_v3  ;;  %v12589_v37 = vor.u32 %v10891_v21, %v8461_v26  ;;  %v8437_v55 = vld [vmem:[#allocation14] sm:$0xf]  ;;  %v10886_v54 = vld [vmem:[#allocation14 + $0xc] sm:$0xf0] }
 0x1aa   :  { %14630 = vst [vmem:[#allocation105_spill] sm:$0xff] %v12572_v0  ;;  %1683 = vmatpush.bf16.msrb.mxu1 %v12587_v51  ;;  %v12597_v32 = vor.u32 %v10886_v54, %v8437_v55  ;;  %v8439_v26 = vld [vmem:[#allocation14 + $0x10] sm:$0xf0]  ;;  %v8445_v21 = vld [vmem:[#allocation14 + $0x8] sm:$0xf] }
 0x1ab   :  { %14631 = vst [vmem:[#allocation106_spill] sm:$0xff] %v12576_v3  ;;  %1697 = vmatpush.bf16.msrb.mxu2 %v12589_v37  ;;  %v10887_v17 = vld [vmem:[#allocation14 + $0x14] sm:$0xf0]  ;;  %v8447_v3 = vld [vmem:[#allocation14 + $0x18] sm:$0xf0] }
 0x1ac   :  { %14632 = vst [vmem:[#allocation107_spill] sm:$0xff] %v12578_v22  ;;  %v12592_v22 = vor.u32 %v10889_v27, %v8463_v44  ;;  %v987_v1 = vpop.f32.mrf.mxu2  ;;  %v891_v27 = vpop.f32.mrf.mxu0  ;;  %v12600_v44 = vor.u32 %v10884_v24, %v8439_v26  ;;  %v8677_v0 = vld [vmem:[#allocation13 + $0xe0] sm:$0xf]  ;;  %1670 = vmatpush.bf16.msrb.mxu0 %v12597_v32  ;;  %v10882_v54 = vld [vmem:[#allocation13 + $0xec] sm:$0xf0] }
 0x1ad   :  { %14633 = vst [vmem:[#allocation108_spill] sm:$0xff] %v12582_v45  ;;  %v988_v45 = vadd.f32 %v987_v1, %v12438_v12  ;;  %v892_v9 = vadd.f32 %v891_v27, %v12426_v10  ;;  %v940_v19 = vpop.f32.mrf.mxu1  ;;  %v12612_v24 = vor.u32 %v10882_v54, %v8677_v0  ;;  %v10881_v27 = vld [vmem:[#allocation13 + $0xec] sm:$0xf]  ;;  %v8663_v54 = vld [vmem:[#allocation13 + $0xd0] sm:$0xf0] }
 0x1ae   :  { %14634 = vst [vmem:[#allocation109_spill] sm:$0xff] %v12585_v5  ;;  %1711 = vmatpush.bf16.msrb.mxu3 %v12592_v22  ;;  %v1036_v5 = vpop.f32.mrf.mxu3  ;;  %1684 = vmatpush.bf16.msrb.mxu1 %v12600_v44 }
 0x1af   :  { %14635 = vst [vmem:[#allocation110_spill] sm:$0xff] %v12587_v51  ;;  %v12602_v51 = vor.u32 %v10887_v17, %v8445_v21  ;;  %v12608_v1 = vadd.f32 %v1036_v5, %v988_v45  ;;  %v8685_v21 = vld [vmem:[#allocation13 + $0xe8] sm:$0xf]  ;;  %v10883_v17 = vld [vmem:[#allocation13 + $0xf4] sm:$0xf0]  ;;  %v12616_v15 = vadd.f32 %v940_v19, %v892_v9 }
 0x1b0   :  { %14636 = vst [vmem:[#allocation111_spill] sm:$0xff] %v12589_v37  ;;  %v10885_v37 = vld [vmem:[#allocation14 + $0xc] sm:$0xf]  ;;  %v8661_v45 = vld [vmem:[#allocation13 + $0xc0] sm:$0xf]  ;;  %1879 = vmatpush.bf16.msra.mxu0 %v12612_v24 }
 0x1b1   :  { %14637 = vst [vmem:[#allocation112_spill] sm:$0xff] %v12592_v22  ;;  %v12606_v55 = vor.u32 %v10885_v37, %v8447_v3  ;;  %v10880_v22 = vld [vmem:[#allocation13 + $0xe4] sm:$0xf]  ;;  %1698 = vmatpush.bf16.msrb.mxu2 %v12602_v51  ;;  %v12619_v3 = vor.u32 %v10883_v17, %v8685_v21  ;;  %v8687_v37 = vld [vmem:[#allocation13 + $0xf8] sm:$0xf0] }
 0x1b2   :  { %14638 = vst [vmem:[#allocation113_spill] sm:$0xff] %v12597_v32  ;;  %v12614_v26 = vor.u32 %v10880_v22, %v8679_v34  ;;  %v10878_v5 = vld [vmem:[#allocation13 + $0xcc] sm:$0xf0]  ;;  %v12623_v0 = vor.u32 %v10881_v27, %v8687_v37  ;;  %v10876_v22 = vld [vmem:[#allocation13 + $0xc4] sm:$0xf] }
 0x1b3   :  { %14639 = vst [vmem:[#allocation114_spill] sm:$0xff] %v12600_v44  ;;  %1712 = vmatpush.bf16.msrb.mxu3 %v12606_v55  ;;  %v12625_v34 = vor.u32 %v10878_v5, %v8661_v45  ;;  %v12628_v19 = vor.u32 %v10876_v22, %v8663_v54  ;;  %v10879_v9 = vld [vmem:[#allocation13 + $0xd4] sm:$0xf0]  ;;  %v10877_v21 = vld [vmem:[#allocation13 + $0xcc] sm:$0xf] }
 0x1b4   :  { %14640 = vst [vmem:[#allocation115_spill] sm:$0xff] %v12602_v51  ;;  %1893 = vmatpush.bf16.msra.mxu1 %v12614_v26  ;;  %v8671_v17 = vld [vmem:[#allocation13 + $0xd8] sm:$0xf0]  ;;  %v989_v37 = vpop.f32.mrf.mxu2  ;;  %v894_v22 = vpop.f32.mrf.mxu0  ;;  %v8645_v54 = vld [vmem:[#allocation13 + $0xa0] sm:$0xf] }
 0x1b5   :  { %14641 = vst [vmem:[#allocation116_spill] sm:$0xff] %v12606_v55  ;;  %1907 = vmatpush.bf16.msra.mxu2 %v12619_v3  ;;  %v12634_v27 = vor.u32 %v10877_v21, %v8671_v17  ;;  %v990_v45 = vadd.f32 %v989_v37, %v12438_v12  ;;  %1880 = vmatpush.bf16.msra.mxu0 %v12625_v34  ;;  %v943_v17 = vpop.f32.mrf.mxu1  ;;  %v10875_v51 = vld [vmem:[#allocation13 + $0xb4] sm:$0xf0] }
 0x1b6   :  { %14642 = vst [vmem:[#allocation117_spill] sm:$0xff] %v12608_v1  ;;  %v8669_v1 = vld [vmem:[#allocation13 + $0xc8] sm:$0xf]  ;;  %v1038_v5 = vpop.f32.mrf.mxu3  ;;  %v895_v21 = vadd.f32 %v894_v22, %v12426_v10 }
 0x1b7   :  { %14643 = vst [vmem:[#allocation118_spill] sm:$0xff] %v12612_v24  ;;  %1921 = vmatpush.bf16.msra.mxu3 %v12623_v0  ;;  %v12632_v55 = vor.u32 %v10879_v9, %v8669_v1  ;;  %v10874_v1 = vld [vmem:[#allocation13 + $0xac] sm:$0xf0]  ;;  %v10872_v9 = vld [vmem:[#allocation13 + $0xa4] sm:$0xf]  ;;  %v12646_v37 = vadd.f32 %v1038_v5, %v990_v45 }
 0x1b8   :  { %14644 = vst [vmem:[#allocation119_spill] sm:$0xff] %v12614_v26  ;;  %1894 = vmatpush.bf16.msra.mxu1 %v12628_v19  ;;  %v10873_v26 = vld [vmem:[#allocation13 + $0xac] sm:$0xf]  ;;  %v8655_v24 = vld [vmem:[#allocation13 + $0xb8] sm:$0xf0]  ;;  %v12653_v44 = vadd.f32 %v943_v17, %v895_v21 }
 0x1b9   :  { %14645 = vst [vmem:[#allocation120_spill] sm:$0xff] %v12616_v15  ;;  %v14650_v15 = vmov 0   ;;  %1908 = vmatpush.bf16.msra.mxu2 %v12632_v55  ;;  %v12655_v22 = vor.u32 %v10873_v26, %v8655_v24  ;;  %v10868_v45 = vld [vmem:[#allocation13 + $0x84] sm:$0xf]  ;;  %v10869_v26 = vld [vmem:[#allocation13 + $0x8c] sm:$0xf] }
 0x1ba   :  { %14646 = vst [vmem:[#allocation121_spill] sm:$0xff] %v12619_v3  ;;  %1671 = vmatmul.bf16.vlgmr.msrb.gmra.mxu0 %v14650_v15  ;;  %1685 = vmatmul.bf16.vlgmr.msrb.gmra.mxu1 %v14650_v15  ;;  %v8647_v3 = vld [vmem:[#allocation13 + $0xb0] sm:$0xf0]  ;;  %v8639_v17 = vld [vmem:[#allocation13 + $0x98] sm:$0xf0] }
 0x1bb   :  { %14647 = vst [vmem:[#allocation122_spill] sm:$0xff] %v12623_v0  ;;  %1699 = vmatmul.bf16.vlgmr.msrb.gmra.mxu2 %v14650_v15  ;;  %1713 = vmatmul.bf16.vlgmr.msrb.gmra.mxu3 %v14650_v15  ;;  %v12644_v0 = vor.u32 %v10874_v1, %v8645_v54  ;;  %v8653_v15 = vld [vmem:[#allocation13 + $0xa8] sm:$0xf]  ;;  %v8629_v54 = vld [vmem:[#allocation13 + $0x80] sm:$0xf] }
 0x1bc   :  { %14648 = vst [vmem:[#allocation123_spill] sm:$0xff] %v12625_v34  ;;  %1922 = vmatpush.bf16.msra.mxu3 %v12634_v27  ;;  %v12649_v34 = vor.u32 %v10872_v9, %v8647_v3  ;;  %v10870_v1 = vld [vmem:[#allocation13 + $0x8c] sm:$0xf0]  ;;  %v8631_v3 = vld [vmem:[#allocation13 + $0x90] sm:$0xf0] }
 0x1bd   :  { %14649 = vst [vmem:[#allocation124_spill] sm:$0xff] %v12628_v19  ;;  %v12651_v19 = vor.u32 %v10875_v51, %v8653_v15  ;;  %1881 = vmatpush.bf16.msra.mxu0 %v12644_v0  ;;  %v12660_v5 = vor.u32 %v10870_v1, %v8629_v54  ;;  %v8637_v51 = vld [vmem:[#allocation13 + $0x88] sm:$0xf]  ;;  %v10871_v9 = vld [vmem:[#allocation13 + $0x94] sm:$0xf0]  ;;  %v12663_v21 = vor.u32 %v10868_v45, %v8631_v3  ;;  %v992_v15 = vpop.f32.mrf.mxu2  ;;  %v945_v3 = vpop.f32.mrf.mxu1 }
 0x1be   :  { %14651 = vst [vmem:[#allocation125_spill] sm:$0xff] %v12632_v55  ;;  %1895 = vmatpush.bf16.msra.mxu1 %v12649_v34  ;;  %v12665_v24 = vor.u32 %v10871_v9, %v8637_v51  ;;  %v8613_v54 = vld [vmem:[#allocation13 + $0x60] sm:$0xf]  ;;  %v10866_v1 = vld [vmem:[#allocation13 + $0x6c] sm:$0xf0] }
 0x1bf   :  { %14652 = vst [vmem:[#allocation126_spill] sm:$0xff] %v12634_v27  ;;  %1909 = vmatpush.bf16.msra.mxu2 %v12651_v19  ;;  %v12674_v51 = vor.u32 %v10866_v1, %v8613_v54  ;;  %v8615_v9 = vld [vmem:[#allocation13 + $0x70] sm:$0xf0]  ;;  %v8623_v27 = vld [vmem:[#allocation13 + $0x78] sm:$0xf0] }
 0x1c0   :  { %14653 = vst [vmem:[#allocation127_spill] sm:$0xff] %v12644_v0  ;;  %1923 = vmatpush.bf16.msra.mxu3 %v12655_v22  ;;  %v10865_v0 = vld [vmem:[#allocation13 + $0x6c] sm:$0xf]  ;;  %v10862_v54 = vld [vmem:[#allocation13 + $0x4c] sm:$0xf0] }
 0x1c1   :  { %14654 = vst [vmem:[#allocation128_spill] sm:$0xff] %v12646_v37  ;;  %v993_v37 = vadd.f32 %v992_v15, %v12438_v12  ;;  %1882 = vmatpush.bf16.msra.mxu0 %v12660_v5  ;;  %v8605_v1 = vld [vmem:[#allocation13 + $0x48] sm:$0xf] }
 0x1c2   :  { %14655 = vst [vmem:[#allocation129_spill] sm:$0xff] %v12649_v34  ;;  %v1041_v34 = vpop.f32.mrf.mxu3  ;;  %1896 = vmatpush.bf16.msra.mxu1 %v12663_v21 }
 0x1c3   :  { %14656 = vst [vmem:[#allocation130_spill] sm:$0xff] %v12651_v19  ;;  %v896_v19 = vpop.f32.mrf.mxu0  ;;  %1910 = vmatpush.bf16.msra.mxu2 %v12665_v24  ;;  %v12676_v15 = vadd.f32 %v1041_v34, %v993_v37  ;;  %v10860_v34 = vld [vmem:[#allocation13 + $0x44] sm:$0xf] }
 0x1c4   :  { %14657 = vst [vmem:[#allocation131_spill] sm:$0xff] %v12653_v44  ;;  %v12667_v44 = vor.u32 %v10869_v26, %v8639_v17  ;;  %v897_v45 = vadd.f32 %v896_v19, %v12426_v10  ;;  %v8621_v26 = vld [vmem:[#allocation13 + $0x68] sm:$0xf]  ;;  %v10867_v17 = vld [vmem:[#allocation13 + $0x74] sm:$0xf0]  ;;  %v12685_v10 = vor.u32 %v10865_v0, %v8623_v27 }
 0x1c5   :  { %14658 = vst [vmem:[#allocation132_spill] sm:$0xff] %v12655_v22  ;;  %v10864_v22 = vld [vmem:[#allocation13 + $0x64] sm:$0xf]  ;;  %1883 = vmatpush.bf16.msra.mxu0 %v12674_v51  ;;  %v8597_v19 = vld [vmem:[#allocation13 + $0x40] sm:$0xf] }
 0x1c6   :  { %14659 = vst [vmem:[#allocation133_spill] sm:$0xff] %v12660_v5  ;;  %1924 = vmatpush.bf16.msra.mxu3 %v12667_v44  ;;  %v12679_v5 = vor.u32 %v10864_v22, %v8615_v9  ;;  %v12683_v55 = vadd.f32 %v945_v3, %v897_v45  ;;  %v12690_v37 = vor.u32 %v10862_v54, %v8597_v19  ;;  %v8599_v22 = vld [vmem:[#allocation13 + $0x50] sm:$0xf0]  ;;  %v10863_v9 = vld [vmem:[#allocation13 + $0x54] sm:$0xf0] }
 0x1c7   :  { %14660 = vst [vmem:[#allocation134_spill] sm:$0xff] %v12663_v21  ;;  %v12681_v21 = vor.u32 %v10867_v17, %v8621_v26  ;;  %v12693_v45 = vor.u32 %v10860_v34, %v8599_v22  ;;  %v12695_v0 = vor.u32 %v10863_v9, %v8605_v1  ;;  %v10861_v27 = vld [vmem:[#allocation13 + $0x4c] sm:$0xf]  ;;  %v8607_v3 = vld [vmem:[#allocation13 + $0x58] sm:$0xf0]  ;;  %v994_v26 = vpop.f32.mrf.mxu2  ;;  %v1425_v22 = vpop.f32.mrf.mxu1 }
 0x1c8   :  { %14661 = vst [vmem:[#allocation135_spill] sm:$0xff] %v12665_v24  ;;  %1897 = vmatpush.bf16.msra.mxu1 %v12679_v5  ;;  %v12697_v17 = vor.u32 %v10861_v27, %v8607_v3  ;;  %v8581_v19 = vld [vmem:[#allocation13 + $0x20] sm:$0xf]  ;;  %v10858_v54 = vld [vmem:[#allocation13 + $0x2c] sm:$0xf0] }
 0x1c9   :  { %14662 = vst [vmem:[#allocation136_spill] sm:$0xff] %v12667_v44  ;;  %1911 = vmatpush.bf16.msra.mxu2 %v12681_v21  ;;  %1884 = vmatpush.bf16.msra.mxu0 %v12690_v37  ;;  %v12704_v1 = vor.u32 %v10858_v54, %v8581_v19  ;;  %v8583_v9 = vld [vmem:[#allocation13 + $0x30] sm:$0xf0]  ;;  %v8589_v27 = vld [vmem:[#allocation13 + $0x28] sm:$0xf] }
 0x1ca   :  { %14663 = vst [vmem:[#allocation137_spill] sm:$0xff] %v12674_v51  ;;  %1925 = vmatpush.bf16.msra.mxu3 %v12685_v10  ;;  %v10859_v3 = vld [vmem:[#allocation13 + $0x34] sm:$0xf0]  ;;  %v8567_v54 = vld [vmem:[#allocation13 + $0x10] sm:$0xf0] }
 0x1cb   :  { %14664 = vst [vmem:[#allocation138_spill] sm:$0xff] %v12676_v15  ;;  %v1043_v15 = vpop.f32.mrf.mxu3 }
 0x1cc   :  { %14665 = vst [vmem:[#allocation139_spill] sm:$0xff] %v12679_v5  ;;  %1898 = vmatpush.bf16.msra.mxu1 %v12693_v45  ;;  %v10857_v5 = vld [vmem:[#allocation13 + $0x2c] sm:$0xf] }
 0x1cd   :  { %14666 = vst [vmem:[#allocation140_spill] sm:$0xff] %v12681_v21  ;;  %v1411_v21 = vpop.f32.mrf.mxu0  ;;  %1912 = vmatpush.bf16.msra.mxu2 %v12695_v0  ;;  %1885 = vmatpush.bf16.msra.mxu0 %v12704_v1 }
 0x1ce   :  { %14667 = vst [vmem:[#allocation141_spill] sm:$0xff] %v12683_v55  ;;  %v995_v55 = vadd.f32 %v994_v26, %v12438_v12  ;;  %v1458_v34 = vadd.f32 %v1411_v21, %v12226_v23  ;;  %v1459_v26 = vadd.f32 %v1425_v22, %v12246_v49  ;;  %1926 = vmatpush.bf16.msra.mxu3 %v12697_v17  ;;  %v8591_v23 = vld [vmem:[#allocation13 + $0x38] sm:$0xf0]  ;;  %v8573_v22 = vld [vmem:[#allocation13 + $0x8] sm:$0xf] }
 0x1cf   :  { %14668 = vst [vmem:[#allocation142_spill] sm:$0xff] %v12685_v10  ;;  %v10856_v10 = vld [vmem:[#allocation13 + $0x24] sm:$0xf]  ;;  %v12714_v51 = vor.u32 %v10857_v5, %v8591_v23 }
 0x1d0   :  { %14669 = vst [vmem:[#allocation143_spill] sm:$0xff] %v12690_v37  ;;  %v12706_v12 = vadd.f32 %v1043_v15, %v995_v55  ;;  %v12712_v37 = vor.u32 %v10859_v3, %v8589_v27  ;;  %v1466_v21 = vmul.f32 0.5, %v1458_v34  ;;  %v1474_v19 = vmul.f32 0.5, %v1459_v26  ;;  %v8565_v55 = vld [vmem:[#allocation13] sm:$0xf]  ;;  %v1439_v3 = vpop.f32.mrf.mxu2 }
 0x1d1   :  { %14670 = vst [vmem:[#allocation144_spill] sm:$0xff] %v12693_v45  ;;  %v12710_v45 = vor.u32 %v10856_v10, %v8583_v9  ;;  %v10854_v15 = vld [vmem:[#allocation13 + $0xc] sm:$0xf0]  ;;  %v10852_v10 = vld [vmem:[#allocation13 + $0x4] sm:$0xf] }
 0x1d2   :  { %14671 = vst [vmem:[#allocation145_spill] sm:$0xff] %v12695_v0  ;;  %11445 = vtanh.f32 %v1466_v21  ;;  %1913 = vmatpush.bf16.msra.mxu2 %v12712_v37  ;;  %v12719_v49 = vor.u32 %v10854_v15, %v8565_v55  ;;  %1927 = vmatpush.bf16.msra.mxu3 %v12714_v51  ;;  %v12722_v5 = vor.u32 %v10852_v10, %v8567_v54  ;;  %v10855_v34 = vld [vmem:[#allocation13 + $0x14] sm:$0xf0]  ;;  %v10853_v9 = vld [vmem:[#allocation13 + $0xc] sm:$0xf]  ;;  %v1427_v54 = vpop.f32.mrf.mxu1 }
 0x1d3   :  { %14672 = vst [vmem:[#allocation146_spill] sm:$0xff] %v12697_v17  ;;  %1899 = vmatpush.bf16.msra.mxu1 %v12710_v45  ;;  %11447 = vtanh.f32 %v1474_v19  ;;  %v8575_v27 = vld [vmem:[#allocation13 + $0x18] sm:$0xf0]  ;;  %v12724_v26 = vor.u32 %v10855_v34, %v8573_v22  ;;  %v1460_v21 = vadd.f32 %v1439_v3, %v12432_v28  ;;  %v1453_v55 = vpop.f32.mrf.mxu3  ;;  %v1463_v22 = vadd.f32 %v1427_v54, %v12255_v20 }
 0x1d4   :  { %14673 = vst [vmem:[#allocation147_spill] sm:$0xff] %v12704_v1  ;;  %v12726_v23 = vor.u32 %v10853_v9, %v8575_v27  ;;  %1886 = vmatpush.bf16.msra.mxu0 %v12719_v49  ;;  %v1461_v19 = vadd.f32 %v1453_v55, %v12443_v31 }
 0x1d5   :  { %14674 = vst [vmem:[#allocation148_spill] sm:$0xff] %v12706_v12  ;;  %v1413_v15 = vpop.f32.mrf.mxu0  ;;  %11449 = vtanh.f32 %v1460_v21  ;;  %v1475_v12 = vmul.f32 0.5, %v1463_v22 }
 0x1d6   :  { %14675 = vst [vmem:[#allocation149_spill] sm:$0xff] %v12710_v45  ;;  %v1462_v10 = vadd.f32 %v1413_v15, %v12248_v50  ;;  %1914 = vmatpush.bf16.msra.mxu2 %v12724_v26  ;;  %1928 = vmatpush.bf16.msra.mxu3 %v12726_v23  ;;  %v1484_v28 = vmul.f32 0.5, %v1461_v19 }
 0x1d7   :  { %14676 = vst [vmem:[#allocation150_spill] sm:$0xff] %v12712_v37  ;;  %1900 = vmatpush.bf16.msra.mxu1 %v12722_v5 }
 0x1d8   :  { %14677 = vst [vmem:[#allocation151_spill] sm:$0xff] %v12714_v51  ;;  %v11446_v34 = vpop.eup %11445  ;;  %v1467_v9 = vmul.f32 0.5, %v1462_v10  ;;  %11451 = vtanh.f32 %v1484_v28  ;;  %v1441_v50 = vpop.f32.mrf.mxu2 }
 0x1d9   :  { %14678 = vst [vmem:[#allocation152_spill] sm:$0xff] %v12719_v49  ;;  %v11448_v27 = vpop.eup %11447  ;;  %v1470_v3 = vmul.f32 0.5, %v11446_v34  ;;  %v1464_v21 = vadd.f32 %v1441_v50, %v12445_v53 }
 0x1da   :  { %14679 = vst [vmem:[#allocation153_spill] sm:$0xff] %v12722_v5  ;;  %v1478_v49 = vmul.f32 0.5, %v11448_v27  ;;  %11453 = vtanh.f32 %v1467_v9 }
 0x1db   :  { %14680 = vst [vmem:[#allocation154_spill] sm:$0xff] %v12724_v26  ;;  %v1472_v5 = vadd.f32 0.5, %v1470_v3  ;;  %11455 = vtanh.f32 %v1475_v12  ;;  %v11450_v55 = vpop.eup %11449  ;;  %v1455_v15 = vpop.f32.mrf.mxu3 }
 0x1dc   :  { %14681 = vst [vmem:[#allocation155_spill] sm:$0xff] %v12726_v23  ;;  %v1480_v31 = vadd.f32 0.5, %v1478_v49  ;;  %v1465_v23 = vadd.f32 %v1455_v15, %v12449_v59  ;;  %11457 = vtanh.f32 %v1464_v21 }
 0x1dd   :  { %v1494_v54 = vmul.f32 %v11450_v55, %v1472_v5 }
 0x1de   :  { %v1492_v20 = vmul.f32 0.0, %v1480_v31  ;;  %v11452_v19 = vpop.eup %11451  ;;  %v1485_v22 = vmul.f32 0.5, %v1465_v23 }
 0x1df   :  { %v1488_v12 = vmul.f32 0.5, %v11452_v19 }
 0x1e0   :  { %v12738_v10 = vadd.f32 %v1494_v54, %v1492_v20  ;;  %v11454_v34 = vpop.eup %11453 }
 0x1e1   :  { %v11456_v28 = vpop.eup %11455  ;;  %v1471_v49 = vmul.f32 0.5, %v11454_v34  ;;  %v1490_v5 = vadd.f32 0.5, %v1488_v12 }
 0x1e2   :  { %14682 = vst [vmem:[#allocation156_spill] sm:$0xff] %v12738_v10  ;;  %11459 = vtanh.f32 %v12738_v10  ;;  %v1479_v9 = vmul.f32 0.5, %v11456_v28  ;;  %v11458_v53 = vpop.eup %11457 }
 0x1e3   :  { %11461 = vtanh.f32 %v1485_v22  ;;  %v1473_v27 = vadd.f32 0.5, %v1471_v49 }
 0x1e4   :  { %v1481_v3 = vadd.f32 0.5, %v1479_v9 }
 0x1e5   :  { %v1495_v31 = vmul.f32 %v11458_v53, %v1473_v27  ;;  %v1206_v53 = vld [vmem:[#allocation16] sm:$0xf] }
 0x1e6   :  { %v1493_v50 = vmul.f32 0.0, %v1481_v3  ;;  %v12759_v10 = vperm.slane %v1206_v53, 2  ;;  %v12761_v26 = vperm.slane %v1206_v53, 3 }
 0x1e8   :  { %v11460_v59 = vpop.eup %11459  ;;  %v12741_v15 = vadd.f32 %v1495_v31, %v1493_v50  ;;  %v12755_v50 = vperm.slane %v1206_v53, 1  ;;  %14687 = vst [vmem:[#allocation161_spill] sm:$0xff] %v12759_v10 }
 0x1e9   :  { %v11462_v55 = vpop.eup %11461  ;;  %v1500_v21 = vmul.f32 %v11460_v59, %v1490_v5  ;;  %v12753_v5 = vperm.slane %v1206_v53, 0  ;;  %14688 = vst [vmem:[#allocation162_spill] sm:$0xff] %v12761_v26 }
 0x1ea   :  { %14683 = vst [vmem:[#allocation157_spill] sm:$0xff] %v12741_v15  ;;  %11463 = vtanh.f32 %v12741_v15  ;;  %v1489_v23 = vmul.f32 0.5, %v11462_v55 }
 0x1eb   :  { %14685 = vst [vmem:[#allocation159_spill] sm:$0xff] %v12753_v5 }
 0x1ec   :  { %v1491_v20 = vadd.f32 0.5, %v1489_v23  ;;  %14686 = vst [vmem:[#allocation160_spill] sm:$0xff] %v12755_v50 }
 0x1f0   :  { %v11464_v54 = vpop.eup %11463 }
 0x1f1   :  { %v1501_v34 = vmul.f32 %v11464_v54, %v1491_v20 }
 0x1f3   :  { %v12744_v19 = vpack.c.bf16 %v1501_v34, %v1500_v21 }
 0x1f5   :  { %14684 = vst [vmem:[#allocation158_spill] sm:$0xff] %v12744_v19  ;;  %1887 = vmatmul.bf16.vlgmr.msra.gmra.mxu0 %v12744_v19  ;;  %1901 = vmatmul.bf16.vlgmr.msra.gmra.mxu1 %v12744_v19 }
 0x1f6   :  { %1915 = vmatmul.bf16.vlgmr.msra.gmra.mxu2 %v12744_v19  ;;  %1929 = vmatmul.bf16.vlgmr.msra.gmra.mxu3 %v12744_v19 }
 0x237   :  { %v1672_v22 = vpop.f32.mrf.mxu0  ;;  %v1686_v28 = vpop.f32.mrf.mxu1 }
 0x23e   :  { %v1700_v49 = vpop.f32.mrf.mxu2  ;;  %v1714_v12 = vpop.f32.mrf.mxu3 }
 0x23f   :  { %v1674_v9 = vpop.f32.mrf.mxu0  ;;  %v1688_v27 = vpop.f32.mrf.mxu1 }
 0x246   :  { %v1702_v3 = vpop.f32.mrf.mxu2  ;;  %v1716_v31 = vpop.f32.mrf.mxu3 }
 0x272   :  { %v1888_v59 = vpop.f32.mrf.mxu0  ;;  %v1902_v55 = vpop.f32.mrf.mxu1 }
 0x273   :  { %v1889_v21 = vadd.f32 %v1888_v59, %v1672_v22  ;;  %v1903_v23 = vadd.f32 %v1902_v55, %v1686_v28 }
 0x275   :  { %v1935_v20 = vadd.f32 %v1889_v21, %v12753_v5  ;;  %v1936_v54 = vadd.f32 %v1903_v23, %v12755_v50 }
 0x277   :  { %v1943_v34 = vmul.f32 0.5, %v1935_v20  ;;  %v1951_v15 = vmul.f32 0.5, %v1936_v54 }
 0x279   :  { %11465 = vtanh.f32 %v1943_v34  ;;  %v1916_v51 = vpop.f32.mrf.mxu2  ;;  %v1930_v37 = vpop.f32.mrf.mxu3 }
 0x27a   :  { %11467 = vtanh.f32 %v1951_v15  ;;  %v1917_v45 = vadd.f32 %v1916_v51, %v1700_v49  ;;  %v1931_v1 = vadd.f32 %v1930_v37, %v1714_v12  ;;  %v1890_v17 = vpop.f32.mrf.mxu0  ;;  %v1904_v0 = vpop.f32.mrf.mxu1 }
 0x27b   :  { %v1891_v22 = vadd.f32 %v1890_v17, %v1674_v9  ;;  %v1905_v28 = vadd.f32 %v1904_v0, %v1688_v27 }
 0x27c   :  { %v1937_v59 = vadd.f32 %v1917_v45, %v12759_v10  ;;  %v1938_v55 = vadd.f32 %v1931_v1, %v12761_v26 }
 0x27d   :  { %v1939_v21 = vadd.f32 %v1891_v22, %v12753_v5  ;;  %v1940_v23 = vadd.f32 %v1905_v28, %v12755_v50 }
 0x27e   :  { %11469 = vtanh.f32 %v1937_v59  ;;  %v1961_v53 = vmul.f32 0.5, %v1938_v55 }
 0x27f   :  { %v11466_v20 = vpop.eup %11465  ;;  %v1944_v54 = vmul.f32 0.5, %v1939_v21  ;;  %v1952_v34 = vmul.f32 0.5, %v1940_v23 }
 0x280   :  { %v11468_v15 = vpop.eup %11467  ;;  %v1947_v51 = vmul.f32 0.5, %v11466_v20  ;;  %11471 = vtanh.f32 %v1961_v53 }
 0x281   :  { %v1955_v37 = vmul.f32 0.5, %v11468_v15  ;;  %11473 = vtanh.f32 %v1944_v54  ;;  %v1918_v17 = vpop.f32.mrf.mxu2  ;;  %v1932_v0 = vpop.f32.mrf.mxu3 }
 0x282   :  { %v1949_v49 = vadd.f32 0.5, %v1947_v51  ;;  %11475 = vtanh.f32 %v1952_v34  ;;  %v1919_v45 = vadd.f32 %v1918_v17, %v1702_v3  ;;  %v1933_v1 = vadd.f32 %v1932_v0, %v1716_v31 }
 0x283   :  { %v1957_v12 = vadd.f32 0.5, %v1955_v37 }
 0x284   :  { %v11470_v9 = vpop.eup %11469  ;;  %v1941_v27 = vadd.f32 %v1919_v45, %v12759_v10  ;;  %v1942_v22 = vadd.f32 %v1933_v1, %v12761_v26 }
 0x285   :  { %v1969_v28 = vmul.f32 0.0, %v1957_v12  ;;  %v1971_v59 = vmul.f32 %v11470_v9, %v1949_v49 }
 0x286   :  { %v11472_v55 = vpop.eup %11471  ;;  %11477 = vtanh.f32 %v1941_v27  ;;  %v1962_v21 = vmul.f32 0.5, %v1942_v22 }
 0x287   :  { %v11474_v23 = vpop.eup %11473  ;;  %v12769_v53 = vadd.f32 %v1971_v59, %v1969_v28  ;;  %v1965_v31 = vmul.f32 0.5, %v11472_v55 }
 0x288   :  { %v11476_v20 = vpop.eup %11475  ;;  %v1948_v54 = vmul.f32 0.5, %v11474_v23  ;;  %11479 = vtanh.f32 %v1962_v21 }
 0x289   :  { %14689 = vst [vmem:[#allocation163_spill] sm:$0xff] %v12769_v53  ;;  %11481 = vtanh.f32 %v12769_v53  ;;  %v1956_v3 = vmul.f32 0.5, %v11476_v20  ;;  %v1967_v49 = vadd.f32 0.5, %v1965_v31 }
 0x28a   :  { %v1950_v34 = vadd.f32 0.5, %v1948_v54 }
 0x28b   :  { %v1958_v15 = vadd.f32 0.5, %v1956_v3 }
 0x28c   :  { %v11478_v51 = vpop.eup %11477 }
 0x28d   :  { %v1970_v37 = vmul.f32 0.0, %v1958_v15  ;;  %v1972_v17 = vmul.f32 %v11478_v51, %v1950_v34 }
 0x28e   :  { %v11480_v0 = vpop.eup %11479 }
 0x28f   :  { %v11482_v45 = vpop.eup %11481  ;;  %v12772_v1 = vadd.f32 %v1972_v17, %v1970_v37  ;;  %v1966_v9 = vmul.f32 0.5, %v11480_v0 }
 0x290   :  { %v12774_v12 = vmul.f32 %v11482_v45, %v1967_v49 }
 0x291   :  { %14690 = vst [vmem:[#allocation164_spill] sm:$0xff] %v12772_v1  ;;  %11483 = vtanh.f32 %v12772_v1  ;;  %v1968_v27 = vadd.f32 0.5, %v1966_v9 }
 0x297   :  { %v11484_v22 = vpop.eup %11483 }
 0x298   :  { %v12777_v28 = vmul.f32 %v11484_v22, %v1968_v27 }
 0x299   :  { %12015 = dma.done.wait [#allocation4], 65536 }
 0x29a   :  { %12016 = vsyncadd [#allocation4], 4294901760  ;;  %v8917_v59 = vld [vmem:[#allocation3 + $0x1c0] sm:$0xf]  ;;  %v10972_v21 = vld [vmem:[#allocation3 + $0x1c4] sm:$0xf] }
 0x29b   :  { %v10976_v55 = vld [vmem:[#allocation3 + $0x1dc] sm:$0xf0]  ;;  %v8919_v20 = vld [vmem:[#allocation3 + $0x1e0] sm:$0xf0]  ;;  %v8925_v54 = vld [vmem:[#allocation3 + $0x1c8] sm:$0xf] }
 0x29c   :  { %v8918_v23 = vor.u32 %v10976_v55, %v8917_v59  ;;  %v10977_v3 = vld [vmem:[#allocation3 + $0x1e4] sm:$0xf0]  ;;  %v8922_v31 = vor.u32 %v10972_v21, %v8919_v20  ;;  %v10973_v15 = vld [vmem:[#allocation3 + $0x1cc] sm:$0xf]  ;;  %v8885_v37 = vld [vmem:[#allocation3 + $0x180] sm:$0xf] }
 0x29d   :  { %v8926_v34 = vor.u32 %v10977_v3, %v8925_v54  ;;  %v8927_v51 = vld [vmem:[#allocation3 + $0x1e8] sm:$0xf0]  ;;  %v10968_v0 = vld [vmem:[#allocation3 + $0x19c] sm:$0xf0]  ;;  %v10964_v49 = vld [vmem:[#allocation3 + $0x184] sm:$0xf] }
 0x29e   :  { %2368 = vmatpush.bf16.msrb.mxu0 %v8918_v23  ;;  %v8930_v17 = vor.u32 %v10973_v15, %v8927_v51  ;;  %v8887_v45 = vld [vmem:[#allocation3 + $0x1a0] sm:$0xf0]  ;;  %2382 = vmatpush.bf16.msrb.mxu1 %v8922_v31  ;;  %v8886_v9 = vor.u32 %v10968_v0, %v8885_v37  ;;  %v8893_v22 = vld [vmem:[#allocation3 + $0x188] sm:$0xf]  ;;  %v10965_v59 = vld [vmem:[#allocation3 + $0x18c] sm:$0xf] }
 0x29f   :  { %2396 = vmatpush.bf16.msrb.mxu2 %v8926_v34  ;;  %v8890_v27 = vor.u32 %v10964_v49, %v8887_v45  ;;  %v10969_v1 = vld [vmem:[#allocation3 + $0x1a4] sm:$0xf0]  ;;  %v8895_v53 = vld [vmem:[#allocation3 + $0x1a8] sm:$0xf0]  ;;  %v8853_v21 = vld [vmem:[#allocation3 + $0x140] sm:$0xf] }
 0x2a0   :  { %2410 = vmatpush.bf16.msrb.mxu3 %v8930_v17  ;;  %v8894_v55 = vor.u32 %v10969_v1, %v8893_v22  ;;  %v10960_v20 = vld [vmem:[#allocation3 + $0x15c] sm:$0xf0]  ;;  %v8898_v54 = vor.u32 %v10965_v59, %v8895_v53  ;;  %v10956_v3 = vld [vmem:[#allocation3 + $0x144] sm:$0xf]  ;;  %v8861_v23 = vld [vmem:[#allocation3 + $0x148] sm:$0xf] }
 0x2a1   :  { %v8855_v26 = vld [vmem:[#allocation3 + $0x160] sm:$0xf0]  ;;  %v8854_v15 = vor.u32 %v10960_v20, %v8853_v21  ;;  %v10961_v51 = vld [vmem:[#allocation3 + $0x164] sm:$0xf0]  ;;  %v10957_v10 = vld [vmem:[#allocation3 + $0x14c] sm:$0xf] }
 0x2a2   :  { %2369 = vmatpush.bf16.msrb.mxu0 %v8886_v9  ;;  %v8863_v31 = vld [vmem:[#allocation3 + $0x168] sm:$0xf0]  ;;  %2383 = vmatpush.bf16.msrb.mxu1 %v8890_v27  ;;  %v8858_v34 = vor.u32 %v10956_v3, %v8855_v26  ;;  %v8862_v37 = vor.u32 %v10961_v51, %v8861_v23  ;;  %v8821_v0 = vld [vmem:[#allocation3 + $0x100] sm:$0xf]  ;;  %v10948_v17 = vld [vmem:[#allocation3 + $0x104] sm:$0xf] }
 0x2a3   :  { %2397 = vmatpush.bf16.msrb.mxu2 %v8894_v55  ;;  %v10952_v49 = vld [vmem:[#allocation3 + $0x11c] sm:$0xf0]  ;;  %v8866_v1 = vor.u32 %v10957_v10, %v8863_v31  ;;  %v8823_v45 = vld [vmem:[#allocation3 + $0x120] sm:$0xf0]  ;;  %v8829_v22 = vld [vmem:[#allocation3 + $0x108] sm:$0xf] }
 0x2a4   :  { %2411 = vmatpush.bf16.msrb.mxu3 %v8898_v54  ;;  %v10953_v53 = vld [vmem:[#allocation3 + $0x124] sm:$0xf0]  ;;  %v10949_v59 = vld [vmem:[#allocation3 + $0x10c] sm:$0xf]  ;;  %v8822_v9 = vor.u32 %v10952_v49, %v8821_v0  ;;  %v8826_v21 = vor.u32 %v10948_v17, %v8823_v45  ;;  %v8789_v27 = vld [vmem:[#allocation3 + $0xc0] sm:$0xf] }
 0x2a5   :  { %v8831_v50 = vld [vmem:[#allocation3 + $0x128] sm:$0xf0]  ;;  %v8830_v20 = vor.u32 %v10953_v53, %v8829_v22  ;;  %v10944_v55 = vld [vmem:[#allocation3 + $0xdc] sm:$0xf0]  ;;  %v10940_v26 = vld [vmem:[#allocation3 + $0xc4] sm:$0xf] }
 0x2a6   :  { %2370 = vmatpush.bf16.msrb.mxu0 %v8854_v15  ;;  %2384 = vmatpush.bf16.msrb.mxu1 %v8858_v34  ;;  %v8834_v3 = vor.u32 %v10949_v59, %v8831_v50  ;;  %v8791_v23 = vld [vmem:[#allocation3 + $0xe0] sm:$0xf0]  ;;  %v8797_v51 = vld [vmem:[#allocation3 + $0xc8] sm:$0xf]  ;;  %v10941_v10 = vld [vmem:[#allocation3 + $0xcc] sm:$0xf]  ;;  %v8790_v5 = vor.u32 %v10944_v55, %v8789_v27 }
 0x2a7   :  { %2398 = vmatpush.bf16.msrb.mxu2 %v8862_v37  ;;  %v10945_v54 = vld [vmem:[#allocation3 + $0xe4] sm:$0xf0]  ;;  %v8799_v31 = vld [vmem:[#allocation3 + $0xe8] sm:$0xf0]  ;;  %v8794_v15 = vor.u32 %v10940_v26, %v8791_v23  ;;  %v8757_v34 = vld [vmem:[#allocation3 + $0x80] sm:$0xf] }
 0x2a8   :  { %2412 = vmatpush.bf16.msrb.mxu3 %v8866_v1  ;;  %v8798_v0 = vor.u32 %v10945_v54, %v8797_v51  ;;  %v10936_v37 = vld [vmem:[#allocation3 + $0x9c] sm:$0xf0]  ;;  %v10932_v49 = vld [vmem:[#allocation3 + $0x84] sm:$0xf]  ;;  %v8802_v17 = vor.u32 %v10941_v10, %v8799_v31  ;;  %v8765_v22 = vld [vmem:[#allocation3 + $0x88] sm:$0xf] }
 0x2a9   :  { %v8759_v45 = vld [vmem:[#allocation3 + $0xa0] sm:$0xf0]  ;;  %v10937_v1 = vld [vmem:[#allocation3 + $0xa4] sm:$0xf0]  ;;  %v10933_v50 = vld [vmem:[#allocation3 + $0x8c] sm:$0xf]  ;;  %v8758_v59 = vor.u32 %v10936_v37, %v8757_v34 }
 0x2aa   :  { %2371 = vmatpush.bf16.msrb.mxu0 %v8822_v9  ;;  %2385 = vmatpush.bf16.msrb.mxu1 %v8826_v21  ;;  %v8767_v53 = vld [vmem:[#allocation3 + $0xa8] sm:$0xf0]  ;;  %v8762_v9 = vor.u32 %v10932_v49, %v8759_v45  ;;  %v8766_v27 = vor.u32 %v10937_v1, %v8765_v22  ;;  %v8725_v21 = vld [vmem:[#allocation3 + $0x40] sm:$0xf]  ;;  %v10924_v55 = vld [vmem:[#allocation3 + $0x44] sm:$0xf] }
 0x2ab   :  { %2399 = vmatpush.bf16.msrb.mxu2 %v8830_v20  ;;  %v10928_v20 = vld [vmem:[#allocation3 + $0x5c] sm:$0xf0]  ;;  %v8770_v26 = vor.u32 %v10933_v50, %v8767_v53  ;;  %v8727_v23 = vld [vmem:[#allocation3 + $0x60] sm:$0xf0]  ;;  %v8733_v51 = vld [vmem:[#allocation3 + $0x48] sm:$0xf] }
 0x2ac   :  { %2413 = vmatpush.bf16.msrb.mxu3 %v8834_v3  ;;  %v10929_v3 = vld [vmem:[#allocation3 + $0x64] sm:$0xf0]  ;;  %v10925_v54 = vld [vmem:[#allocation3 + $0x4c] sm:$0xf]  ;;  %v8726_v31 = vor.u32 %v10928_v20, %v8725_v21  ;;  %v8693_v44 = vld [vmem:[#allocation3] sm:$0xf] }
 0x2ad   :  { %v8735_v10 = vld [vmem:[#allocation3 + $0x68] sm:$0xf0]  ;;  %v10920_v24 = vld [vmem:[#allocation3 + $0x1c] sm:$0xf0]  ;;  %v8695_v34 = vld [vmem:[#allocation3 + $0x20] sm:$0xf0] }
 0x2ae   :  { %2372 = vmatpush.bf16.msrb.mxu0 %v8790_v5  ;;  %2386 = vmatpush.bf16.msrb.mxu1 %v8794_v15  ;;  %v8730_v5 = vor.u32 %v10924_v55, %v8727_v23  ;;  %v8734_v15 = vor.u32 %v10929_v3, %v8733_v51  ;;  %v8701_v37 = vld [vmem:[#allocation3 + $0x8] sm:$0xf]  ;;  %v8738_v49 = vor.u32 %v10925_v54, %v8735_v10  ;;  %v10917_v45 = vld [vmem:[#allocation3 + $0xc] sm:$0xf]  ;;  %v8933_v1 = vld [vmem:[#allocation3 + $0x1d0] sm:$0xf] }
 0x2af   :  { %2400 = vmatpush.bf16.msrb.mxu2 %v8798_v0  ;;  %v10916_v0 = vld [vmem:[#allocation3 + $0x4] sm:$0xf]  ;;  %v8703_v22 = vld [vmem:[#allocation3 + $0x28] sm:$0xf0]  ;;  %v10978_v50 = vld [vmem:[#allocation3 + $0x1ec] sm:$0xf0] }
 0x2b0   :  { %2414 = vmatpush.bf16.msrb.mxu3 %v8802_v17  ;;  %v10921_v17 = vld [vmem:[#allocation3 + $0x24] sm:$0xf0]  ;;  %v10974_v53 = vld [vmem:[#allocation3 + $0x1d4] sm:$0xf]  ;;  %v8941_v20 = vld [vmem:[#allocation3 + $0x1d8] sm:$0xf]  ;;  %v8934_v51 = vor.u32 %v10978_v50, %v8933_v1 }
 0x2b1   :  { %v8935_v21 = vld [vmem:[#allocation3 + $0x1f0] sm:$0xf0]  ;;  %v10979_v32 = vld [vmem:[#allocation3 + $0x1f4] sm:$0xf0]  ;;  %v10975_v55 = vld [vmem:[#allocation3 + $0x1dc] sm:$0xf] }
 0x2b2   :  { %2373 = vmatpush.bf16.msrb.mxu0 %v8758_v59  ;;  %2387 = vmatpush.bf16.msrb.mxu1 %v8762_v9  ;;  %v8694_v59 = vor.u32 %v10920_v24, %v8693_v44  ;;  %v8698_v9 = vor.u32 %v10916_v0, %v8695_v34  ;;  %v8943_v23 = vld [vmem:[#allocation3 + $0x1f8] sm:$0xf0]  ;;  %v8938_v3 = vor.u32 %v10974_v53, %v8935_v21  ;;  %v8901_v10 = vld [vmem:[#allocation3 + $0x190] sm:$0xf]  ;;  %v10966_v33 = vld [vmem:[#allocation3 + $0x194] sm:$0xf] }
 0x2b3   :  { %2401 = vmatpush.bf16.msrb.mxu2 %v8766_v27  ;;  %v8702_v27 = vor.u32 %v10921_v17, %v8701_v37  ;;  %v8942_v54 = vor.u32 %v10979_v32, %v8941_v20  ;;  %v10970_v19 = vld [vmem:[#allocation3 + $0x1ac] sm:$0xf0]  ;;  %v8903_v44 = vld [vmem:[#allocation3 + $0x1b0] sm:$0xf0]  ;;  %v8909_v24 = vld [vmem:[#allocation3 + $0x198] sm:$0xf] }
 0x2b4   :  { %2415 = vmatpush.bf16.msrb.mxu3 %v8770_v26  ;;  %v8706_v26 = vor.u32 %v10917_v45, %v8703_v22  ;;  %v10971_v8 = vld [vmem:[#allocation3 + $0x1b4] sm:$0xf0]  ;;  %v8911_v0 = vld [vmem:[#allocation3 + $0x1b8] sm:$0xf0]  ;;  %v8902_v34 = vor.u32 %v10970_v19, %v8901_v10  ;;  %v8906_v32 = vor.u32 %v10966_v33, %v8903_v44  ;;  %v10962_v17 = vld [vmem:[#allocation3 + $0x16c] sm:$0xf0] }
 0x2b5   :  { %v8910_v37 = vor.u32 %v10971_v8, %v8909_v24  ;;  %v10958_v45 = vld [vmem:[#allocation3 + $0x154] sm:$0xf]  ;;  %v8877_v50 = vld [vmem:[#allocation3 + $0x158] sm:$0xf]  ;;  %v8879_v53 = vld [vmem:[#allocation3 + $0x178] sm:$0xf0] }
 0x2b6   :  { %2374 = vmatpush.bf16.msrb.mxu0 %v8726_v31  ;;  %2388 = vmatpush.bf16.msrb.mxu1 %v8730_v5  ;;  %v8946_v31 = vor.u32 %v10975_v55, %v8943_v23  ;;  %v12781_v5 = vpack.c.bf16 %v12777_v28, %v12774_v12  ;;  %v8871_v1 = vld [vmem:[#allocation3 + $0x170] sm:$0xf0]  ;;  %v10963_v12 = vld [vmem:[#allocation3 + $0x174] sm:$0xf0]  ;;  %v10959_v28 = vld [vmem:[#allocation3 + $0x15c] sm:$0xf] }
 0x2b7   :  { %2402 = vmatpush.bf16.msrb.mxu2 %v8734_v15  ;;  %v10967_v15 = vld [vmem:[#allocation3 + $0x19c] sm:$0xf]  ;;  %v8874_v8 = vor.u32 %v10958_v45, %v8871_v1  ;;  %v8878_v33 = vor.u32 %v10963_v12, %v8877_v50  ;;  %v10954_v21 = vld [vmem:[#allocation3 + $0x12c] sm:$0xf0]  ;;  %v10950_v20 = vld [vmem:[#allocation3 + $0x114] sm:$0xf] }
 0x2b8   :  { %2416 = vmatpush.bf16.msrb.mxu3 %v8738_v49  ;;  %v8869_v49 = vld [vmem:[#allocation3 + $0x150] sm:$0xf]  ;;  %v8914_v22 = vor.u32 %v10967_v15, %v8911_v0  ;;  %v8845_v55 = vld [vmem:[#allocation3 + $0x118] sm:$0xf]  ;;  %v10942_v24 = vld [vmem:[#allocation3 + $0xd4] sm:$0xf] }
 0x2b9   :  { %v8870_v19 = vor.u32 %v10962_v17, %v8869_v49  ;;  %v10955_v23 = vld [vmem:[#allocation3 + $0x134] sm:$0xf0]  ;;  %v10946_v44 = vld [vmem:[#allocation3 + $0xec] sm:$0xf0]  ;;  %v8807_v0 = vld [vmem:[#allocation3 + $0xf0] sm:$0xf0] }
 0x2ba   :  { %2375 = vmatpush.bf16.msrb.mxu0 %v8694_v59  ;;  %2389 = vmatpush.bf16.msrb.mxu1 %v8698_v9  ;;  %v8837_v59 = vld [vmem:[#allocation3 + $0x110] sm:$0xf]  ;;  %v8882_v9 = vor.u32 %v10959_v28, %v8879_v53  ;;  %v8846_v10 = vor.u32 %v10955_v23, %v8845_v55  ;;  %v8815_v49 = vld [vmem:[#allocation3 + $0xf8] sm:$0xf0]  ;;  %v8810_v45 = vor.u32 %v10942_v24, %v8807_v0  ;;  %v10934_v12 = vld [vmem:[#allocation3 + $0x94] sm:$0xf] }
 0x2bb   :  { %2403 = vmatpush.bf16.msrb.mxu2 %v8702_v27  ;;  %v8839_v27 = vld [vmem:[#allocation3 + $0x130] sm:$0xf0]  ;;  %v8773_v1 = vld [vmem:[#allocation3 + $0x90] sm:$0xf]  ;;  %s12033_s7 = smov [#allocation19]   ;;  %s7964_s5 = sshll.u32 %s14375_s9, 4  ;;  %s7965_s5 = int_to_ptr.hbm [resolvable:$true] %s7964_s5 }
 0x2bc   :  { %2417 = vmatpush.bf16.msrb.mxu3 %v8706_v26  ;;  %v10951_v26 = vld [vmem:[#allocation3 + $0x11c] sm:$0xf]  ;;  %v10938_v50 = vld [vmem:[#allocation3 + $0xac] sm:$0xf0]  ;;  %v8775_v53 = vld [vmem:[#allocation3 + $0xb0] sm:$0xf0] }
 0x2bd   :  { %2376 = vmatmul.bf16.vlgmr.msrb.gmra.mxu0 %v12781_v5  ;;  %2390 = vmatmul.bf16.vlgmr.msrb.gmra.mxu1 %v12781_v5  ;;  %v10930_v55 = vld [vmem:[#allocation3 + $0x6c] sm:$0xf0]  ;;  %v10926_v23 = vld [vmem:[#allocation3 + $0x54] sm:$0xf]  ;;  %s7962_s27 = sshll.u32 %s12033_s7, 4  ;;  %s12034_s30 = smov 1024   ;;  %s7963_s27 = int_to_ptr.vmem [resolvable:$true] %s7962_s27 }
 0x2be   :  { %2424 = vmatpush.bf16.msra.mxu0 %v8934_v51  ;;  %2438 = vmatpush.bf16.msra.mxu1 %v8938_v3  ;;  %v8847_v51 = vld [vmem:[#allocation3 + $0x138] sm:$0xf0]  ;;  %v8838_v3 = vor.u32 %v10954_v21, %v8837_v59  ;;  %v8774_v21 = vor.u32 %v10938_v50, %v8773_v1  ;;  %v8709_v0 = vld [vmem:[#allocation3 + $0x10] sm:$0xf]  ;;  %s12035_s10 = smov 64  }
 0x2bf   :  { %2452 = vmatpush.bf16.msra.mxu2 %v8942_v54  ;;  %2418 = vmatmul.bf16.vlgmr.msrb.gmra.mxu3 %v12781_v5  ;;  %v8842_v54 = vor.u32 %v10950_v20, %v8839_v27  ;;  %v8850_v15 = vor.u32 %v10951_v26, %v8847_v51  ;;  %v8783_v59 = vld [vmem:[#allocation3 + $0xb8] sm:$0xf0]  ;;  %v8778_v20 = vor.u32 %v10934_v12, %v8775_v53  ;;  %v8741_v27 = vld [vmem:[#allocation3 + $0x50] sm:$0xf]  ;;  %v8743_v51 = vld [vmem:[#allocation3 + $0x70] sm:$0xf0] }
 0x2c0   :  { %2466 = vmatpush.bf16.msra.mxu3 %v8946_v31  ;;  %2404 = vmatmul.bf16.vlgmr.msrb.gmra.mxu2 %v12781_v5  ;;  %v8805_v31 = vld [vmem:[#allocation3 + $0xd0] sm:$0xf]  ;;  %v8746_v24 = vor.u32 %v10926_v23, %v8743_v51  ;;  %v8719_v1 = vld [vmem:[#allocation3 + $0x38] sm:$0xf0]  ;;  %v14700_v23 = vld [vmem:[#allocation86_spill] sm:$0xff] }
 0x2c1   :  { %v8806_v17 = vor.u32 %v10946_v44, %v8805_v31  ;;  %v8751_v31 = vld [vmem:[#allocation3 + $0x78] sm:$0xf0]  ;;  %v8742_v44 = vor.u32 %v10930_v55, %v8741_v27  ;;  %v14699_v55 = vld [vmem:[#allocation85_spill] sm:$0xff]  ;;  %v14702_v51 = vld [vmem:[#allocation90_spill] sm:$0xff] }
 0x2c2   :  { %2425 = vmatpush.bf16.msra.mxu0 %v8902_v34  ;;  %2439 = vmatpush.bf16.msra.mxu1 %v8906_v32  ;;  %v8813_v34 = vld [vmem:[#allocation3 + $0xd8] sm:$0xf] }
 0x2c3   :  { %2453 = vmatpush.bf16.msra.mxu2 %v8910_v37  ;;  %v10947_v32 = vld [vmem:[#allocation3 + $0xf4] sm:$0xf0]  ;;  %v10943_v37 = vld [vmem:[#allocation3 + $0xdc] sm:$0xf] }
 0x2c4   :  { %2467 = vmatpush.bf16.msra.mxu3 %v8914_v22  ;;  %v8814_v22 = vor.u32 %v10947_v32, %v8813_v34  ;;  %v8818_v28 = vor.u32 %v10943_v37, %v8815_v49  ;;  %v10922_v34 = vld [vmem:[#allocation3 + $0x2c] sm:$0xf0]  ;;  %v10918_v32 = vld [vmem:[#allocation3 + $0x14] sm:$0xf]  ;;  %v14698_v27 = vld [vmem:[#allocation84_spill] sm:$0xff] }
 0x2c5   :  { %v8711_v49 = vld [vmem:[#allocation3 + $0x30] sm:$0xf0]  ;;  %v8710_v50 = vor.u32 %v10922_v34, %v8709_v0  ;;  %v14710_v0 = vld [vmem:[#allocation100_spill] sm:$0xff]  ;;  %v14711_v34 = vld [vmem:[#allocation101_spill] sm:$0xff] }
 0x2c6   :  { %2426 = vmatpush.bf16.msra.mxu0 %v8870_v19  ;;  %2440 = vmatpush.bf16.msra.mxu1 %v8874_v8  ;;  %v8781_v19 = vld [vmem:[#allocation3 + $0x98] sm:$0xf]  ;;  %v8714_v12 = vor.u32 %v10918_v32, %v8711_v49  ;;  %v14712_v32 = vld [vmem:[#allocation102_spill] sm:$0xff] }
 0x2c7   :  { %2454 = vmatpush.bf16.msra.mxu2 %v8878_v33  ;;  %v10939_v8 = vld [vmem:[#allocation3 + $0xb4] sm:$0xf0]  ;;  %v10935_v33 = vld [vmem:[#allocation3 + $0x9c] sm:$0xf] }
 0x2c8   :  { %2468 = vmatpush.bf16.msra.mxu3 %v8882_v9  ;;  %v8782_v9 = vor.u32 %v10939_v8, %v8781_v19  ;;  %v8786_v26 = vor.u32 %v10935_v33, %v8783_v59  ;;  %v14691_v19 = vld [vmem:[#allocation54_spill] sm:$0xff]  ;;  %v14692_v8 = vld [vmem:[#allocation79_spill] sm:$0xff]  ;;  %v14694_v59 = vld [vmem:[#allocation80_spill] sm:$0xff] }
 0x2c9   :  { %v14693_v33 = vld [vmem:[#allocation158_spill] sm:$0xff]  ;;  %v14714_v49 = vld [vmem:[#allocation104_spill] sm:$0xff] }
 0x2ca   :  { %2427 = vmatpush.bf16.msra.mxu0 %v8838_v3  ;;  %2441 = vmatpush.bf16.msra.mxu1 %v8842_v54  ;;  %v8749_v3 = vld [vmem:[#allocation3 + $0x58] sm:$0xf] }
 0x2cb   :  { %2455 = vmatpush.bf16.msra.mxu2 %v8846_v10  ;;  %v10931_v54 = vld [vmem:[#allocation3 + $0x74] sm:$0xf0]  ;;  %v10927_v10 = vld [vmem:[#allocation3 + $0x5c] sm:$0xf] }
 0x2cc   :  { %2469 = vmatpush.bf16.msra.mxu3 %v8850_v15  ;;  %v8750_v15 = vor.u32 %v10931_v54, %v8749_v3  ;;  %v8754_v37 = vor.u32 %v10927_v10, %v8751_v31  ;;  %v14703_v3 = vld [vmem:[#allocation91_spill] sm:$0xff]  ;;  %v14704_v54 = vld [vmem:[#allocation92_spill] sm:$0xff]  ;;  %v14705_v10 = vld [vmem:[#allocation93_spill] sm:$0xff] }
 0x2cd   :  { %v14706_v31 = vld [vmem:[#allocation94_spill] sm:$0xff] }
 0x2ce   :  { %2428 = vmatpush.bf16.msra.mxu0 %v8806_v17  ;;  %2442 = vmatpush.bf16.msra.mxu1 %v8810_v45  ;;  %v8717_v17 = vld [vmem:[#allocation3 + $0x18] sm:$0xf] }
 0x2cf   :  { %2456 = vmatpush.bf16.msra.mxu2 %v8814_v22  ;;  %v10923_v45 = vld [vmem:[#allocation3 + $0x34] sm:$0xf0]  ;;  %v10919_v22 = vld [vmem:[#allocation3 + $0x1c] sm:$0xf] }
 0x2d0   :  { %2470 = vmatpush.bf16.msra.mxu3 %v8818_v28  ;;  %v8718_v28 = vor.u32 %v10923_v45, %v8717_v17  ;;  %v8722_v53 = vor.u32 %v10919_v22, %v8719_v1  ;;  %v14715_v17 = vld [vmem:[#allocation105_spill] sm:$0xff]  ;;  %v14716_v45 = vld [vmem:[#allocation106_spill] sm:$0xff] }
 0x2d1   :  { %v14717_v22 = vld [vmem:[#allocation109_spill] sm:$0xff]  ;;  %v14718_v1 = vld [vmem:[#allocation110_spill] sm:$0xff] }
 0x2d2   :  { %2429 = vmatpush.bf16.msra.mxu0 %v8774_v21  ;;  %2443 = vmatpush.bf16.msra.mxu1 %v8778_v20  ;;  %v14695_v21 = vld [vmem:[#allocation81_spill] sm:$0xff]  ;;  %v14696_v20 = vld [vmem:[#allocation82_spill] sm:$0xff] }
 0x2d3   :  { %2457 = vmatpush.bf16.msra.mxu2 %v8782_v9  ;;  %v14697_v9 = vld [vmem:[#allocation83_spill] sm:$0xff] }
 0x2d4   :  { %2471 = vmatpush.bf16.msra.mxu3 %v8786_v26  ;;  %v14701_v26 = vld [vmem:[#allocation89_spill] sm:$0xff] }
 0x2d6   :  { %2430 = vmatpush.bf16.msra.mxu0 %v8742_v44  ;;  %2444 = vmatpush.bf16.msra.mxu1 %v8746_v24  ;;  %v14707_v44 = vld [vmem:[#allocation95_spill] sm:$0xff]  ;;  %v14708_v24 = vld [vmem:[#allocation96_spill] sm:$0xff] }
 0x2d7   :  { %2458 = vmatpush.bf16.msra.mxu2 %v8750_v15  ;;  %v14709_v15 = vld [vmem:[#allocation99_spill] sm:$0xff] }
 0x2d8   :  { %2472 = vmatpush.bf16.msra.mxu3 %v8754_v37  ;;  %v14713_v37 = vld [vmem:[#allocation103_spill] sm:$0xff] }
 0x2da   :  { %2431 = vmatpush.bf16.msra.mxu0 %v8710_v50  ;;  %2445 = vmatpush.bf16.msra.mxu1 %v8714_v12  ;;  %v14719_v50 = vld [vmem:[#allocation111_spill] sm:$0xff]  ;;  %v14720_v12 = vld [vmem:[#allocation112_spill] sm:$0xff] }
 0x2db   :  { %2459 = vmatpush.bf16.msra.mxu2 %v8718_v28  ;;  %v14721_v28 = vld [vmem:[#allocation113_spill] sm:$0xff] }
 0x2dc   :  { %2473 = vmatpush.bf16.msra.mxu3 %v8722_v53  ;;  %v14722_v53 = vld [vmem:[#allocation114_spill] sm:$0xff] }
 0x2dd   :  { %2432 = vmatmul.bf16.vlgmr.msra.gmra.mxu0 %v12781_v5  ;;  %2446 = vmatmul.bf16.vlgmr.msra.gmra.mxu1 %v12781_v5 }
 0x2de   :  { %2504 = vmatpush.bf16.msrb.mxu0 %v12188_v36  ;;  %2518 = vmatpush.bf16.msrb.mxu1 %v12190_v40 }
 0x2df   :  { %2532 = vmatpush.bf16.msrb.mxu2 %v12192_v43  ;;  %2474 = vmatmul.bf16.vlgmr.msra.gmra.mxu3 %v12781_v5 }
 0x2e0   :  { %2546 = vmatpush.bf16.msrb.mxu3 %v12197_v52  ;;  %2460 = vmatmul.bf16.vlgmr.msra.gmra.mxu2 %v12781_v5 }
 0x2e2   :  { %2505 = vmatpush.bf16.msrb.mxu0 %v12208_v58  ;;  %2519 = vmatpush.bf16.msrb.mxu1 %v12210_v13 }
 0x2e3   :  { %2533 = vmatpush.bf16.msrb.mxu2 %v12212_v14 }
 0x2e4   :  { %2547 = vmatpush.bf16.msrb.mxu3 %v12219_v18 }
 0x2e6   :  { %2506 = vmatpush.bf16.msrb.mxu0 %v12235_v30  ;;  %2520 = vmatpush.bf16.msrb.mxu1 %v12237_v38 }
 0x2e7   :  { %2534 = vmatpush.bf16.msrb.mxu2 %v12239_v39 }
 0x2e8   :  { %2548 = vmatpush.bf16.msrb.mxu3 %v12250_v56 }
 0x2ea   :  { %2507 = vmatpush.bf16.msrb.mxu0 %v12263_v29  ;;  %2521 = vmatpush.bf16.msrb.mxu1 %v12265_v2 }
 0x2eb   :  { %2535 = vmatpush.bf16.msrb.mxu2 %v12267_v46 }
 0x2ec   :  { %2549 = vmatpush.bf16.msrb.mxu3 %v12278_v62 }
 0x2ee   :  { %2508 = vmatpush.bf16.msrb.mxu0 %v12291_v7  ;;  %2522 = vmatpush.bf16.msrb.mxu1 %v12293_v61 }
 0x2ef   :  { %2536 = vmatpush.bf16.msrb.mxu2 %v12295_v63 }
 0x2f0   :  { %2550 = vmatpush.bf16.msrb.mxu3 %v12306_v47 }
 0x2f2   :  { %2509 = vmatpush.bf16.msrb.mxu0 %v12319_v35  ;;  %2523 = vmatpush.bf16.msrb.mxu1 %v12321_v42 }
 0x2f3   :  { %2537 = vmatpush.bf16.msrb.mxu2 %v12323_v11 }
 0x2f4   :  { %2551 = vmatpush.bf16.msrb.mxu3 %v12334_v48 }
 0x2f6   :  { %2510 = vmatpush.bf16.msrb.mxu0 %v12347_v60  ;;  %2524 = vmatpush.bf16.msrb.mxu1 %v12349_v41 }
 0x2f7   :  { %2538 = vmatpush.bf16.msrb.mxu2 %v12351_v4 }
 0x2f8   :  { %2552 = vmatpush.bf16.msrb.mxu3 %v12362_v57 }
 0x2fa   :  { %2511 = vmatpush.bf16.msrb.mxu0 %v12375_v25  ;;  %2525 = vmatpush.bf16.msrb.mxu1 %v12377_v6 }
 0x2fb   :  { %2539 = vmatpush.bf16.msrb.mxu2 %v12379_v16 }
 0x2fc   :  { %2553 = vmatpush.bf16.msrb.mxu3 %v14691_v19 }
 0x2fd   :  { %2512 = vmatmul.bf16.vlgmr.msrb.gmra.mxu0 %v14693_v33  ;;  %2526 = vmatmul.bf16.vlgmr.msrb.gmra.mxu1 %v14693_v33 }
 0x2fe   :  { %2605 = vmatpush.bf16.msra.mxu0 %v14692_v8  ;;  %2619 = vmatpush.bf16.msra.mxu1 %v14694_v59  ;;  %v10986_v8 = vld [vmem:[#allocation3 + $0x22c] sm:$0xf0] }
 0x2ff   :  { %2540 = vmatmul.bf16.vlgmr.msrb.gmra.mxu2 %v14693_v33  ;;  %2554 = vmatmul.bf16.vlgmr.msrb.gmra.mxu3 %v14693_v33  ;;  %v14723_v33 = vld [vmem:[#allocation118_spill] sm:$0xff] }
 0x300   :  { %2633 = vmatpush.bf16.msra.mxu2 %v14695_v21  ;;  %2647 = vmatpush.bf16.msra.mxu3 %v14696_v20  ;;  %v14787_v21 = vld [vmem:[#allocation160_spill] sm:$0xff] }
 0x302   :  { %2606 = vmatpush.bf16.msra.mxu0 %v14697_v9  ;;  %2620 = vmatpush.bf16.msra.mxu1 %v14698_v27  ;;  %v11021_v27 = vld [vmem:[#allocation3 + $0x34c] sm:$0xf] }
 0x303   :  { %v9119_v9 = vld [vmem:[#allocation3 + $0x368] sm:$0xf0] }
 0x304   :  { %2634 = vmatpush.bf16.msra.mxu2 %v14699_v55  ;;  %2648 = vmatpush.bf16.msra.mxu3 %v14700_v23  ;;  %v11020_v55 = vld [vmem:[#allocation3 + $0x344] sm:$0xf] }
 0x306   :  { %2607 = vmatpush.bf16.msra.mxu0 %v14701_v26  ;;  %2621 = vmatpush.bf16.msra.mxu1 %v14702_v51  ;;  %v11041_v51 = vld [vmem:[#allocation3 + $0x3e4] sm:$0xf0] }
 0x308   :  { %2635 = vmatpush.bf16.msra.mxu2 %v14703_v3  ;;  %2649 = vmatpush.bf16.msra.mxu3 %v14704_v54  ;;  %v11036_v54 = vld [vmem:[#allocation3 + $0x3c4] sm:$0xf] }
 0x30a   :  { %2608 = vmatpush.bf16.msra.mxu0 %v14705_v10  ;;  %2622 = vmatpush.bf16.msra.mxu1 %v14706_v31  ;;  %v14778_v31 = vld [vmem:[#allocation35_spill] sm:$0xff] }
 0x30c   :  { %2636 = vmatpush.bf16.msra.mxu2 %v14707_v44  ;;  %2650 = vmatpush.bf16.msra.mxu3 %v14708_v24  ;;  %v14777_v44 = vld [vmem:[#allocation65_spill] sm:$0xff] }
 0x30e   :  { %2609 = vmatpush.bf16.msra.mxu0 %v14709_v15  ;;  %2623 = vmatpush.bf16.msra.mxu1 %v14710_v0 }
 0x310   :  { %2637 = vmatpush.bf16.msra.mxu2 %v14711_v34  ;;  %2651 = vmatpush.bf16.msra.mxu3 %v14712_v32  ;;  %v14774_v32 = vld [vmem:[#allocation33_spill] sm:$0xff] }
 0x312   :  { %2610 = vmatpush.bf16.msra.mxu0 %v14713_v37  ;;  %2624 = vmatpush.bf16.msra.mxu1 %v14714_v49  ;;  %v14724_v37 = vld [vmem:[#allocation119_spill] sm:$0xff] }
 0x313   :  { %v14725_v49 = vld [vmem:[#allocation115_spill] sm:$0xff] }
 0x314   :  { %2638 = vmatpush.bf16.msra.mxu2 %v14715_v17  ;;  %2652 = vmatpush.bf16.msra.mxu3 %v14716_v45  ;;  %v14726_v45 = vld [vmem:[#allocation116_spill] sm:$0xff] }
 0x316   :  { %2611 = vmatpush.bf16.msra.mxu0 %v14717_v22  ;;  %2625 = vmatpush.bf16.msra.mxu1 %v14718_v1  ;;  %v14727_v22 = vld [vmem:[#allocation121_spill] sm:$0xff]  ;;  %v14728_v1 = vld [vmem:[#allocation122_spill] sm:$0xff] }
 0x318   :  { %2639 = vmatpush.bf16.msra.mxu2 %v14719_v50  ;;  %2653 = vmatpush.bf16.msra.mxu3 %v14720_v12  ;;  %v14729_v50 = vld [vmem:[#allocation123_spill] sm:$0xff]  ;;  %v14730_v12 = vld [vmem:[#allocation124_spill] sm:$0xff] }
 0x31a   :  { %2612 = vmatpush.bf16.msra.mxu0 %v14721_v28  ;;  %2626 = vmatpush.bf16.msra.mxu1 %v14722_v53  ;;  %v14739_v53 = vld [vmem:[#allocation135_spill] sm:$0xff]  ;;  %v14740_v28 = vld [vmem:[#allocation136_spill] sm:$0xff] }
 0x31c   :  { %2640 = vmatpush.bf16.msra.mxu2 %v14725_v49  ;;  %2654 = vmatpush.bf16.msra.mxu3 %v14726_v45  ;;  %v14733_v49 = vld [vmem:[#allocation127_spill] sm:$0xff]  ;;  %v14734_v45 = vld [vmem:[#allocation129_spill] sm:$0xff] }
 0x31d   :  { %2613 = vmatmul.bf16.vlgmr.msra.gmra.mxu0 %v12781_v5  ;;  %2627 = vmatmul.bf16.vlgmr.msra.gmra.mxu1 %v12781_v5 }
 0x31e   :  { %2661 = vmatpush.bf16.msrb.mxu0 %v14723_v33  ;;  %2675 = vmatpush.bf16.msrb.mxu1 %v14724_v37  ;;  %v14731_v37 = vld [vmem:[#allocation125_spill] sm:$0xff]  ;;  %v14732_v33 = vld [vmem:[#allocation126_spill] sm:$0xff] }
 0x31f   :  { %2641 = vmatmul.bf16.vlgmr.msra.gmra.mxu2 %v12781_v5  ;;  %2655 = vmatmul.bf16.vlgmr.msra.gmra.mxu3 %v12781_v5  ;;  %v14741_v5 = vld [vmem:[#allocation137_spill] sm:$0xff] }
 0x320   :  { %2689 = vmatpush.bf16.msrb.mxu2 %v14727_v22  ;;  %2703 = vmatpush.bf16.msrb.mxu3 %v14728_v1  ;;  %v14735_v22 = vld [vmem:[#allocation130_spill] sm:$0xff]  ;;  %v14736_v1 = vld [vmem:[#allocation132_spill] sm:$0xff] }
 0x322   :  { %2662 = vmatpush.bf16.msrb.mxu0 %v14729_v50  ;;  %2676 = vmatpush.bf16.msrb.mxu1 %v14730_v12  ;;  %v14737_v50 = vld [vmem:[#allocation133_spill] sm:$0xff]  ;;  %v14738_v12 = vld [vmem:[#allocation134_spill] sm:$0xff] }
 0x324   :  { %2690 = vmatpush.bf16.msrb.mxu2 %v14731_v37  ;;  %2704 = vmatpush.bf16.msrb.mxu3 %v14732_v33  ;;  %v14742_v37 = vld [vmem:[#allocation139_spill] sm:$0xff]  ;;  %v14743_v33 = vld [vmem:[#allocation140_spill] sm:$0xff] }
 0x326   :  { %2663 = vmatpush.bf16.msrb.mxu0 %v14733_v49  ;;  %2677 = vmatpush.bf16.msrb.mxu1 %v14734_v45  ;;  %v14744_v49 = vld [vmem:[#allocation142_spill] sm:$0xff]  ;;  %v14745_v45 = vld [vmem:[#allocation143_spill] sm:$0xff] }
 0x328   :  { %2691 = vmatpush.bf16.msrb.mxu2 %v14735_v22  ;;  %2705 = vmatpush.bf16.msrb.mxu3 %v14736_v1  ;;  %v14746_v22 = vld [vmem:[#allocation144_spill] sm:$0xff]  ;;  %v14747_v1 = vld [vmem:[#allocation145_spill] sm:$0xff] }
 0x32a   :  { %2664 = vmatpush.bf16.msrb.mxu0 %v14737_v50  ;;  %2678 = vmatpush.bf16.msrb.mxu1 %v14738_v12  ;;  %v14748_v50 = vld [vmem:[#allocation146_spill] sm:$0xff]  ;;  %v14749_v12 = vld [vmem:[#allocation147_spill] sm:$0xff] }
 0x32c   :  { %2692 = vmatpush.bf16.msrb.mxu2 %v14739_v53  ;;  %2706 = vmatpush.bf16.msrb.mxu3 %v14740_v28  ;;  %v14750_v53 = vld [vmem:[#allocation149_spill] sm:$0xff]  ;;  %v14751_v28 = vld [vmem:[#allocation150_spill] sm:$0xff] }
 0x32e   :  { %2665 = vmatpush.bf16.msrb.mxu0 %v14741_v5  ;;  %2679 = vmatpush.bf16.msrb.mxu1 %v14742_v37  ;;  %v14752_v5 = vld [vmem:[#allocation151_spill] sm:$0xff]  ;;  %v14753_v37 = vld [vmem:[#allocation152_spill] sm:$0xff] }
 0x330   :  { %2693 = vmatpush.bf16.msrb.mxu2 %v14743_v33  ;;  %2707 = vmatpush.bf16.msrb.mxu3 %v14744_v49  ;;  %v14754_v33 = vld [vmem:[#allocation153_spill] sm:$0xff]  ;;  %v14755_v49 = vld [vmem:[#allocation154_spill] sm:$0xff] }
 0x332   :  { %2666 = vmatpush.bf16.msrb.mxu0 %v14745_v45  ;;  %2680 = vmatpush.bf16.msrb.mxu1 %v14746_v22  ;;  %v14756_v45 = vld [vmem:[#allocation155_spill] sm:$0xff] }
 0x334   :  { %2694 = vmatpush.bf16.msrb.mxu2 %v14747_v1  ;;  %2708 = vmatpush.bf16.msrb.mxu3 %v14748_v50 }
 0x336   :  { %2667 = vmatpush.bf16.msrb.mxu0 %v14749_v12  ;;  %2681 = vmatpush.bf16.msrb.mxu1 %v14750_v53 }
 0x338   :  { %2695 = vmatpush.bf16.msrb.mxu2 %v14751_v28  ;;  %2709 = vmatpush.bf16.msrb.mxu3 %v14752_v5 }
 0x33a   :  { %2668 = vmatpush.bf16.msrb.mxu0 %v14753_v37  ;;  %2682 = vmatpush.bf16.msrb.mxu1 %v14754_v33  ;;  %v12895_v22 = vpop.f32.mrf.mxu0  ;;  %v12897_v1 = vpop.f32.mrf.mxu1 }
 0x33b   :  { %14757 = vst [vmem:[#allocation158_spill] sm:$0xff] %v12895_v22 }
 0x33c   :  { %2696 = vmatpush.bf16.msrb.mxu2 %v14755_v49  ;;  %2710 = vmatpush.bf16.msrb.mxu3 %v14756_v45  ;;  %14758 = vst [vmem:[#allocation165_spill] sm:$0xff] %v12897_v1 }
 0x342   :  { %v12901_v12 = vpop.f32.mrf.mxu3  ;;  %v12903_v53 = vpop.f32.mrf.mxu0 }
 0x343   :  { %v12899_v50 = vpop.f32.mrf.mxu2  ;;  %14760 = vst [vmem:[#allocation167_spill] sm:$0xff] %v12901_v12  ;;  %v12905_v28 = vpop.f32.mrf.mxu1 }
 0x344   :  { %14759 = vst [vmem:[#allocation166_spill] sm:$0xff] %v12899_v50 }
 0x345   :  { %14761 = vst [vmem:[#allocation168_spill] sm:$0xff] %v12903_v53 }
 0x346   :  { %14762 = vst [vmem:[#allocation169_spill] sm:$0xff] %v12905_v28 }
 0x34a   :  { %v12909_v37 = vpop.f32.mrf.mxu3 }
 0x34b   :  { %v12907_v5 = vpop.f32.mrf.mxu2  ;;  %14764 = vst [vmem:[#allocation171_spill] sm:$0xff] %v12909_v37 }
 0x34c   :  { %14763 = vst [vmem:[#allocation170_spill] sm:$0xff] %v12907_v5  ;;  %v14773_v5 = vld [vmem:[#allocation32_spill] sm:$0xff] }
 0x35a   :  { %v12911_v33 = vpop.f32.mrf.mxu0  ;;  %v12913_v49 = vpop.f32.mrf.mxu1 }
 0x35b   :  { %14765 = vst [vmem:[#allocation172_spill] sm:$0xff] %v12911_v33 }
 0x35c   :  { %14766 = vst [vmem:[#allocation173_spill] sm:$0xff] %v12913_v49 }
 0x362   :  { %v12917_v22 = vpop.f32.mrf.mxu3  ;;  %v12919_v1 = vpop.f32.mrf.mxu0 }
 0x363   :  { %v12915_v45 = vpop.f32.mrf.mxu2  ;;  %14768 = vst [vmem:[#allocation175_spill] sm:$0xff] %v12917_v22  ;;  %v12921_v50 = vpop.f32.mrf.mxu1  ;;  %v14775_v22 = vld [vmem:[#allocation64_spill] sm:$0xff] }
 0x364   :  { %14767 = vst [vmem:[#allocation174_spill] sm:$0xff] %v12915_v45 }
 0x365   :  { %14769 = vst [vmem:[#allocation176_spill] sm:$0xff] %v12919_v1 }
 0x366   :  { %14770 = vst [vmem:[#allocation177_spill] sm:$0xff] %v12921_v50  ;;  %v14776_v50 = vld [vmem:[#allocation34_spill] sm:$0xff] }
 0x36a   :  { %v12925_v53 = vpop.f32.mrf.mxu3 }
 0x36b   :  { %v12923_v12 = vpop.f32.mrf.mxu2  ;;  %14772 = vst [vmem:[#allocation179_spill] sm:$0xff] %v12925_v53 }
 0x36c   :  { %14771 = vst [vmem:[#allocation178_spill] sm:$0xff] %v12923_v12 }
 0x37a   :  { %v2513_v28 = vpop.f32.mrf.mxu0  ;;  %v2527_v37 = vpop.f32.mrf.mxu1 }
 0x37b   :  { %v2560_v17 = vadd.f32 %v2513_v28, %v14773_v5  ;;  %v2561_v33 = vadd.f32 %v2527_v37, %v14774_v32  ;;  %v9173_v28 = vld [vmem:[#allocation3 + $0x3c0] sm:$0xf] }
 0x37c   :  { %v11040_v5 = vld [vmem:[#allocation3 + $0x3dc] sm:$0xf0] }
 0x37d   :  { %v2568_v34 = vmul.f32 0.5, %v2560_v17  ;;  %v2576_v49 = vmul.f32 0.5, %v2561_v33  ;;  %v9181_v17 = vld [vmem:[#allocation3 + $0x3c8] sm:$0xf] }
 0x37f   :  { %11485 = vtanh.f32 %v2568_v34  ;;  %v9174_v34 = vor.u32 %v11040_v5, %v9173_v28 }
 0x380   :  { %11487 = vtanh.f32 %v2576_v49  ;;  %v9175_v49 = vld [vmem:[#allocation3 + $0x3e0] sm:$0xf0] }
 0x381   :  { %v9178_v3 = vor.u32 %v11036_v54, %v9175_v49  ;;  %3146 = vmatpush.bf16.msra.mxu0 %v9174_v34  ;;  %v9143_v54 = vld [vmem:[#allocation3 + $0x3a0] sm:$0xf0]  ;;  %v14779_v49 = vld [vmem:[#allocation66_spill] sm:$0xff] }
 0x382   :  { %v2541_v45 = vpop.f32.mrf.mxu2  ;;  %v2555_v1 = vpop.f32.mrf.mxu3 }
 0x383   :  { %v2562_v0 = vadd.f32 %v2541_v45, %v14775_v22  ;;  %v2515_v15 = vpop.f32.mrf.mxu0  ;;  %v2529_v12 = vpop.f32.mrf.mxu1  ;;  %v2563_v53 = vadd.f32 %v2555_v1, %v14777_v44  ;;  %v9182_v44 = vor.u32 %v11041_v51, %v9181_v17  ;;  %v9183_v1 = vld [vmem:[#allocation3 + $0x3e8] sm:$0xf0]  ;;  %3160 = vmatpush.bf16.msra.mxu1 %v9178_v3  ;;  %v11033_v17 = vld [vmem:[#allocation3 + $0x3a4] sm:$0xf0] }
 0x384   :  { %v2564_v24 = vadd.f32 %v2515_v15, %v14776_v50  ;;  %v2565_v10 = vadd.f32 %v2529_v12, %v14778_v31  ;;  %v11037_v15 = vld [vmem:[#allocation3 + $0x3cc] sm:$0xf]  ;;  %v9141_v31 = vld [vmem:[#allocation3 + $0x380] sm:$0xf] }
 0x385   :  { %v11486_v32 = vpop.eup %11485  ;;  %11489 = vtanh.f32 %v2562_v0  ;;  %v2586_v12 = vmul.f32 0.5, %v2563_v53  ;;  %v9186_v26 = vor.u32 %v11037_v15, %v9183_v1  ;;  %v11032_v0 = vld [vmem:[#allocation3 + $0x39c] sm:$0xf0]  ;;  %3174 = vmatpush.bf16.msra.mxu2 %v9182_v44  ;;  %v11029_v53 = vld [vmem:[#allocation3 + $0x38c] sm:$0xf]  ;;  %v14780_v15 = vld [vmem:[#allocation67_spill] sm:$0xff] }
 0x386   :  { %v2569_v37 = vmul.f32 0.5, %v2564_v24  ;;  %v11488_v33 = vpop.eup %11487  ;;  %v2572_v45 = vmul.f32 0.5, %v11486_v32  ;;  %v2577_v22 = vmul.f32 0.5, %v2565_v10  ;;  %v11028_v24 = vld [vmem:[#allocation3 + $0x384] sm:$0xf]  ;;  %v9142_v10 = vor.u32 %v11032_v0, %v9141_v31 }
 0x387   :  { %v2580_v50 = vmul.f32 0.5, %v11488_v33  ;;  %v9149_v32 = vld [vmem:[#allocation3 + $0x388] sm:$0xf]  ;;  %3188 = vmatpush.bf16.msra.mxu3 %v9186_v26  ;;  %v9146_v51 = vor.u32 %v11028_v24, %v9143_v54  ;;  %v9111_v0 = vld [vmem:[#allocation3 + $0x360] sm:$0xf0] }
 0x388   :  { %11491 = vtanh.f32 %v2569_v37  ;;  %v2574_v28 = vadd.f32 0.5, %v2572_v45  ;;  %v9151_v37 = vld [vmem:[#allocation3 + $0x3a8] sm:$0xf0]  ;;  %3147 = vmatpush.bf16.msra.mxu0 %v9142_v10  ;;  %v9150_v45 = vor.u32 %v11033_v17, %v9149_v32  ;;  %v9114_v24 = vor.u32 %v11020_v55, %v9111_v0  ;;  %v11017_v0 = vld [vmem:[#allocation3 + $0x324] sm:$0xf0] }
 0x389   :  { %v2582_v5 = vadd.f32 0.5, %v2580_v50  ;;  %11493 = vtanh.f32 %v2577_v22  ;;  %v9109_v50 = vld [vmem:[#allocation3 + $0x340] sm:$0xf]  ;;  %3161 = vmatpush.bf16.msra.mxu1 %v9146_v51  ;;  %v9154_v44 = vor.u32 %v11029_v53, %v9151_v37  ;;  %v9122_v17 = vor.u32 %v11021_v27, %v9119_v9 }
 0x38a   :  { %v2543_v23 = vpop.f32.mrf.mxu2  ;;  %v2557_v34 = vpop.f32.mrf.mxu3  ;;  %v11024_v22 = vld [vmem:[#allocation3 + $0x35c] sm:$0xf0]  ;;  %3175 = vmatpush.bf16.msra.mxu2 %v9150_v45 }
 0x38b   :  { %v2566_v33 = vadd.f32 %v2543_v23, %v14779_v49  ;;  %v11490_v3 = vpop.eup %11489  ;;  %v2567_v1 = vadd.f32 %v2557_v34, %v14780_v15  ;;  %v9110_v31 = vor.u32 %v11024_v22, %v9109_v50  ;;  %v9117_v23 = vld [vmem:[#allocation3 + $0x348] sm:$0xf]  ;;  %v14781_v34 = vld [vmem:[#allocation156_spill] sm:$0xff]  ;;  %3189 = vmatpush.bf16.msra.mxu3 %v9154_v44  ;;  %v11016_v51 = vld [vmem:[#allocation3 + $0x31c] sm:$0xf0] }
 0x38c   :  { %v11025_v49 = vld [vmem:[#allocation3 + $0x364] sm:$0xf0]  ;;  %v2594_v10 = vmul.f32 %v2582_v5, %v14781_v34  ;;  %v2596_v32 = vmul.f32 %v11490_v3, %v2574_v28  ;;  %v11012_v50 = vld [vmem:[#allocation3 + $0x304] sm:$0xf]  ;;  %v9087_v5 = vld [vmem:[#allocation3 + $0x328] sm:$0xf0] }
 0x38d   :  { %11495 = vtanh.f32 %v2566_v33  ;;  %v2587_v26 = vmul.f32 0.5, %v2567_v1  ;;  %v9118_v54 = vor.u32 %v11025_v49, %v9117_v23  ;;  %v9077_v33 = vld [vmem:[#allocation3 + $0x300] sm:$0xf]  ;;  %3148 = vmatpush.bf16.msra.mxu0 %v9110_v31  ;;  %v9079_v1 = vld [vmem:[#allocation3 + $0x320] sm:$0xf0]  ;;  %3162 = vmatpush.bf16.msra.mxu1 %v9114_v24 }
 0x38e   :  { %v11492_v20 = vpop.eup %11491  ;;  %11497 = vtanh.f32 %v2586_v12  ;;  %v9078_v15 = vor.u32 %v11016_v51, %v9077_v33  ;;  %v9082_v55 = vor.u32 %v11012_v50, %v9079_v1  ;;  %v9085_v22 = vld [vmem:[#allocation3 + $0x308] sm:$0xf]  ;;  %v11013_v12 = vld [vmem:[#allocation3 + $0x30c] sm:$0xf]  ;;  %v12936_v27 = vadd.f32 %v2596_v32, %v2594_v10  ;;  %v9045_v44 = vld [vmem:[#allocation3 + $0x2c0] sm:$0xf] }
 0x38f   :  { %v11494_v53 = vpop.eup %11493  ;;  %v2573_v37 = vmul.f32 0.5, %v11492_v20  ;;  %11499 = vtanh.f32 %v2587_v26  ;;  %3176 = vmatpush.bf16.msra.mxu2 %v9118_v54  ;;  %v9086_v28 = vor.u32 %v11017_v0, %v9085_v22  ;;  %3190 = vmatpush.bf16.msra.mxu3 %v9122_v17  ;;  %v9090_v20 = vor.u32 %v11013_v12, %v9087_v5  ;;  %v11008_v31 = vld [vmem:[#allocation3 + $0x2dc] sm:$0xf0]  ;;  %v11004_v24 = vld [vmem:[#allocation3 + $0x2c4] sm:$0xf] }
 0x390   :  { %v2581_v45 = vmul.f32 0.5, %v11494_v53  ;;  %14782 = vst [vmem:[#allocation32_spill] sm:$0xff] %v12936_v27  ;;  %v9046_v26 = vor.u32 %v11008_v31, %v9045_v44  ;;  %v9047_v34 = vld [vmem:[#allocation3 + $0x2e0] sm:$0xf0]  ;;  %v9053_v33 = vld [vmem:[#allocation3 + $0x2c8] sm:$0xf]  ;;  %11501 = vtanh.f32 %v12936_v27 }
 0x391   :  { %v2575_v23 = vadd.f32 0.5, %v2573_v37  ;;  %3149 = vmatpush.bf16.msra.mxu0 %v9078_v15  ;;  %v14783_v53 = vld [vmem:[#allocation157_spill] sm:$0xff]  ;;  %3163 = vmatpush.bf16.msra.mxu1 %v9082_v55  ;;  %v9050_v37 = vor.u32 %v11004_v24, %v9047_v34  ;;  %v11009_v50 = vld [vmem:[#allocation3 + $0x2e4] sm:$0xf0]  ;;  %v11005_v1 = vld [vmem:[#allocation3 + $0x2cc] sm:$0xf] }
 0x392   :  { %v2583_v3 = vadd.f32 0.5, %v2581_v45  ;;  %v9055_v10 = vld [vmem:[#allocation3 + $0x2e8] sm:$0xf0]  ;;  %v9054_v32 = vor.u32 %v11009_v50, %v9053_v33  ;;  %v11000_v44 = vld [vmem:[#allocation3 + $0x29c] sm:$0xf0] }
 0x393   :  { %v11496_v9 = vpop.eup %11495  ;;  %3177 = vmatpush.bf16.msra.mxu2 %v9086_v28  ;;  %3191 = vmatpush.bf16.msra.mxu3 %v9090_v20  ;;  %v9058_v15 = vor.u32 %v11005_v1, %v9055_v10  ;;  %v9013_v20 = vld [vmem:[#allocation3 + $0x280] sm:$0xf]  ;;  %v10996_v31 = vld [vmem:[#allocation3 + $0x284] sm:$0xf]  ;;  %v9021_v24 = vld [vmem:[#allocation3 + $0x288] sm:$0xf] }
 0x394   :  { %v2597_v49 = vmul.f32 %v11496_v9, %v2575_v23  ;;  %v11498_v51 = vpop.eup %11497  ;;  %v2595_v54 = vmul.f32 %v2583_v3, %v14783_v53  ;;  %v11001_v34 = vld [vmem:[#allocation3 + $0x2a4] sm:$0xf0]  ;;  %v10997_v53 = vld [vmem:[#allocation3 + $0x28c] sm:$0xf]  ;;  %v8981_v50 = vld [vmem:[#allocation3 + $0x240] sm:$0xf] }
 0x395   :  { %v11500_v17 = vpop.eup %11499  ;;  %v2590_v22 = vmul.f32 0.5, %v11498_v51  ;;  %3150 = vmatpush.bf16.msra.mxu0 %v9046_v26  ;;  %3164 = vmatpush.bf16.msra.mxu1 %v9050_v37  ;;  %v9015_v26 = vld [vmem:[#allocation3 + $0x2a0] sm:$0xf0]  ;;  %v9022_v51 = vor.u32 %v11001_v34, %v9021_v24  ;;  %v10992_v1 = vld [vmem:[#allocation3 + $0x25c] sm:$0xf0] }
 0x396   :  { %v12940_v45 = vadd.f32 %v2597_v49, %v2595_v54  ;;  %v2591_v0 = vmul.f32 0.5, %v11500_v17  ;;  %v11502_v23 = vpop.eup %11501  ;;  %v9014_v49 = vor.u32 %v11000_v44, %v9013_v20  ;;  %v9018_v33 = vor.u32 %v10996_v31, %v9015_v26  ;;  %v9023_v54 = vld [vmem:[#allocation3 + $0x2a8] sm:$0xf0]  ;;  %v10988_v10 = vld [vmem:[#allocation3 + $0x244] sm:$0xf] }
 0x397   :  { %3178 = vmatpush.bf16.msra.mxu2 %v9054_v32  ;;  %3192 = vmatpush.bf16.msra.mxu3 %v9058_v15  ;;  %v2592_v55 = vadd.f32 0.5, %v2590_v22  ;;  %v9026_v37 = vor.u32 %v10997_v53, %v9023_v54  ;;  %v8982_v32 = vor.u32 %v10992_v1, %v8981_v50  ;;  %v8983_v17 = vld [vmem:[#allocation3 + $0x260] sm:$0xf0]  ;;  %v8989_v15 = vld [vmem:[#allocation3 + $0x248] sm:$0xf] }
 0x398   :  { %14784 = vst [vmem:[#allocation33_spill] sm:$0xff] %v12940_v45  ;;  %11503 = vtanh.f32 %v12940_v45  ;;  %v2593_v12 = vadd.f32 0.5, %v2591_v0  ;;  %v10993_v22 = vld [vmem:[#allocation3 + $0x264] sm:$0xf0]  ;;  %v8986_v0 = vor.u32 %v10988_v10, %v8983_v17  ;;  %v10980_v20 = vld [vmem:[#allocation3 + $0x204] sm:$0xf] }
 0x399   :  { %v2602_v5 = vmul.f32 %v11502_v23, %v2592_v55  ;;  %3151 = vmatpush.bf16.msra.mxu0 %v9014_v49  ;;  %3165 = vmatpush.bf16.msra.mxu1 %v9018_v33  ;;  %v8990_v55 = vor.u32 %v10993_v22, %v8989_v15  ;;  %v10989_v23 = vld [vmem:[#allocation3 + $0x24c] sm:$0xf]  ;;  %v8951_v31 = vld [vmem:[#allocation3 + $0x220] sm:$0xf0]  ;;  %v8957_v49 = vld [vmem:[#allocation3 + $0x208] sm:$0xf] }
 0x39a   :  { %v10985_v26 = vld [vmem:[#allocation3 + $0x224] sm:$0xf0]  ;;  %v8954_v24 = vor.u32 %v10980_v20, %v8951_v31  ;;  %v10981_v33 = vld [vmem:[#allocation3 + $0x20c] sm:$0xf]  ;;  %v9189_v53 = vld [vmem:[#allocation3 + $0x3d0] sm:$0xf] }
 0x39b   :  { %3179 = vmatpush.bf16.msra.mxu2 %v9022_v51  ;;  %3193 = vmatpush.bf16.msra.mxu3 %v9026_v37  ;;  %v8958_v34 = vor.u32 %v10985_v26, %v8957_v49  ;;  %v8959_v51 = vld [vmem:[#allocation3 + $0x228] sm:$0xf0]  ;;  %v11042_v37 = vld [vmem:[#allocation3 + $0x3ec] sm:$0xf0]  ;;  %v11038_v50 = vld [vmem:[#allocation3 + $0x3d4] sm:$0xf] }
 0x39c   :  { %v8962_v54 = vor.u32 %v10981_v33, %v8959_v51  ;;  %v9191_v1 = vld [vmem:[#allocation3 + $0x3f0] sm:$0xf0]  ;;  %v9190_v10 = vor.u32 %v11042_v37, %v9189_v53  ;;  %v9197_v17 = vld [vmem:[#allocation3 + $0x3d8] sm:$0xf]  ;;  %v11039_v22 = vld [vmem:[#allocation3 + $0x3dc] sm:$0xf] }
 0x39d   :  { %3152 = vmatpush.bf16.msra.mxu0 %v8982_v32  ;;  %3166 = vmatpush.bf16.msra.mxu1 %v8986_v0  ;;  %v9194_v32 = vor.u32 %v11038_v50, %v9191_v1  ;;  %v11043_v15 = vld [vmem:[#allocation3 + $0x3f4] sm:$0xf0]  ;;  %v12949_v0 = vpop.f32.mrf.mxu0  ;;  %v9159_v31 = vld [vmem:[#allocation3 + $0x3b0] sm:$0xf0]  ;;  %v9167_v33 = vld [vmem:[#allocation3 + $0x3b8] sm:$0xf0] }
 0x39e   :  { %v11504_v28 = vpop.eup %11503  ;;  %v9165_v49 = vld [vmem:[#allocation3 + $0x398] sm:$0xf]  ;;  %v11026_v37 = vld [vmem:[#allocation3 + $0x36c] sm:$0xf0]  ;;  %v11022_v50 = vld [vmem:[#allocation3 + $0x354] sm:$0xf] }
 0x39f   :  { %v2603_v9 = vmul.f32 %v11504_v28, %v2593_v12  ;;  %v8991_v12 = vld [vmem:[#allocation3 + $0x268] sm:$0xf0]  ;;  %3180 = vmatpush.bf16.msra.mxu2 %v8990_v55  ;;  %v12951_v55 = vpop.f32.mrf.mxu1  ;;  %v11007_v27 = vld [vmem:[#allocation3 + $0x2dc] sm:$0xf] }
 0x3a0   :  { %v8994_v28 = vor.u32 %v10989_v23, %v8991_v12  ;;  %v9198_v23 = vor.u32 %v11043_v15, %v9197_v17  ;;  %v9199_v12 = vld [vmem:[#allocation3 + $0x3f8] sm:$0xf0]  ;;  %v11027_v17 = vld [vmem:[#allocation3 + $0x374] sm:$0xf0] }
 0x3a1   :  { %v12943_v3 = vpack.c.bf16 %v2603_v9, %v2602_v5  ;;  %v8949_v5 = vld [vmem:[#allocation3 + $0x200] sm:$0xf]  ;;  %3167 = vmatpush.bf16.msra.mxu1 %v8954_v24  ;;  %v11035_v24 = vld [vmem:[#allocation3 + $0x3b4] sm:$0xf0] }
 0x3a2   :  { %v10984_v9 = vld [vmem:[#allocation3 + $0x21c] sm:$0xf0]  ;;  %3194 = vmatpush.bf16.msra.mxu3 %v8994_v28  ;;  %v9157_v28 = vld [vmem:[#allocation3 + $0x390] sm:$0xf]  ;;  %v9166_v51 = vor.u32 %v11035_v24, %v9165_v49  ;;  %v11014_v49 = vld [vmem:[#allocation3 + $0x314] sm:$0xf] }
 0x3a3   :  { %14785 = vst [vmem:[#allocation64_spill] sm:$0xff] %v12943_v3  ;;  %2669 = vmatmul.bf16.vlgmr.msrb.gmra.mxu0 %v12943_v3  ;;  %2683 = vmatmul.bf16.vlgmr.msrb.gmra.mxu1 %v12943_v3  ;;  %v8950_v44 = vor.u32 %v10984_v9, %v8949_v5  ;;  %v11034_v5 = vld [vmem:[#allocation3 + $0x3ac] sm:$0xf0]  ;;  %v9202_v9 = vor.u32 %v11039_v22, %v9199_v12  ;;  %v9135_v12 = vld [vmem:[#allocation3 + $0x378] sm:$0xf0] }
 0x3a4   :  { %2697 = vmatmul.bf16.vlgmr.msrb.gmra.mxu2 %v12943_v3  ;;  %2711 = vmatmul.bf16.vlgmr.msrb.gmra.mxu3 %v12943_v3  ;;  %v9158_v20 = vor.u32 %v11034_v5, %v9157_v28  ;;  %v12953_v28 = vpop.f32.mrf.mxu2  ;;  %v12955_v5 = vpop.f32.mrf.mxu3  ;;  %v9101_v24 = vld [vmem:[#allocation3 + $0x318] sm:$0xf]  ;;  %v8997_v3 = vld [vmem:[#allocation3 + $0x250] sm:$0xf] }
 0x3a5   :  { %3153 = vmatpush.bf16.msra.mxu0 %v8950_v44  ;;  %3181 = vmatpush.bf16.msra.mxu2 %v8958_v34  ;;  %v11030_v44 = vld [vmem:[#allocation3 + $0x394] sm:$0xf]  ;;  %v11031_v34 = vld [vmem:[#allocation3 + $0x39c] sm:$0xf] }
 0x3a6   :  { %3195 = vmatpush.bf16.msra.mxu3 %v8962_v54  ;;  %3216 = vmatpush.bf16.msrb.mxu1 %v9194_v32  ;;  %v9162_v26 = vor.u32 %v11030_v44, %v9159_v31  ;;  %v9170_v53 = vor.u32 %v11031_v34, %v9167_v33  ;;  %v9125_v54 = vld [vmem:[#allocation3 + $0x350] sm:$0xf]  ;;  %v9133_v32 = vld [vmem:[#allocation3 + $0x358] sm:$0xf]  ;;  %v12957_v33 = vpop.f32.mrf.mxu0 }
 0x3a7   :  { %v9126_v1 = vor.u32 %v11026_v37, %v9125_v54  ;;  %v9134_v22 = vor.u32 %v11027_v17, %v9133_v32  ;;  %v9093_v44 = vld [vmem:[#allocation3 + $0x310] sm:$0xf]  ;;  %v11019_v34 = vld [vmem:[#allocation3 + $0x334] sm:$0xf0] }
 0x3a8   :  { %v11018_v31 = vld [vmem:[#allocation3 + $0x32c] sm:$0xf0]  ;;  %v9102_v37 = vor.u32 %v11019_v34, %v9101_v24 }
 0x3a9   :  { %3202 = vmatpush.bf16.msrb.mxu0 %v9190_v10  ;;  %3230 = vmatpush.bf16.msrb.mxu2 %v9198_v23  ;;  %v9127_v10 = vld [vmem:[#allocation3 + $0x370] sm:$0xf0]  ;;  %v11023_v23 = vld [vmem:[#allocation3 + $0x35c] sm:$0xf]  ;;  %v9061_v32 = vld [vmem:[#allocation3 + $0x2d0] sm:$0xf] }
 0x3aa   :  { %3244 = vmatpush.bf16.msrb.mxu3 %v9202_v9  ;;  %3217 = vmatpush.bf16.msrb.mxu1 %v9162_v26  ;;  %v9130_v15 = vor.u32 %v11022_v50, %v9127_v10  ;;  %v9138_v9 = vor.u32 %v11023_v23, %v9135_v12  ;;  %v9095_v26 = vld [vmem:[#allocation3 + $0x330] sm:$0xf0]  ;;  %v11015_v50 = vld [vmem:[#allocation3 + $0x31c] sm:$0xf]  ;;  %v11010_v17 = vld [vmem:[#allocation3 + $0x2ec] sm:$0xf0] }
 0x3ab   :  { %v9098_v54 = vor.u32 %v11014_v49, %v9095_v26  ;;  %v9103_v10 = vld [vmem:[#allocation3 + $0x338] sm:$0xf0]  ;;  %v11006_v23 = vld [vmem:[#allocation3 + $0x2d4] sm:$0xf]  ;;  %v9069_v12 = vld [vmem:[#allocation3 + $0x2d8] sm:$0xf] }
 0x3ac   :  { %v9029_v26 = vld [vmem:[#allocation3 + $0x290] sm:$0xf]  ;;  %v12961_v34 = vpop.f32.mrf.mxu2 }
 0x3ad   :  { %3203 = vmatpush.bf16.msrb.mxu0 %v9158_v20  ;;  %3231 = vmatpush.bf16.msrb.mxu2 %v9166_v51  ;;  %v9094_v20 = vor.u32 %v11018_v31, %v9093_v44  ;;  %v12959_v51 = vpop.f32.mrf.mxu1  ;;  %v11011_v44 = vld [vmem:[#allocation3 + $0x2f4] sm:$0xf0]  ;;  %v11002_v24 = vld [vmem:[#allocation3 + $0x2ac] sm:$0xf0] }
 0x3ae   :  { %3245 = vmatpush.bf16.msrb.mxu3 %v9170_v53  ;;  %3218 = vmatpush.bf16.msrb.mxu1 %v9130_v15  ;;  %v9106_v53 = vor.u32 %v11015_v50, %v9103_v10  ;;  %v9063_v15 = vld [vmem:[#allocation3 + $0x2f0] sm:$0xf0]  ;;  %v9070_v45 = vor.u32 %v11011_v44, %v9069_v12  ;;  %v12963_v50 = vpop.f32.mrf.mxu3  ;;  %v9037_v10 = vld [vmem:[#allocation3 + $0x298] sm:$0xf] }
 0x3af   :  { %v9066_v31 = vor.u32 %v11006_v23, %v9063_v15 }
 0x3b1   :  { %3204 = vmatpush.bf16.msrb.mxu0 %v9126_v1  ;;  %3232 = vmatpush.bf16.msrb.mxu2 %v9134_v22  ;;  %v9062_v1 = vor.u32 %v11010_v17, %v9061_v32  ;;  %v9071_v22 = vld [vmem:[#allocation3 + $0x2f8] sm:$0xf0]  ;;  %v11003_v32 = vld [vmem:[#allocation3 + $0x2b4] sm:$0xf0] }
 0x3b2   :  { %3246 = vmatpush.bf16.msrb.mxu3 %v9138_v9  ;;  %3219 = vmatpush.bf16.msrb.mxu1 %v9098_v54  ;;  %v9074_v49 = vor.u32 %v11007_v27, %v9071_v22  ;;  %v10998_v9 = vld [vmem:[#allocation3 + $0x294] sm:$0xf]  ;;  %v9038_v15 = vor.u32 %v11003_v32, %v9037_v10  ;;  %v9039_v27 = vld [vmem:[#allocation3 + $0x2b8] sm:$0xf0]  ;;  %v10995_v10 = vld [vmem:[#allocation3 + $0x274] sm:$0xf0] }
 0x3b3   :  { %v9031_v54 = vld [vmem:[#allocation3 + $0x2b0] sm:$0xf0] }
 0x3b4   :  { %v9034_v23 = vor.u32 %v10998_v9, %v9031_v54  ;;  %v8999_v9 = vld [vmem:[#allocation3 + $0x270] sm:$0xf0]  ;;  %v9005_v54 = vld [vmem:[#allocation3 + $0x258] sm:$0xf] }
 0x3b5   :  { %3205 = vmatpush.bf16.msrb.mxu0 %v9094_v20  ;;  %3233 = vmatpush.bf16.msrb.mxu2 %v9102_v37  ;;  %v9030_v20 = vor.u32 %v11002_v24, %v9029_v26  ;;  %v14786_v26 = vld [vmem:[#allocation159_spill] sm:$0xff] }
 0x3b6   :  { %3247 = vmatpush.bf16.msrb.mxu3 %v9106_v53  ;;  %3220 = vmatpush.bf16.msrb.mxu1 %v9066_v31  ;;  %v10999_v53 = vld [vmem:[#allocation3 + $0x29c] sm:$0xf]  ;;  %v10990_v31 = vld [vmem:[#allocation3 + $0x254] sm:$0xf] }
 0x3b7   :  { %v9042_v22 = vor.u32 %v10999_v53, %v9039_v27  ;;  %v9002_v32 = vor.u32 %v10990_v31, %v8999_v9  ;;  %v8965_v27 = vld [vmem:[#allocation3 + $0x210] sm:$0xf] }
 0x3b9   :  { %3206 = vmatpush.bf16.msrb.mxu0 %v9062_v1  ;;  %3234 = vmatpush.bf16.msrb.mxu2 %v9070_v45  ;;  %v10994_v1 = vld [vmem:[#allocation3 + $0x26c] sm:$0xf0] }
 0x3ba   :  { %3248 = vmatpush.bf16.msrb.mxu3 %v9074_v49  ;;  %3221 = vmatpush.bf16.msrb.mxu1 %v9034_v23  ;;  %v8998_v45 = vor.u32 %v10994_v1, %v8997_v3  ;;  %v8966_v3 = vor.u32 %v10986_v8, %v8965_v27  ;;  %v8967_v23 = vld [vmem:[#allocation3 + $0x230] sm:$0xf0]  ;;  %v8973_v1 = vld [vmem:[#allocation3 + $0x218] sm:$0xf]  ;;  %v14788_v8 = vld [vmem:[#allocation161_spill] sm:$0xff] }
 0x3bd   :  { %3207 = vmatpush.bf16.msrb.mxu0 %v9030_v20  ;;  %3235 = vmatpush.bf16.msrb.mxu2 %v9038_v15  ;;  %v10987_v15 = vld [vmem:[#allocation3 + $0x234] sm:$0xf0] }
 0x3be   :  { %3249 = vmatpush.bf16.msrb.mxu3 %v9042_v22  ;;  %3222 = vmatpush.bf16.msrb.mxu1 %v9002_v32  ;;  %v10983_v22 = vld [vmem:[#allocation3 + $0x21c] sm:$0xf] }
 0x3c1   :  { %3208 = vmatpush.bf16.msrb.mxu0 %v8998_v45  ;;  %v8974_v45 = vor.u32 %v10987_v15, %v8973_v1 }
 0x3c5   :  { %3209 = vmatpush.bf16.msrb.mxu0 %v8966_v3 }
 0x420   :  { %v2670_v37 = vpop.f32.mrf.mxu0  ;;  %v2684_v17 = vpop.f32.mrf.mxu1 }
 0x421   :  { %v2671_v12 = vadd.f32 %v2670_v37, %v12949_v0  ;;  %v2685_v44 = vadd.f32 %v2684_v17, %v12951_v55  ;;  %v9006_v0 = vor.u32 %v10995_v10, %v9005_v54  ;;  %v10991_v37 = vld [vmem:[#allocation3 + $0x25c] sm:$0xf] }
 0x422   :  { %v9007_v55 = vld [vmem:[#allocation3 + $0x278] sm:$0xf0] }
 0x423   :  { %v2717_v24 = vadd.f32 %v2671_v12, %v14786_v26  ;;  %v2718_v59 = vadd.f32 %v2685_v44, %v14787_v21  ;;  %v9010_v53 = vor.u32 %v10991_v37, %v9007_v55  ;;  %v10982_v12 = vld [vmem:[#allocation3 + $0x214] sm:$0xf]  ;;  %3236 = vmatpush.bf16.msrb.mxu2 %v9006_v0  ;;  %v8975_v54 = vld [vmem:[#allocation3 + $0x238] sm:$0xf0] }
 0x424   :  { %v8978_v32 = vor.u32 %v10983_v22, %v8975_v54 }
 0x425   :  { %v2725_v49 = vmul.f32 0.5, %v2717_v24  ;;  %v2733_v17 = vmul.f32 0.5, %v2718_v59  ;;  %v8970_v59 = vor.u32 %v10982_v12, %v8967_v23  ;;  %3250 = vmatpush.bf16.msrb.mxu3 %v9010_v53  ;;  %v14789_v12 = vld [vmem:[#allocation162_spill] sm:$0xff] }
 0x427   :  { %11505 = vtanh.f32 %v2725_v49  ;;  %v2698_v44 = vpop.f32.mrf.mxu2  ;;  %v2712_v20 = vpop.f32.mrf.mxu3  ;;  %3223 = vmatpush.bf16.msrb.mxu1 %v8970_v59  ;;  %3237 = vmatpush.bf16.msrb.mxu2 %v8974_v45 }
 0x428   :  { %11507 = vtanh.f32 %v2733_v17  ;;  %v2699_v31 = vadd.f32 %v2698_v44, %v12953_v28  ;;  %v2672_v9 = vpop.f32.mrf.mxu0  ;;  %v2686_v24 = vpop.f32.mrf.mxu1  ;;  %v2713_v49 = vadd.f32 %v2712_v20, %v12955_v5 }
 0x429   :  { %v2673_v10 = vadd.f32 %v2672_v9, %v12957_v33  ;;  %v2687_v37 = vadd.f32 %v2686_v24, %v12959_v51  ;;  %3251 = vmatpush.bf16.msrb.mxu3 %v8978_v32 }
 0x42a   :  { %v2719_v55 = vadd.f32 %v2699_v31, %v14788_v8  ;;  %v2720_v44 = vadd.f32 %v2713_v49, %v14789_v12 }
 0x42b   :  { %v2721_v17 = vadd.f32 %v2673_v10, %v14786_v26  ;;  %v2722_v28 = vadd.f32 %v2687_v37, %v14787_v21  ;;  %v14790_v37 = vld [vmem:[#allocation163_spill] sm:$0xff] }
 0x42c   :  { %11509 = vtanh.f32 %v2719_v55  ;;  %v2743_v24 = vmul.f32 0.5, %v2720_v44 }
 0x42d   :  { %v11506_v0 = vpop.eup %11505  ;;  %v2726_v27 = vmul.f32 0.5, %v2721_v17  ;;  %v2734_v33 = vmul.f32 0.5, %v2722_v28 }
 0x42e   :  { %v11508_v51 = vpop.eup %11507  ;;  %v2729_v53 = vmul.f32 0.5, %v11506_v0 }
 0x42f   :  { %v2737_v23 = vmul.f32 0.5, %v11508_v51  ;;  %11511 = vtanh.f32 %v2726_v27  ;;  %v2700_v1 = vpop.f32.mrf.mxu2  ;;  %v2714_v5 = vpop.f32.mrf.mxu3  ;;  %v14791_v27 = vld [vmem:[#allocation164_spill] sm:$0xff] }
 0x430   :  { %11513 = vtanh.f32 %v2734_v33  ;;  %v2701_v20 = vadd.f32 %v2700_v1, %v12961_v34  ;;  %v2715_v3 = vadd.f32 %v2714_v5, %v12963_v50  ;;  %v2731_v15 = vadd.f32 0.5, %v2729_v53 }
 0x431   :  { %v2739_v31 = vadd.f32 0.5, %v2737_v23 }
 0x432   :  { %v11510_v9 = vpop.eup %11509  ;;  %v2723_v59 = vadd.f32 %v2701_v20, %v14788_v8  ;;  %v2724_v22 = vadd.f32 %v2715_v3, %v14789_v12 }
 0x433   :  { %v2751_v45 = vmul.f32 %v2739_v31, %v14790_v37  ;;  %v2753_v32 = vmul.f32 %v11510_v9, %v2731_v15  ;;  %v14795_v37 = vld [vmem:[#allocation82_spill] sm:$0xff] }
 0x434   :  { %11515 = vtanh.f32 %v2723_v59  ;;  %v2744_v54 = vmul.f32 0.5, %v2724_v22  ;;  %v14792_v22 = vld [vmem:[#allocation79_spill] sm:$0xff] }
 0x435   :  { %v11512_v10 = vpop.eup %11511  ;;  %11517 = vtanh.f32 %v2743_v24  ;;  %v12982_v17 = vadd.f32 %v2753_v32, %v2751_v45  ;;  %v14796_v45 = vld [vmem:[#allocation64_spill] sm:$0xff]  ;;  %v14797_v32 = vld [vmem:[#allocation83_spill] sm:$0xff] }
 0x436   :  { %v11514_v55 = vpop.eup %11513  ;;  %v2730_v49 = vmul.f32 0.5, %v11512_v10  ;;  %11519 = vtanh.f32 %v2744_v54  ;;  %v14793_v54 = vld [vmem:[#allocation80_spill] sm:$0xff]  ;;  %v14794_v10 = vld [vmem:[#allocation81_spill] sm:$0xff] }
 0x437   :  { %v2738_v34 = vmul.f32 0.5, %v11514_v55  ;;  %11521 = vtanh.f32 %v12982_v17  ;;  %v14798_v55 = vld [vmem:[#allocation84_spill] sm:$0xff] }
 0x438   :  { %v2732_v50 = vadd.f32 0.5, %v2730_v49  ;;  %v14799_v49 = vld [vmem:[#allocation85_spill] sm:$0xff] }
 0x439   :  { %v2740_v28 = vadd.f32 0.5, %v2738_v34  ;;  %v14800_v34 = vld [vmem:[#allocation86_spill] sm:$0xff] }
 0x43a   :  { %v11516_v0 = vpop.eup %11515 }
 0x43b   :  { %v2752_v33 = vmul.f32 %v2740_v28, %v14791_v27  ;;  %v2754_v51 = vmul.f32 %v11516_v0, %v2732_v50  ;;  %v11518_v53 = vpop.eup %11517  ;;  %v14801_v50 = vld [vmem:[#allocation89_spill] sm:$0xff]  ;;  %v14802_v28 = vld [vmem:[#allocation90_spill] sm:$0xff]  ;;  %v14803_v0 = vld [vmem:[#allocation91_spill] sm:$0xff] }
 0x43c   :  { %v11520_v44 = vpop.eup %11519  ;;  %v2747_v1 = vmul.f32 0.5, %v11518_v53  ;;  %v14804_v27 = vld [vmem:[#allocation92_spill] sm:$0xff]  ;;  %v14807_v53 = vld [vmem:[#allocation95_spill] sm:$0xff] }
 0x43d   :  { %v12986_v23 = vadd.f32 %v2754_v51, %v2752_v33  ;;  %v2748_v5 = vmul.f32 0.5, %v11520_v44  ;;  %v11522_v20 = vpop.eup %11521  ;;  %v14805_v33 = vld [vmem:[#allocation93_spill] sm:$0xff]  ;;  %v14806_v51 = vld [vmem:[#allocation94_spill] sm:$0xff]  ;;  %v14808_v44 = vld [vmem:[#allocation96_spill] sm:$0xff] }
 0x43e   :  { %v2749_v3 = vadd.f32 0.5, %v2747_v1  ;;  %v14809_v1 = vld [vmem:[#allocation99_spill] sm:$0xff] }
 0x43f   :  { %11523 = vtanh.f32 %v12986_v23  ;;  %v2750_v15 = vadd.f32 0.5, %v2748_v5  ;;  %v14810_v5 = vld [vmem:[#allocation100_spill] sm:$0xff] }
 0x440   :  { %v2759_v9 = vmul.f32 %v11522_v20, %v2749_v3  ;;  %v14811_v20 = vld [vmem:[#allocation101_spill] sm:$0xff]  ;;  %v14812_v3 = vld [vmem:[#allocation102_spill] sm:$0xff] }
 0x445   :  { %v11524_v31 = vpop.eup %11523 }
 0x446   :  { %v2760_v24 = vmul.f32 %v11524_v31, %v2750_v15  ;;  %v14813_v15 = vld [vmem:[#allocation103_spill] sm:$0xff]  ;;  %v14814_v31 = vld [vmem:[#allocation104_spill] sm:$0xff] }
 0x448   :  { %v12989_v59 = vpack.c.bf16 %v2760_v24, %v2759_v9  ;;  %v14815_v9 = vld [vmem:[#allocation105_spill] sm:$0xff]  ;;  %v14816_v24 = vld [vmem:[#allocation106_spill] sm:$0xff] }
 0x44a   :  { %3154 = vmatmul.bf16.vlgmr.msra.gmra.mxu0 %v12989_v59  ;;  %3168 = vmatmul.bf16.vlgmr.msra.gmra.mxu1 %v12989_v59 }
 0x44b   :  { %3182 = vmatmul.bf16.vlgmr.msra.gmra.mxu2 %v12989_v59  ;;  %3196 = vmatmul.bf16.vlgmr.msra.gmra.mxu3 %v12989_v59 }
 0x44c   :  { %3282 = vmatpush.bf16.msra.mxu0 %v12188_v36  ;;  %3296 = vmatpush.bf16.msra.mxu1 %v12190_v40 }
 0x44d   :  { %3310 = vmatpush.bf16.msra.mxu2 %v12192_v43  ;;  %3324 = vmatpush.bf16.msra.mxu3 %v12197_v52 }
 0x450   :  { %3283 = vmatpush.bf16.msra.mxu0 %v12208_v58  ;;  %3297 = vmatpush.bf16.msra.mxu1 %v12210_v13 }
 0x451   :  { %3311 = vmatpush.bf16.msra.mxu2 %v12212_v14  ;;  %3325 = vmatpush.bf16.msra.mxu3 %v12219_v18 }
 0x454   :  { %3284 = vmatpush.bf16.msra.mxu0 %v12235_v30  ;;  %3298 = vmatpush.bf16.msra.mxu1 %v12237_v38 }
 0x455   :  { %3312 = vmatpush.bf16.msra.mxu2 %v12239_v39  ;;  %3326 = vmatpush.bf16.msra.mxu3 %v12250_v56 }
 0x458   :  { %3285 = vmatpush.bf16.msra.mxu0 %v12263_v29  ;;  %3299 = vmatpush.bf16.msra.mxu1 %v12265_v2 }
 0x459   :  { %3313 = vmatpush.bf16.msra.mxu2 %v12267_v46  ;;  %3327 = vmatpush.bf16.msra.mxu3 %v12278_v62 }
 0x45a   :  { %3210 = vmatmul.bf16.vlgmr.msrb.gmra.mxu0 %v12989_v59  ;;  %3224 = vmatmul.bf16.vlgmr.msrb.gmra.mxu1 %v12989_v59 }
 0x45b   :  { %3238 = vmatmul.bf16.vlgmr.msrb.gmra.mxu2 %v12989_v59  ;;  %3252 = vmatmul.bf16.vlgmr.msrb.gmra.mxu3 %v12989_v59 }
 0x45c   :  { %3286 = vmatpush.bf16.msra.mxu0 %v12291_v7  ;;  %3300 = vmatpush.bf16.msra.mxu1 %v12293_v61 }
 0x45d   :  { %3314 = vmatpush.bf16.msra.mxu2 %v12295_v63  ;;  %3328 = vmatpush.bf16.msra.mxu3 %v12306_v47 }
 0x460   :  { %3287 = vmatpush.bf16.msra.mxu0 %v12319_v35  ;;  %3301 = vmatpush.bf16.msra.mxu1 %v12321_v42 }
 0x461   :  { %3315 = vmatpush.bf16.msra.mxu2 %v12323_v11  ;;  %3329 = vmatpush.bf16.msra.mxu3 %v12334_v48 }
 0x464   :  { %3288 = vmatpush.bf16.msra.mxu0 %v12347_v60  ;;  %3302 = vmatpush.bf16.msra.mxu1 %v12349_v41 }
 0x465   :  { %3316 = vmatpush.bf16.msra.mxu2 %v12351_v4  ;;  %3330 = vmatpush.bf16.msra.mxu3 %v12362_v57 }
 0x468   :  { %3289 = vmatpush.bf16.msra.mxu0 %v12375_v25  ;;  %3303 = vmatpush.bf16.msra.mxu1 %v12377_v6  ;;  %v9253_v6 = vld [vmem:[#allocation3 + $0x450] sm:$0xf] }
 0x469   :  { %3317 = vmatpush.bf16.msra.mxu2 %v12379_v16  ;;  %3331 = vmatpush.bf16.msra.mxu3 %v14691_v19  ;;  %v9407_v19 = vld [vmem:[#allocation3 + $0x5a8] sm:$0xf0]  ;;  %v11071_v16 = vld [vmem:[#allocation3 + $0x4dc] sm:$0xf]  ;;  %v11050_v25 = vld [vmem:[#allocation3 + $0x42c] sm:$0xf0] }
 0x46b   :  { %3290 = vmatmul.bf16.vlgmr.msra.gmra.mxu0 %v14796_v45  ;;  %3304 = vmatmul.bf16.vlgmr.msra.gmra.mxu1 %v14796_v45 }
 0x46c   :  { %3383 = vmatpush.bf16.msrb.mxu0 %v14792_v22  ;;  %3397 = vmatpush.bf16.msrb.mxu1 %v14793_v54  ;;  %v11097_v54 = vld [vmem:[#allocation3 + $0x5a4] sm:$0xf0]  ;;  %v11093_v22 = vld [vmem:[#allocation3 + $0x58c] sm:$0xf] }
 0x46d   :  { %3411 = vmatpush.bf16.msrb.mxu2 %v14794_v10  ;;  %3425 = vmatpush.bf16.msrb.mxu3 %v14795_v37  ;;  %v14896_v10 = vld [vmem:[#allocation70_spill] sm:$0xff] }
 0x46e   :  { %3318 = vmatmul.bf16.vlgmr.msra.gmra.mxu2 %v14796_v45  ;;  %3332 = vmatmul.bf16.vlgmr.msra.gmra.mxu3 %v14796_v45  ;;  %v14817_v45 = vld [vmem:[#allocation109_spill] sm:$0xff] }
 0x470   :  { %3384 = vmatpush.bf16.msrb.mxu0 %v14797_v32  ;;  %3398 = vmatpush.bf16.msrb.mxu1 %v14798_v55 }
 0x471   :  { %3412 = vmatpush.bf16.msrb.mxu2 %v14799_v49  ;;  %3426 = vmatpush.bf16.msrb.mxu3 %v14800_v34 }
 0x474   :  { %3385 = vmatpush.bf16.msrb.mxu0 %v14801_v50  ;;  %3399 = vmatpush.bf16.msrb.mxu1 %v14802_v28 }
 0x475   :  { %3413 = vmatpush.bf16.msrb.mxu2 %v14803_v0  ;;  %3427 = vmatpush.bf16.msrb.mxu3 %v14804_v27  ;;  %v14867_v0 = vld [vmem:[#allocation167_spill] sm:$0xff] }
 0x478   :  { %3386 = vmatpush.bf16.msrb.mxu0 %v14805_v33  ;;  %3400 = vmatpush.bf16.msrb.mxu1 %v14806_v51  ;;  %v14861_v51 = vld [vmem:[#allocation165_spill] sm:$0xff] }
 0x479   :  { %3414 = vmatpush.bf16.msrb.mxu2 %v14807_v53  ;;  %3428 = vmatpush.bf16.msrb.mxu3 %v14808_v44  ;;  %v14818_v53 = vld [vmem:[#allocation110_spill] sm:$0xff]  ;;  %v14819_v44 = vld [vmem:[#allocation111_spill] sm:$0xff] }
 0x47c   :  { %3387 = vmatpush.bf16.msrb.mxu0 %v14809_v1  ;;  %3401 = vmatpush.bf16.msrb.mxu1 %v14810_v5  ;;  %v14820_v1 = vld [vmem:[#allocation112_spill] sm:$0xff]  ;;  %v14821_v5 = vld [vmem:[#allocation113_spill] sm:$0xff] }
 0x47d   :  { %3415 = vmatpush.bf16.msrb.mxu2 %v14811_v20  ;;  %3429 = vmatpush.bf16.msrb.mxu3 %v14812_v3  ;;  %v14822_v20 = vld [vmem:[#allocation114_spill] sm:$0xff]  ;;  %v14823_v3 = vld [vmem:[#allocation115_spill] sm:$0xff] }
 0x480   :  { %3388 = vmatpush.bf16.msrb.mxu0 %v14813_v15  ;;  %3402 = vmatpush.bf16.msrb.mxu1 %v14814_v31  ;;  %v14824_v15 = vld [vmem:[#allocation116_spill] sm:$0xff]  ;;  %v14825_v31 = vld [vmem:[#allocation118_spill] sm:$0xff] }
 0x481   :  { %3416 = vmatpush.bf16.msrb.mxu2 %v14815_v9  ;;  %3430 = vmatpush.bf16.msrb.mxu3 %v14816_v24  ;;  %v14826_v9 = vld [vmem:[#allocation119_spill] sm:$0xff]  ;;  %v14859_v24 = vld [vmem:[#allocation158_spill] sm:$0xff] }
 0x484   :  { %3389 = vmatpush.bf16.msrb.mxu0 %v14817_v45  ;;  %3403 = vmatpush.bf16.msrb.mxu1 %v14818_v53  ;;  %v14835_v53 = vld [vmem:[#allocation130_spill] sm:$0xff]  ;;  %v14836_v45 = vld [vmem:[#allocation132_spill] sm:$0xff] }
 0x485   :  { %3417 = vmatpush.bf16.msrb.mxu2 %v14819_v44  ;;  %3431 = vmatpush.bf16.msrb.mxu3 %v14820_v1  ;;  %v14827_v1 = vld [vmem:[#allocation121_spill] sm:$0xff] }
 0x486   :  { %v14834_v44 = vld [vmem:[#allocation129_spill] sm:$0xff] }
 0x488   :  { %3390 = vmatpush.bf16.msrb.mxu0 %v14821_v5  ;;  %3404 = vmatpush.bf16.msrb.mxu1 %v14822_v20  ;;  %v14828_v5 = vld [vmem:[#allocation122_spill] sm:$0xff]  ;;  %v14829_v20 = vld [vmem:[#allocation123_spill] sm:$0xff] }
 0x489   :  { %3418 = vmatpush.bf16.msrb.mxu2 %v14823_v3  ;;  %3432 = vmatpush.bf16.msrb.mxu3 %v14824_v15  ;;  %v14830_v3 = vld [vmem:[#allocation124_spill] sm:$0xff]  ;;  %v14831_v15 = vld [vmem:[#allocation125_spill] sm:$0xff] }
 0x48b   :  { %3391 = vmatmul.bf16.vlgmr.msrb.gmra.mxu0 %v12989_v59  ;;  %3405 = vmatmul.bf16.vlgmr.msrb.gmra.mxu1 %v12989_v59 }
 0x48c   :  { %3439 = vmatpush.bf16.msra.mxu0 %v14825_v31  ;;  %3453 = vmatpush.bf16.msra.mxu1 %v14826_v9  ;;  %v14832_v31 = vld [vmem:[#allocation126_spill] sm:$0xff]  ;;  %v14833_v9 = vld [vmem:[#allocation127_spill] sm:$0xff] }
 0x48d   :  { %3419 = vmatmul.bf16.vlgmr.msrb.gmra.mxu2 %v12989_v59  ;;  %3433 = vmatmul.bf16.vlgmr.msrb.gmra.mxu3 %v12989_v59  ;;  %v14837_v59 = vld [vmem:[#allocation133_spill] sm:$0xff] }
 0x48e   :  { %3467 = vmatpush.bf16.msra.mxu2 %v14827_v1  ;;  %3481 = vmatpush.bf16.msra.mxu3 %v14828_v5  ;;  %v14838_v1 = vld [vmem:[#allocation134_spill] sm:$0xff]  ;;  %v14839_v5 = vld [vmem:[#allocation135_spill] sm:$0xff] }
 0x490   :  { %3440 = vmatpush.bf16.msra.mxu0 %v14829_v20  ;;  %3454 = vmatpush.bf16.msra.mxu1 %v14830_v3  ;;  %v14840_v20 = vld [vmem:[#allocation136_spill] sm:$0xff]  ;;  %v14841_v3 = vld [vmem:[#allocation137_spill] sm:$0xff] }
 0x492   :  { %3468 = vmatpush.bf16.msra.mxu2 %v14831_v15  ;;  %3482 = vmatpush.bf16.msra.mxu3 %v14832_v31  ;;  %v14842_v15 = vld [vmem:[#allocation139_spill] sm:$0xff]  ;;  %v14843_v31 = vld [vmem:[#allocation140_spill] sm:$0xff] }
 0x494   :  { %3441 = vmatpush.bf16.msra.mxu0 %v14833_v9  ;;  %3455 = vmatpush.bf16.msra.mxu1 %v14834_v44  ;;  %v14844_v9 = vld [vmem:[#allocation142_spill] sm:$0xff]  ;;  %v14845_v44 = vld [vmem:[#allocation143_spill] sm:$0xff] }
 0x496   :  { %3469 = vmatpush.bf16.msra.mxu2 %v14835_v53  ;;  %3483 = vmatpush.bf16.msra.mxu3 %v14836_v45  ;;  %v14846_v53 = vld [vmem:[#allocation144_spill] sm:$0xff]  ;;  %v14847_v45 = vld [vmem:[#allocation145_spill] sm:$0xff] }
 0x498   :  { %3442 = vmatpush.bf16.msra.mxu0 %v14837_v59  ;;  %3456 = vmatpush.bf16.msra.mxu1 %v14838_v1  ;;  %v14848_v59 = vld [vmem:[#allocation146_spill] sm:$0xff]  ;;  %v14849_v1 = vld [vmem:[#allocation147_spill] sm:$0xff] }
 0x49a   :  { %3470 = vmatpush.bf16.msra.mxu2 %v14839_v5  ;;  %3484 = vmatpush.bf16.msra.mxu3 %v14840_v20  ;;  %v14850_v5 = vld [vmem:[#allocation149_spill] sm:$0xff]  ;;  %v14851_v20 = vld [vmem:[#allocation150_spill] sm:$0xff] }
 0x49c   :  { %3443 = vmatpush.bf16.msra.mxu0 %v14841_v3  ;;  %3457 = vmatpush.bf16.msra.mxu1 %v14842_v15  ;;  %v14852_v3 = vld [vmem:[#allocation151_spill] sm:$0xff]  ;;  %v14853_v15 = vld [vmem:[#allocation152_spill] sm:$0xff] }
 0x49e   :  { %3471 = vmatpush.bf16.msra.mxu2 %v14843_v31  ;;  %3485 = vmatpush.bf16.msra.mxu3 %v14844_v9  ;;  %v14854_v31 = vld [vmem:[#allocation153_spill] sm:$0xff]  ;;  %v14855_v9 = vld [vmem:[#allocation154_spill] sm:$0xff] }
 0x4a0   :  { %3444 = vmatpush.bf16.msra.mxu0 %v14845_v44  ;;  %3458 = vmatpush.bf16.msra.mxu1 %v14846_v53  ;;  %v14856_v44 = vld [vmem:[#allocation155_spill] sm:$0xff] }
 0x4a1   :  { %v14857_v53 = vld [vmem:[#allocation31_spill] sm:$0xff] }
 0x4a2   :  { %3472 = vmatpush.bf16.msra.mxu2 %v14847_v45  ;;  %3486 = vmatpush.bf16.msra.mxu3 %v14848_v59  ;;  %v14858_v45 = vperm.slane %v14857_v53, 0 }
 0x4a4   :  { %3445 = vmatpush.bf16.msra.mxu0 %v14849_v1  ;;  %3459 = vmatpush.bf16.msra.mxu1 %v14850_v5  ;;  %v2480_v59 = vadd.f32 %v14859_v24, %v14858_v45  ;;  %v14860_v1 = vperm.slane %v14857_v53, 1 }
 0x4a6   :  { %3473 = vmatpush.bf16.msra.mxu2 %v14851_v20  ;;  %3487 = vmatpush.bf16.msra.mxu3 %v14852_v3  ;;  %v2481_v5 = vadd.f32 %v14861_v51, %v14860_v1  ;;  %v14872_v1 = vperm.slane %v14857_v53, 4 }
 0x4a8   :  { %3446 = vmatpush.bf16.msra.mxu0 %v14853_v15  ;;  %3460 = vmatpush.bf16.msra.mxu1 %v14854_v31  ;;  %v14864_v31 = vperm.slane %v14857_v53, 2  ;;  %v14865_v15 = vld [vmem:[#allocation166_spill] sm:$0xff] }
 0x4aa   :  { %3474 = vmatpush.bf16.msra.mxu2 %v14855_v9  ;;  %3488 = vmatpush.bf16.msra.mxu3 %v14856_v44  ;;  %v2482_v9 = vadd.f32 %v14865_v15, %v14864_v31  ;;  %v14866_v44 = vperm.slane %v14857_v53, 3  ;;  %v14874_v15 = vperm.slane %v14857_v53, 5  ;;  %v14875_v31 = vld [vmem:[#allocation173_spill] sm:$0xff] }
 0x4ac   :  { %v2483_v28 = vadd.f32 %v14867_v0, %v14866_v44 }
 0x4c7   :  { %v3155_v33 = vpop.f32.mrf.mxu0  ;;  %v3169_v20 = vpop.f32.mrf.mxu1 }
 0x4c8   :  { %v13109_v27 = vadd.f32 %v3155_v33, %v2480_v59  ;;  %v13111_v3 = vadd.f32 %v3169_v20, %v2481_v5  ;;  %v14873_v5 = vld [vmem:[#allocation172_spill] sm:$0xff]  ;;  %v2485_v59 = vadd.f32 %v14875_v31, %v14874_v15 }
 0x4c9   :  { %v2484_v20 = vadd.f32 %v14873_v5, %v14872_v1  ;;  %v14882_v1 = vperm.slane %v14857_v53, 7  ;;  %v14883_v5 = vld [vmem:[#allocation175_spill] sm:$0xff] }
 0x4ca   :  { %14862 = vst [vmem:[#allocation34_spill] sm:$0xff] %v13109_v27  ;;  %v14895_v27 = vld [vmem:[#allocation69_spill] sm:$0xff] }
 0x4cb   :  { %14863 = vst [vmem:[#allocation65_spill] sm:$0xff] %v13111_v3 }
 0x4ce   :  { %v3183_v50 = vpop.f32.mrf.mxu2  ;;  %v3197_v24 = vpop.f32.mrf.mxu3 }
 0x4cf   :  { %v13119_v45 = vadd.f32 %v3183_v50, %v2482_v9  ;;  %v13121_v34 = vadd.f32 %v3197_v24, %v2483_v28  ;;  %v13123_v51 = vpop.f32.mrf.mxu0  ;;  %v13125_v33 = vpop.f32.mrf.mxu1  ;;  %v14880_v24 = vperm.slane %v14857_v53, 6 }
 0x4d0   :  { %14870 = vst [vmem:[#allocation67_spill] sm:$0xff] %v13123_v51 }
 0x4d1   :  { %14868 = vst [vmem:[#allocation35_spill] sm:$0xff] %v13119_v45 }
 0x4d2   :  { %14869 = vst [vmem:[#allocation66_spill] sm:$0xff] %v13121_v34  ;;  %v2487_v34 = vadd.f32 %v14883_v5, %v14882_v1 }
 0x4d3   :  { %14871 = vst [vmem:[#allocation156_spill] sm:$0xff] %v13125_v33  ;;  %v14881_v33 = vld [vmem:[#allocation174_spill] sm:$0xff] }
 0x4d4   :  { %v2486_v51 = vadd.f32 %v14881_v33, %v14880_v24  ;;  %v14890_v24 = vld [vmem:[#allocation36_spill] sm:$0xff] }
 0x4d6   :  { %v13133_v3 = vpop.f32.mrf.mxu2  ;;  %v13135_v0 = vpop.f32.mrf.mxu3 }
 0x4d7   :  { %14876 = vst [vmem:[#allocation157_spill] sm:$0xff] %v13133_v3  ;;  %v3211_v50 = vpop.f32.mrf.mxu0  ;;  %v3225_v44 = vpop.f32.mrf.mxu1 }
 0x4d8   :  { %14877 = vst [vmem:[#allocation159_spill] sm:$0xff] %v13135_v0  ;;  %v13137_v28 = vadd.f32 %v3211_v50, %v2484_v20  ;;  %v13139_v9 = vadd.f32 %v3225_v44, %v2485_v59 }
 0x4da   :  { %14878 = vst [vmem:[#allocation160_spill] sm:$0xff] %v13137_v28 }
 0x4db   :  { %14879 = vst [vmem:[#allocation161_spill] sm:$0xff] %v13139_v9  ;;  %v14891_v9 = vld [vmem:[#allocation37_spill] sm:$0xff] }
 0x4de   :  { %v3239_v45 = vpop.f32.mrf.mxu2  ;;  %v3253_v15 = vpop.f32.mrf.mxu3 }
 0x4df   :  { %v13147_v31 = vadd.f32 %v3239_v45, %v2486_v51  ;;  %v13149_v3 = vadd.f32 %v3253_v15, %v2487_v34  ;;  %v13151_v0 = vpop.f32.mrf.mxu0  ;;  %v13153_v20 = vpop.f32.mrf.mxu1  ;;  %v14892_v51 = vld [vmem:[#allocation68_spill] sm:$0xff] }
 0x4e0   :  { %14886 = vst [vmem:[#allocation164_spill] sm:$0xff] %v13151_v0 }
 0x4e1   :  { %14884 = vst [vmem:[#allocation162_spill] sm:$0xff] %v13147_v31  ;;  %v14894_v31 = vld [vmem:[#allocation39_spill] sm:$0xff] }
 0x4e2   :  { %14885 = vst [vmem:[#allocation163_spill] sm:$0xff] %v13149_v3  ;;  %v14893_v3 = vld [vmem:[#allocation38_spill] sm:$0xff] }
 0x4e3   :  { %14887 = vst [vmem:[#allocation64_spill] sm:$0xff] %v13153_v20 }
 0x4e6   :  { %v13155_v59 = vpop.f32.mrf.mxu2  ;;  %v13157_v50 = vpop.f32.mrf.mxu3 }
 0x4e7   :  { %14888 = vst [vmem:[#allocation158_spill] sm:$0xff] %v13155_v59 }
 0x4e8   :  { %14889 = vst [vmem:[#allocation165_spill] sm:$0xff] %v13157_v50  ;;  %v3291_v44 = vpop.f32.mrf.mxu0  ;;  %v3305_v33 = vpop.f32.mrf.mxu1 }
 0x4e9   :  { %v3338_v53 = vadd.f32 %v3291_v44, %v14890_v24  ;;  %v3339_v1 = vadd.f32 %v3305_v33, %v14891_v9 }
 0x4eb   :  { %v3346_v5 = vmul.f32 0.5, %v3338_v53  ;;  %v3354_v28 = vmul.f32 0.5, %v3339_v1  ;;  %v9429_v1 = vld [vmem:[#allocation3 + $0x5c0] sm:$0xf] }
 0x4ed   :  { %11525 = vtanh.f32 %v3346_v5 }
 0x4ee   :  { %11527 = vtanh.f32 %v3354_v28  ;;  %v11104_v28 = vld [vmem:[#allocation3 + $0x5dc] sm:$0xf0] }
 0x4ef   :  { %v9430_v55 = vor.u32 %v11104_v28, %v9429_v1 }
 0x4f0   :  { %v3293_v0 = vpop.f32.mrf.mxu0  ;;  %v3307_v20 = vpop.f32.mrf.mxu1 }
 0x4f1   :  { %v3319_v34 = vpop.f32.mrf.mxu2  ;;  %v3333_v45 = vpop.f32.mrf.mxu3  ;;  %v3342_v59 = vadd.f32 %v3293_v0, %v14893_v3  ;;  %v3343_v50 = vadd.f32 %v3307_v20, %v14894_v31  ;;  %v9437_v0 = vld [vmem:[#allocation3 + $0x5c8] sm:$0xf]  ;;  %3924 = vmatpush.bf16.msrb.mxu0 %v9430_v55 }
 0x4f2   :  { %v3340_v15 = vadd.f32 %v3319_v34, %v14892_v51  ;;  %v3341_v49 = vadd.f32 %v3333_v45, %v14895_v27  ;;  %v11100_v34 = vld [vmem:[#allocation3 + $0x5c4] sm:$0xf]  ;;  %v11105_v31 = vld [vmem:[#allocation3 + $0x5e4] sm:$0xf0] }
 0x4f3   :  { %v11526_v44 = vpop.eup %11525  ;;  %v3347_v24 = vmul.f32 0.5, %v3342_v59  ;;  %v3355_v9 = vmul.f32 0.5, %v3343_v50  ;;  %v9431_v51 = vld [vmem:[#allocation3 + $0x5e0] sm:$0xf0]  ;;  %v9438_v59 = vor.u32 %v11105_v31, %v9437_v0  ;;  %v11101_v50 = vld [vmem:[#allocation3 + $0x5cc] sm:$0xf] }
 0x4f4   :  { %11529 = vtanh.f32 %v3340_v15  ;;  %v11528_v53 = vpop.eup %11527  ;;  %v3350_v33 = vmul.f32 0.5, %v11526_v44  ;;  %v3364_v32 = vmul.f32 0.5, %v3341_v49  ;;  %v9434_v3 = vor.u32 %v11100_v34, %v9431_v51  ;;  %v9439_v44 = vld [vmem:[#allocation3 + $0x5e8] sm:$0xf0]  ;;  %v9397_v49 = vld [vmem:[#allocation3 + $0x580] sm:$0xf] }
 0x4f5   :  { %v3358_v5 = vmul.f32 0.5, %v11528_v53  ;;  %11531 = vtanh.f32 %v3347_v24  ;;  %v14897_v24 = vld [vmem:[#allocation71_spill] sm:$0xff]  ;;  %v9442_v28 = vor.u32 %v11101_v50, %v9439_v44  ;;  %v11092_v34 = vld [vmem:[#allocation3 + $0x584] sm:$0xf]  ;;  %3952 = vmatpush.bf16.msrb.mxu2 %v9438_v59  ;;  %v9410_v50 = vor.u32 %v11093_v22, %v9407_v19  ;;  %v9365_v44 = vld [vmem:[#allocation3 + $0x540] sm:$0xf] }
 0x4f6   :  { %11533 = vtanh.f32 %v3355_v9  ;;  %v3352_v20 = vadd.f32 0.5, %v3350_v33  ;;  %3938 = vmatpush.bf16.msrb.mxu1 %v9434_v3  ;;  %v11096_v9 = vld [vmem:[#allocation3 + $0x59c] sm:$0xf0]  ;;  %v9399_v33 = vld [vmem:[#allocation3 + $0x5a0] sm:$0xf0] }
 0x4f7   :  { %v3360_v15 = vadd.f32 0.5, %v3358_v5  ;;  %v9398_v51 = vor.u32 %v11096_v9, %v9397_v49  ;;  %v9405_v5 = vld [vmem:[#allocation3 + $0x588] sm:$0xf]  ;;  %3966 = vmatpush.bf16.msrb.mxu3 %v9442_v28  ;;  %v9402_v0 = vor.u32 %v11092_v34, %v9399_v33  ;;  %v9375_v19 = vld [vmem:[#allocation3 + $0x568] sm:$0xf0] }
 0x4f8   :  { %v9406_v31 = vor.u32 %v11097_v54, %v9405_v5  ;;  %v9373_v34 = vld [vmem:[#allocation3 + $0x548] sm:$0xf] }
 0x4f9   :  { %v3321_v27 = vpop.f32.mrf.mxu2  ;;  %v3335_v45 = vpop.f32.mrf.mxu3  ;;  %3925 = vmatpush.bf16.msrb.mxu0 %v9398_v51  ;;  %v11089_v33 = vld [vmem:[#allocation3 + $0x564] sm:$0xf0]  ;;  %v9333_v51 = vld [vmem:[#allocation3 + $0x500] sm:$0xf] }
 0x4fa   :  { %v11530_v37 = vpop.eup %11529  ;;  %v3344_v53 = vadd.f32 %v3321_v27, %v14896_v10  ;;  %v3345_v1 = vadd.f32 %v3335_v45, %v14897_v24  ;;  %v14898_v27 = vld [vmem:[#allocation32_spill] sm:$0xff]  ;;  %v11088_v24 = vld [vmem:[#allocation3 + $0x55c] sm:$0xf0]  ;;  %3939 = vmatpush.bf16.msrb.mxu1 %v9402_v0  ;;  %3953 = vmatpush.bf16.msrb.mxu2 %v9406_v31  ;;  %v9335_v31 = vld [vmem:[#allocation3 + $0x520] sm:$0xf0] }
 0x4fb   :  { %v11532_v10 = vpop.eup %11531  ;;  %v3372_v45 = vmul.f32 %v3360_v15, %v14898_v27  ;;  %v3374_v3 = vmul.f32 %v11530_v37, %v3352_v20  ;;  %v9366_v9 = vor.u32 %v11088_v24, %v9365_v44  ;;  %3967 = vmatpush.bf16.msrb.mxu3 %v9410_v50  ;;  %v9374_v37 = vor.u32 %v11089_v33, %v9373_v34  ;;  %v11085_v20 = vld [vmem:[#allocation3 + $0x54c] sm:$0xf]  ;;  %v11080_v0 = vld [vmem:[#allocation3 + $0x51c] sm:$0xf0]  ;;  %v9341_v44 = vld [vmem:[#allocation3 + $0x508] sm:$0xf] }
 0x4fc   :  { %11535 = vtanh.f32 %v3344_v53  ;;  %v3365_v55 = vmul.f32 0.5, %v3345_v1  ;;  %v11534_v59 = vpop.eup %11533  ;;  %v3351_v49 = vmul.f32 0.5, %v11532_v10  ;;  %v11084_v53 = vld [vmem:[#allocation3 + $0x544] sm:$0xf]  ;;  %v9334_v27 = vor.u32 %v11080_v0, %v9333_v51  ;;  %v9301_v34 = vld [vmem:[#allocation3 + $0x4c0] sm:$0xf] }
 0x4fd   :  { %11537 = vtanh.f32 %v3364_v32  ;;  %v9367_v1 = vld [vmem:[#allocation3 + $0x560] sm:$0xf0]  ;;  %v3359_v28 = vmul.f32 0.5, %v11534_v59  ;;  %v13168_v22 = vadd.f32 %v3374_v3, %v3372_v45  ;;  %3926 = vmatpush.bf16.msrb.mxu0 %v9366_v9  ;;  %v9378_v32 = vor.u32 %v11085_v20, %v9375_v19  ;;  %v9343_v45 = vld [vmem:[#allocation3 + $0x528] sm:$0xf0] }
 0x4fe   :  { %11539 = vtanh.f32 %v3365_v55  ;;  %v9370_v54 = vor.u32 %v11084_v53, %v9367_v1  ;;  %v3353_v5 = vadd.f32 0.5, %v3351_v49  ;;  %v11076_v55 = vld [vmem:[#allocation3 + $0x504] sm:$0xf]  ;;  %3954 = vmatpush.bf16.msrb.mxu2 %v9374_v37  ;;  %v11081_v53 = vld [vmem:[#allocation3 + $0x524] sm:$0xf0] }
 0x4ff   :  { %14899 = vst [vmem:[#allocation166_spill] sm:$0xff] %v13168_v22  ;;  %v3361_v15 = vadd.f32 0.5, %v3359_v28  ;;  %v14900_v24 = vld [vmem:[#allocation33_spill] sm:$0xff]  ;;  %v9338_v50 = vor.u32 %v11076_v55, %v9335_v31  ;;  %v11077_v1 = vld [vmem:[#allocation3 + $0x50c] sm:$0xf]  ;;  %3968 = vmatpush.bf16.msrb.mxu3 %v9378_v32  ;;  %v9342_v9 = vor.u32 %v11081_v53, %v9341_v44  ;;  %11541 = vtanh.f32 %v13168_v22 }
 0x500   :  { %3940 = vmatpush.bf16.msrb.mxu1 %v9370_v54  ;;  %v9346_v28 = vor.u32 %v11077_v1, %v9343_v45  ;;  %v11072_v33 = vld [vmem:[#allocation3 + $0x4dc] sm:$0xf0]  ;;  %v11068_v20 = vld [vmem:[#allocation3 + $0x4c4] sm:$0xf]  ;;  %v9309_v37 = vld [vmem:[#allocation3 + $0x4c8] sm:$0xf] }
 0x501   :  { %v3373_v59 = vmul.f32 %v3361_v15, %v14900_v24  ;;  %3927 = vmatpush.bf16.msrb.mxu0 %v9334_v27  ;;  %v9302_v15 = vor.u32 %v11072_v33, %v9301_v34  ;;  %v11073_v0 = vld [vmem:[#allocation3 + $0x4e4] sm:$0xf0]  ;;  %v9311_v55 = vld [vmem:[#allocation3 + $0x4e8] sm:$0xf0]  ;;  %v9271_v33 = vld [vmem:[#allocation3 + $0x4a0] sm:$0xf0] }
 0x502   :  { %v11536_v10 = vpop.eup %11535  ;;  %3955 = vmatpush.bf16.msrb.mxu2 %v9342_v9  ;;  %v9310_v32 = vor.u32 %v11073_v0, %v9309_v37  ;;  %v11064_v9 = vld [vmem:[#allocation3 + $0x49c] sm:$0xf0]  ;;  %v11061_v37 = vld [vmem:[#allocation3 + $0x48c] sm:$0xf] }
 0x503   :  { %v3375_v49 = vmul.f32 %v11536_v10, %v3353_v5  ;;  %v11538_v3 = vpop.eup %11537  ;;  %v9303_v5 = vld [vmem:[#allocation3 + $0x4e0] sm:$0xf0]  ;;  %v11069_v10 = vld [vmem:[#allocation3 + $0x4cc] sm:$0xf]  ;;  %3969 = vmatpush.bf16.msrb.mxu3 %v9346_v28 }
 0x504   :  { %v11540_v54 = vpop.eup %11539  ;;  %3941 = vmatpush.bf16.msrb.mxu1 %v9338_v50  ;;  %v9306_v51 = vor.u32 %v11068_v20, %v9303_v5  ;;  %v3368_v31 = vmul.f32 0.5, %v11538_v3  ;;  %v9314_v24 = vor.u32 %v11069_v10, %v9311_v55  ;;  %v9269_v3 = vld [vmem:[#allocation3 + $0x480] sm:$0xf]  ;;  %v11060_v28 = vld [vmem:[#allocation3 + $0x484] sm:$0xf] }
 0x505   :  { %v13172_v19 = vadd.f32 %v3375_v49, %v3373_v59  ;;  %v3369_v44 = vmul.f32 0.5, %v11540_v54  ;;  %3928 = vmatpush.bf16.msrb.mxu0 %v9302_v15  ;;  %v11542_v59 = vpop.eup %11541  ;;  %v9270_v34 = vor.u32 %v11064_v9, %v9269_v3  ;;  %v9277_v20 = vld [vmem:[#allocation3 + $0x488] sm:$0xf]  ;;  %v9274_v15 = vor.u32 %v11060_v28, %v9271_v33  ;;  %v9237_v10 = vld [vmem:[#allocation3 + $0x440] sm:$0xf] }
 0x506   :  { %3956 = vmatpush.bf16.msrb.mxu2 %v9310_v32  ;;  %v3370_v27 = vadd.f32 0.5, %v3368_v31  ;;  %v11065_v54 = vld [vmem:[#allocation3 + $0x4a4] sm:$0xf0]  ;;  %v11056_v55 = vld [vmem:[#allocation3 + $0x45c] sm:$0xf0] }
 0x507   :  { %14901 = vst [vmem:[#allocation167_spill] sm:$0xff] %v13172_v19  ;;  %11543 = vtanh.f32 %v13172_v19  ;;  %v3371_v49 = vadd.f32 0.5, %v3369_v44  ;;  %3970 = vmatpush.bf16.msrb.mxu3 %v9314_v24  ;;  %v9278_v5 = vor.u32 %v11065_v54, %v9277_v20  ;;  %v11052_v32 = vld [vmem:[#allocation3 + $0x444] sm:$0xf]  ;;  %v9238_v31 = vor.u32 %v11056_v55, %v9237_v10  ;;  %v9245_v24 = vld [vmem:[#allocation3 + $0x448] sm:$0xf] }
 0x508   :  { %3942 = vmatpush.bf16.msrb.mxu1 %v9306_v51  ;;  %v3380_v53 = vmul.f32 %v11542_v59, %v3370_v27  ;;  %v9279_v51 = vld [vmem:[#allocation3 + $0x4a8] sm:$0xf0]  ;;  %v9239_v44 = vld [vmem:[#allocation3 + $0x460] sm:$0xf0]  ;;  %v11057_v59 = vld [vmem:[#allocation3 + $0x464] sm:$0xf0] }
 0x509   :  { %3929 = vmatpush.bf16.msrb.mxu0 %v9270_v34  ;;  %v9282_v0 = vor.u32 %v11061_v37, %v9279_v51  ;;  %v9242_v27 = vor.u32 %v11052_v32, %v9239_v44  ;;  %v9205_v3 = vld [vmem:[#allocation3 + $0x400] sm:$0xf]  ;;  %v11044_v28 = vld [vmem:[#allocation3 + $0x404] sm:$0xf]  ;;  %v9213_v20 = vld [vmem:[#allocation3 + $0x408] sm:$0xf] }
 0x50a   :  { %3957 = vmatpush.bf16.msrb.mxu2 %v9278_v5  ;;  %v11048_v9 = vld [vmem:[#allocation3 + $0x41c] sm:$0xf0]  ;;  %v9207_v33 = vld [vmem:[#allocation3 + $0x420] sm:$0xf0]  ;;  %v11049_v54 = vld [vmem:[#allocation3 + $0x424] sm:$0xf0] }
 0x50b   :  { %3971 = vmatpush.bf16.msrb.mxu3 %v9282_v0  ;;  %v9206_v34 = vor.u32 %v11048_v9, %v9205_v3  ;;  %v9214_v5 = vor.u32 %v11049_v54, %v9213_v20  ;;  %v11045_v37 = vld [vmem:[#allocation3 + $0x40c] sm:$0xf]  ;;  %v9445_v0 = vld [vmem:[#allocation3 + $0x5d0] sm:$0xf]  ;;  %v11102_v32 = vld [vmem:[#allocation3 + $0x5d4] sm:$0xf] }
 0x50c   :  { %3943 = vmatpush.bf16.msrb.mxu1 %v9274_v15  ;;  %v9210_v15 = vor.u32 %v11044_v28, %v9207_v33  ;;  %v9215_v51 = vld [vmem:[#allocation3 + $0x428] sm:$0xf0]  ;;  %v11106_v55 = vld [vmem:[#allocation3 + $0x5ec] sm:$0xf0]  ;;  %v9455_v3 = vld [vmem:[#allocation3 + $0x5f8] sm:$0xf0] }
 0x50d   :  { %v11544_v50 = vpop.eup %11543  ;;  %3930 = vmatpush.bf16.msrb.mxu0 %v9238_v31  ;;  %v9218_v10 = vor.u32 %v11045_v37, %v9215_v51  ;;  %v9447_v31 = vld [vmem:[#allocation3 + $0x5f0] sm:$0xf0]  ;;  %v9446_v44 = vor.u32 %v11106_v55, %v9445_v0  ;;  %v9413_v9 = vld [vmem:[#allocation3 + $0x590] sm:$0xf]  ;;  %v11099_v37 = vld [vmem:[#allocation3 + $0x5b4] sm:$0xf0] }
 0x50e   :  { %v3381_v1 = vmul.f32 %v11544_v50, %v3371_v49  ;;  %v9246_v49 = vor.u32 %v11057_v59, %v9245_v24  ;;  %v11053_v50 = vld [vmem:[#allocation3 + $0x44c] sm:$0xf]  ;;  %v9450_v24 = vor.u32 %v11102_v32, %v9447_v31  ;;  %v9453_v59 = vld [vmem:[#allocation3 + $0x5d8] sm:$0xf]  ;;  %v11098_v28 = vld [vmem:[#allocation3 + $0x5ac] sm:$0xf0] }
 0x50f   :  { %v9414_v33 = vor.u32 %v11098_v28, %v9413_v9  ;;  %v11094_v20 = vld [vmem:[#allocation3 + $0x594] sm:$0xf]  ;;  %v11095_v51 = vld [vmem:[#allocation3 + $0x59c] sm:$0xf]  ;;  %v11090_v31 = vld [vmem:[#allocation3 + $0x56c] sm:$0xf0] }
 0x510   :  { %v13175_v45 = vpack.c.bf16 %v3381_v1, %v3380_v53  ;;  %v9247_v53 = vld [vmem:[#allocation3 + $0x468] sm:$0xf0]  ;;  %3944 = vmatpush.bf16.msrb.mxu1 %v9242_v27  ;;  %3958 = vmatpush.bf16.msrb.mxu2 %v9246_v49  ;;  %v11107_v27 = vld [vmem:[#allocation3 + $0x5f4] sm:$0xf0]  ;;  %v11103_v49 = vld [vmem:[#allocation3 + $0x5dc] sm:$0xf] }
 0x511   :  { %v9250_v1 = vor.u32 %v11053_v50, %v9247_v53  ;;  %3931 = vmatpush.bf16.msrb.mxu0 %v9206_v34  ;;  %v13181_v50 = vpop.f32.mrf.mxu0  ;;  %v13183_v53 = vpop.f32.mrf.mxu1  ;;  %v9458_v34 = vor.u32 %v11103_v49, %v9455_v3  ;;  %v9415_v54 = vld [vmem:[#allocation3 + $0x5b0] sm:$0xf0]  ;;  %v9423_v0 = vld [vmem:[#allocation3 + $0x5b8] sm:$0xf0]  ;;  %v11091_v49 = vld [vmem:[#allocation3 + $0x574] sm:$0xf0] }
 0x512   :  { %14902 = vst [vmem:[#allocation172_spill] sm:$0xff] %v13175_v45  ;;  %3447 = vmatmul.bf16.vlgmr.msra.gmra.mxu0 %v13175_v45  ;;  %3461 = vmatmul.bf16.vlgmr.msra.gmra.mxu1 %v13175_v45  ;;  %v9426_v32 = vor.u32 %v11095_v51, %v9423_v0  ;;  %v9391_v28 = vld [vmem:[#allocation3 + $0x578] sm:$0xf0]  ;;  %v11078_v51 = vld [vmem:[#allocation3 + $0x514] sm:$0xf] }
 0x513   :  { %3475 = vmatmul.bf16.vlgmr.msra.gmra.mxu2 %v13175_v45  ;;  %3489 = vmatmul.bf16.vlgmr.msra.gmra.mxu3 %v13175_v45  ;;  %v9357_v0 = vld [vmem:[#allocation3 + $0x518] sm:$0xf]  ;;  %v11070_v19 = vld [vmem:[#allocation3 + $0x4d4] sm:$0xf] }
 0x514   :  { %3972 = vmatpush.bf16.msrb.mxu3 %v9250_v1  ;;  %3945 = vmatpush.bf16.msrb.mxu1 %v9210_v15  ;;  %v9454_v1 = vor.u32 %v11107_v27, %v9453_v59  ;;  %v9421_v15 = vld [vmem:[#allocation3 + $0x598] sm:$0xf]  ;;  %v11086_v59 = vld [vmem:[#allocation3 + $0x554] sm:$0xf] }
 0x515   :  { %3959 = vmatpush.bf16.msrb.mxu2 %v9214_v5  ;;  %3980 = vmatpush.bf16.msra.mxu0 %v9446_v44  ;;  %v9418_v5 = vor.u32 %v11094_v20, %v9415_v54  ;;  %v9422_v55 = vor.u32 %v11099_v37, %v9421_v15  ;;  %v9389_v27 = vld [vmem:[#allocation3 + $0x558] sm:$0xf]  ;;  %v13185_v20 = vpop.f32.mrf.mxu2  ;;  %v13187_v54 = vpop.f32.mrf.mxu3  ;;  %v9349_v15 = vld [vmem:[#allocation3 + $0x510] sm:$0xf] }
 0x516   :  { %v9390_v9 = vor.u32 %v11091_v49, %v9389_v27  ;;  %v11082_v37 = vld [vmem:[#allocation3 + $0x52c] sm:$0xf0]  ;;  %v11079_v27 = vld [vmem:[#allocation3 + $0x51c] sm:$0xf] }
 0x517   :  { %v9359_v49 = vld [vmem:[#allocation3 + $0x538] sm:$0xf0] }
 0x518   :  { %3973 = vmatpush.bf16.msrb.mxu3 %v9218_v10  ;;  %3994 = vmatpush.bf16.msra.mxu1 %v9450_v24  ;;  %v9381_v10 = vld [vmem:[#allocation3 + $0x550] sm:$0xf]  ;;  %v9383_v24 = vld [vmem:[#allocation3 + $0x570] sm:$0xf0] }
 0x519   :  { %4008 = vmatpush.bf16.msra.mxu2 %v9454_v1  ;;  %3981 = vmatpush.bf16.msra.mxu0 %v9414_v33  ;;  %v9382_v44 = vor.u32 %v11090_v31, %v9381_v10  ;;  %v9386_v3 = vor.u32 %v11086_v59, %v9383_v24  ;;  %v11087_v1 = vld [vmem:[#allocation3 + $0x55c] sm:$0xf]  ;;  %v9350_v33 = vor.u32 %v11082_v37, %v9349_v15  ;;  %v11083_v10 = vld [vmem:[#allocation3 + $0x534] sm:$0xf0]  ;;  %v13191_v31 = vpop.f32.mrf.mxu1 }
 0x51a   :  { %v9358_v24 = vor.u32 %v11083_v10, %v9357_v0  ;;  %v9325_v15 = vld [vmem:[#allocation3 + $0x4d8] sm:$0xf]  ;;  %v11066_v0 = vld [vmem:[#allocation3 + $0x4ac] sm:$0xf0] }
 0x51b   :  { %v11075_v37 = vld [vmem:[#allocation3 + $0x4f4] sm:$0xf0] }
 0x51c   :  { %4022 = vmatpush.bf16.msra.mxu3 %v9458_v34  ;;  %3995 = vmatpush.bf16.msra.mxu1 %v9418_v5  ;;  %v9394_v34 = vor.u32 %v11087_v1, %v9391_v28  ;;  %v9351_v5 = vld [vmem:[#allocation3 + $0x530] sm:$0xf0]  ;;  %v9317_v1 = vld [vmem:[#allocation3 + $0x4d0] sm:$0xf]  ;;  %v9326_v45 = vor.u32 %v11075_v37, %v9325_v15 }
 0x51d   :  { %4009 = vmatpush.bf16.msra.mxu2 %v9422_v55  ;;  %3982 = vmatpush.bf16.msra.mxu0 %v9382_v44  ;;  %v13189_v55 = vpop.f32.mrf.mxu0  ;;  %v9354_v59 = vor.u32 %v11078_v51, %v9351_v5  ;;  %v11074_v28 = vld [vmem:[#allocation3 + $0x4ec] sm:$0xf0]  ;;  %v13193_v10 = vpop.f32.mrf.mxu2 }
 0x51e   :  { %v9318_v44 = vor.u32 %v11074_v28, %v9317_v1  ;;  %v9285_v5 = vld [vmem:[#allocation3 + $0x490] sm:$0xf]  ;;  %v11067_v1 = vld [vmem:[#allocation3 + $0x4b4] sm:$0xf0] }
 0x520   :  { %4023 = vmatpush.bf16.msra.mxu3 %v9426_v32  ;;  %3996 = vmatpush.bf16.msra.mxu1 %v9386_v3  ;;  %v9362_v32 = vor.u32 %v11079_v27, %v9359_v49  ;;  %v9319_v3 = vld [vmem:[#allocation3 + $0x4f0] sm:$0xf0]  ;;  %v13195_v27 = vpop.f32.mrf.mxu3  ;;  %v9293_v49 = vld [vmem:[#allocation3 + $0x498] sm:$0xf] }
 0x521   :  { %4010 = vmatpush.bf16.msra.mxu2 %v9390_v9  ;;  %3983 = vmatpush.bf16.msra.mxu0 %v9350_v33  ;;  %v9322_v22 = vor.u32 %v11070_v19, %v9319_v3  ;;  %v9327_v9 = vld [vmem:[#allocation3 + $0x4f8] sm:$0xf0]  ;;  %v9286_v33 = vor.u32 %v11066_v0, %v9285_v5  ;;  %v9294_v3 = vor.u32 %v11067_v1, %v9293_v49  ;;  %v11059_v49 = vld [vmem:[#allocation3 + $0x474] sm:$0xf0] }
 0x522   :  { %v9330_v51 = vor.u32 %v11071_v16, %v9327_v9  ;;  %v9295_v16 = vld [vmem:[#allocation3 + $0x4b8] sm:$0xf0] }
 0x524   :  { %4024 = vmatpush.bf16.msra.mxu3 %v9394_v34  ;;  %3997 = vmatpush.bf16.msra.mxu1 %v9354_v59  ;;  %v11062_v34 = vld [vmem:[#allocation3 + $0x494] sm:$0xf] }
 0x525   :  { %4011 = vmatpush.bf16.msra.mxu2 %v9358_v24  ;;  %3984 = vmatpush.bf16.msra.mxu0 %v9318_v44  ;;  %v9287_v59 = vld [vmem:[#allocation3 + $0x4b0] sm:$0xf0]  ;;  %v11058_v44 = vld [vmem:[#allocation3 + $0x46c] sm:$0xf0] }
 0x526   :  { %v9290_v28 = vor.u32 %v11062_v34, %v9287_v59  ;;  %v9255_v34 = vld [vmem:[#allocation3 + $0x470] sm:$0xf0]  ;;  %v9261_v59 = vld [vmem:[#allocation3 + $0x458] sm:$0xf] }
 0x528   :  { %4025 = vmatpush.bf16.msra.mxu3 %v9362_v32  ;;  %3998 = vmatpush.bf16.msra.mxu1 %v9322_v22  ;;  %v11063_v32 = vld [vmem:[#allocation3 + $0x49c] sm:$0xf]  ;;  %v11054_v22 = vld [vmem:[#allocation3 + $0x454] sm:$0xf] }
 0x529   :  { %4012 = vmatpush.bf16.msra.mxu2 %v9326_v45  ;;  %v9298_v9 = vor.u32 %v11063_v32, %v9295_v16  ;;  %3985 = vmatpush.bf16.msra.mxu0 %v9286_v33  ;;  %v9254_v45 = vor.u32 %v11058_v44, %v9253_v6  ;;  %v9258_v1 = vor.u32 %v11054_v22, %v9255_v34  ;;  %v9221_v16 = vld [vmem:[#allocation3 + $0x410] sm:$0xf]  ;;  %v9229_v44 = vld [vmem:[#allocation3 + $0x418] sm:$0xf] }
 0x52a   :  { %v9222_v6 = vor.u32 %v11050_v25, %v9221_v16 }
 0x52c   :  { %4026 = vmatpush.bf16.msra.mxu3 %v9330_v51  ;;  %3999 = vmatpush.bf16.msra.mxu1 %v9290_v28  ;;  %v9223_v28 = vld [vmem:[#allocation3 + $0x430] sm:$0xf0] }
 0x52d   :  { %4013 = vmatpush.bf16.msra.mxu2 %v9294_v3  ;;  %3986 = vmatpush.bf16.msra.mxu0 %v9254_v45  ;;  %v11051_v3 = vld [vmem:[#allocation3 + $0x434] sm:$0xf0] }
 0x52e   :  { %v9230_v45 = vor.u32 %v11051_v3, %v9229_v44 }
 0x530   :  { %4027 = vmatpush.bf16.msra.mxu3 %v9298_v9  ;;  %4000 = vmatpush.bf16.msra.mxu1 %v9258_v1 }
 0x531   :  { %3987 = vmatpush.bf16.msra.mxu0 %v9222_v6 }
 0x58f   :  { %v3448_v24 = vpop.f32.mrf.mxu0  ;;  %v3462_v19 = vpop.f32.mrf.mxu1 }
 0x590   :  { %v3449_v15 = vadd.f32 %v3448_v24, %v13181_v50  ;;  %v3463_v37 = vadd.f32 %v3462_v19, %v13183_v53  ;;  %v9262_v50 = vor.u32 %v11059_v49, %v9261_v59  ;;  %v11055_v24 = vld [vmem:[#allocation3 + $0x45c] sm:$0xf] }
 0x591   :  { %v9263_v53 = vld [vmem:[#allocation3 + $0x478] sm:$0xf0] }
 0x592   :  { %v3495_v5 = vadd.f32 %v3449_v15, %v14786_v26  ;;  %v3496_v0 = vadd.f32 %v3463_v37, %v14787_v21  ;;  %v9266_v32 = vor.u32 %v11055_v24, %v9263_v53  ;;  %v11046_v15 = vld [vmem:[#allocation3 + $0x414] sm:$0xf]  ;;  %4014 = vmatpush.bf16.msra.mxu2 %v9262_v50  ;;  %v9231_v59 = vld [vmem:[#allocation3 + $0x438] sm:$0xf0] }
 0x593   :  { %v9226_v9 = vor.u32 %v11046_v15, %v9223_v28 }
 0x594   :  { %v3503_v51 = vmul.f32 0.5, %v3495_v5  ;;  %v3511_v19 = vmul.f32 0.5, %v3496_v0  ;;  %v11047_v0 = vld [vmem:[#allocation3 + $0x41c] sm:$0xf]  ;;  %4028 = vmatpush.bf16.msra.mxu3 %v9266_v32 }
 0x595   :  { %v9234_v1 = vor.u32 %v11047_v0, %v9231_v59  ;;  %4001 = vmatpush.bf16.msra.mxu1 %v9226_v9 }
 0x596   :  { %11545 = vtanh.f32 %v3503_v51  ;;  %v3476_v37 = vpop.f32.mrf.mxu2  ;;  %v3490_v33 = vpop.f32.mrf.mxu3  ;;  %4015 = vmatpush.bf16.msra.mxu2 %v9230_v45 }
 0x597   :  { %11547 = vtanh.f32 %v3511_v19  ;;  %v3477_v22 = vadd.f32 %v3476_v37, %v13185_v20  ;;  %v3450_v34 = vpop.f32.mrf.mxu0  ;;  %v3464_v5 = vpop.f32.mrf.mxu1  ;;  %v3491_v53 = vadd.f32 %v3490_v33, %v13187_v54 }
 0x598   :  { %v3451_v49 = vadd.f32 %v3450_v34, %v13189_v55  ;;  %v3465_v24 = vadd.f32 %v3464_v5, %v13191_v31  ;;  %4029 = vmatpush.bf16.msra.mxu3 %v9234_v1 }
 0x599   :  { %v3497_v25 = vadd.f32 %v3477_v22, %v14788_v8  ;;  %v3498_v16 = vadd.f32 %v3491_v53, %v14789_v12 }
 0x59a   :  { %v3499_v51 = vadd.f32 %v3451_v49, %v14786_v26  ;;  %v3500_v20 = vadd.f32 %v3465_v24, %v14787_v21 }
 0x59b   :  { %11549 = vtanh.f32 %v3497_v25  ;;  %v3521_v22 = vmul.f32 0.5, %v3498_v16 }
 0x59c   :  { %v11546_v50 = vpop.eup %11545  ;;  %v3504_v19 = vmul.f32 0.5, %v3499_v51  ;;  %v3512_v55 = vmul.f32 0.5, %v3500_v20 }
 0x59d   :  { %v11548_v31 = vpop.eup %11547  ;;  %v3507_v32 = vmul.f32 0.5, %v11546_v50 }
 0x59e   :  { %v3515_v15 = vmul.f32 0.5, %v11548_v31  ;;  %11551 = vtanh.f32 %v3504_v19  ;;  %v3478_v37 = vpop.f32.mrf.mxu2  ;;  %v3492_v54 = vpop.f32.mrf.mxu3 }
 0x59f   :  { %11553 = vtanh.f32 %v3512_v55  ;;  %v3479_v33 = vadd.f32 %v3478_v37, %v13193_v10  ;;  %v3493_v6 = vadd.f32 %v3492_v54, %v13195_v27  ;;  %v3509_v28 = vadd.f32 0.5, %v3507_v32 }
 0x5a0   :  { %v3517_v44 = vadd.f32 0.5, %v3515_v15 }
 0x5a1   :  { %v11550_v3 = vpop.eup %11549  ;;  %v3501_v34 = vadd.f32 %v3479_v33, %v14788_v8  ;;  %v3502_v5 = vadd.f32 %v3493_v6, %v14789_v12 }
 0x5a2   :  { %v3529_v59 = vmul.f32 %v3517_v44, %v12982_v17  ;;  %v3531_v49 = vmul.f32 %v11550_v3, %v3509_v28  ;;  %v14904_v28 = vld [vmem:[#allocation50_spill] sm:$0xff]  ;;  %v14905_v44 = vld [vmem:[#allocation51_spill] sm:$0xff] }
 0x5a3   :  { %11555 = vtanh.f32 %v3501_v34  ;;  %v3522_v9 = vmul.f32 0.5, %v3502_v5  ;;  %v14906_v3 = vld [vmem:[#allocation54_spill] sm:$0xff]  ;;  %v14908_v34 = vld [vmem:[#allocation80_spill] sm:$0xff]  ;;  %v14909_v5 = vld [vmem:[#allocation81_spill] sm:$0xff] }
 0x5a4   :  { %v11552_v0 = vpop.eup %11551  ;;  %11557 = vtanh.f32 %v3521_v22  ;;  %v13214_v1 = vadd.f32 %v3531_v49, %v3529_v59  ;;  %v14907_v22 = vld [vmem:[#allocation79_spill] sm:$0xff]  ;;  %v14913_v49 = vld [vmem:[#allocation84_spill] sm:$0xff] }
 0x5a5   :  { %v11554_v24 = vpop.eup %11553  ;;  %v3508_v45 = vmul.f32 0.5, %v11552_v0  ;;  %11559 = vtanh.f32 %v3522_v9  ;;  %v14910_v9 = vld [vmem:[#allocation82_spill] sm:$0xff]  ;;  %v14911_v0 = vld [vmem:[#allocation172_spill] sm:$0xff]  ;;  %v14912_v59 = vld [vmem:[#allocation83_spill] sm:$0xff] }
 0x5a6   :  { %v3516_v10 = vmul.f32 0.5, %v11554_v24  ;;  %11561 = vtanh.f32 %v13214_v1  ;;  %v14914_v24 = vld [vmem:[#allocation85_spill] sm:$0xff] }
 0x5a7   :  { %v3510_v27 = vadd.f32 0.5, %v3508_v45  ;;  %v14915_v45 = vld [vmem:[#allocation86_spill] sm:$0xff] }
 0x5a8   :  { %v3518_v25 = vadd.f32 0.5, %v3516_v10  ;;  %v14916_v10 = vld [vmem:[#allocation89_spill] sm:$0xff] }
 0x5a9   :  { %v11556_v53 = vpop.eup %11555 }
 0x5aa   :  { %v3530_v51 = vmul.f32 %v3518_v25, %v12986_v23  ;;  %v3532_v20 = vmul.f32 %v11556_v53, %v3510_v27  ;;  %v11558_v50 = vpop.eup %11557  ;;  %v14903_v23 = vld [vmem:[#allocation49_spill] sm:$0xff]  ;;  %v14917_v27 = vld [vmem:[#allocation90_spill] sm:$0xff]  ;;  %v14918_v25 = vld [vmem:[#allocation91_spill] sm:$0xff] }
 0x5ab   :  { %v11560_v19 = vpop.eup %11559  ;;  %v3525_v17 = vmul.f32 0.5, %v11558_v50  ;;  %v14919_v53 = vld [vmem:[#allocation92_spill] sm:$0xff]  ;;  %v14922_v50 = vld [vmem:[#allocation95_spill] sm:$0xff] }
 0x5ac   :  { %v13218_v55 = vadd.f32 %v3532_v20, %v3530_v51  ;;  %v3526_v31 = vmul.f32 0.5, %v11560_v19  ;;  %v11562_v32 = vpop.eup %11561  ;;  %v14920_v51 = vld [vmem:[#allocation93_spill] sm:$0xff]  ;;  %v14921_v20 = vld [vmem:[#allocation94_spill] sm:$0xff]  ;;  %v14923_v19 = vld [vmem:[#allocation96_spill] sm:$0xff] }
 0x5ad   :  { %v3527_v16 = vadd.f32 0.5, %v3525_v17  ;;  %v14924_v17 = vld [vmem:[#allocation99_spill] sm:$0xff] }
 0x5ae   :  { %11563 = vtanh.f32 %v13218_v55  ;;  %v3528_v15 = vadd.f32 0.5, %v3526_v31  ;;  %v14925_v31 = vld [vmem:[#allocation100_spill] sm:$0xff] }
 0x5af   :  { %v3537_v54 = vmul.f32 %v11562_v32, %v3527_v16  ;;  %v14926_v32 = vld [vmem:[#allocation101_spill] sm:$0xff]  ;;  %v14927_v16 = vld [vmem:[#allocation102_spill] sm:$0xff] }
 0x5b4   :  { %v11564_v37 = vpop.eup %11563 }
 0x5b5   :  { %v3538_v33 = vmul.f32 %v11564_v37, %v3528_v15  ;;  %v14928_v15 = vld [vmem:[#allocation103_spill] sm:$0xff]  ;;  %v14929_v37 = vld [vmem:[#allocation104_spill] sm:$0xff] }
 0x5b7   :  { %v13221_v6 = vpack.c.bf16 %v3538_v33, %v3537_v54  ;;  %v14930_v54 = vld [vmem:[#allocation105_spill] sm:$0xff]  ;;  %v14931_v33 = vld [vmem:[#allocation106_spill] sm:$0xff] }
 0x5b9   :  { %3932 = vmatmul.bf16.vlgmr.msrb.gmra.mxu0 %v13221_v6  ;;  %3946 = vmatmul.bf16.vlgmr.msrb.gmra.mxu1 %v13221_v6 }
 0x5ba   :  { %3960 = vmatmul.bf16.vlgmr.msrb.gmra.mxu2 %v13221_v6  ;;  %3974 = vmatmul.bf16.vlgmr.msrb.gmra.mxu3 %v13221_v6 }
 0x5bb   :  { %4060 = vmatpush.bf16.msrb.mxu0 %v12188_v36  ;;  %4074 = vmatpush.bf16.msrb.mxu1 %v12190_v40 }
 0x5bc   :  { %4088 = vmatpush.bf16.msrb.mxu2 %v12192_v43  ;;  %4102 = vmatpush.bf16.msrb.mxu3 %v12197_v52 }
 0x5bf   :  { %4061 = vmatpush.bf16.msrb.mxu0 %v12208_v58  ;;  %4075 = vmatpush.bf16.msrb.mxu1 %v12210_v13 }
 0x5c0   :  { %4089 = vmatpush.bf16.msrb.mxu2 %v12212_v14  ;;  %4103 = vmatpush.bf16.msrb.mxu3 %v12219_v18 }
 0x5c3   :  { %4062 = vmatpush.bf16.msrb.mxu0 %v12235_v30  ;;  %4076 = vmatpush.bf16.msrb.mxu1 %v12237_v38 }
 0x5c4   :  { %4090 = vmatpush.bf16.msrb.mxu2 %v12239_v39  ;;  %4104 = vmatpush.bf16.msrb.mxu3 %v12250_v56 }
 0x5c7   :  { %4063 = vmatpush.bf16.msrb.mxu0 %v12263_v29  ;;  %4077 = vmatpush.bf16.msrb.mxu1 %v12265_v2 }
 0x5c8   :  { %4091 = vmatpush.bf16.msrb.mxu2 %v12267_v46  ;;  %4105 = vmatpush.bf16.msrb.mxu3 %v12278_v62 }
 0x5c9   :  { %3988 = vmatmul.bf16.vlgmr.msra.gmra.mxu0 %v13221_v6  ;;  %4002 = vmatmul.bf16.vlgmr.msra.gmra.mxu1 %v13221_v6 }
 0x5ca   :  { %4016 = vmatmul.bf16.vlgmr.msra.gmra.mxu2 %v13221_v6  ;;  %4030 = vmatmul.bf16.vlgmr.msra.gmra.mxu3 %v13221_v6 }
 0x5cb   :  { %4064 = vmatpush.bf16.msrb.mxu0 %v12291_v7  ;;  %4078 = vmatpush.bf16.msrb.mxu1 %v12293_v61 }
 0x5cc   :  { %4092 = vmatpush.bf16.msrb.mxu2 %v12295_v63  ;;  %4106 = vmatpush.bf16.msrb.mxu3 %v12306_v47 }
 0x5cf   :  { %4065 = vmatpush.bf16.msrb.mxu0 %v12319_v35  ;;  %4079 = vmatpush.bf16.msrb.mxu1 %v12321_v42 }
 0x5d0   :  { %4093 = vmatpush.bf16.msrb.mxu2 %v12323_v11  ;;  %4107 = vmatpush.bf16.msrb.mxu3 %v12334_v48 }
 0x5d3   :  { %4066 = vmatpush.bf16.msrb.mxu0 %v12347_v60  ;;  %4080 = vmatpush.bf16.msrb.mxu1 %v12349_v41 }
 0x5d4   :  { %4094 = vmatpush.bf16.msrb.mxu2 %v12351_v4  ;;  %4108 = vmatpush.bf16.msrb.mxu3 %v12362_v57 }
 0x5d7   :  { %4067 = vmatpush.bf16.msrb.mxu0 %v14903_v23  ;;  %4081 = vmatpush.bf16.msrb.mxu1 %v14904_v28  ;;  %v9509_v28 = vld [vmem:[#allocation3 + $0x650] sm:$0xf] }
 0x5d8   :  { %4095 = vmatpush.bf16.msrb.mxu2 %v14905_v44  ;;  %4109 = vmatpush.bf16.msrb.mxu3 %v14906_v3  ;;  %v9663_v3 = vld [vmem:[#allocation3 + $0x7a8] sm:$0xf0]  ;;  %v11135_v44 = vld [vmem:[#allocation3 + $0x6dc] sm:$0xf]  ;;  %v11114_v23 = vld [vmem:[#allocation3 + $0x62c] sm:$0xf0] }
 0x5da   :  { %4068 = vmatmul.bf16.vlgmr.msrb.gmra.mxu0 %v14911_v0  ;;  %4082 = vmatmul.bf16.vlgmr.msrb.gmra.mxu1 %v14911_v0 }
 0x5db   :  { %4161 = vmatpush.bf16.msra.mxu0 %v14907_v22  ;;  %4175 = vmatpush.bf16.msra.mxu1 %v14908_v34  ;;  %v11161_v34 = vld [vmem:[#allocation3 + $0x7a4] sm:$0xf0]  ;;  %v11157_v22 = vld [vmem:[#allocation3 + $0x78c] sm:$0xf] }
 0x5dc   :  { %4189 = vmatpush.bf16.msra.mxu2 %v14909_v5  ;;  %4203 = vmatpush.bf16.msra.mxu3 %v14910_v9  ;;  %v15002_v5 = vld [vmem:[#allocation74_spill] sm:$0xff] }
 0x5dd   :  { %4096 = vmatmul.bf16.vlgmr.msrb.gmra.mxu2 %v14911_v0  ;;  %4110 = vmatmul.bf16.vlgmr.msrb.gmra.mxu3 %v14911_v0  ;;  %v14932_v0 = vld [vmem:[#allocation109_spill] sm:$0xff] }
 0x5df   :  { %4162 = vmatpush.bf16.msra.mxu0 %v14912_v59  ;;  %4176 = vmatpush.bf16.msra.mxu1 %v14913_v49 }
 0x5e0   :  { %4190 = vmatpush.bf16.msra.mxu2 %v14914_v24  ;;  %4204 = vmatpush.bf16.msra.mxu3 %v14915_v45  ;;  %v15001_v45 = vld [vmem:[#allocation73_spill] sm:$0xff] }
 0x5e3   :  { %4163 = vmatpush.bf16.msra.mxu0 %v14916_v10  ;;  %4177 = vmatpush.bf16.msra.mxu1 %v14917_v27  ;;  %v15000_v10 = vld [vmem:[#allocation43_spill] sm:$0xff] }
 0x5e4   :  { %4191 = vmatpush.bf16.msra.mxu2 %v14918_v25  ;;  %4205 = vmatpush.bf16.msra.mxu3 %v14919_v53 }
 0x5e7   :  { %4164 = vmatpush.bf16.msra.mxu0 %v14920_v51  ;;  %4178 = vmatpush.bf16.msra.mxu1 %v14921_v20  ;;  %v14976_v51 = vld [vmem:[#allocation35_spill] sm:$0xff] }
 0x5e8   :  { %4192 = vmatpush.bf16.msra.mxu2 %v14922_v50  ;;  %4206 = vmatpush.bf16.msra.mxu3 %v14923_v19  ;;  %v14933_v50 = vld [vmem:[#allocation110_spill] sm:$0xff]  ;;  %v14934_v19 = vld [vmem:[#allocation111_spill] sm:$0xff] }
 0x5eb   :  { %4165 = vmatpush.bf16.msra.mxu0 %v14924_v17  ;;  %4179 = vmatpush.bf16.msra.mxu1 %v14925_v31  ;;  %v14935_v17 = vld [vmem:[#allocation112_spill] sm:$0xff]  ;;  %v14936_v31 = vld [vmem:[#allocation113_spill] sm:$0xff] }
 0x5ec   :  { %4193 = vmatpush.bf16.msra.mxu2 %v14926_v32  ;;  %4207 = vmatpush.bf16.msra.mxu3 %v14927_v16  ;;  %v14937_v32 = vld [vmem:[#allocation114_spill] sm:$0xff]  ;;  %v14938_v16 = vld [vmem:[#allocation115_spill] sm:$0xff] }
 0x5ef   :  { %4166 = vmatpush.bf16.msra.mxu0 %v14928_v15  ;;  %4180 = vmatpush.bf16.msra.mxu1 %v14929_v37  ;;  %v14939_v15 = vld [vmem:[#allocation116_spill] sm:$0xff]  ;;  %v14940_v37 = vld [vmem:[#allocation118_spill] sm:$0xff] }
 0x5f0   :  { %4194 = vmatpush.bf16.msra.mxu2 %v14930_v54  ;;  %4208 = vmatpush.bf16.msra.mxu3 %v14931_v33  ;;  %v14941_v54 = vld [vmem:[#allocation119_spill] sm:$0xff]  ;;  %v14972_v33 = vld [vmem:[#allocation34_spill] sm:$0xff] }
 0x5f3   :  { %4167 = vmatpush.bf16.msra.mxu0 %v14932_v0  ;;  %4181 = vmatpush.bf16.msra.mxu1 %v14933_v50  ;;  %v14950_v50 = vld [vmem:[#allocation130_spill] sm:$0xff]  ;;  %v14951_v0 = vld [vmem:[#allocation132_spill] sm:$0xff] }
 0x5f4   :  { %4195 = vmatpush.bf16.msra.mxu2 %v14934_v19  ;;  %4209 = vmatpush.bf16.msra.mxu3 %v14935_v17  ;;  %v14942_v17 = vld [vmem:[#allocation121_spill] sm:$0xff] }
 0x5f5   :  { %v14949_v19 = vld [vmem:[#allocation129_spill] sm:$0xff] }
 0x5f7   :  { %4168 = vmatpush.bf16.msra.mxu0 %v14936_v31  ;;  %4182 = vmatpush.bf16.msra.mxu1 %v14937_v32  ;;  %v14943_v31 = vld [vmem:[#allocation122_spill] sm:$0xff]  ;;  %v14944_v32 = vld [vmem:[#allocation123_spill] sm:$0xff] }
 0x5f8   :  { %4196 = vmatpush.bf16.msra.mxu2 %v14938_v16  ;;  %4210 = vmatpush.bf16.msra.mxu3 %v14939_v15  ;;  %v14945_v16 = vld [vmem:[#allocation124_spill] sm:$0xff]  ;;  %v14946_v15 = vld [vmem:[#allocation125_spill] sm:$0xff] }
 0x5fa   :  { %4169 = vmatmul.bf16.vlgmr.msra.gmra.mxu0 %v13221_v6  ;;  %4183 = vmatmul.bf16.vlgmr.msra.gmra.mxu1 %v13221_v6 }
 0x5fb   :  { %4217 = vmatpush.bf16.msrb.mxu0 %v14940_v37  ;;  %4231 = vmatpush.bf16.msrb.mxu1 %v14941_v54  ;;  %v14947_v37 = vld [vmem:[#allocation126_spill] sm:$0xff]  ;;  %v14948_v54 = vld [vmem:[#allocation127_spill] sm:$0xff] }
 0x5fc   :  { %4197 = vmatmul.bf16.vlgmr.msra.gmra.mxu2 %v13221_v6  ;;  %4211 = vmatmul.bf16.vlgmr.msra.gmra.mxu3 %v13221_v6  ;;  %v14952_v6 = vld [vmem:[#allocation133_spill] sm:$0xff] }
 0x5fd   :  { %4245 = vmatpush.bf16.msrb.mxu2 %v14942_v17  ;;  %4259 = vmatpush.bf16.msrb.mxu3 %v14943_v31  ;;  %v14953_v17 = vld [vmem:[#allocation134_spill] sm:$0xff]  ;;  %v14954_v31 = vld [vmem:[#allocation135_spill] sm:$0xff] }
 0x5ff   :  { %4218 = vmatpush.bf16.msrb.mxu0 %v14944_v32  ;;  %4232 = vmatpush.bf16.msrb.mxu1 %v14945_v16  ;;  %v14955_v32 = vld [vmem:[#allocation136_spill] sm:$0xff]  ;;  %v14956_v16 = vld [vmem:[#allocation137_spill] sm:$0xff] }
 0x601   :  { %4246 = vmatpush.bf16.msrb.mxu2 %v14946_v15  ;;  %4260 = vmatpush.bf16.msrb.mxu3 %v14947_v37  ;;  %v14957_v15 = vld [vmem:[#allocation139_spill] sm:$0xff]  ;;  %v14958_v37 = vld [vmem:[#allocation140_spill] sm:$0xff] }
 0x603   :  { %4219 = vmatpush.bf16.msrb.mxu0 %v14948_v54  ;;  %4233 = vmatpush.bf16.msrb.mxu1 %v14949_v19  ;;  %v14959_v54 = vld [vmem:[#allocation142_spill] sm:$0xff]  ;;  %v14960_v19 = vld [vmem:[#allocation143_spill] sm:$0xff] }
 0x605   :  { %4247 = vmatpush.bf16.msrb.mxu2 %v14950_v50  ;;  %4261 = vmatpush.bf16.msrb.mxu3 %v14951_v0  ;;  %v14961_v50 = vld [vmem:[#allocation144_spill] sm:$0xff]  ;;  %v14962_v0 = vld [vmem:[#allocation145_spill] sm:$0xff] }
 0x607   :  { %4220 = vmatpush.bf16.msrb.mxu0 %v14952_v6  ;;  %4234 = vmatpush.bf16.msrb.mxu1 %v14953_v17  ;;  %v14963_v6 = vld [vmem:[#allocation146_spill] sm:$0xff]  ;;  %v14964_v17 = vld [vmem:[#allocation147_spill] sm:$0xff] }
 0x609   :  { %4248 = vmatpush.bf16.msrb.mxu2 %v14954_v31  ;;  %4262 = vmatpush.bf16.msrb.mxu3 %v14955_v32  ;;  %v14965_v31 = vld [vmem:[#allocation149_spill] sm:$0xff]  ;;  %v14966_v32 = vld [vmem:[#allocation150_spill] sm:$0xff] }
 0x60b   :  { %4221 = vmatpush.bf16.msrb.mxu0 %v14956_v16  ;;  %4235 = vmatpush.bf16.msrb.mxu1 %v14957_v15  ;;  %v14967_v16 = vld [vmem:[#allocation151_spill] sm:$0xff]  ;;  %v14968_v15 = vld [vmem:[#allocation152_spill] sm:$0xff] }
 0x60d   :  { %4249 = vmatpush.bf16.msrb.mxu2 %v14958_v37  ;;  %4263 = vmatpush.bf16.msrb.mxu3 %v14959_v54  ;;  %v14969_v37 = vld [vmem:[#allocation153_spill] sm:$0xff]  ;;  %v14970_v54 = vld [vmem:[#allocation154_spill] sm:$0xff] }
 0x60f   :  { %4222 = vmatpush.bf16.msrb.mxu0 %v14960_v19  ;;  %4236 = vmatpush.bf16.msrb.mxu1 %v14961_v50  ;;  %v14971_v19 = vld [vmem:[#allocation155_spill] sm:$0xff] }
 0x611   :  { %4250 = vmatpush.bf16.msrb.mxu2 %v14962_v0  ;;  %4264 = vmatpush.bf16.msrb.mxu3 %v14963_v6 }
 0x613   :  { %4223 = vmatpush.bf16.msrb.mxu0 %v14964_v17  ;;  %4237 = vmatpush.bf16.msrb.mxu1 %v14965_v31  ;;  %v14974_v17 = vld [vmem:[#allocation65_spill] sm:$0xff] }
 0x615   :  { %4251 = vmatpush.bf16.msrb.mxu2 %v14966_v32  ;;  %4265 = vmatpush.bf16.msrb.mxu3 %v14967_v16 }
 0x617   :  { %4224 = vmatpush.bf16.msrb.mxu0 %v14968_v15  ;;  %4238 = vmatpush.bf16.msrb.mxu1 %v14969_v37  ;;  %v14978_v15 = vld [vmem:[#allocation66_spill] sm:$0xff] }
 0x619   :  { %4252 = vmatpush.bf16.msrb.mxu2 %v14970_v54  ;;  %4266 = vmatpush.bf16.msrb.mxu3 %v14971_v19 }
 0x636   :  { %v3933_v50 = vpop.f32.mrf.mxu0  ;;  %v3947_v0 = vpop.f32.mrf.mxu1 }
 0x637   :  { %v13336_v6 = vadd.f32 %v3933_v50, %v14972_v33  ;;  %v13339_v20 = vadd.f32 %v3947_v0, %v14974_v17  ;;  %v14984_v17 = vld [vmem:[#allocation160_spill] sm:$0xff] }
 0x639   :  { %14973 = vst [vmem:[#allocation173_spill] sm:$0xff] %v13336_v6 }
 0x63a   :  { %14975 = vst [vmem:[#allocation174_spill] sm:$0xff] %v13339_v20  ;;  %v14986_v20 = vld [vmem:[#allocation161_spill] sm:$0xff] }
 0x63d   :  { %v3961_v31 = vpop.f32.mrf.mxu2  ;;  %v3975_v32 = vpop.f32.mrf.mxu3 }
 0x63e   :  { %v13342_v16 = vadd.f32 %v3961_v31, %v14976_v51  ;;  %v13345_v53 = vadd.f32 %v3975_v32, %v14978_v15  ;;  %v13347_v37 = vpop.f32.mrf.mxu0  ;;  %v13349_v54 = vpop.f32.mrf.mxu1  ;;  %v14988_v32 = vld [vmem:[#allocation162_spill] sm:$0xff] }
 0x63f   :  { %14980 = vst [vmem:[#allocation37_spill] sm:$0xff] %v13347_v37  ;;  %v14990_v37 = vld [vmem:[#allocation163_spill] sm:$0xff] }
 0x640   :  { %14977 = vst [vmem:[#allocation175_spill] sm:$0xff] %v13342_v16 }
 0x641   :  { %14979 = vst [vmem:[#allocation36_spill] sm:$0xff] %v13345_v53 }
 0x642   :  { %14981 = vst [vmem:[#allocation68_spill] sm:$0xff] %v13349_v54 }
 0x645   :  { %v13351_v19 = vpop.f32.mrf.mxu2  ;;  %v13353_v25 = vpop.f32.mrf.mxu3 }
 0x646   :  { %14982 = vst [vmem:[#allocation38_spill] sm:$0xff] %v13351_v19  ;;  %v3989_v50 = vpop.f32.mrf.mxu0  ;;  %v4003_v33 = vpop.f32.mrf.mxu1 }
 0x647   :  { %14983 = vst [vmem:[#allocation39_spill] sm:$0xff] %v13353_v25  ;;  %v13356_v0 = vadd.f32 %v3989_v50, %v14984_v17  ;;  %v13359_v6 = vadd.f32 %v4003_v33, %v14986_v20  ;;  %v14996_v20 = vld [vmem:[#allocation40_spill] sm:$0xff] }
 0x649   :  { %14985 = vst [vmem:[#allocation69_spill] sm:$0xff] %v13356_v0 }
 0x64a   :  { %14987 = vst [vmem:[#allocation70_spill] sm:$0xff] %v13359_v6  ;;  %v14997_v6 = vld [vmem:[#allocation41_spill] sm:$0xff] }
 0x64d   :  { %v4017_v51 = vpop.f32.mrf.mxu2  ;;  %v4031_v31 = vpop.f32.mrf.mxu3 }
 0x64e   :  { %v13362_v15 = vadd.f32 %v4017_v51, %v14988_v32  ;;  %v13365_v53 = vadd.f32 %v4031_v31, %v14990_v37  ;;  %v13367_v54 = vpop.f32.mrf.mxu0  ;;  %v13369_v19 = vpop.f32.mrf.mxu1  ;;  %v14998_v32 = vld [vmem:[#allocation72_spill] sm:$0xff] }
 0x64f   :  { %14992 = vst [vmem:[#allocation33_spill] sm:$0xff] %v13367_v54 }
 0x650   :  { %14989 = vst [vmem:[#allocation71_spill] sm:$0xff] %v13362_v15  ;;  %v14999_v15 = vld [vmem:[#allocation42_spill] sm:$0xff] }
 0x651   :  { %14991 = vst [vmem:[#allocation32_spill] sm:$0xff] %v13365_v53 }
 0x652   :  { %14993 = vst [vmem:[#allocation172_spill] sm:$0xff] %v13369_v19 }
 0x655   :  { %v13371_v25 = vpop.f32.mrf.mxu2  ;;  %v13373_v16 = vpop.f32.mrf.mxu3 }
 0x656   :  { %14994 = vst [vmem:[#allocation34_spill] sm:$0xff] %v13371_v25 }
 0x657   :  { %14995 = vst [vmem:[#allocation65_spill] sm:$0xff] %v13373_v16  ;;  %v4069_v50 = vpop.f32.mrf.mxu0  ;;  %v4083_v17 = vpop.f32.mrf.mxu1 }
 0x658   :  { %v4116_v33 = vadd.f32 %v4069_v50, %v14996_v20  ;;  %v4117_v0 = vadd.f32 %v4083_v17, %v14997_v6 }
 0x65a   :  { %v4124_v27 = vmul.f32 0.5, %v4116_v33  ;;  %v4132_v51 = vmul.f32 0.5, %v4117_v0  ;;  %v11168_v33 = vld [vmem:[#allocation3 + $0x7dc] sm:$0xf0] }
 0x65c   :  { %11565 = vtanh.f32 %v4124_v27  ;;  %v9685_v27 = vld [vmem:[#allocation3 + $0x7c0] sm:$0xf] }
 0x65d   :  { %11567 = vtanh.f32 %v4132_v51  ;;  %v9686_v49 = vor.u32 %v11168_v33, %v9685_v27 }
 0x65f   :  { %v4071_v53 = vpop.f32.mrf.mxu0  ;;  %v4085_v19 = vpop.f32.mrf.mxu1  ;;  %4702 = vmatpush.bf16.msra.mxu0 %v9686_v49 }
 0x660   :  { %v4097_v37 = vpop.f32.mrf.mxu2  ;;  %v4111_v31 = vpop.f32.mrf.mxu3  ;;  %v4120_v25 = vadd.f32 %v4071_v53, %v14999_v15  ;;  %v4121_v16 = vadd.f32 %v4085_v19, %v15000_v10  ;;  %v9693_v15 = vld [vmem:[#allocation3 + $0x7c8] sm:$0xf] }
 0x661   :  { %v4118_v54 = vadd.f32 %v4097_v37, %v14998_v32  ;;  %v4119_v24 = vadd.f32 %v4111_v31, %v15001_v45  ;;  %v11164_v37 = vld [vmem:[#allocation3 + $0x7c4] sm:$0xf]  ;;  %v11169_v10 = vld [vmem:[#allocation3 + $0x7e4] sm:$0xf0] }
 0x662   :  { %v11566_v50 = vpop.eup %11565  ;;  %v4125_v20 = vmul.f32 0.5, %v4120_v25  ;;  %v4133_v6 = vmul.f32 0.5, %v4121_v16  ;;  %v9687_v32 = vld [vmem:[#allocation3 + $0x7e0] sm:$0xf0]  ;;  %v9694_v25 = vor.u32 %v11169_v10, %v9693_v15  ;;  %v11165_v16 = vld [vmem:[#allocation3 + $0x7cc] sm:$0xf] }
 0x663   :  { %11569 = vtanh.f32 %v4118_v54  ;;  %v11568_v17 = vpop.eup %11567  ;;  %v4128_v0 = vmul.f32 0.5, %v11566_v50  ;;  %v4142_v59 = vmul.f32 0.5, %v4119_v24  ;;  %v9690_v53 = vor.u32 %v11164_v37, %v9687_v32  ;;  %v9695_v50 = vld [vmem:[#allocation3 + $0x7e8] sm:$0xf0]  ;;  %v9653_v24 = vld [vmem:[#allocation3 + $0x780] sm:$0xf] }
 0x664   :  { %v4136_v51 = vmul.f32 0.5, %v11568_v17  ;;  %11571 = vtanh.f32 %v4125_v20  ;;  %v15003_v20 = vld [vmem:[#allocation75_spill] sm:$0xff]  ;;  %v9698_v33 = vor.u32 %v11165_v16, %v9695_v50  ;;  %v11156_v37 = vld [vmem:[#allocation3 + $0x784] sm:$0xf]  ;;  %4730 = vmatpush.bf16.msra.mxu2 %v9694_v25  ;;  %v9666_v16 = vor.u32 %v11157_v22, %v9663_v3  ;;  %v9621_v50 = vld [vmem:[#allocation3 + $0x740] sm:$0xf] }
 0x665   :  { %11573 = vtanh.f32 %v4133_v6  ;;  %v4130_v19 = vadd.f32 0.5, %v4128_v0  ;;  %4716 = vmatpush.bf16.msra.mxu1 %v9690_v53  ;;  %v11160_v6 = vld [vmem:[#allocation3 + $0x79c] sm:$0xf0]  ;;  %v9655_v0 = vld [vmem:[#allocation3 + $0x7a0] sm:$0xf0] }
 0x666   :  { %v4138_v54 = vadd.f32 0.5, %v4136_v51  ;;  %v9654_v32 = vor.u32 %v11160_v6, %v9653_v24  ;;  %v9661_v51 = vld [vmem:[#allocation3 + $0x788] sm:$0xf]  ;;  %4744 = vmatpush.bf16.msra.mxu3 %v9698_v33  ;;  %v9658_v15 = vor.u32 %v11156_v37, %v9655_v0  ;;  %v9631_v3 = vld [vmem:[#allocation3 + $0x768] sm:$0xf0] }
 0x667   :  { %v9662_v10 = vor.u32 %v11161_v34, %v9661_v51  ;;  %v9629_v37 = vld [vmem:[#allocation3 + $0x748] sm:$0xf] }
 0x668   :  { %v4099_v45 = vpop.f32.mrf.mxu2  ;;  %v4113_v31 = vpop.f32.mrf.mxu3  ;;  %4703 = vmatpush.bf16.msra.mxu0 %v9654_v32  ;;  %v11153_v0 = vld [vmem:[#allocation3 + $0x764] sm:$0xf0]  ;;  %v9589_v32 = vld [vmem:[#allocation3 + $0x700] sm:$0xf] }
 0x669   :  { %v11570_v9 = vpop.eup %11569  ;;  %v4122_v17 = vadd.f32 %v4099_v45, %v15002_v5  ;;  %v4123_v27 = vadd.f32 %v4113_v31, %v15003_v20  ;;  %v15004_v45 = vld [vmem:[#allocation166_spill] sm:$0xff]  ;;  %v11152_v20 = vld [vmem:[#allocation3 + $0x75c] sm:$0xf0]  ;;  %4717 = vmatpush.bf16.msra.mxu1 %v9658_v15  ;;  %4731 = vmatpush.bf16.msra.mxu2 %v9662_v10  ;;  %v9591_v10 = vld [vmem:[#allocation3 + $0x720] sm:$0xf0] }
 0x66a   :  { %v11572_v5 = vpop.eup %11571  ;;  %v4150_v31 = vmul.f32 %v4138_v54, %v15004_v45  ;;  %v4152_v53 = vmul.f32 %v11570_v9, %v4130_v19  ;;  %v9622_v6 = vor.u32 %v11152_v20, %v9621_v50  ;;  %4745 = vmatpush.bf16.msra.mxu3 %v9666_v16  ;;  %v9630_v9 = vor.u32 %v11153_v0, %v9629_v37  ;;  %v11149_v19 = vld [vmem:[#allocation3 + $0x74c] sm:$0xf]  ;;  %v11144_v15 = vld [vmem:[#allocation3 + $0x71c] sm:$0xf0]  ;;  %v9597_v50 = vld [vmem:[#allocation3 + $0x708] sm:$0xf] }
 0x66b   :  { %11575 = vtanh.f32 %v4122_v17  ;;  %v4143_v49 = vmul.f32 0.5, %v4123_v27  ;;  %v11574_v25 = vpop.eup %11573  ;;  %v4129_v24 = vmul.f32 0.5, %v11572_v5  ;;  %v11148_v17 = vld [vmem:[#allocation3 + $0x744] sm:$0xf]  ;;  %v9590_v45 = vor.u32 %v11144_v15, %v9589_v32  ;;  %v15006_v20 = vld [vmem:[#allocation167_spill] sm:$0xff] }
 0x66c   :  { %11577 = vtanh.f32 %v4142_v59  ;;  %v9623_v27 = vld [vmem:[#allocation3 + $0x760] sm:$0xf0]  ;;  %v4137_v33 = vmul.f32 0.5, %v11574_v25  ;;  %v13384_v22 = vadd.f32 %v4152_v53, %v4150_v31  ;;  %4704 = vmatpush.bf16.msra.mxu0 %v9622_v6  ;;  %v9634_v59 = vor.u32 %v11149_v19, %v9631_v3  ;;  %v9599_v31 = vld [vmem:[#allocation3 + $0x728] sm:$0xf0] }
 0x66d   :  { %11579 = vtanh.f32 %v4143_v49  ;;  %v9626_v34 = vor.u32 %v11148_v17, %v9623_v27  ;;  %v4131_v51 = vadd.f32 0.5, %v4129_v24  ;;  %v11140_v49 = vld [vmem:[#allocation3 + $0x704] sm:$0xf]  ;;  %4732 = vmatpush.bf16.msra.mxu2 %v9630_v9  ;;  %v11145_v17 = vld [vmem:[#allocation3 + $0x724] sm:$0xf0] }
 0x66e   :  { %15005 = vst [vmem:[#allocation35_spill] sm:$0xff] %v13384_v22  ;;  %v4139_v54 = vadd.f32 0.5, %v4137_v33  ;;  %v9594_v16 = vor.u32 %v11140_v49, %v9591_v10  ;;  %v11141_v27 = vld [vmem:[#allocation3 + $0x70c] sm:$0xf]  ;;  %4746 = vmatpush.bf16.msra.mxu3 %v9634_v59  ;;  %v9598_v6 = vor.u32 %v11145_v17, %v9597_v50  ;;  %v9557_v37 = vld [vmem:[#allocation3 + $0x6c0] sm:$0xf]  ;;  %11581 = vtanh.f32 %v13384_v22 }
 0x66f   :  { %4718 = vmatpush.bf16.msra.mxu1 %v9626_v34  ;;  %v9602_v33 = vor.u32 %v11141_v27, %v9599_v31  ;;  %v11136_v0 = vld [vmem:[#allocation3 + $0x6dc] sm:$0xf0]  ;;  %v11132_v19 = vld [vmem:[#allocation3 + $0x6c4] sm:$0xf]  ;;  %v9565_v9 = vld [vmem:[#allocation3 + $0x6c8] sm:$0xf] }
 0x670   :  { %v4151_v25 = vmul.f32 %v4139_v54, %v15006_v20  ;;  %4705 = vmatpush.bf16.msra.mxu0 %v9590_v45  ;;  %v9558_v54 = vor.u32 %v11136_v0, %v9557_v37  ;;  %v11137_v15 = vld [vmem:[#allocation3 + $0x6e4] sm:$0xf0]  ;;  %v9567_v49 = vld [vmem:[#allocation3 + $0x6e8] sm:$0xf0]  ;;  %v9527_v0 = vld [vmem:[#allocation3 + $0x6a0] sm:$0xf0] }
 0x671   :  { %v11576_v5 = vpop.eup %11575  ;;  %4733 = vmatpush.bf16.msra.mxu2 %v9598_v6  ;;  %v9566_v59 = vor.u32 %v11137_v15, %v9565_v9  ;;  %v11128_v6 = vld [vmem:[#allocation3 + $0x69c] sm:$0xf0]  ;;  %v11125_v9 = vld [vmem:[#allocation3 + $0x68c] sm:$0xf] }
 0x672   :  { %v4153_v24 = vmul.f32 %v11576_v5, %v4131_v51  ;;  %v11578_v53 = vpop.eup %11577  ;;  %v9559_v51 = vld [vmem:[#allocation3 + $0x6e0] sm:$0xf0]  ;;  %v11133_v5 = vld [vmem:[#allocation3 + $0x6cc] sm:$0xf]  ;;  %4747 = vmatpush.bf16.msra.mxu3 %v9602_v33 }
 0x673   :  { %v11580_v34 = vpop.eup %11579  ;;  %4719 = vmatpush.bf16.msra.mxu1 %v9594_v16  ;;  %v9562_v32 = vor.u32 %v11132_v19, %v9559_v51  ;;  %v4146_v10 = vmul.f32 0.5, %v11578_v53  ;;  %v9570_v20 = vor.u32 %v11133_v5, %v9567_v49  ;;  %v9525_v53 = vld [vmem:[#allocation3 + $0x680] sm:$0xf]  ;;  %v11124_v33 = vld [vmem:[#allocation3 + $0x684] sm:$0xf] }
 0x674   :  { %v13388_v3 = vadd.f32 %v4153_v24, %v4151_v25  ;;  %v4147_v50 = vmul.f32 0.5, %v11580_v34  ;;  %4706 = vmatpush.bf16.msra.mxu0 %v9558_v54  ;;  %v11582_v25 = vpop.eup %11581  ;;  %v9526_v37 = vor.u32 %v11128_v6, %v9525_v53  ;;  %v9533_v19 = vld [vmem:[#allocation3 + $0x688] sm:$0xf]  ;;  %v9530_v54 = vor.u32 %v11124_v33, %v9527_v0  ;;  %v9493_v5 = vld [vmem:[#allocation3 + $0x640] sm:$0xf] }
 0x675   :  { %4734 = vmatpush.bf16.msra.mxu2 %v9566_v59  ;;  %v4148_v45 = vadd.f32 0.5, %v4146_v10  ;;  %v11129_v34 = vld [vmem:[#allocation3 + $0x6a4] sm:$0xf0]  ;;  %v11120_v49 = vld [vmem:[#allocation3 + $0x65c] sm:$0xf0] }
 0x676   :  { %15007 = vst [vmem:[#allocation66_spill] sm:$0xff] %v13388_v3  ;;  %11583 = vtanh.f32 %v13388_v3  ;;  %v4149_v24 = vadd.f32 0.5, %v4147_v50  ;;  %4748 = vmatpush.bf16.msra.mxu3 %v9570_v20  ;;  %v9534_v51 = vor.u32 %v11129_v34, %v9533_v19  ;;  %v11116_v59 = vld [vmem:[#allocation3 + $0x644] sm:$0xf]  ;;  %v9494_v10 = vor.u32 %v11120_v49, %v9493_v5  ;;  %v9501_v20 = vld [vmem:[#allocation3 + $0x648] sm:$0xf] }
 0x677   :  { %4720 = vmatpush.bf16.msra.mxu1 %v9562_v32  ;;  %v4158_v17 = vmul.f32 %v11582_v25, %v4148_v45  ;;  %v9535_v32 = vld [vmem:[#allocation3 + $0x6a8] sm:$0xf0]  ;;  %v9495_v50 = vld [vmem:[#allocation3 + $0x660] sm:$0xf0]  ;;  %v11121_v25 = vld [vmem:[#allocation3 + $0x664] sm:$0xf0] }
 0x678   :  { %4707 = vmatpush.bf16.msra.mxu0 %v9526_v37  ;;  %v9538_v15 = vor.u32 %v11125_v9, %v9535_v32  ;;  %v9498_v45 = vor.u32 %v11116_v59, %v9495_v50  ;;  %v9461_v53 = vld [vmem:[#allocation3 + $0x600] sm:$0xf]  ;;  %v11108_v33 = vld [vmem:[#allocation3 + $0x604] sm:$0xf]  ;;  %v9469_v19 = vld [vmem:[#allocation3 + $0x608] sm:$0xf] }
 0x679   :  { %4735 = vmatpush.bf16.msra.mxu2 %v9534_v51  ;;  %v11112_v6 = vld [vmem:[#allocation3 + $0x61c] sm:$0xf0]  ;;  %v9463_v0 = vld [vmem:[#allocation3 + $0x620] sm:$0xf0]  ;;  %v11113_v34 = vld [vmem:[#allocation3 + $0x624] sm:$0xf0] }
 0x67a   :  { %4749 = vmatpush.bf16.msra.mxu3 %v9538_v15  ;;  %v9462_v37 = vor.u32 %v11112_v6, %v9461_v53  ;;  %v9470_v51 = vor.u32 %v11113_v34, %v9469_v19  ;;  %v11109_v9 = vld [vmem:[#allocation3 + $0x60c] sm:$0xf]  ;;  %v9701_v15 = vld [vmem:[#allocation3 + $0x7d0] sm:$0xf]  ;;  %v11166_v59 = vld [vmem:[#allocation3 + $0x7d4] sm:$0xf] }
 0x67b   :  { %4721 = vmatpush.bf16.msra.mxu1 %v9530_v54  ;;  %v9466_v54 = vor.u32 %v11108_v33, %v9463_v0  ;;  %v9471_v32 = vld [vmem:[#allocation3 + $0x628] sm:$0xf0]  ;;  %v11170_v49 = vld [vmem:[#allocation3 + $0x7ec] sm:$0xf0]  ;;  %v9711_v53 = vld [vmem:[#allocation3 + $0x7f8] sm:$0xf0] }
 0x67c   :  { %v11584_v16 = vpop.eup %11583  ;;  %4708 = vmatpush.bf16.msra.mxu0 %v9494_v10  ;;  %v9474_v5 = vor.u32 %v11109_v9, %v9471_v32  ;;  %v9703_v10 = vld [vmem:[#allocation3 + $0x7f0] sm:$0xf0]  ;;  %v9702_v50 = vor.u32 %v11170_v49, %v9701_v15  ;;  %v9669_v6 = vld [vmem:[#allocation3 + $0x790] sm:$0xf]  ;;  %v11163_v9 = vld [vmem:[#allocation3 + $0x7b4] sm:$0xf0] }
 0x67d   :  { %v4159_v27 = vmul.f32 %v11584_v16, %v4149_v24  ;;  %v9502_v24 = vor.u32 %v11121_v25, %v9501_v20  ;;  %v11117_v16 = vld [vmem:[#allocation3 + $0x64c] sm:$0xf]  ;;  %v9706_v20 = vor.u32 %v11166_v59, %v9703_v10  ;;  %v9709_v25 = vld [vmem:[#allocation3 + $0x7d8] sm:$0xf]  ;;  %v11162_v33 = vld [vmem:[#allocation3 + $0x7ac] sm:$0xf0] }
 0x67e   :  { %v9670_v0 = vor.u32 %v11162_v33, %v9669_v6  ;;  %v11158_v19 = vld [vmem:[#allocation3 + $0x794] sm:$0xf]  ;;  %v11159_v32 = vld [vmem:[#allocation3 + $0x79c] sm:$0xf]  ;;  %v11154_v10 = vld [vmem:[#allocation3 + $0x76c] sm:$0xf0] }
 0x67f   :  { %v13391_v31 = vpack.c.bf16 %v4159_v27, %v4158_v17  ;;  %v9503_v17 = vld [vmem:[#allocation3 + $0x668] sm:$0xf0]  ;;  %4722 = vmatpush.bf16.msra.mxu1 %v9498_v45  ;;  %4736 = vmatpush.bf16.msra.mxu2 %v9502_v24  ;;  %v11171_v45 = vld [vmem:[#allocation3 + $0x7f4] sm:$0xf0]  ;;  %v11167_v24 = vld [vmem:[#allocation3 + $0x7dc] sm:$0xf] }
 0x680   :  { %v9506_v27 = vor.u32 %v11117_v16, %v9503_v17  ;;  %4709 = vmatpush.bf16.msra.mxu0 %v9462_v37  ;;  %v13397_v16 = vpop.f32.mrf.mxu0  ;;  %v13399_v17 = vpop.f32.mrf.mxu1  ;;  %v9714_v37 = vor.u32 %v11167_v24, %v9711_v53  ;;  %v9671_v34 = vld [vmem:[#allocation3 + $0x7b0] sm:$0xf0]  ;;  %v9679_v15 = vld [vmem:[#allocation3 + $0x7b8] sm:$0xf0]  ;;  %v11155_v24 = vld [vmem:[#allocation3 + $0x774] sm:$0xf0] }
 0x681   :  { %15008 = vst [vmem:[#allocation160_spill] sm:$0xff] %v13391_v31  ;;  %4225 = vmatmul.bf16.vlgmr.msrb.gmra.mxu0 %v13391_v31  ;;  %4239 = vmatmul.bf16.vlgmr.msrb.gmra.mxu1 %v13391_v31  ;;  %v9682_v59 = vor.u32 %v11159_v32, %v9679_v15  ;;  %v9647_v33 = vld [vmem:[#allocation3 + $0x778] sm:$0xf0]  ;;  %v11142_v32 = vld [vmem:[#allocation3 + $0x714] sm:$0xf] }
 0x682   :  { %4253 = vmatmul.bf16.vlgmr.msrb.gmra.mxu2 %v13391_v31  ;;  %4267 = vmatmul.bf16.vlgmr.msrb.gmra.mxu3 %v13391_v31  ;;  %v9613_v15 = vld [vmem:[#allocation3 + $0x718] sm:$0xf]  ;;  %v11134_v3 = vld [vmem:[#allocation3 + $0x6d4] sm:$0xf] }
 0x683   :  { %4750 = vmatpush.bf16.msra.mxu3 %v9506_v27  ;;  %4723 = vmatpush.bf16.msra.mxu1 %v9466_v54  ;;  %v9710_v27 = vor.u32 %v11171_v45, %v9709_v25  ;;  %v9677_v54 = vld [vmem:[#allocation3 + $0x798] sm:$0xf]  ;;  %v11150_v25 = vld [vmem:[#allocation3 + $0x754] sm:$0xf] }
 0x684   :  { %4737 = vmatpush.bf16.msra.mxu2 %v9470_v51  ;;  %4758 = vmatpush.bf16.msrb.mxu0 %v9702_v50  ;;  %v9674_v51 = vor.u32 %v11158_v19, %v9671_v34  ;;  %v9678_v49 = vor.u32 %v11163_v9, %v9677_v54  ;;  %v9645_v45 = vld [vmem:[#allocation3 + $0x758] sm:$0xf]  ;;  %v13401_v19 = vpop.f32.mrf.mxu2  ;;  %v13403_v34 = vpop.f32.mrf.mxu3  ;;  %v9605_v54 = vld [vmem:[#allocation3 + $0x710] sm:$0xf] }
 0x685   :  { %v9646_v6 = vor.u32 %v11155_v24, %v9645_v45  ;;  %v11146_v9 = vld [vmem:[#allocation3 + $0x72c] sm:$0xf0]  ;;  %v11143_v45 = vld [vmem:[#allocation3 + $0x71c] sm:$0xf] }
 0x686   :  { %v9615_v24 = vld [vmem:[#allocation3 + $0x738] sm:$0xf0] }
 0x687   :  { %4751 = vmatpush.bf16.msra.mxu3 %v9474_v5  ;;  %4772 = vmatpush.bf16.msrb.mxu1 %v9706_v20  ;;  %v9637_v5 = vld [vmem:[#allocation3 + $0x750] sm:$0xf]  ;;  %v9639_v20 = vld [vmem:[#allocation3 + $0x770] sm:$0xf0] }
 0x688   :  { %4786 = vmatpush.bf16.msrb.mxu2 %v9710_v27  ;;  %4759 = vmatpush.bf16.msrb.mxu0 %v9670_v0  ;;  %v9638_v50 = vor.u32 %v11154_v10, %v9637_v5  ;;  %v9642_v53 = vor.u32 %v11150_v25, %v9639_v20  ;;  %v11151_v27 = vld [vmem:[#allocation3 + $0x75c] sm:$0xf]  ;;  %v9606_v0 = vor.u32 %v11146_v9, %v9605_v54  ;;  %v11147_v5 = vld [vmem:[#allocation3 + $0x734] sm:$0xf0]  ;;  %v13407_v10 = vpop.f32.mrf.mxu1 }
 0x689   :  { %v9614_v20 = vor.u32 %v11147_v5, %v9613_v15  ;;  %v9581_v54 = vld [vmem:[#allocation3 + $0x6d8] sm:$0xf]  ;;  %v11130_v15 = vld [vmem:[#allocation3 + $0x6ac] sm:$0xf0] }
 0x68a   :  { %v11139_v9 = vld [vmem:[#allocation3 + $0x6f4] sm:$0xf0] }
 0x68b   :  { %4800 = vmatpush.bf16.msrb.mxu3 %v9714_v37  ;;  %4773 = vmatpush.bf16.msrb.mxu1 %v9674_v51  ;;  %v9650_v37 = vor.u32 %v11151_v27, %v9647_v33  ;;  %v9607_v51 = vld [vmem:[#allocation3 + $0x730] sm:$0xf0]  ;;  %v9573_v27 = vld [vmem:[#allocation3 + $0x6d0] sm:$0xf]  ;;  %v9582_v31 = vor.u32 %v11139_v9, %v9581_v54 }
 0x68c   :  { %4787 = vmatpush.bf16.msrb.mxu2 %v9678_v49  ;;  %4760 = vmatpush.bf16.msrb.mxu0 %v9638_v50  ;;  %v13405_v49 = vpop.f32.mrf.mxu0  ;;  %v9610_v25 = vor.u32 %v11142_v32, %v9607_v51  ;;  %v11138_v33 = vld [vmem:[#allocation3 + $0x6ec] sm:$0xf0]  ;;  %v13409_v5 = vpop.f32.mrf.mxu2 }
 0x68d   :  { %v9574_v50 = vor.u32 %v11138_v33, %v9573_v27  ;;  %v9541_v51 = vld [vmem:[#allocation3 + $0x690] sm:$0xf]  ;;  %v11131_v27 = vld [vmem:[#allocation3 + $0x6b4] sm:$0xf0] }
 0x68f   :  { %4801 = vmatpush.bf16.msrb.mxu3 %v9682_v59  ;;  %4774 = vmatpush.bf16.msrb.mxu1 %v9642_v53  ;;  %v9618_v59 = vor.u32 %v11143_v45, %v9615_v24  ;;  %v9575_v53 = vld [vmem:[#allocation3 + $0x6f0] sm:$0xf0]  ;;  %v13411_v45 = vpop.f32.mrf.mxu3  ;;  %v9549_v24 = vld [vmem:[#allocation3 + $0x698] sm:$0xf] }
 0x690   :  { %4788 = vmatpush.bf16.msrb.mxu2 %v9646_v6  ;;  %4761 = vmatpush.bf16.msrb.mxu0 %v9606_v0  ;;  %v9578_v22 = vor.u32 %v11134_v3, %v9575_v53  ;;  %v9583_v6 = vld [vmem:[#allocation3 + $0x6f8] sm:$0xf0]  ;;  %v9542_v0 = vor.u32 %v11130_v15, %v9541_v51  ;;  %v9550_v53 = vor.u32 %v11131_v27, %v9549_v24  ;;  %v11123_v24 = vld [vmem:[#allocation3 + $0x674] sm:$0xf0] }
 0x691   :  { %v9586_v32 = vor.u32 %v11135_v44, %v9583_v6  ;;  %v9551_v44 = vld [vmem:[#allocation3 + $0x6b8] sm:$0xf0] }
 0x693   :  { %4802 = vmatpush.bf16.msrb.mxu3 %v9650_v37  ;;  %4775 = vmatpush.bf16.msrb.mxu1 %v9610_v25  ;;  %v11126_v37 = vld [vmem:[#allocation3 + $0x694] sm:$0xf] }
 0x694   :  { %4789 = vmatpush.bf16.msrb.mxu2 %v9614_v20  ;;  %4762 = vmatpush.bf16.msrb.mxu0 %v9574_v50  ;;  %v9543_v25 = vld [vmem:[#allocation3 + $0x6b0] sm:$0xf0]  ;;  %v11122_v50 = vld [vmem:[#allocation3 + $0x66c] sm:$0xf0] }
 0x695   :  { %v9546_v33 = vor.u32 %v11126_v37, %v9543_v25  ;;  %v9511_v37 = vld [vmem:[#allocation3 + $0x670] sm:$0xf0]  ;;  %v9517_v25 = vld [vmem:[#allocation3 + $0x658] sm:$0xf] }
 0x697   :  { %4803 = vmatpush.bf16.msrb.mxu3 %v9618_v59  ;;  %4776 = vmatpush.bf16.msrb.mxu1 %v9578_v22  ;;  %v11127_v59 = vld [vmem:[#allocation3 + $0x69c] sm:$0xf]  ;;  %v11118_v22 = vld [vmem:[#allocation3 + $0x654] sm:$0xf] }
 0x698   :  { %4790 = vmatpush.bf16.msrb.mxu2 %v9582_v31  ;;  %v9554_v6 = vor.u32 %v11127_v59, %v9551_v44  ;;  %4763 = vmatpush.bf16.msrb.mxu0 %v9542_v0  ;;  %v9510_v31 = vor.u32 %v11122_v50, %v9509_v28  ;;  %v9514_v27 = vor.u32 %v11118_v22, %v9511_v37  ;;  %v9477_v44 = vld [vmem:[#allocation3 + $0x610] sm:$0xf]  ;;  %v9485_v50 = vld [vmem:[#allocation3 + $0x618] sm:$0xf] }
 0x699   :  { %v9478_v28 = vor.u32 %v11114_v23, %v9477_v44 }
 0x69b   :  { %4804 = vmatpush.bf16.msrb.mxu3 %v9586_v32  ;;  %4777 = vmatpush.bf16.msrb.mxu1 %v9546_v33  ;;  %v9479_v33 = vld [vmem:[#allocation3 + $0x630] sm:$0xf0] }
 0x69c   :  { %4791 = vmatpush.bf16.msrb.mxu2 %v9550_v53  ;;  %4764 = vmatpush.bf16.msrb.mxu0 %v9510_v31  ;;  %v11115_v53 = vld [vmem:[#allocation3 + $0x634] sm:$0xf0] }
 0x69d   :  { %v9486_v31 = vor.u32 %v11115_v53, %v9485_v50 }
 0x69f   :  { %4805 = vmatpush.bf16.msrb.mxu3 %v9554_v6  ;;  %4778 = vmatpush.bf16.msrb.mxu1 %v9514_v27 }
 0x6a0   :  { %4765 = vmatpush.bf16.msrb.mxu0 %v9478_v28 }
 0x6fe   :  { %v4226_v20 = vpop.f32.mrf.mxu0  ;;  %v4240_v3 = vpop.f32.mrf.mxu1 }
 0x6ff   :  { %v4227_v54 = vadd.f32 %v4226_v20, %v13397_v16  ;;  %v4241_v9 = vadd.f32 %v4240_v3, %v13399_v17  ;;  %v9518_v16 = vor.u32 %v11123_v24, %v9517_v25  ;;  %v11119_v20 = vld [vmem:[#allocation3 + $0x65c] sm:$0xf] }
 0x700   :  { %v9519_v17 = vld [vmem:[#allocation3 + $0x678] sm:$0xf0] }
 0x701   :  { %v4273_v51 = vadd.f32 %v4227_v54, %v14786_v26  ;;  %v4274_v15 = vadd.f32 %v4241_v9, %v14787_v21  ;;  %v9522_v59 = vor.u32 %v11119_v20, %v9519_v17  ;;  %v11110_v54 = vld [vmem:[#allocation3 + $0x614] sm:$0xf]  ;;  %4792 = vmatpush.bf16.msrb.mxu2 %v9518_v16  ;;  %v9487_v25 = vld [vmem:[#allocation3 + $0x638] sm:$0xf0] }
 0x702   :  { %v9482_v6 = vor.u32 %v11110_v54, %v9479_v33 }
 0x703   :  { %v4281_v32 = vmul.f32 0.5, %v4273_v51  ;;  %v4289_v3 = vmul.f32 0.5, %v4274_v15  ;;  %v11111_v15 = vld [vmem:[#allocation3 + $0x61c] sm:$0xf]  ;;  %4806 = vmatpush.bf16.msrb.mxu3 %v9522_v59 }
 0x704   :  { %v9490_v27 = vor.u32 %v11111_v15, %v9487_v25  ;;  %4779 = vmatpush.bf16.msrb.mxu1 %v9482_v6 }
 0x705   :  { %11585 = vtanh.f32 %v4281_v32  ;;  %v4254_v9 = vpop.f32.mrf.mxu2  ;;  %v4268_v0 = vpop.f32.mrf.mxu3  ;;  %4793 = vmatpush.bf16.msrb.mxu2 %v9486_v31 }
 0x706   :  { %11587 = vtanh.f32 %v4289_v3  ;;  %v4255_v22 = vadd.f32 %v4254_v9, %v13401_v19  ;;  %v4228_v37 = vpop.f32.mrf.mxu0  ;;  %v4242_v51 = vpop.f32.mrf.mxu1  ;;  %v4269_v17 = vadd.f32 %v4268_v0, %v13403_v34 }
 0x707   :  { %v4229_v24 = vadd.f32 %v4228_v37, %v13405_v49  ;;  %v4243_v20 = vadd.f32 %v4242_v51, %v13407_v10  ;;  %4807 = vmatpush.bf16.msrb.mxu3 %v9490_v27 }
 0x708   :  { %v4275_v23 = vadd.f32 %v4255_v22, %v14788_v8  ;;  %v4276_v44 = vadd.f32 %v4269_v17, %v14789_v12 }
 0x709   :  { %v4277_v32 = vadd.f32 %v4229_v24, %v14786_v26  ;;  %v4278_v19 = vadd.f32 %v4243_v20, %v14787_v21 }
 0x70a   :  { %11589 = vtanh.f32 %v4275_v23  ;;  %v4299_v22 = vmul.f32 0.5, %v4276_v44 }
 0x70b   :  { %v11586_v16 = vpop.eup %11585  ;;  %v4282_v3 = vmul.f32 0.5, %v4277_v32  ;;  %v4290_v49 = vmul.f32 0.5, %v4278_v19 }
 0x70c   :  { %v11588_v10 = vpop.eup %11587  ;;  %v4285_v59 = vmul.f32 0.5, %v11586_v16 }
 0x70d   :  { %v4293_v54 = vmul.f32 0.5, %v11588_v10  ;;  %11591 = vtanh.f32 %v4282_v3  ;;  %v4256_v9 = vpop.f32.mrf.mxu2  ;;  %v4270_v34 = vpop.f32.mrf.mxu3 }
 0x70e   :  { %11593 = vtanh.f32 %v4290_v49  ;;  %v4257_v0 = vadd.f32 %v4256_v9, %v13409_v5  ;;  %v4271_v28 = vadd.f32 %v4270_v34, %v13411_v45  ;;  %v4287_v33 = vadd.f32 0.5, %v4285_v59 }
 0x70f   :  { %v4295_v50 = vadd.f32 0.5, %v4293_v54 }
 0x710   :  { %v11590_v53 = vpop.eup %11589  ;;  %v4279_v37 = vadd.f32 %v4257_v0, %v14788_v8  ;;  %v4280_v51 = vadd.f32 %v4271_v28, %v14789_v12 }
 0x711   :  { %v4307_v25 = vmul.f32 %v4295_v50, %v13214_v1  ;;  %v4309_v24 = vmul.f32 %v11590_v53, %v4287_v33  ;;  %v15010_v33 = vld [vmem:[#allocation50_spill] sm:$0xff]  ;;  %v15011_v50 = vld [vmem:[#allocation51_spill] sm:$0xff] }
 0x712   :  { %11595 = vtanh.f32 %v4279_v37  ;;  %v4300_v6 = vmul.f32 0.5, %v4280_v51  ;;  %v15012_v53 = vld [vmem:[#allocation54_spill] sm:$0xff]  ;;  %v15014_v37 = vld [vmem:[#allocation80_spill] sm:$0xff]  ;;  %v15015_v51 = vld [vmem:[#allocation81_spill] sm:$0xff] }
 0x713   :  { %v11592_v15 = vpop.eup %11591  ;;  %11597 = vtanh.f32 %v4299_v22  ;;  %v13430_v27 = vadd.f32 %v4309_v24, %v4307_v25  ;;  %v15013_v22 = vld [vmem:[#allocation79_spill] sm:$0xff]  ;;  %v15019_v24 = vld [vmem:[#allocation84_spill] sm:$0xff] }
 0x714   :  { %v11594_v20 = vpop.eup %11593  ;;  %v4286_v31 = vmul.f32 0.5, %v11592_v15  ;;  %11599 = vtanh.f32 %v4300_v6  ;;  %v15016_v6 = vld [vmem:[#allocation82_spill] sm:$0xff]  ;;  %v15017_v15 = vld [vmem:[#allocation160_spill] sm:$0xff]  ;;  %v15018_v25 = vld [vmem:[#allocation83_spill] sm:$0xff] }
 0x715   :  { %v4294_v5 = vmul.f32 0.5, %v11594_v20  ;;  %11601 = vtanh.f32 %v13430_v27  ;;  %v15020_v20 = vld [vmem:[#allocation85_spill] sm:$0xff] }
 0x716   :  { %v4288_v45 = vadd.f32 0.5, %v4286_v31  ;;  %v15021_v31 = vld [vmem:[#allocation86_spill] sm:$0xff] }
 0x717   :  { %v4296_v23 = vadd.f32 0.5, %v4294_v5  ;;  %v15022_v5 = vld [vmem:[#allocation89_spill] sm:$0xff] }
 0x718   :  { %v11596_v17 = vpop.eup %11595 }
 0x719   :  { %v4308_v32 = vmul.f32 %v4296_v23, %v13218_v55  ;;  %v4310_v19 = vmul.f32 %v11596_v17, %v4288_v45  ;;  %v11598_v16 = vpop.eup %11597  ;;  %v15009_v55 = vld [vmem:[#allocation49_spill] sm:$0xff]  ;;  %v15023_v45 = vld [vmem:[#allocation90_spill] sm:$0xff]  ;;  %v15024_v23 = vld [vmem:[#allocation91_spill] sm:$0xff] }
 0x71a   :  { %v11600_v3 = vpop.eup %11599  ;;  %v4303_v1 = vmul.f32 0.5, %v11598_v16  ;;  %v15025_v17 = vld [vmem:[#allocation92_spill] sm:$0xff]  ;;  %v15028_v16 = vld [vmem:[#allocation95_spill] sm:$0xff] }
 0x71b   :  { %v13434_v49 = vadd.f32 %v4310_v19, %v4308_v32  ;;  %v4304_v10 = vmul.f32 0.5, %v11600_v3  ;;  %v11602_v59 = vpop.eup %11601  ;;  %v15026_v32 = vld [vmem:[#allocation93_spill] sm:$0xff]  ;;  %v15027_v19 = vld [vmem:[#allocation94_spill] sm:$0xff]  ;;  %v15029_v3 = vld [vmem:[#allocation96_spill] sm:$0xff] }
 0x71c   :  { %v4305_v44 = vadd.f32 0.5, %v4303_v1  ;;  %v15030_v1 = vld [vmem:[#allocation99_spill] sm:$0xff] }
 0x71d   :  { %11603 = vtanh.f32 %v13434_v49  ;;  %v4306_v54 = vadd.f32 0.5, %v4304_v10  ;;  %v15031_v10 = vld [vmem:[#allocation100_spill] sm:$0xff] }
 0x71e   :  { %v4315_v34 = vmul.f32 %v11602_v59, %v4305_v44  ;;  %v15032_v59 = vld [vmem:[#allocation101_spill] sm:$0xff]  ;;  %v15033_v44 = vld [vmem:[#allocation102_spill] sm:$0xff] }
 0x723   :  { %v11604_v9 = vpop.eup %11603 }
 0x724   :  { %v4316_v0 = vmul.f32 %v11604_v9, %v4306_v54  ;;  %v15034_v54 = vld [vmem:[#allocation103_spill] sm:$0xff]  ;;  %v15035_v9 = vld [vmem:[#allocation104_spill] sm:$0xff] }
 0x726   :  { %v13437_v28 = vpack.c.bf16 %v4316_v0, %v4315_v34  ;;  %v15036_v34 = vld [vmem:[#allocation105_spill] sm:$0xff]  ;;  %v15037_v0 = vld [vmem:[#allocation106_spill] sm:$0xff] }
 0x728   :  { %4710 = vmatmul.bf16.vlgmr.msra.gmra.mxu0 %v13437_v28  ;;  %4724 = vmatmul.bf16.vlgmr.msra.gmra.mxu1 %v13437_v28 }
 0x729   :  { %4738 = vmatmul.bf16.vlgmr.msra.gmra.mxu2 %v13437_v28  ;;  %4752 = vmatmul.bf16.vlgmr.msra.gmra.mxu3 %v13437_v28 }
 0x72a   :  { %4838 = vmatpush.bf16.msra.mxu0 %v12188_v36  ;;  %4852 = vmatpush.bf16.msra.mxu1 %v12190_v40 }
 0x72b   :  { %4866 = vmatpush.bf16.msra.mxu2 %v12192_v43  ;;  %4880 = vmatpush.bf16.msra.mxu3 %v12197_v52 }
 0x72e   :  { %4839 = vmatpush.bf16.msra.mxu0 %v12208_v58  ;;  %4853 = vmatpush.bf16.msra.mxu1 %v12210_v13 }
 0x72f   :  { %4867 = vmatpush.bf16.msra.mxu2 %v12212_v14  ;;  %4881 = vmatpush.bf16.msra.mxu3 %v12219_v18 }
 0x732   :  { %4840 = vmatpush.bf16.msra.mxu0 %v12235_v30  ;;  %4854 = vmatpush.bf16.msra.mxu1 %v12237_v38 }
 0x733   :  { %4868 = vmatpush.bf16.msra.mxu2 %v12239_v39  ;;  %4882 = vmatpush.bf16.msra.mxu3 %v12250_v56 }
 0x736   :  { %4841 = vmatpush.bf16.msra.mxu0 %v12263_v29  ;;  %4855 = vmatpush.bf16.msra.mxu1 %v12265_v2 }
 0x737   :  { %4869 = vmatpush.bf16.msra.mxu2 %v12267_v46  ;;  %4883 = vmatpush.bf16.msra.mxu3 %v12278_v62 }
 0x738   :  { %4766 = vmatmul.bf16.vlgmr.msrb.gmra.mxu0 %v13437_v28  ;;  %4780 = vmatmul.bf16.vlgmr.msrb.gmra.mxu1 %v13437_v28 }
 0x739   :  { %4794 = vmatmul.bf16.vlgmr.msrb.gmra.mxu2 %v13437_v28  ;;  %4808 = vmatmul.bf16.vlgmr.msrb.gmra.mxu3 %v13437_v28 }
 0x73a   :  { %4842 = vmatpush.bf16.msra.mxu0 %v12291_v7  ;;  %4856 = vmatpush.bf16.msra.mxu1 %v12293_v61 }
 0x73b   :  { %4870 = vmatpush.bf16.msra.mxu2 %v12295_v63  ;;  %4884 = vmatpush.bf16.msra.mxu3 %v12306_v47 }
 0x73e   :  { %4843 = vmatpush.bf16.msra.mxu0 %v12319_v35  ;;  %4857 = vmatpush.bf16.msra.mxu1 %v12321_v42 }
 0x73f   :  { %4871 = vmatpush.bf16.msra.mxu2 %v12323_v11  ;;  %4885 = vmatpush.bf16.msra.mxu3 %v12334_v48 }
 0x742   :  { %4844 = vmatpush.bf16.msra.mxu0 %v12347_v60  ;;  %4858 = vmatpush.bf16.msra.mxu1 %v12349_v41 }
 0x743   :  { %4872 = vmatpush.bf16.msra.mxu2 %v12351_v4  ;;  %4886 = vmatpush.bf16.msra.mxu3 %v12362_v57 }
 0x746   :  { %4845 = vmatpush.bf16.msra.mxu0 %v15009_v55  ;;  %4859 = vmatpush.bf16.msra.mxu1 %v15010_v33  ;;  %v9765_v33 = vld [vmem:[#allocation3 + $0x850] sm:$0xf] }
 0x747   :  { %4873 = vmatpush.bf16.msra.mxu2 %v15011_v50  ;;  %4887 = vmatpush.bf16.msra.mxu3 %v15012_v53  ;;  %v9919_v53 = vld [vmem:[#allocation3 + $0x9a8] sm:$0xf0]  ;;  %v11199_v50 = vld [vmem:[#allocation3 + $0x8dc] sm:$0xf]  ;;  %v11178_v55 = vld [vmem:[#allocation3 + $0x82c] sm:$0xf0] }
 0x749   :  { %4846 = vmatmul.bf16.vlgmr.msra.gmra.mxu0 %v15017_v15  ;;  %4860 = vmatmul.bf16.vlgmr.msra.gmra.mxu1 %v15017_v15 }
 0x74a   :  { %4939 = vmatpush.bf16.msrb.mxu0 %v15013_v22  ;;  %4953 = vmatpush.bf16.msrb.mxu1 %v15014_v37  ;;  %v11225_v37 = vld [vmem:[#allocation3 + $0x9a4] sm:$0xf0]  ;;  %v11221_v22 = vld [vmem:[#allocation3 + $0x98c] sm:$0xf] }
 0x74b   :  { %4967 = vmatpush.bf16.msrb.mxu2 %v15015_v51  ;;  %4981 = vmatpush.bf16.msrb.mxu3 %v15016_v6  ;;  %v15108_v51 = vld [vmem:[#allocation78_spill] sm:$0xff] }
 0x74c   :  { %4874 = vmatmul.bf16.vlgmr.msra.gmra.mxu2 %v15017_v15  ;;  %4888 = vmatmul.bf16.vlgmr.msra.gmra.mxu3 %v15017_v15  ;;  %v15038_v15 = vld [vmem:[#allocation109_spill] sm:$0xff] }
 0x74e   :  { %4940 = vmatpush.bf16.msrb.mxu0 %v15018_v25  ;;  %4954 = vmatpush.bf16.msrb.mxu1 %v15019_v24 }
 0x74f   :  { %4968 = vmatpush.bf16.msrb.mxu2 %v15020_v20  ;;  %4982 = vmatpush.bf16.msrb.mxu3 %v15021_v31  ;;  %v15107_v31 = vld [vmem:[#allocation77_spill] sm:$0xff] }
 0x752   :  { %4941 = vmatpush.bf16.msrb.mxu0 %v15022_v5  ;;  %4955 = vmatpush.bf16.msrb.mxu1 %v15023_v45  ;;  %v15106_v5 = vld [vmem:[#allocation47_spill] sm:$0xff] }
 0x753   :  { %4969 = vmatpush.bf16.msrb.mxu2 %v15024_v23  ;;  %4983 = vmatpush.bf16.msrb.mxu3 %v15025_v17 }
 0x756   :  { %4942 = vmatpush.bf16.msrb.mxu0 %v15026_v32  ;;  %4956 = vmatpush.bf16.msrb.mxu1 %v15027_v19  ;;  %v15082_v32 = vld [vmem:[#allocation175_spill] sm:$0xff] }
 0x757   :  { %4970 = vmatpush.bf16.msrb.mxu2 %v15028_v16  ;;  %4984 = vmatpush.bf16.msrb.mxu3 %v15029_v3  ;;  %v15039_v16 = vld [vmem:[#allocation110_spill] sm:$0xff]  ;;  %v15040_v3 = vld [vmem:[#allocation111_spill] sm:$0xff] }
 0x75a   :  { %4943 = vmatpush.bf16.msrb.mxu0 %v15030_v1  ;;  %4957 = vmatpush.bf16.msrb.mxu1 %v15031_v10  ;;  %v15041_v1 = vld [vmem:[#allocation112_spill] sm:$0xff]  ;;  %v15042_v10 = vld [vmem:[#allocation113_spill] sm:$0xff] }
 0x75b   :  { %4971 = vmatpush.bf16.msrb.mxu2 %v15032_v59  ;;  %4985 = vmatpush.bf16.msrb.mxu3 %v15033_v44  ;;  %v15043_v59 = vld [vmem:[#allocation114_spill] sm:$0xff]  ;;  %v15044_v44 = vld [vmem:[#allocation115_spill] sm:$0xff] }
 0x75e   :  { %4944 = vmatpush.bf16.msrb.mxu0 %v15034_v54  ;;  %4958 = vmatpush.bf16.msrb.mxu1 %v15035_v9  ;;  %v15045_v54 = vld [vmem:[#allocation116_spill] sm:$0xff]  ;;  %v15046_v9 = vld [vmem:[#allocation118_spill] sm:$0xff] }
 0x75f   :  { %4972 = vmatpush.bf16.msrb.mxu2 %v15036_v34  ;;  %4986 = vmatpush.bf16.msrb.mxu3 %v15037_v0  ;;  %v15047_v34 = vld [vmem:[#allocation119_spill] sm:$0xff]  ;;  %v15078_v0 = vld [vmem:[#allocation173_spill] sm:$0xff] }
 0x762   :  { %4945 = vmatpush.bf16.msrb.mxu0 %v15038_v15  ;;  %4959 = vmatpush.bf16.msrb.mxu1 %v15039_v16  ;;  %v15056_v16 = vld [vmem:[#allocation130_spill] sm:$0xff]  ;;  %v15057_v15 = vld [vmem:[#allocation132_spill] sm:$0xff] }
 0x763   :  { %4973 = vmatpush.bf16.msrb.mxu2 %v15040_v3  ;;  %4987 = vmatpush.bf16.msrb.mxu3 %v15041_v1  ;;  %v15048_v1 = vld [vmem:[#allocation121_spill] sm:$0xff] }
 0x764   :  { %v15055_v3 = vld [vmem:[#allocation129_spill] sm:$0xff] }
 0x766   :  { %4946 = vmatpush.bf16.msrb.mxu0 %v15042_v10  ;;  %4960 = vmatpush.bf16.msrb.mxu1 %v15043_v59  ;;  %v15049_v10 = vld [vmem:[#allocation122_spill] sm:$0xff]  ;;  %v15050_v59 = vld [vmem:[#allocation123_spill] sm:$0xff] }
 0x767   :  { %4974 = vmatpush.bf16.msrb.mxu2 %v15044_v44  ;;  %4988 = vmatpush.bf16.msrb.mxu3 %v15045_v54  ;;  %v15051_v44 = vld [vmem:[#allocation124_spill] sm:$0xff]  ;;  %v15052_v54 = vld [vmem:[#allocation125_spill] sm:$0xff] }
 0x769   :  { %4947 = vmatmul.bf16.vlgmr.msrb.gmra.mxu0 %v13437_v28  ;;  %4961 = vmatmul.bf16.vlgmr.msrb.gmra.mxu1 %v13437_v28 }
 0x76a   :  { %4995 = vmatpush.bf16.msra.mxu0 %v15046_v9  ;;  %5009 = vmatpush.bf16.msra.mxu1 %v15047_v34  ;;  %v15053_v9 = vld [vmem:[#allocation126_spill] sm:$0xff]  ;;  %v15054_v34 = vld [vmem:[#allocation127_spill] sm:$0xff] }
 0x76b   :  { %4975 = vmatmul.bf16.vlgmr.msrb.gmra.mxu2 %v13437_v28  ;;  %4989 = vmatmul.bf16.vlgmr.msrb.gmra.mxu3 %v13437_v28  ;;  %v15058_v28 = vld [vmem:[#allocation133_spill] sm:$0xff] }
 0x76c   :  { %5023 = vmatpush.bf16.msra.mxu2 %v15048_v1  ;;  %5037 = vmatpush.bf16.msra.mxu3 %v15049_v10  ;;  %v15059_v1 = vld [vmem:[#allocation134_spill] sm:$0xff]  ;;  %v15060_v10 = vld [vmem:[#allocation135_spill] sm:$0xff] }
 0x76e   :  { %4996 = vmatpush.bf16.msra.mxu0 %v15050_v59  ;;  %5010 = vmatpush.bf16.msra.mxu1 %v15051_v44  ;;  %v15061_v59 = vld [vmem:[#allocation136_spill] sm:$0xff]  ;;  %v15062_v44 = vld [vmem:[#allocation137_spill] sm:$0xff] }
 0x770   :  { %5024 = vmatpush.bf16.msra.mxu2 %v15052_v54  ;;  %5038 = vmatpush.bf16.msra.mxu3 %v15053_v9  ;;  %v15063_v54 = vld [vmem:[#allocation139_spill] sm:$0xff]  ;;  %v15064_v9 = vld [vmem:[#allocation140_spill] sm:$0xff] }
 0x772   :  { %4997 = vmatpush.bf16.msra.mxu0 %v15054_v34  ;;  %5011 = vmatpush.bf16.msra.mxu1 %v15055_v3  ;;  %v15065_v34 = vld [vmem:[#allocation142_spill] sm:$0xff]  ;;  %v15066_v3 = vld [vmem:[#allocation143_spill] sm:$0xff] }
 0x774   :  { %5025 = vmatpush.bf16.msra.mxu2 %v15056_v16  ;;  %5039 = vmatpush.bf16.msra.mxu3 %v15057_v15  ;;  %v15067_v16 = vld [vmem:[#allocation144_spill] sm:$0xff]  ;;  %v15068_v15 = vld [vmem:[#allocation145_spill] sm:$0xff] }
 0x776   :  { %4998 = vmatpush.bf16.msra.mxu0 %v15058_v28  ;;  %5012 = vmatpush.bf16.msra.mxu1 %v15059_v1  ;;  %v15069_v28 = vld [vmem:[#allocation146_spill] sm:$0xff]  ;;  %v15070_v1 = vld [vmem:[#allocation147_spill] sm:$0xff] }
 0x778   :  { %5026 = vmatpush.bf16.msra.mxu2 %v15060_v10  ;;  %5040 = vmatpush.bf16.msra.mxu3 %v15061_v59  ;;  %v15071_v10 = vld [vmem:[#allocation149_spill] sm:$0xff]  ;;  %v15072_v59 = vld [vmem:[#allocation150_spill] sm:$0xff] }
 0x77a   :  { %4999 = vmatpush.bf16.msra.mxu0 %v15062_v44  ;;  %5013 = vmatpush.bf16.msra.mxu1 %v15063_v54  ;;  %v15073_v44 = vld [vmem:[#allocation151_spill] sm:$0xff]  ;;  %v15074_v54 = vld [vmem:[#allocation152_spill] sm:$0xff] }
 0x77c   :  { %5027 = vmatpush.bf16.msra.mxu2 %v15064_v9  ;;  %5041 = vmatpush.bf16.msra.mxu3 %v15065_v34  ;;  %v15075_v9 = vld [vmem:[#allocation153_spill] sm:$0xff]  ;;  %v15076_v34 = vld [vmem:[#allocation154_spill] sm:$0xff] }
 0x77e   :  { %5000 = vmatpush.bf16.msra.mxu0 %v15066_v3  ;;  %5014 = vmatpush.bf16.msra.mxu1 %v15067_v16  ;;  %v15077_v3 = vld [vmem:[#allocation155_spill] sm:$0xff] }
 0x780   :  { %5028 = vmatpush.bf16.msra.mxu2 %v15068_v15  ;;  %5042 = vmatpush.bf16.msra.mxu3 %v15069_v28 }
 0x782   :  { %5001 = vmatpush.bf16.msra.mxu0 %v15070_v1  ;;  %5015 = vmatpush.bf16.msra.mxu1 %v15071_v10  ;;  %v15080_v1 = vld [vmem:[#allocation174_spill] sm:$0xff] }
 0x784   :  { %5029 = vmatpush.bf16.msra.mxu2 %v15072_v59  ;;  %5043 = vmatpush.bf16.msra.mxu3 %v15073_v44 }
 0x786   :  { %5002 = vmatpush.bf16.msra.mxu0 %v15074_v54  ;;  %5016 = vmatpush.bf16.msra.mxu1 %v15075_v9  ;;  %v15084_v54 = vld [vmem:[#allocation36_spill] sm:$0xff] }
 0x788   :  { %5030 = vmatpush.bf16.msra.mxu2 %v15076_v34  ;;  %5044 = vmatpush.bf16.msra.mxu3 %v15077_v3 }
 0x7a5   :  { %v4711_v16 = vpop.f32.mrf.mxu0  ;;  %v4725_v15 = vpop.f32.mrf.mxu1 }
 0x7a6   :  { %v13552_v28 = vadd.f32 %v4711_v16, %v15078_v0  ;;  %v13555_v19 = vadd.f32 %v4725_v15, %v15080_v1  ;;  %v15090_v1 = vld [vmem:[#allocation69_spill] sm:$0xff] }
 0x7a8   :  { %15079 = vst [vmem:[#allocation161_spill] sm:$0xff] %v13552_v28 }
 0x7a9   :  { %15081 = vst [vmem:[#allocation162_spill] sm:$0xff] %v13555_v19  ;;  %v15092_v19 = vld [vmem:[#allocation70_spill] sm:$0xff] }
 0x7ac   :  { %v4739_v10 = vpop.f32.mrf.mxu2  ;;  %v4753_v59 = vpop.f32.mrf.mxu3 }
 0x7ad   :  { %v13558_v44 = vadd.f32 %v4739_v10, %v15082_v32  ;;  %v13561_v17 = vadd.f32 %v4753_v59, %v15084_v54  ;;  %v13563_v9 = vpop.f32.mrf.mxu0  ;;  %v13565_v34 = vpop.f32.mrf.mxu1  ;;  %v15094_v59 = vld [vmem:[#allocation71_spill] sm:$0xff] }
 0x7ae   :  { %15086 = vst [vmem:[#allocation41_spill] sm:$0xff] %v13563_v9  ;;  %v15096_v9 = vld [vmem:[#allocation32_spill] sm:$0xff] }
 0x7af   :  { %15083 = vst [vmem:[#allocation163_spill] sm:$0xff] %v13558_v44 }
 0x7b0   :  { %15085 = vst [vmem:[#allocation40_spill] sm:$0xff] %v13561_v17 }
 0x7b1   :  { %15087 = vst [vmem:[#allocation72_spill] sm:$0xff] %v13565_v34 }
 0x7b4   :  { %v13567_v3 = vpop.f32.mrf.mxu2  ;;  %v13569_v23 = vpop.f32.mrf.mxu3 }
 0x7b5   :  { %15088 = vst [vmem:[#allocation42_spill] sm:$0xff] %v13567_v3  ;;  %v4767_v16 = vpop.f32.mrf.mxu0  ;;  %v4781_v0 = vpop.f32.mrf.mxu1 }
 0x7b6   :  { %15089 = vst [vmem:[#allocation43_spill] sm:$0xff] %v13569_v23  ;;  %v13572_v15 = vadd.f32 %v4767_v16, %v15090_v1  ;;  %v13575_v28 = vadd.f32 %v4781_v0, %v15092_v19  ;;  %v15102_v19 = vld [vmem:[#allocation44_spill] sm:$0xff] }
 0x7b8   :  { %15091 = vst [vmem:[#allocation73_spill] sm:$0xff] %v13572_v15 }
 0x7b9   :  { %15093 = vst [vmem:[#allocation74_spill] sm:$0xff] %v13575_v28  ;;  %v15103_v28 = vld [vmem:[#allocation45_spill] sm:$0xff] }
 0x7bc   :  { %v4795_v32 = vpop.f32.mrf.mxu2  ;;  %v4809_v10 = vpop.f32.mrf.mxu3 }
 0x7bd   :  { %v13578_v54 = vadd.f32 %v4795_v32, %v15094_v59  ;;  %v13581_v17 = vadd.f32 %v4809_v10, %v15096_v9  ;;  %v13583_v34 = vpop.f32.mrf.mxu0  ;;  %v13585_v3 = vpop.f32.mrf.mxu1  ;;  %v15104_v59 = vld [vmem:[#allocation76_spill] sm:$0xff] }
 0x7be   :  { %15098 = vst [vmem:[#allocation167_spill] sm:$0xff] %v13583_v34 }
 0x7bf   :  { %15095 = vst [vmem:[#allocation75_spill] sm:$0xff] %v13578_v54  ;;  %v15105_v54 = vld [vmem:[#allocation46_spill] sm:$0xff] }
 0x7c0   :  { %15097 = vst [vmem:[#allocation166_spill] sm:$0xff] %v13581_v17 }
 0x7c1   :  { %15099 = vst [vmem:[#allocation160_spill] sm:$0xff] %v13585_v3 }
 0x7c4   :  { %v13587_v23 = vpop.f32.mrf.mxu2  ;;  %v13589_v44 = vpop.f32.mrf.mxu3 }
 0x7c5   :  { %15100 = vst [vmem:[#allocation173_spill] sm:$0xff] %v13587_v23 }
 0x7c6   :  { %15101 = vst [vmem:[#allocation174_spill] sm:$0xff] %v13589_v44  ;;  %v4847_v16 = vpop.f32.mrf.mxu0  ;;  %v4861_v1 = vpop.f32.mrf.mxu1 }
 0x7c7   :  { %v4894_v0 = vadd.f32 %v4847_v16, %v15102_v19  ;;  %v4895_v15 = vadd.f32 %v4861_v1, %v15103_v28 }
 0x7c9   :  { %v4902_v45 = vmul.f32 0.5, %v4894_v0  ;;  %v4910_v32 = vmul.f32 0.5, %v4895_v15  ;;  %v11232_v0 = vld [vmem:[#allocation3 + $0x9dc] sm:$0xf0] }
 0x7cb   :  { %11605 = vtanh.f32 %v4902_v45  ;;  %v9941_v45 = vld [vmem:[#allocation3 + $0x9c0] sm:$0xf] }
 0x7cc   :  { %11607 = vtanh.f32 %v4910_v32  ;;  %v9942_v24 = vor.u32 %v11232_v0, %v9941_v45 }
 0x7ce   :  { %v4849_v17 = vpop.f32.mrf.mxu0  ;;  %v4863_v3 = vpop.f32.mrf.mxu1  ;;  %5480 = vmatpush.bf16.msrb.mxu0 %v9942_v24 }
 0x7cf   :  { %v4875_v9 = vpop.f32.mrf.mxu2  ;;  %v4889_v10 = vpop.f32.mrf.mxu3  ;;  %v4898_v23 = vadd.f32 %v4849_v17, %v15105_v54  ;;  %v4899_v44 = vadd.f32 %v4863_v3, %v15106_v5  ;;  %v9949_v54 = vld [vmem:[#allocation3 + $0x9c8] sm:$0xf] }
 0x7d0   :  { %v4896_v34 = vadd.f32 %v4875_v9, %v15104_v59  ;;  %v4897_v20 = vadd.f32 %v4889_v10, %v15107_v31  ;;  %v11228_v9 = vld [vmem:[#allocation3 + $0x9c4] sm:$0xf]  ;;  %v11233_v5 = vld [vmem:[#allocation3 + $0x9e4] sm:$0xf0] }
 0x7d1   :  { %v11606_v16 = vpop.eup %11605  ;;  %v4903_v19 = vmul.f32 0.5, %v4898_v23  ;;  %v4911_v28 = vmul.f32 0.5, %v4899_v44  ;;  %v9943_v59 = vld [vmem:[#allocation3 + $0x9e0] sm:$0xf0]  ;;  %v9950_v23 = vor.u32 %v11233_v5, %v9949_v54  ;;  %v11229_v44 = vld [vmem:[#allocation3 + $0x9cc] sm:$0xf] }
 0x7d2   :  { %11609 = vtanh.f32 %v4896_v34  ;;  %v11608_v1 = vpop.eup %11607  ;;  %v4906_v15 = vmul.f32 0.5, %v11606_v16  ;;  %v4920_v25 = vmul.f32 0.5, %v4897_v20  ;;  %v9946_v17 = vor.u32 %v11228_v9, %v9943_v59  ;;  %v9951_v16 = vld [vmem:[#allocation3 + $0x9e8] sm:$0xf0]  ;;  %v9909_v20 = vld [vmem:[#allocation3 + $0x980] sm:$0xf] }
 0x7d3   :  { %v4914_v32 = vmul.f32 0.5, %v11608_v1  ;;  %11611 = vtanh.f32 %v4903_v19  ;;  %v15109_v19 = vld [vmem:[#allocation87_spill] sm:$0xff]  ;;  %v9954_v0 = vor.u32 %v11229_v44, %v9951_v16  ;;  %v11220_v9 = vld [vmem:[#allocation3 + $0x984] sm:$0xf]  ;;  %5508 = vmatpush.bf16.msrb.mxu2 %v9950_v23  ;;  %v9922_v44 = vor.u32 %v11221_v22, %v9919_v53  ;;  %v9877_v16 = vld [vmem:[#allocation3 + $0x940] sm:$0xf] }
 0x7d4   :  { %11613 = vtanh.f32 %v4911_v28  ;;  %v4908_v3 = vadd.f32 0.5, %v4906_v15  ;;  %5494 = vmatpush.bf16.msrb.mxu1 %v9946_v17  ;;  %v11224_v28 = vld [vmem:[#allocation3 + $0x99c] sm:$0xf0]  ;;  %v9911_v15 = vld [vmem:[#allocation3 + $0x9a0] sm:$0xf0] }
 0x7d5   :  { %v4916_v34 = vadd.f32 0.5, %v4914_v32  ;;  %v9910_v59 = vor.u32 %v11224_v28, %v9909_v20  ;;  %v9917_v32 = vld [vmem:[#allocation3 + $0x988] sm:$0xf]  ;;  %5522 = vmatpush.bf16.msrb.mxu3 %v9954_v0  ;;  %v9914_v54 = vor.u32 %v11220_v9, %v9911_v15  ;;  %v9887_v53 = vld [vmem:[#allocation3 + $0x968] sm:$0xf0] }
 0x7d6   :  { %v9918_v5 = vor.u32 %v11225_v37, %v9917_v32  ;;  %v9885_v9 = vld [vmem:[#allocation3 + $0x948] sm:$0xf] }
 0x7d7   :  { %v4877_v31 = vpop.f32.mrf.mxu2  ;;  %v4891_v10 = vpop.f32.mrf.mxu3  ;;  %5481 = vmatpush.bf16.msrb.mxu0 %v9910_v59  ;;  %v11217_v15 = vld [vmem:[#allocation3 + $0x964] sm:$0xf0]  ;;  %v9845_v59 = vld [vmem:[#allocation3 + $0x900] sm:$0xf] }
 0x7d8   :  { %v11610_v6 = vpop.eup %11609  ;;  %v4900_v1 = vadd.f32 %v4877_v31, %v15108_v51  ;;  %v4901_v45 = vadd.f32 %v4891_v10, %v15109_v19  ;;  %v15110_v31 = vld [vmem:[#allocation35_spill] sm:$0xff]  ;;  %v11216_v19 = vld [vmem:[#allocation3 + $0x95c] sm:$0xf0]  ;;  %5495 = vmatpush.bf16.msrb.mxu1 %v9914_v54  ;;  %5509 = vmatpush.bf16.msrb.mxu2 %v9918_v5  ;;  %v9847_v5 = vld [vmem:[#allocation3 + $0x920] sm:$0xf0] }
 0x7d9   :  { %v11612_v51 = vpop.eup %11611  ;;  %v4928_v10 = vmul.f32 %v4916_v34, %v15110_v31  ;;  %v4930_v17 = vmul.f32 %v11610_v6, %v4908_v3  ;;  %v9878_v28 = vor.u32 %v11216_v19, %v9877_v16  ;;  %5523 = vmatpush.bf16.msrb.mxu3 %v9922_v44  ;;  %v9886_v6 = vor.u32 %v11217_v15, %v9885_v9  ;;  %v11213_v3 = vld [vmem:[#allocation3 + $0x94c] sm:$0xf]  ;;  %v11208_v54 = vld [vmem:[#allocation3 + $0x91c] sm:$0xf0]  ;;  %v9853_v16 = vld [vmem:[#allocation3 + $0x908] sm:$0xf] }
 0x7da   :  { %11615 = vtanh.f32 %v4900_v1  ;;  %v4921_v24 = vmul.f32 0.5, %v4901_v45  ;;  %v11614_v23 = vpop.eup %11613  ;;  %v4907_v20 = vmul.f32 0.5, %v11612_v51  ;;  %v11212_v1 = vld [vmem:[#allocation3 + $0x944] sm:$0xf]  ;;  %v9846_v31 = vor.u32 %v11208_v54, %v9845_v59  ;;  %v15112_v19 = vld [vmem:[#allocation66_spill] sm:$0xff] }
 0x7db   :  { %11617 = vtanh.f32 %v4920_v25  ;;  %v9879_v45 = vld [vmem:[#allocation3 + $0x960] sm:$0xf0]  ;;  %v4915_v0 = vmul.f32 0.5, %v11614_v23  ;;  %v13600_v22 = vadd.f32 %v4930_v17, %v4928_v10  ;;  %5482 = vmatpush.bf16.msrb.mxu0 %v9878_v28  ;;  %v9890_v25 = vor.u32 %v11213_v3, %v9887_v53  ;;  %v9855_v10 = vld [vmem:[#allocation3 + $0x928] sm:$0xf0] }
 0x7dc   :  { %11619 = vtanh.f32 %v4921_v24  ;;  %v9882_v37 = vor.u32 %v11212_v1, %v9879_v45  ;;  %v4909_v32 = vadd.f32 0.5, %v4907_v20  ;;  %v11204_v24 = vld [vmem:[#allocation3 + $0x904] sm:$0xf]  ;;  %5510 = vmatpush.bf16.msrb.mxu2 %v9886_v6  ;;  %v11209_v1 = vld [vmem:[#allocation3 + $0x924] sm:$0xf0] }
 0x7dd   :  { %15111 = vst [vmem:[#allocation175_spill] sm:$0xff] %v13600_v22  ;;  %v4917_v34 = vadd.f32 0.5, %v4915_v0  ;;  %v9850_v44 = vor.u32 %v11204_v24, %v9847_v5  ;;  %v11205_v45 = vld [vmem:[#allocation3 + $0x90c] sm:$0xf]  ;;  %5524 = vmatpush.bf16.msrb.mxu3 %v9890_v25  ;;  %v9854_v28 = vor.u32 %v11209_v1, %v9853_v16  ;;  %v9813_v9 = vld [vmem:[#allocation3 + $0x8c0] sm:$0xf]  ;;  %11621 = vtanh.f32 %v13600_v22 }
 0x7de   :  { %5496 = vmatpush.bf16.msrb.mxu1 %v9882_v37  ;;  %v9858_v0 = vor.u32 %v11205_v45, %v9855_v10  ;;  %v11200_v15 = vld [vmem:[#allocation3 + $0x8dc] sm:$0xf0]  ;;  %v11196_v3 = vld [vmem:[#allocation3 + $0x8c4] sm:$0xf]  ;;  %v9821_v6 = vld [vmem:[#allocation3 + $0x8c8] sm:$0xf] }
 0x7df   :  { %v4929_v23 = vmul.f32 %v4917_v34, %v15112_v19  ;;  %5483 = vmatpush.bf16.msrb.mxu0 %v9846_v31  ;;  %v9814_v34 = vor.u32 %v11200_v15, %v9813_v9  ;;  %v11201_v54 = vld [vmem:[#allocation3 + $0x8e4] sm:$0xf0]  ;;  %v9823_v24 = vld [vmem:[#allocation3 + $0x8e8] sm:$0xf0]  ;;  %v9783_v15 = vld [vmem:[#allocation3 + $0x8a0] sm:$0xf0] }
 0x7e0   :  { %v11616_v51 = vpop.eup %11615  ;;  %5511 = vmatpush.bf16.msrb.mxu2 %v9854_v28  ;;  %v9822_v25 = vor.u32 %v11201_v54, %v9821_v6  ;;  %v11192_v28 = vld [vmem:[#allocation3 + $0x89c] sm:$0xf0]  ;;  %v11189_v6 = vld [vmem:[#allocation3 + $0x88c] sm:$0xf] }
 0x7e1   :  { %v4931_v20 = vmul.f32 %v11616_v51, %v4909_v32  ;;  %v11618_v17 = vpop.eup %11617  ;;  %v9815_v32 = vld [vmem:[#allocation3 + $0x8e0] sm:$0xf0]  ;;  %v11197_v51 = vld [vmem:[#allocation3 + $0x8cc] sm:$0xf]  ;;  %5525 = vmatpush.bf16.msrb.mxu3 %v9858_v0 }
 0x7e2   :  { %v11620_v37 = vpop.eup %11619  ;;  %5497 = vmatpush.bf16.msrb.mxu1 %v9850_v44  ;;  %v9818_v59 = vor.u32 %v11196_v3, %v9815_v32  ;;  %v4924_v5 = vmul.f32 0.5, %v11618_v17  ;;  %v9826_v19 = vor.u32 %v11197_v51, %v9823_v24  ;;  %v9781_v17 = vld [vmem:[#allocation3 + $0x880] sm:$0xf]  ;;  %v11188_v0 = vld [vmem:[#allocation3 + $0x884] sm:$0xf] }
 0x7e3   :  { %v13604_v53 = vadd.f32 %v4931_v20, %v4929_v23  ;;  %v4925_v16 = vmul.f32 0.5, %v11620_v37  ;;  %5484 = vmatpush.bf16.msrb.mxu0 %v9814_v34  ;;  %v11622_v23 = vpop.eup %11621  ;;  %v9782_v9 = vor.u32 %v11192_v28, %v9781_v17  ;;  %v9789_v3 = vld [vmem:[#allocation3 + $0x888] sm:$0xf]  ;;  %v9786_v34 = vor.u32 %v11188_v0, %v9783_v15  ;;  %v9749_v51 = vld [vmem:[#allocation3 + $0x840] sm:$0xf] }
 0x7e4   :  { %5512 = vmatpush.bf16.msrb.mxu2 %v9822_v25  ;;  %v4926_v31 = vadd.f32 0.5, %v4924_v5  ;;  %v11193_v37 = vld [vmem:[#allocation3 + $0x8a4] sm:$0xf0]  ;;  %v11184_v24 = vld [vmem:[#allocation3 + $0x85c] sm:$0xf0] }
 0x7e5   :  { %15113 = vst [vmem:[#allocation36_spill] sm:$0xff] %v13604_v53  ;;  %11623 = vtanh.f32 %v13604_v53  ;;  %v4927_v20 = vadd.f32 0.5, %v4925_v16  ;;  %5526 = vmatpush.bf16.msrb.mxu3 %v9826_v19  ;;  %v9790_v32 = vor.u32 %v11193_v37, %v9789_v3  ;;  %v11180_v25 = vld [vmem:[#allocation3 + $0x844] sm:$0xf]  ;;  %v9750_v5 = vor.u32 %v11184_v24, %v9749_v51  ;;  %v9757_v19 = vld [vmem:[#allocation3 + $0x848] sm:$0xf] }
 0x7e6   :  { %5498 = vmatpush.bf16.msrb.mxu1 %v9818_v59  ;;  %v4936_v1 = vmul.f32 %v11622_v23, %v4926_v31  ;;  %v9791_v59 = vld [vmem:[#allocation3 + $0x8a8] sm:$0xf0]  ;;  %v9751_v16 = vld [vmem:[#allocation3 + $0x860] sm:$0xf0]  ;;  %v11185_v23 = vld [vmem:[#allocation3 + $0x864] sm:$0xf0] }
 0x7e7   :  { %5485 = vmatpush.bf16.msrb.mxu0 %v9782_v9  ;;  %v9794_v54 = vor.u32 %v11189_v6, %v9791_v59  ;;  %v9754_v31 = vor.u32 %v11180_v25, %v9751_v16  ;;  %v9717_v17 = vld [vmem:[#allocation3 + $0x800] sm:$0xf]  ;;  %v11172_v0 = vld [vmem:[#allocation3 + $0x804] sm:$0xf]  ;;  %v9725_v3 = vld [vmem:[#allocation3 + $0x808] sm:$0xf] }
 0x7e8   :  { %5513 = vmatpush.bf16.msrb.mxu2 %v9790_v32  ;;  %v11176_v28 = vld [vmem:[#allocation3 + $0x81c] sm:$0xf0]  ;;  %v9719_v15 = vld [vmem:[#allocation3 + $0x820] sm:$0xf0]  ;;  %v11177_v37 = vld [vmem:[#allocation3 + $0x824] sm:$0xf0] }
 0x7e9   :  { %5527 = vmatpush.bf16.msrb.mxu3 %v9794_v54  ;;  %v9718_v9 = vor.u32 %v11176_v28, %v9717_v17  ;;  %v9726_v32 = vor.u32 %v11177_v37, %v9725_v3  ;;  %v11173_v6 = vld [vmem:[#allocation3 + $0x80c] sm:$0xf]  ;;  %v9957_v54 = vld [vmem:[#allocation3 + $0x9d0] sm:$0xf]  ;;  %v11230_v25 = vld [vmem:[#allocation3 + $0x9d4] sm:$0xf] }
 0x7ea   :  { %5499 = vmatpush.bf16.msrb.mxu1 %v9786_v34  ;;  %v9722_v34 = vor.u32 %v11172_v0, %v9719_v15  ;;  %v9727_v59 = vld [vmem:[#allocation3 + $0x828] sm:$0xf0]  ;;  %v11234_v24 = vld [vmem:[#allocation3 + $0x9ec] sm:$0xf0]  ;;  %v9967_v17 = vld [vmem:[#allocation3 + $0x9f8] sm:$0xf0] }
 0x7eb   :  { %v11624_v44 = vpop.eup %11623  ;;  %5486 = vmatpush.bf16.msrb.mxu0 %v9750_v5  ;;  %v9730_v51 = vor.u32 %v11173_v6, %v9727_v59  ;;  %v9959_v5 = vld [vmem:[#allocation3 + $0x9f0] sm:$0xf0]  ;;  %v9958_v16 = vor.u32 %v11234_v24, %v9957_v54  ;;  %v9925_v28 = vld [vmem:[#allocation3 + $0x990] sm:$0xf]  ;;  %v11227_v6 = vld [vmem:[#allocation3 + $0x9b4] sm:$0xf0] }
 0x7ec   :  { %v4937_v45 = vmul.f32 %v11624_v44, %v4927_v20  ;;  %v9758_v20 = vor.u32 %v11185_v23, %v9757_v19  ;;  %v11181_v44 = vld [vmem:[#allocation3 + $0x84c] sm:$0xf]  ;;  %v9962_v19 = vor.u32 %v11230_v25, %v9959_v5  ;;  %v9965_v23 = vld [vmem:[#allocation3 + $0x9d8] sm:$0xf]  ;;  %v11226_v0 = vld [vmem:[#allocation3 + $0x9ac] sm:$0xf0] }
 0x7ed   :  { %v9926_v15 = vor.u32 %v11226_v0, %v9925_v28  ;;  %v11222_v3 = vld [vmem:[#allocation3 + $0x994] sm:$0xf]  ;;  %v11223_v59 = vld [vmem:[#allocation3 + $0x99c] sm:$0xf]  ;;  %v11218_v5 = vld [vmem:[#allocation3 + $0x96c] sm:$0xf0] }
 0x7ee   :  { %v13607_v10 = vpack.c.bf16 %v4937_v45, %v4936_v1  ;;  %v9759_v1 = vld [vmem:[#allocation3 + $0x868] sm:$0xf0]  ;;  %5500 = vmatpush.bf16.msrb.mxu1 %v9754_v31  ;;  %5514 = vmatpush.bf16.msrb.mxu2 %v9758_v20  ;;  %v11235_v31 = vld [vmem:[#allocation3 + $0x9f4] sm:$0xf0]  ;;  %v11231_v20 = vld [vmem:[#allocation3 + $0x9dc] sm:$0xf] }
 0x7ef   :  { %v9762_v45 = vor.u32 %v11181_v44, %v9759_v1  ;;  %5487 = vmatpush.bf16.msrb.mxu0 %v9718_v9  ;;  %v13613_v44 = vpop.f32.mrf.mxu0  ;;  %v13615_v1 = vpop.f32.mrf.mxu1  ;;  %v9970_v9 = vor.u32 %v11231_v20, %v9967_v17  ;;  %v9927_v37 = vld [vmem:[#allocation3 + $0x9b0] sm:$0xf0]  ;;  %v9935_v54 = vld [vmem:[#allocation3 + $0x9b8] sm:$0xf0]  ;;  %v11219_v20 = vld [vmem:[#allocation3 + $0x974] sm:$0xf0] }
 0x7f0   :  { %15114 = vst [vmem:[#allocation69_spill] sm:$0xff] %v13607_v10  ;;  %5003 = vmatmul.bf16.vlgmr.msra.gmra.mxu0 %v13607_v10  ;;  %5017 = vmatmul.bf16.vlgmr.msra.gmra.mxu1 %v13607_v10  ;;  %v9938_v25 = vor.u32 %v11223_v59, %v9935_v54  ;;  %v9903_v0 = vld [vmem:[#allocation3 + $0x978] sm:$0xf0]  ;;  %v11206_v59 = vld [vmem:[#allocation3 + $0x914] sm:$0xf] }
 0x7f1   :  { %5031 = vmatmul.bf16.vlgmr.msra.gmra.mxu2 %v13607_v10  ;;  %5045 = vmatmul.bf16.vlgmr.msra.gmra.mxu3 %v13607_v10  ;;  %v9869_v54 = vld [vmem:[#allocation3 + $0x918] sm:$0xf]  ;;  %v11198_v53 = vld [vmem:[#allocation3 + $0x8d4] sm:$0xf] }
 0x7f2   :  { %5528 = vmatpush.bf16.msrb.mxu3 %v9762_v45  ;;  %5501 = vmatpush.bf16.msrb.mxu1 %v9722_v34  ;;  %v9966_v45 = vor.u32 %v11235_v31, %v9965_v23  ;;  %v9933_v34 = vld [vmem:[#allocation3 + $0x998] sm:$0xf]  ;;  %v11214_v23 = vld [vmem:[#allocation3 + $0x954] sm:$0xf] }
 0x7f3   :  { %5515 = vmatpush.bf16.msrb.mxu2 %v9726_v32  ;;  %5536 = vmatpush.bf16.msra.mxu0 %v9958_v16  ;;  %v9930_v32 = vor.u32 %v11222_v3, %v9927_v37  ;;  %v9934_v24 = vor.u32 %v11227_v6, %v9933_v34  ;;  %v9901_v31 = vld [vmem:[#allocation3 + $0x958] sm:$0xf]  ;;  %v13617_v3 = vpop.f32.mrf.mxu2  ;;  %v13619_v37 = vpop.f32.mrf.mxu3  ;;  %v9861_v34 = vld [vmem:[#allocation3 + $0x910] sm:$0xf] }
 0x7f4   :  { %v9902_v28 = vor.u32 %v11219_v20, %v9901_v31  ;;  %v11210_v6 = vld [vmem:[#allocation3 + $0x92c] sm:$0xf0]  ;;  %v11207_v31 = vld [vmem:[#allocation3 + $0x91c] sm:$0xf] }
 0x7f5   :  { %v9871_v20 = vld [vmem:[#allocation3 + $0x938] sm:$0xf0] }
 0x7f6   :  { %5529 = vmatpush.bf16.msrb.mxu3 %v9730_v51  ;;  %5550 = vmatpush.bf16.msra.mxu1 %v9962_v19  ;;  %v9893_v51 = vld [vmem:[#allocation3 + $0x950] sm:$0xf]  ;;  %v9895_v19 = vld [vmem:[#allocation3 + $0x970] sm:$0xf0] }
 0x7f7   :  { %5564 = vmatpush.bf16.msra.mxu2 %v9966_v45  ;;  %5537 = vmatpush.bf16.msra.mxu0 %v9926_v15  ;;  %v9894_v16 = vor.u32 %v11218_v5, %v9893_v51  ;;  %v9898_v17 = vor.u32 %v11214_v23, %v9895_v19  ;;  %v11215_v45 = vld [vmem:[#allocation3 + $0x95c] sm:$0xf]  ;;  %v9862_v15 = vor.u32 %v11210_v6, %v9861_v34  ;;  %v11211_v51 = vld [vmem:[#allocation3 + $0x934] sm:$0xf0]  ;;  %v13623_v5 = vpop.f32.mrf.mxu1 }
 0x7f8   :  { %v9870_v19 = vor.u32 %v11211_v51, %v9869_v54  ;;  %v9837_v34 = vld [vmem:[#allocation3 + $0x8d8] sm:$0xf]  ;;  %v11194_v54 = vld [vmem:[#allocation3 + $0x8ac] sm:$0xf0] }
 0x7f9   :  { %v11203_v6 = vld [vmem:[#allocation3 + $0x8f4] sm:$0xf0] }
 0x7fa   :  { %5578 = vmatpush.bf16.msra.mxu3 %v9970_v9  ;;  %5551 = vmatpush.bf16.msra.mxu1 %v9930_v32  ;;  %v9906_v9 = vor.u32 %v11215_v45, %v9903_v0  ;;  %v9863_v32 = vld [vmem:[#allocation3 + $0x930] sm:$0xf0]  ;;  %v9829_v45 = vld [vmem:[#allocation3 + $0x8d0] sm:$0xf]  ;;  %v9838_v10 = vor.u32 %v11203_v6, %v9837_v34 }
 0x7fb   :  { %5565 = vmatpush.bf16.msra.mxu2 %v9934_v24  ;;  %5538 = vmatpush.bf16.msra.mxu0 %v9894_v16  ;;  %v13621_v24 = vpop.f32.mrf.mxu0  ;;  %v9866_v23 = vor.u32 %v11206_v59, %v9863_v32  ;;  %v11202_v0 = vld [vmem:[#allocation3 + $0x8ec] sm:$0xf0]  ;;  %v13625_v51 = vpop.f32.mrf.mxu2 }
 0x7fc   :  { %v9830_v16 = vor.u32 %v11202_v0, %v9829_v45  ;;  %v9797_v32 = vld [vmem:[#allocation3 + $0x890] sm:$0xf]  ;;  %v11195_v45 = vld [vmem:[#allocation3 + $0x8b4] sm:$0xf0] }
 0x7fe   :  { %5579 = vmatpush.bf16.msra.mxu3 %v9938_v25  ;;  %5552 = vmatpush.bf16.msra.mxu1 %v9898_v17  ;;  %v9874_v25 = vor.u32 %v11207_v31, %v9871_v20  ;;  %v9831_v17 = vld [vmem:[#allocation3 + $0x8f0] sm:$0xf0]  ;;  %v13627_v31 = vpop.f32.mrf.mxu3  ;;  %v9805_v20 = vld [vmem:[#allocation3 + $0x898] sm:$0xf] }
 0x7ff   :  { %5566 = vmatpush.bf16.msra.mxu2 %v9902_v28  ;;  %5539 = vmatpush.bf16.msra.mxu0 %v9862_v15  ;;  %v9834_v22 = vor.u32 %v11198_v53, %v9831_v17  ;;  %v9839_v28 = vld [vmem:[#allocation3 + $0x8f8] sm:$0xf0]  ;;  %v9798_v15 = vor.u32 %v11194_v54, %v9797_v32  ;;  %v9806_v17 = vor.u32 %v11195_v45, %v9805_v20  ;;  %v11187_v20 = vld [vmem:[#allocation3 + $0x874] sm:$0xf0] }
 0x800   :  { %v9842_v59 = vor.u32 %v11199_v50, %v9839_v28  ;;  %v9807_v50 = vld [vmem:[#allocation3 + $0x8b8] sm:$0xf0] }
 0x802   :  { %5580 = vmatpush.bf16.msra.mxu3 %v9906_v9  ;;  %5553 = vmatpush.bf16.msra.mxu1 %v9866_v23  ;;  %v11190_v9 = vld [vmem:[#allocation3 + $0x894] sm:$0xf] }
 0x803   :  { %5567 = vmatpush.bf16.msra.mxu2 %v9870_v19  ;;  %5540 = vmatpush.bf16.msra.mxu0 %v9830_v16  ;;  %v9799_v23 = vld [vmem:[#allocation3 + $0x8b0] sm:$0xf0]  ;;  %v11186_v16 = vld [vmem:[#allocation3 + $0x86c] sm:$0xf0] }
 0x804   :  { %v9802_v0 = vor.u32 %v11190_v9, %v9799_v23  ;;  %v9767_v9 = vld [vmem:[#allocation3 + $0x870] sm:$0xf0]  ;;  %v9773_v23 = vld [vmem:[#allocation3 + $0x858] sm:$0xf] }
 0x806   :  { %5581 = vmatpush.bf16.msra.mxu3 %v9874_v25  ;;  %5554 = vmatpush.bf16.msra.mxu1 %v9834_v22  ;;  %v11191_v25 = vld [vmem:[#allocation3 + $0x89c] sm:$0xf]  ;;  %v11182_v22 = vld [vmem:[#allocation3 + $0x854] sm:$0xf] }
 0x807   :  { %5568 = vmatpush.bf16.msra.mxu2 %v9838_v10  ;;  %v9810_v28 = vor.u32 %v11191_v25, %v9807_v50  ;;  %5541 = vmatpush.bf16.msra.mxu0 %v9798_v15  ;;  %v9766_v10 = vor.u32 %v11186_v16, %v9765_v33  ;;  %v9770_v45 = vor.u32 %v11182_v22, %v9767_v9  ;;  %v9733_v50 = vld [vmem:[#allocation3 + $0x810] sm:$0xf]  ;;  %v9741_v16 = vld [vmem:[#allocation3 + $0x818] sm:$0xf] }
 0x808   :  { %v9734_v33 = vor.u32 %v11178_v55, %v9733_v50 }
 0x80a   :  { %5582 = vmatpush.bf16.msra.mxu3 %v9842_v59  ;;  %5555 = vmatpush.bf16.msra.mxu1 %v9802_v0  ;;  %v9735_v0 = vld [vmem:[#allocation3 + $0x830] sm:$0xf0] }
 0x80b   :  { %5569 = vmatpush.bf16.msra.mxu2 %v9806_v17  ;;  %5542 = vmatpush.bf16.msra.mxu0 %v9766_v10  ;;  %v11179_v17 = vld [vmem:[#allocation3 + $0x834] sm:$0xf0] }
 0x80c   :  { %v9742_v10 = vor.u32 %v11179_v17, %v9741_v16 }
 0x80e   :  { %5583 = vmatpush.bf16.msra.mxu3 %v9810_v28  ;;  %5556 = vmatpush.bf16.msra.mxu1 %v9770_v45 }
 0x80f   :  { %5543 = vmatpush.bf16.msra.mxu0 %v9734_v33 }
 0x86d   :  { %v5004_v19 = vpop.f32.mrf.mxu0  ;;  %v5018_v53 = vpop.f32.mrf.mxu1 }
 0x86e   :  { %v5005_v34 = vadd.f32 %v5004_v19, %v13613_v44  ;;  %v5019_v6 = vadd.f32 %v5018_v53, %v13615_v1  ;;  %v9774_v44 = vor.u32 %v11187_v20, %v9773_v23  ;;  %v11183_v19 = vld [vmem:[#allocation3 + $0x85c] sm:$0xf] }
 0x86f   :  { %v9775_v1 = vld [vmem:[#allocation3 + $0x878] sm:$0xf0] }
 0x870   :  { %v5051_v32 = vadd.f32 %v5005_v34, %v14786_v26  ;;  %v5052_v54 = vadd.f32 %v5019_v6, %v14787_v21  ;;  %v9778_v25 = vor.u32 %v11183_v19, %v9775_v1  ;;  %v11174_v34 = vld [vmem:[#allocation3 + $0x814] sm:$0xf]  ;;  %5570 = vmatpush.bf16.msra.mxu2 %v9774_v44  ;;  %v9743_v23 = vld [vmem:[#allocation3 + $0x838] sm:$0xf0] }
 0x871   :  { %v9738_v28 = vor.u32 %v11174_v34, %v9735_v0 }
 0x872   :  { %v5059_v59 = vmul.f32 0.5, %v5051_v32  ;;  %v5067_v53 = vmul.f32 0.5, %v5052_v54  ;;  %v11175_v54 = vld [vmem:[#allocation3 + $0x81c] sm:$0xf]  ;;  %5584 = vmatpush.bf16.msra.mxu3 %v9778_v25 }
 0x873   :  { %v9746_v45 = vor.u32 %v11175_v54, %v9743_v23  ;;  %5557 = vmatpush.bf16.msra.mxu1 %v9738_v28 }
 0x874   :  { %11625 = vtanh.f32 %v5059_v59  ;;  %v5032_v6 = vpop.f32.mrf.mxu2  ;;  %v5046_v15 = vpop.f32.mrf.mxu3  ;;  %5571 = vmatpush.bf16.msra.mxu2 %v9742_v10 }
 0x875   :  { %11627 = vtanh.f32 %v5067_v53  ;;  %v5033_v22 = vadd.f32 %v5032_v6, %v13617_v3  ;;  %v5006_v9 = vpop.f32.mrf.mxu0  ;;  %v5020_v32 = vpop.f32.mrf.mxu1  ;;  %v5047_v1 = vadd.f32 %v5046_v15, %v13619_v37 }
 0x876   :  { %v5007_v20 = vadd.f32 %v5006_v9, %v13621_v24  ;;  %v5021_v19 = vadd.f32 %v5020_v32, %v13623_v5  ;;  %5585 = vmatpush.bf16.msra.mxu3 %v9746_v45 }
 0x877   :  { %v5053_v55 = vadd.f32 %v5033_v22, %v14788_v8  ;;  %v5054_v50 = vadd.f32 %v5047_v1, %v14789_v12 }
 0x878   :  { %v5055_v59 = vadd.f32 %v5007_v20, %v14786_v26  ;;  %v5056_v3 = vadd.f32 %v5021_v19, %v14787_v21 }
 0x879   :  { %11629 = vtanh.f32 %v5053_v55  ;;  %v5077_v22 = vmul.f32 0.5, %v5054_v50 }
 0x87a   :  { %v11626_v44 = vpop.eup %11625  ;;  %v5060_v53 = vmul.f32 0.5, %v5055_v59  ;;  %v5068_v24 = vmul.f32 0.5, %v5056_v3 }
 0x87b   :  { %v11628_v5 = vpop.eup %11627  ;;  %v5063_v25 = vmul.f32 0.5, %v11626_v44 }
 0x87c   :  { %v5071_v34 = vmul.f32 0.5, %v11628_v5  ;;  %11631 = vtanh.f32 %v5060_v53  ;;  %v5034_v6 = vpop.f32.mrf.mxu2  ;;  %v5048_v37 = vpop.f32.mrf.mxu3 }
 0x87d   :  { %11633 = vtanh.f32 %v5068_v24  ;;  %v5035_v15 = vadd.f32 %v5034_v6, %v13625_v51  ;;  %v5049_v33 = vadd.f32 %v5048_v37, %v13627_v31  ;;  %v5065_v0 = vadd.f32 0.5, %v5063_v25 }
 0x87e   :  { %v5073_v16 = vadd.f32 0.5, %v5071_v34 }
 0x87f   :  { %v11630_v17 = vpop.eup %11629  ;;  %v5057_v9 = vadd.f32 %v5035_v15, %v14788_v8  ;;  %v5058_v32 = vadd.f32 %v5049_v33, %v14789_v12 }
 0x880   :  { %v5085_v23 = vmul.f32 %v5073_v16, %v13430_v27  ;;  %v5087_v20 = vmul.f32 %v11630_v17, %v5065_v0  ;;  %v15116_v0 = vld [vmem:[#allocation50_spill] sm:$0xff]  ;;  %v15117_v16 = vld [vmem:[#allocation51_spill] sm:$0xff] }
 0x881   :  { %11635 = vtanh.f32 %v5057_v9  ;;  %v5078_v28 = vmul.f32 0.5, %v5058_v32  ;;  %v15118_v17 = vld [vmem:[#allocation54_spill] sm:$0xff]  ;;  %v15120_v9 = vld [vmem:[#allocation80_spill] sm:$0xff]  ;;  %v15121_v32 = vld [vmem:[#allocation81_spill] sm:$0xff] }
 0x882   :  { %v11632_v54 = vpop.eup %11631  ;;  %11637 = vtanh.f32 %v5077_v22  ;;  %v13646_v45 = vadd.f32 %v5087_v20, %v5085_v23  ;;  %v15119_v22 = vld [vmem:[#allocation79_spill] sm:$0xff]  ;;  %v15125_v20 = vld [vmem:[#allocation84_spill] sm:$0xff] }
 0x883   :  { %v11634_v19 = vpop.eup %11633  ;;  %v5064_v10 = vmul.f32 0.5, %v11632_v54  ;;  %11639 = vtanh.f32 %v5078_v28  ;;  %v15122_v28 = vld [vmem:[#allocation82_spill] sm:$0xff]  ;;  %v15123_v54 = vld [vmem:[#allocation69_spill] sm:$0xff]  ;;  %v15124_v23 = vld [vmem:[#allocation83_spill] sm:$0xff] }
 0x884   :  { %v5072_v51 = vmul.f32 0.5, %v11634_v19  ;;  %11641 = vtanh.f32 %v13646_v45  ;;  %v15126_v19 = vld [vmem:[#allocation85_spill] sm:$0xff] }
 0x885   :  { %v5066_v31 = vadd.f32 0.5, %v5064_v10  ;;  %v15127_v10 = vld [vmem:[#allocation86_spill] sm:$0xff] }
 0x886   :  { %v5074_v55 = vadd.f32 0.5, %v5072_v51  ;;  %v15128_v51 = vld [vmem:[#allocation89_spill] sm:$0xff] }
 0x887   :  { %v11636_v1 = vpop.eup %11635 }
 0x888   :  { %v5086_v59 = vmul.f32 %v5074_v55, %v13434_v49  ;;  %v5088_v3 = vmul.f32 %v11636_v1, %v5066_v31  ;;  %v11638_v44 = vpop.eup %11637  ;;  %v15115_v49 = vld [vmem:[#allocation49_spill] sm:$0xff]  ;;  %v15129_v31 = vld [vmem:[#allocation90_spill] sm:$0xff]  ;;  %v15130_v55 = vld [vmem:[#allocation91_spill] sm:$0xff] }
 0x889   :  { %v11640_v53 = vpop.eup %11639  ;;  %v5081_v27 = vmul.f32 0.5, %v11638_v44  ;;  %v15131_v1 = vld [vmem:[#allocation92_spill] sm:$0xff]  ;;  %v15134_v44 = vld [vmem:[#allocation95_spill] sm:$0xff] }
 0x88a   :  { %v13650_v24 = vadd.f32 %v5088_v3, %v5086_v59  ;;  %v5082_v5 = vmul.f32 0.5, %v11640_v53  ;;  %v11642_v25 = vpop.eup %11641  ;;  %v15132_v59 = vld [vmem:[#allocation93_spill] sm:$0xff]  ;;  %v15133_v3 = vld [vmem:[#allocation94_spill] sm:$0xff]  ;;  %v15135_v53 = vld [vmem:[#allocation96_spill] sm:$0xff] }
 0x88b   :  { %v5083_v50 = vadd.f32 0.5, %v5081_v27  ;;  %v15136_v27 = vld [vmem:[#allocation99_spill] sm:$0xff] }
 0x88c   :  { %11643 = vtanh.f32 %v13650_v24  ;;  %v5084_v34 = vadd.f32 0.5, %v5082_v5  ;;  %v15137_v5 = vld [vmem:[#allocation100_spill] sm:$0xff] }
 0x88d   :  { %v5093_v37 = vmul.f32 %v11642_v25, %v5083_v50  ;;  %v15138_v25 = vld [vmem:[#allocation101_spill] sm:$0xff]  ;;  %v15139_v50 = vld [vmem:[#allocation102_spill] sm:$0xff] }
 0x892   :  { %v11644_v6 = vpop.eup %11643 }
 0x893   :  { %v5094_v15 = vmul.f32 %v11644_v6, %v5084_v34  ;;  %v15140_v34 = vld [vmem:[#allocation103_spill] sm:$0xff]  ;;  %v15141_v6 = vld [vmem:[#allocation104_spill] sm:$0xff] }
 0x895   :  { %v13653_v33 = vpack.c.bf16 %v5094_v15, %v5093_v37  ;;  %v15142_v37 = vld [vmem:[#allocation105_spill] sm:$0xff]  ;;  %v15143_v15 = vld [vmem:[#allocation106_spill] sm:$0xff] }
 0x897   :  { %5488 = vmatmul.bf16.vlgmr.msrb.gmra.mxu0 %v13653_v33  ;;  %5502 = vmatmul.bf16.vlgmr.msrb.gmra.mxu1 %v13653_v33 }
 0x898   :  { %5516 = vmatmul.bf16.vlgmr.msrb.gmra.mxu2 %v13653_v33  ;;  %5530 = vmatmul.bf16.vlgmr.msrb.gmra.mxu3 %v13653_v33 }
 0x899   :  { %5616 = vmatpush.bf16.msrb.mxu0 %v12188_v36  ;;  %5630 = vmatpush.bf16.msrb.mxu1 %v12190_v40 }
 0x89a   :  { %5644 = vmatpush.bf16.msrb.mxu2 %v12192_v43  ;;  %5658 = vmatpush.bf16.msrb.mxu3 %v12197_v52 }
 0x89d   :  { %5617 = vmatpush.bf16.msrb.mxu0 %v12208_v58  ;;  %5631 = vmatpush.bf16.msrb.mxu1 %v12210_v13 }
 0x89e   :  { %5645 = vmatpush.bf16.msrb.mxu2 %v12212_v14  ;;  %5659 = vmatpush.bf16.msrb.mxu3 %v12219_v18 }
 0x8a1   :  { %5618 = vmatpush.bf16.msrb.mxu0 %v12235_v30  ;;  %5632 = vmatpush.bf16.msrb.mxu1 %v12237_v38 }
 0x8a2   :  { %5646 = vmatpush.bf16.msrb.mxu2 %v12239_v39  ;;  %5660 = vmatpush.bf16.msrb.mxu3 %v12250_v56 }
 0x8a5   :  { %5619 = vmatpush.bf16.msrb.mxu0 %v12263_v29  ;;  %5633 = vmatpush.bf16.msrb.mxu1 %v12265_v2 }
 0x8a6   :  { %5647 = vmatpush.bf16.msrb.mxu2 %v12267_v46  ;;  %5661 = vmatpush.bf16.msrb.mxu3 %v12278_v62 }
 0x8a7   :  { %5544 = vmatmul.bf16.vlgmr.msra.gmra.mxu0 %v13653_v33  ;;  %5558 = vmatmul.bf16.vlgmr.msra.gmra.mxu1 %v13653_v33 }
 0x8a8   :  { %5572 = vmatmul.bf16.vlgmr.msra.gmra.mxu2 %v13653_v33  ;;  %5586 = vmatmul.bf16.vlgmr.msra.gmra.mxu3 %v13653_v33 }
 0x8a9   :  { %5620 = vmatpush.bf16.msrb.mxu0 %v12291_v7  ;;  %5634 = vmatpush.bf16.msrb.mxu1 %v12293_v61 }
 0x8aa   :  { %5648 = vmatpush.bf16.msrb.mxu2 %v12295_v63  ;;  %5662 = vmatpush.bf16.msrb.mxu3 %v12306_v47 }
 0x8ad   :  { %5621 = vmatpush.bf16.msrb.mxu0 %v12319_v35  ;;  %5635 = vmatpush.bf16.msrb.mxu1 %v12321_v42 }
 0x8ae   :  { %5649 = vmatpush.bf16.msrb.mxu2 %v12323_v11  ;;  %5663 = vmatpush.bf16.msrb.mxu3 %v12334_v48 }
 0x8b1   :  { %5622 = vmatpush.bf16.msrb.mxu0 %v12347_v60  ;;  %5636 = vmatpush.bf16.msrb.mxu1 %v12349_v41 }
 0x8b2   :  { %5650 = vmatpush.bf16.msrb.mxu2 %v12351_v4  ;;  %5664 = vmatpush.bf16.msrb.mxu3 %v12362_v57 }
 0x8b5   :  { %5623 = vmatpush.bf16.msrb.mxu0 %v15115_v49  ;;  %5637 = vmatpush.bf16.msrb.mxu1 %v15116_v0  ;;  %v10021_v0 = vld [vmem:[#allocation3 + $0xa50] sm:$0xf] }
 0x8b6   :  { %5651 = vmatpush.bf16.msrb.mxu2 %v15117_v16  ;;  %5665 = vmatpush.bf16.msrb.mxu3 %v15118_v17  ;;  %v10175_v17 = vld [vmem:[#allocation3 + $0xba8] sm:$0xf0]  ;;  %v11263_v16 = vld [vmem:[#allocation3 + $0xadc] sm:$0xf]  ;;  %v11242_v49 = vld [vmem:[#allocation3 + $0xa2c] sm:$0xf0] }
 0x8b8   :  { %5624 = vmatmul.bf16.vlgmr.msrb.gmra.mxu0 %v15123_v54  ;;  %5638 = vmatmul.bf16.vlgmr.msrb.gmra.mxu1 %v15123_v54 }
 0x8b9   :  { %5717 = vmatpush.bf16.msra.mxu0 %v15119_v22  ;;  %5731 = vmatpush.bf16.msra.mxu1 %v15120_v9  ;;  %v11289_v9 = vld [vmem:[#allocation3 + $0xba4] sm:$0xf0]  ;;  %v11285_v22 = vld [vmem:[#allocation3 + $0xb8c] sm:$0xf] }
 0x8ba   :  { %5745 = vmatpush.bf16.msra.mxu2 %v15121_v32  ;;  %5759 = vmatpush.bf16.msra.mxu3 %v15122_v28  ;;  %v15214_v32 = vld [vmem:[#allocation98_spill] sm:$0xff] }
 0x8bb   :  { %5652 = vmatmul.bf16.vlgmr.msrb.gmra.mxu2 %v15123_v54  ;;  %5666 = vmatmul.bf16.vlgmr.msrb.gmra.mxu3 %v15123_v54  ;;  %v15144_v54 = vld [vmem:[#allocation109_spill] sm:$0xff] }
 0x8bd   :  { %5718 = vmatpush.bf16.msra.mxu0 %v15124_v23  ;;  %5732 = vmatpush.bf16.msra.mxu1 %v15125_v20 }
 0x8be   :  { %5746 = vmatpush.bf16.msra.mxu2 %v15126_v19  ;;  %5760 = vmatpush.bf16.msra.mxu3 %v15127_v10  ;;  %v15213_v10 = vld [vmem:[#allocation97_spill] sm:$0xff] }
 0x8c1   :  { %5719 = vmatpush.bf16.msra.mxu0 %v15128_v51  ;;  %5733 = vmatpush.bf16.msra.mxu1 %v15129_v31  ;;  %v15212_v51 = vld [vmem:[#allocation55_spill] sm:$0xff] }
 0x8c2   :  { %5747 = vmatpush.bf16.msra.mxu2 %v15130_v55  ;;  %5761 = vmatpush.bf16.msra.mxu3 %v15131_v1 }
 0x8c5   :  { %5720 = vmatpush.bf16.msra.mxu0 %v15132_v59  ;;  %5734 = vmatpush.bf16.msra.mxu1 %v15133_v3  ;;  %v15188_v59 = vld [vmem:[#allocation163_spill] sm:$0xff] }
 0x8c6   :  { %5748 = vmatpush.bf16.msra.mxu2 %v15134_v44  ;;  %5762 = vmatpush.bf16.msra.mxu3 %v15135_v53  ;;  %v15145_v44 = vld [vmem:[#allocation110_spill] sm:$0xff]  ;;  %v15146_v53 = vld [vmem:[#allocation111_spill] sm:$0xff] }
 0x8c9   :  { %5721 = vmatpush.bf16.msra.mxu0 %v15136_v27  ;;  %5735 = vmatpush.bf16.msra.mxu1 %v15137_v5  ;;  %v15147_v27 = vld [vmem:[#allocation112_spill] sm:$0xff]  ;;  %v15148_v5 = vld [vmem:[#allocation113_spill] sm:$0xff] }
 0x8ca   :  { %5749 = vmatpush.bf16.msra.mxu2 %v15138_v25  ;;  %5763 = vmatpush.bf16.msra.mxu3 %v15139_v50  ;;  %v15149_v25 = vld [vmem:[#allocation114_spill] sm:$0xff]  ;;  %v15150_v50 = vld [vmem:[#allocation115_spill] sm:$0xff] }
 0x8cd   :  { %5722 = vmatpush.bf16.msra.mxu0 %v15140_v34  ;;  %5736 = vmatpush.bf16.msra.mxu1 %v15141_v6  ;;  %v15151_v34 = vld [vmem:[#allocation116_spill] sm:$0xff]  ;;  %v15152_v6 = vld [vmem:[#allocation118_spill] sm:$0xff] }
 0x8ce   :  { %5750 = vmatpush.bf16.msra.mxu2 %v15142_v37  ;;  %5764 = vmatpush.bf16.msra.mxu3 %v15143_v15  ;;  %v15153_v37 = vld [vmem:[#allocation119_spill] sm:$0xff]  ;;  %v15184_v15 = vld [vmem:[#allocation161_spill] sm:$0xff] }
 0x8d1   :  { %5723 = vmatpush.bf16.msra.mxu0 %v15144_v54  ;;  %5737 = vmatpush.bf16.msra.mxu1 %v15145_v44  ;;  %v15162_v44 = vld [vmem:[#allocation130_spill] sm:$0xff]  ;;  %v15163_v54 = vld [vmem:[#allocation132_spill] sm:$0xff] }
 0x8d2   :  { %5751 = vmatpush.bf16.msra.mxu2 %v15146_v53  ;;  %5765 = vmatpush.bf16.msra.mxu3 %v15147_v27  ;;  %v15154_v27 = vld [vmem:[#allocation121_spill] sm:$0xff] }
 0x8d3   :  { %v15161_v53 = vld [vmem:[#allocation129_spill] sm:$0xff] }
 0x8d5   :  { %5724 = vmatpush.bf16.msra.mxu0 %v15148_v5  ;;  %5738 = vmatpush.bf16.msra.mxu1 %v15149_v25  ;;  %v15155_v5 = vld [vmem:[#allocation122_spill] sm:$0xff]  ;;  %v15156_v25 = vld [vmem:[#allocation123_spill] sm:$0xff] }
 0x8d6   :  { %5752 = vmatpush.bf16.msra.mxu2 %v15150_v50  ;;  %5766 = vmatpush.bf16.msra.mxu3 %v15151_v34  ;;  %v15157_v50 = vld [vmem:[#allocation124_spill] sm:$0xff]  ;;  %v15158_v34 = vld [vmem:[#allocation125_spill] sm:$0xff] }
 0x8d8   :  { %5725 = vmatmul.bf16.vlgmr.msra.gmra.mxu0 %v13653_v33  ;;  %5739 = vmatmul.bf16.vlgmr.msra.gmra.mxu1 %v13653_v33 }
 0x8d9   :  { %5773 = vmatpush.bf16.msrb.mxu0 %v15152_v6  ;;  %5787 = vmatpush.bf16.msrb.mxu1 %v15153_v37  ;;  %v15159_v6 = vld [vmem:[#allocation126_spill] sm:$0xff]  ;;  %v15160_v37 = vld [vmem:[#allocation127_spill] sm:$0xff] }
 0x8da   :  { %5753 = vmatmul.bf16.vlgmr.msra.gmra.mxu2 %v13653_v33  ;;  %5767 = vmatmul.bf16.vlgmr.msra.gmra.mxu3 %v13653_v33  ;;  %v15164_v33 = vld [vmem:[#allocation133_spill] sm:$0xff] }
 0x8db   :  { %5801 = vmatpush.bf16.msrb.mxu2 %v15154_v27  ;;  %5815 = vmatpush.bf16.msrb.mxu3 %v15155_v5  ;;  %v15165_v27 = vld [vmem:[#allocation134_spill] sm:$0xff]  ;;  %v15166_v5 = vld [vmem:[#allocation135_spill] sm:$0xff] }
 0x8dd   :  { %5774 = vmatpush.bf16.msrb.mxu0 %v15156_v25  ;;  %5788 = vmatpush.bf16.msrb.mxu1 %v15157_v50  ;;  %v15167_v25 = vld [vmem:[#allocation136_spill] sm:$0xff]  ;;  %v15168_v50 = vld [vmem:[#allocation137_spill] sm:$0xff] }
 0x8df   :  { %5802 = vmatpush.bf16.msrb.mxu2 %v15158_v34  ;;  %5816 = vmatpush.bf16.msrb.mxu3 %v15159_v6  ;;  %v15169_v34 = vld [vmem:[#allocation139_spill] sm:$0xff]  ;;  %v15170_v6 = vld [vmem:[#allocation140_spill] sm:$0xff] }
 0x8e1   :  { %5775 = vmatpush.bf16.msrb.mxu0 %v15160_v37  ;;  %5789 = vmatpush.bf16.msrb.mxu1 %v15161_v53  ;;  %v15171_v37 = vld [vmem:[#allocation142_spill] sm:$0xff]  ;;  %v15172_v53 = vld [vmem:[#allocation143_spill] sm:$0xff] }
 0x8e3   :  { %5803 = vmatpush.bf16.msrb.mxu2 %v15162_v44  ;;  %5817 = vmatpush.bf16.msrb.mxu3 %v15163_v54  ;;  %v15173_v44 = vld [vmem:[#allocation144_spill] sm:$0xff]  ;;  %v15174_v54 = vld [vmem:[#allocation145_spill] sm:$0xff] }
 0x8e5   :  { %5776 = vmatpush.bf16.msrb.mxu0 %v15164_v33  ;;  %5790 = vmatpush.bf16.msrb.mxu1 %v15165_v27  ;;  %v15175_v33 = vld [vmem:[#allocation146_spill] sm:$0xff]  ;;  %v15176_v27 = vld [vmem:[#allocation147_spill] sm:$0xff] }
 0x8e7   :  { %5804 = vmatpush.bf16.msrb.mxu2 %v15166_v5  ;;  %5818 = vmatpush.bf16.msrb.mxu3 %v15167_v25  ;;  %v15177_v5 = vld [vmem:[#allocation149_spill] sm:$0xff]  ;;  %v15178_v25 = vld [vmem:[#allocation150_spill] sm:$0xff] }
 0x8e9   :  { %5777 = vmatpush.bf16.msrb.mxu0 %v15168_v50  ;;  %5791 = vmatpush.bf16.msrb.mxu1 %v15169_v34  ;;  %v15179_v50 = vld [vmem:[#allocation151_spill] sm:$0xff]  ;;  %v15180_v34 = vld [vmem:[#allocation152_spill] sm:$0xff] }
 0x8eb   :  { %5805 = vmatpush.bf16.msrb.mxu2 %v15170_v6  ;;  %5819 = vmatpush.bf16.msrb.mxu3 %v15171_v37  ;;  %v15181_v6 = vld [vmem:[#allocation153_spill] sm:$0xff]  ;;  %v15182_v37 = vld [vmem:[#allocation154_spill] sm:$0xff] }
 0x8ed   :  { %5778 = vmatpush.bf16.msrb.mxu0 %v15172_v53  ;;  %5792 = vmatpush.bf16.msrb.mxu1 %v15173_v44  ;;  %v15183_v53 = vld [vmem:[#allocation155_spill] sm:$0xff] }
 0x8ef   :  { %5806 = vmatpush.bf16.msrb.mxu2 %v15174_v54  ;;  %5820 = vmatpush.bf16.msrb.mxu3 %v15175_v33 }
 0x8f1   :  { %5779 = vmatpush.bf16.msrb.mxu0 %v15176_v27  ;;  %5793 = vmatpush.bf16.msrb.mxu1 %v15177_v5  ;;  %v15186_v27 = vld [vmem:[#allocation162_spill] sm:$0xff] }
 0x8f3   :  { %5807 = vmatpush.bf16.msrb.mxu2 %v15178_v25  ;;  %5821 = vmatpush.bf16.msrb.mxu3 %v15179_v50 }
 0x8f5   :  { %5780 = vmatpush.bf16.msrb.mxu0 %v15180_v34  ;;  %5794 = vmatpush.bf16.msrb.mxu1 %v15181_v6  ;;  %v15190_v34 = vld [vmem:[#allocation40_spill] sm:$0xff] }
 0x8f7   :  { %5808 = vmatpush.bf16.msrb.mxu2 %v15182_v37  ;;  %5822 = vmatpush.bf16.msrb.mxu3 %v15183_v53 }
 0x914   :  { %v5489_v44 = vpop.f32.mrf.mxu0  ;;  %v5503_v54 = vpop.f32.mrf.mxu1 }
 0x915   :  { %v13768_v33 = vadd.f32 %v5489_v44, %v15184_v15  ;;  %v13771_v3 = vadd.f32 %v5503_v54, %v15186_v27  ;;  %v15196_v27 = vld [vmem:[#allocation73_spill] sm:$0xff] }
 0x917   :  { %15185 = vst [vmem:[#allocation70_spill] sm:$0xff] %v13768_v33 }
 0x918   :  { %15187 = vst [vmem:[#allocation71_spill] sm:$0xff] %v13771_v3  ;;  %v15198_v3 = vld [vmem:[#allocation74_spill] sm:$0xff] }
 0x91b   :  { %v5517_v5 = vpop.f32.mrf.mxu2  ;;  %v5531_v25 = vpop.f32.mrf.mxu3 }
 0x91c   :  { %v13774_v50 = vadd.f32 %v5517_v5, %v15188_v59  ;;  %v13777_v1 = vadd.f32 %v5531_v25, %v15190_v34  ;;  %v13779_v6 = vpop.f32.mrf.mxu0  ;;  %v13781_v37 = vpop.f32.mrf.mxu1  ;;  %v15200_v25 = vld [vmem:[#allocation75_spill] sm:$0xff] }
 0x91d   :  { %15192 = vst [vmem:[#allocation45_spill] sm:$0xff] %v13779_v6  ;;  %v15202_v6 = vld [vmem:[#allocation166_spill] sm:$0xff] }
 0x91e   :  { %15189 = vst [vmem:[#allocation32_spill] sm:$0xff] %v13774_v50 }
 0x91f   :  { %15191 = vst [vmem:[#allocation44_spill] sm:$0xff] %v13777_v1 }
 0x920   :  { %15193 = vst [vmem:[#allocation76_spill] sm:$0xff] %v13781_v37 }
 0x923   :  { %v13783_v53 = vpop.f32.mrf.mxu2  ;;  %v13785_v55 = vpop.f32.mrf.mxu3 }
 0x924   :  { %15194 = vst [vmem:[#allocation46_spill] sm:$0xff] %v13783_v53  ;;  %v5545_v44 = vpop.f32.mrf.mxu0  ;;  %v5559_v15 = vpop.f32.mrf.mxu1 }
 0x925   :  { %15195 = vst [vmem:[#allocation47_spill] sm:$0xff] %v13785_v55  ;;  %v13788_v54 = vadd.f32 %v5545_v44, %v15196_v27  ;;  %v13791_v33 = vadd.f32 %v5559_v15, %v15198_v3  ;;  %v15208_v3 = vld [vmem:[#allocation48_spill] sm:$0xff] }
 0x927   :  { %15197 = vst [vmem:[#allocation77_spill] sm:$0xff] %v13788_v54 }
 0x928   :  { %15199 = vst [vmem:[#allocation78_spill] sm:$0xff] %v13791_v33  ;;  %v15209_v33 = vld [vmem:[#allocation52_spill] sm:$0xff] }
 0x92b   :  { %v5573_v59 = vpop.f32.mrf.mxu2  ;;  %v5587_v5 = vpop.f32.mrf.mxu3 }
 0x92c   :  { %v13794_v34 = vadd.f32 %v5573_v59, %v15200_v25  ;;  %v13797_v1 = vadd.f32 %v5587_v5, %v15202_v6  ;;  %v13799_v37 = vpop.f32.mrf.mxu0  ;;  %v13801_v53 = vpop.f32.mrf.mxu1  ;;  %v15210_v25 = vld [vmem:[#allocation88_spill] sm:$0xff] }
 0x92d   :  { %15204 = vst [vmem:[#allocation66_spill] sm:$0xff] %v13799_v37 }
 0x92e   :  { %15201 = vst [vmem:[#allocation87_spill] sm:$0xff] %v13794_v34  ;;  %v15211_v34 = vld [vmem:[#allocation53_spill] sm:$0xff] }
 0x92f   :  { %15203 = vst [vmem:[#allocation35_spill] sm:$0xff] %v13797_v1 }
 0x930   :  { %15205 = vst [vmem:[#allocation69_spill] sm:$0xff] %v13801_v53 }
 0x933   :  { %v13803_v55 = vpop.f32.mrf.mxu2  ;;  %v13805_v50 = vpop.f32.mrf.mxu3 }
 0x934   :  { %15206 = vst [vmem:[#allocation161_spill] sm:$0xff] %v13803_v55 }
 0x935   :  { %15207 = vst [vmem:[#allocation162_spill] sm:$0xff] %v13805_v50  ;;  %v5625_v44 = vpop.f32.mrf.mxu0  ;;  %v5639_v27 = vpop.f32.mrf.mxu1 }
 0x936   :  { %v5672_v15 = vadd.f32 %v5625_v44, %v15208_v3  ;;  %v5673_v54 = vadd.f32 %v5639_v27, %v15209_v33 }
 0x938   :  { %v5680_v31 = vmul.f32 0.5, %v5672_v15  ;;  %v5688_v59 = vmul.f32 0.5, %v5673_v54  ;;  %v11296_v15 = vld [vmem:[#allocation3 + $0xbdc] sm:$0xf0] }
 0x93a   :  { %11645 = vtanh.f32 %v5680_v31  ;;  %v10197_v31 = vld [vmem:[#allocation3 + $0xbc0] sm:$0xf] }
 0x93b   :  { %11647 = vtanh.f32 %v5688_v59  ;;  %v10198_v20 = vor.u32 %v11296_v15, %v10197_v31 }
 0x93d   :  { %v5627_v1 = vpop.f32.mrf.mxu0  ;;  %v5641_v53 = vpop.f32.mrf.mxu1  ;;  %6258 = vmatpush.bf16.msra.mxu0 %v10198_v20 }
 0x93e   :  { %v5653_v6 = vpop.f32.mrf.mxu2  ;;  %v5667_v5 = vpop.f32.mrf.mxu3  ;;  %v5676_v55 = vadd.f32 %v5627_v1, %v15211_v34  ;;  %v5677_v50 = vadd.f32 %v5641_v53, %v15212_v51  ;;  %v10205_v34 = vld [vmem:[#allocation3 + $0xbc8] sm:$0xf] }
 0x93f   :  { %v5674_v37 = vadd.f32 %v5653_v6, %v15210_v25  ;;  %v5675_v19 = vadd.f32 %v5667_v5, %v15213_v10  ;;  %v11292_v6 = vld [vmem:[#allocation3 + $0xbc4] sm:$0xf]  ;;  %v11297_v51 = vld [vmem:[#allocation3 + $0xbe4] sm:$0xf0] }
 0x940   :  { %v11646_v44 = vpop.eup %11645  ;;  %v5681_v3 = vmul.f32 0.5, %v5676_v55  ;;  %v5689_v33 = vmul.f32 0.5, %v5677_v50  ;;  %v10199_v25 = vld [vmem:[#allocation3 + $0xbe0] sm:$0xf0]  ;;  %v10206_v55 = vor.u32 %v11297_v51, %v10205_v34  ;;  %v11293_v50 = vld [vmem:[#allocation3 + $0xbcc] sm:$0xf] }
 0x941   :  { %11649 = vtanh.f32 %v5674_v37  ;;  %v11648_v27 = vpop.eup %11647  ;;  %v5684_v54 = vmul.f32 0.5, %v11646_v44  ;;  %v5698_v23 = vmul.f32 0.5, %v5675_v19  ;;  %v10202_v1 = vor.u32 %v11292_v6, %v10199_v25  ;;  %v10207_v44 = vld [vmem:[#allocation3 + $0xbe8] sm:$0xf0]  ;;  %v10165_v19 = vld [vmem:[#allocation3 + $0xb80] sm:$0xf] }
 0x942   :  { %v5692_v59 = vmul.f32 0.5, %v11648_v27  ;;  %11651 = vtanh.f32 %v5681_v3  ;;  %v15215_v3 = vld [vmem:[#allocation107_spill] sm:$0xff]  ;;  %v10210_v15 = vor.u32 %v11293_v50, %v10207_v44  ;;  %v11284_v6 = vld [vmem:[#allocation3 + $0xb84] sm:$0xf]  ;;  %6286 = vmatpush.bf16.msra.mxu2 %v10206_v55  ;;  %v10178_v50 = vor.u32 %v11285_v22, %v10175_v17  ;;  %v10133_v44 = vld [vmem:[#allocation3 + $0xb40] sm:$0xf] }
 0x943   :  { %11653 = vtanh.f32 %v5689_v33  ;;  %v5686_v53 = vadd.f32 0.5, %v5684_v54  ;;  %6272 = vmatpush.bf16.msra.mxu1 %v10202_v1  ;;  %v11288_v33 = vld [vmem:[#allocation3 + $0xb9c] sm:$0xf0]  ;;  %v10167_v54 = vld [vmem:[#allocation3 + $0xba0] sm:$0xf0] }
 0x944   :  { %v5694_v37 = vadd.f32 0.5, %v5692_v59  ;;  %v10166_v25 = vor.u32 %v11288_v33, %v10165_v19  ;;  %v10173_v59 = vld [vmem:[#allocation3 + $0xb88] sm:$0xf]  ;;  %6300 = vmatpush.bf16.msra.mxu3 %v10210_v15  ;;  %v10170_v34 = vor.u32 %v11284_v6, %v10167_v54  ;;  %v10143_v17 = vld [vmem:[#allocation3 + $0xb68] sm:$0xf0] }
 0x945   :  { %v10174_v51 = vor.u32 %v11289_v9, %v10173_v59  ;;  %v10141_v6 = vld [vmem:[#allocation3 + $0xb48] sm:$0xf] }
 0x946   :  { %v5655_v10 = vpop.f32.mrf.mxu2  ;;  %v5669_v5 = vpop.f32.mrf.mxu3  ;;  %6259 = vmatpush.bf16.msra.mxu0 %v10166_v25  ;;  %v11281_v54 = vld [vmem:[#allocation3 + $0xb64] sm:$0xf0]  ;;  %v10101_v25 = vld [vmem:[#allocation3 + $0xb00] sm:$0xf] }
 0x947   :  { %v11650_v28 = vpop.eup %11649  ;;  %v5678_v27 = vadd.f32 %v5655_v10, %v15214_v32  ;;  %v5679_v31 = vadd.f32 %v5669_v5, %v15215_v3  ;;  %v15216_v10 = vld [vmem:[#allocation175_spill] sm:$0xff]  ;;  %v11280_v3 = vld [vmem:[#allocation3 + $0xb5c] sm:$0xf0]  ;;  %6273 = vmatpush.bf16.msra.mxu1 %v10170_v34  ;;  %6287 = vmatpush.bf16.msra.mxu2 %v10174_v51  ;;  %v10103_v51 = vld [vmem:[#allocation3 + $0xb20] sm:$0xf0] }
 0x948   :  { %v11652_v32 = vpop.eup %11651  ;;  %v5706_v5 = vmul.f32 %v5694_v37, %v15216_v10  ;;  %v5708_v1 = vmul.f32 %v11650_v28, %v5686_v53  ;;  %v10134_v33 = vor.u32 %v11280_v3, %v10133_v44  ;;  %6301 = vmatpush.bf16.msra.mxu3 %v10178_v50  ;;  %v10142_v28 = vor.u32 %v11281_v54, %v10141_v6  ;;  %v11277_v53 = vld [vmem:[#allocation3 + $0xb4c] sm:$0xf]  ;;  %v11272_v34 = vld [vmem:[#allocation3 + $0xb1c] sm:$0xf0]  ;;  %v10109_v44 = vld [vmem:[#allocation3 + $0xb08] sm:$0xf] }
 0x949   :  { %11655 = vtanh.f32 %v5678_v27  ;;  %v5699_v20 = vmul.f32 0.5, %v5679_v31  ;;  %v11654_v55 = vpop.eup %11653  ;;  %v5685_v19 = vmul.f32 0.5, %v11652_v32  ;;  %v11276_v27 = vld [vmem:[#allocation3 + $0xb44] sm:$0xf]  ;;  %v10102_v10 = vor.u32 %v11272_v34, %v10101_v25  ;;  %v15218_v3 = vld [vmem:[#allocation36_spill] sm:$0xff] }
 0x94a   :  { %11657 = vtanh.f32 %v5698_v23  ;;  %v10135_v31 = vld [vmem:[#allocation3 + $0xb60] sm:$0xf0]  ;;  %v5693_v15 = vmul.f32 0.5, %v11654_v55  ;;  %v13816_v22 = vadd.f32 %v5708_v1, %v5706_v5  ;;  %6260 = vmatpush.bf16.msra.mxu0 %v10134_v33  ;;  %v10146_v23 = vor.u32 %v11277_v53, %v10143_v17  ;;  %v10111_v5 = vld [vmem:[#allocation3 + $0xb28] sm:$0xf0] }
 0x94b   :  { %11659 = vtanh.f32 %v5699_v20  ;;  %v10138_v9 = vor.u32 %v11276_v27, %v10135_v31  ;;  %v5687_v59 = vadd.f32 0.5, %v5685_v19  ;;  %v11268_v20 = vld [vmem:[#allocation3 + $0xb04] sm:$0xf]  ;;  %6288 = vmatpush.bf16.msra.mxu2 %v10142_v28  ;;  %v11273_v27 = vld [vmem:[#allocation3 + $0xb24] sm:$0xf0] }
 0x94c   :  { %15217 = vst [vmem:[#allocation163_spill] sm:$0xff] %v13816_v22  ;;  %v5695_v37 = vadd.f32 0.5, %v5693_v15  ;;  %v10106_v50 = vor.u32 %v11268_v20, %v10103_v51  ;;  %v11269_v31 = vld [vmem:[#allocation3 + $0xb0c] sm:$0xf]  ;;  %6302 = vmatpush.bf16.msra.mxu3 %v10146_v23  ;;  %v10110_v33 = vor.u32 %v11273_v27, %v10109_v44  ;;  %v10069_v6 = vld [vmem:[#allocation3 + $0xac0] sm:$0xf]  ;;  %11661 = vtanh.f32 %v13816_v22 }
 0x94d   :  { %6274 = vmatpush.bf16.msra.mxu1 %v10138_v9  ;;  %v10114_v15 = vor.u32 %v11269_v31, %v10111_v5  ;;  %v11264_v54 = vld [vmem:[#allocation3 + $0xadc] sm:$0xf0]  ;;  %v11260_v53 = vld [vmem:[#allocation3 + $0xac4] sm:$0xf]  ;;  %v10077_v28 = vld [vmem:[#allocation3 + $0xac8] sm:$0xf] }
 0x94e   :  { %v5707_v55 = vmul.f32 %v5695_v37, %v15218_v3  ;;  %6261 = vmatpush.bf16.msra.mxu0 %v10102_v10  ;;  %v10070_v37 = vor.u32 %v11264_v54, %v10069_v6  ;;  %v11265_v34 = vld [vmem:[#allocation3 + $0xae4] sm:$0xf0]  ;;  %v10079_v20 = vld [vmem:[#allocation3 + $0xae8] sm:$0xf0]  ;;  %v10039_v54 = vld [vmem:[#allocation3 + $0xaa0] sm:$0xf0] }
 0x94f   :  { %v11656_v32 = vpop.eup %11655  ;;  %6289 = vmatpush.bf16.msra.mxu2 %v10110_v33  ;;  %v10078_v23 = vor.u32 %v11265_v34, %v10077_v28  ;;  %v11256_v33 = vld [vmem:[#allocation3 + $0xa9c] sm:$0xf0]  ;;  %v11253_v28 = vld [vmem:[#allocation3 + $0xa8c] sm:$0xf] }
 0x950   :  { %v5709_v19 = vmul.f32 %v11656_v32, %v5687_v59  ;;  %v11658_v1 = vpop.eup %11657  ;;  %v10071_v59 = vld [vmem:[#allocation3 + $0xae0] sm:$0xf0]  ;;  %v11261_v32 = vld [vmem:[#allocation3 + $0xacc] sm:$0xf]  ;;  %6303 = vmatpush.bf16.msra.mxu3 %v10114_v15 }
 0x951   :  { %v11660_v9 = vpop.eup %11659  ;;  %6275 = vmatpush.bf16.msra.mxu1 %v10106_v50  ;;  %v10074_v25 = vor.u32 %v11260_v53, %v10071_v59  ;;  %v5702_v51 = vmul.f32 0.5, %v11658_v1  ;;  %v10082_v3 = vor.u32 %v11261_v32, %v10079_v20  ;;  %v10037_v1 = vld [vmem:[#allocation3 + $0xa80] sm:$0xf]  ;;  %v11252_v15 = vld [vmem:[#allocation3 + $0xa84] sm:$0xf] }
 0x952   :  { %v13820_v17 = vadd.f32 %v5709_v19, %v5707_v55  ;;  %v5703_v44 = vmul.f32 0.5, %v11660_v9  ;;  %6262 = vmatpush.bf16.msra.mxu0 %v10070_v37  ;;  %v11662_v55 = vpop.eup %11661  ;;  %v10038_v6 = vor.u32 %v11256_v33, %v10037_v1  ;;  %v10045_v53 = vld [vmem:[#allocation3 + $0xa88] sm:$0xf]  ;;  %v10042_v37 = vor.u32 %v11252_v15, %v10039_v54  ;;  %v10005_v32 = vld [vmem:[#allocation3 + $0xa40] sm:$0xf] }
 0x953   :  { %6290 = vmatpush.bf16.msra.mxu2 %v10078_v23  ;;  %v5704_v10 = vadd.f32 0.5, %v5702_v51  ;;  %v11257_v9 = vld [vmem:[#allocation3 + $0xaa4] sm:$0xf0]  ;;  %v11248_v20 = vld [vmem:[#allocation3 + $0xa5c] sm:$0xf0] }
 0x954   :  { %15219 = vst [vmem:[#allocation40_spill] sm:$0xff] %v13820_v17  ;;  %11663 = vtanh.f32 %v13820_v17  ;;  %v5705_v19 = vadd.f32 0.5, %v5703_v44  ;;  %6304 = vmatpush.bf16.msra.mxu3 %v10082_v3  ;;  %v10046_v59 = vor.u32 %v11257_v9, %v10045_v53  ;;  %v11244_v23 = vld [vmem:[#allocation3 + $0xa44] sm:$0xf]  ;;  %v10006_v51 = vor.u32 %v11248_v20, %v10005_v32  ;;  %v10013_v3 = vld [vmem:[#allocation3 + $0xa48] sm:$0xf] }
 0x955   :  { %6276 = vmatpush.bf16.msra.mxu1 %v10074_v25  ;;  %v5714_v27 = vmul.f32 %v11662_v55, %v5704_v10  ;;  %v10047_v25 = vld [vmem:[#allocation3 + $0xaa8] sm:$0xf0]  ;;  %v10007_v44 = vld [vmem:[#allocation3 + $0xa60] sm:$0xf0]  ;;  %v11249_v55 = vld [vmem:[#allocation3 + $0xa64] sm:$0xf0] }
 0x956   :  { %6263 = vmatpush.bf16.msra.mxu0 %v10038_v6  ;;  %v10050_v34 = vor.u32 %v11253_v28, %v10047_v25  ;;  %v10010_v10 = vor.u32 %v11244_v23, %v10007_v44  ;;  %v9973_v1 = vld [vmem:[#allocation3 + $0xa00] sm:$0xf]  ;;  %v11236_v15 = vld [vmem:[#allocation3 + $0xa04] sm:$0xf]  ;;  %v9981_v53 = vld [vmem:[#allocation3 + $0xa08] sm:$0xf] }
 0x957   :  { %6291 = vmatpush.bf16.msra.mxu2 %v10046_v59  ;;  %v11240_v33 = vld [vmem:[#allocation3 + $0xa1c] sm:$0xf0]  ;;  %v9975_v54 = vld [vmem:[#allocation3 + $0xa20] sm:$0xf0]  ;;  %v11241_v9 = vld [vmem:[#allocation3 + $0xa24] sm:$0xf0] }
 0x958   :  { %6305 = vmatpush.bf16.msra.mxu3 %v10050_v34  ;;  %v9974_v6 = vor.u32 %v11240_v33, %v9973_v1  ;;  %v9982_v59 = vor.u32 %v11241_v9, %v9981_v53  ;;  %v11237_v28 = vld [vmem:[#allocation3 + $0xa0c] sm:$0xf]  ;;  %v10213_v34 = vld [vmem:[#allocation3 + $0xbd0] sm:$0xf]  ;;  %v11294_v23 = vld [vmem:[#allocation3 + $0xbd4] sm:$0xf] }
 0x959   :  { %6277 = vmatpush.bf16.msra.mxu1 %v10042_v37  ;;  %v9978_v37 = vor.u32 %v11236_v15, %v9975_v54  ;;  %v9983_v25 = vld [vmem:[#allocation3 + $0xa28] sm:$0xf0]  ;;  %v11298_v20 = vld [vmem:[#allocation3 + $0xbec] sm:$0xf0]  ;;  %v10223_v1 = vld [vmem:[#allocation3 + $0xbf8] sm:$0xf0] }
 0x95a   :  { %v11664_v50 = vpop.eup %11663  ;;  %6264 = vmatpush.bf16.msra.mxu0 %v10006_v51  ;;  %v9986_v32 = vor.u32 %v11237_v28, %v9983_v25  ;;  %v10215_v51 = vld [vmem:[#allocation3 + $0xbf0] sm:$0xf0]  ;;  %v10214_v44 = vor.u32 %v11298_v20, %v10213_v34  ;;  %v10181_v33 = vld [vmem:[#allocation3 + $0xb90] sm:$0xf]  ;;  %v11291_v28 = vld [vmem:[#allocation3 + $0xbb4] sm:$0xf0] }
 0x95b   :  { %v5715_v31 = vmul.f32 %v11664_v50, %v5705_v19  ;;  %v10014_v19 = vor.u32 %v11249_v55, %v10013_v3  ;;  %v11245_v50 = vld [vmem:[#allocation3 + $0xa4c] sm:$0xf]  ;;  %v10218_v3 = vor.u32 %v11294_v23, %v10215_v51  ;;  %v10221_v55 = vld [vmem:[#allocation3 + $0xbd8] sm:$0xf]  ;;  %v11290_v15 = vld [vmem:[#allocation3 + $0xbac] sm:$0xf0] }
 0x95c   :  { %v10182_v54 = vor.u32 %v11290_v15, %v10181_v33  ;;  %v11286_v53 = vld [vmem:[#allocation3 + $0xb94] sm:$0xf]  ;;  %v11287_v25 = vld [vmem:[#allocation3 + $0xb9c] sm:$0xf]  ;;  %v11282_v51 = vld [vmem:[#allocation3 + $0xb6c] sm:$0xf0] }
 0x95d   :  { %v13823_v5 = vpack.c.bf16 %v5715_v31, %v5714_v27  ;;  %v10015_v27 = vld [vmem:[#allocation3 + $0xa68] sm:$0xf0]  ;;  %6278 = vmatpush.bf16.msra.mxu1 %v10010_v10  ;;  %6292 = vmatpush.bf16.msra.mxu2 %v10014_v19  ;;  %v11299_v10 = vld [vmem:[#allocation3 + $0xbf4] sm:$0xf0]  ;;  %v11295_v19 = vld [vmem:[#allocation3 + $0xbdc] sm:$0xf] }
 0x95e   :  { %v10018_v31 = vor.u32 %v11245_v50, %v10015_v27  ;;  %6265 = vmatpush.bf16.msra.mxu0 %v9974_v6  ;;  %v13829_v50 = vpop.f32.mrf.mxu0  ;;  %v13831_v27 = vpop.f32.mrf.mxu1  ;;  %v10226_v6 = vor.u32 %v11295_v19, %v10223_v1  ;;  %v10183_v9 = vld [vmem:[#allocation3 + $0xbb0] sm:$0xf0]  ;;  %v10191_v34 = vld [vmem:[#allocation3 + $0xbb8] sm:$0xf0]  ;;  %v11283_v19 = vld [vmem:[#allocation3 + $0xb74] sm:$0xf0] }
 0x95f   :  { %15220 = vst [vmem:[#allocation73_spill] sm:$0xff] %v13823_v5  ;;  %5781 = vmatmul.bf16.vlgmr.msrb.gmra.mxu0 %v13823_v5  ;;  %5795 = vmatmul.bf16.vlgmr.msrb.gmra.mxu1 %v13823_v5  ;;  %v10194_v23 = vor.u32 %v11287_v25, %v10191_v34  ;;  %v10159_v15 = vld [vmem:[#allocation3 + $0xb78] sm:$0xf0]  ;;  %v11270_v25 = vld [vmem:[#allocation3 + $0xb14] sm:$0xf] }
 0x960   :  { %5809 = vmatmul.bf16.vlgmr.msrb.gmra.mxu2 %v13823_v5  ;;  %5823 = vmatmul.bf16.vlgmr.msrb.gmra.mxu3 %v13823_v5  ;;  %v10125_v34 = vld [vmem:[#allocation3 + $0xb18] sm:$0xf]  ;;  %v11262_v17 = vld [vmem:[#allocation3 + $0xad4] sm:$0xf] }
 0x961   :  { %6306 = vmatpush.bf16.msra.mxu3 %v10018_v31  ;;  %6279 = vmatpush.bf16.msra.mxu1 %v9978_v37  ;;  %v10222_v31 = vor.u32 %v11299_v10, %v10221_v55  ;;  %v10189_v37 = vld [vmem:[#allocation3 + $0xb98] sm:$0xf]  ;;  %v11278_v55 = vld [vmem:[#allocation3 + $0xb54] sm:$0xf] }
 0x962   :  { %6293 = vmatpush.bf16.msra.mxu2 %v9982_v59  ;;  %6314 = vmatpush.bf16.msrb.mxu0 %v10214_v44  ;;  %v10186_v59 = vor.u32 %v11286_v53, %v10183_v9  ;;  %v10190_v20 = vor.u32 %v11291_v28, %v10189_v37  ;;  %v10157_v10 = vld [vmem:[#allocation3 + $0xb58] sm:$0xf]  ;;  %v13833_v53 = vpop.f32.mrf.mxu2  ;;  %v13835_v9 = vpop.f32.mrf.mxu3  ;;  %v10117_v37 = vld [vmem:[#allocation3 + $0xb10] sm:$0xf] }
 0x963   :  { %v10158_v33 = vor.u32 %v11283_v19, %v10157_v10  ;;  %v11274_v28 = vld [vmem:[#allocation3 + $0xb2c] sm:$0xf0]  ;;  %v11271_v10 = vld [vmem:[#allocation3 + $0xb1c] sm:$0xf] }
 0x964   :  { %v10127_v19 = vld [vmem:[#allocation3 + $0xb38] sm:$0xf0] }
 0x965   :  { %6307 = vmatpush.bf16.msra.mxu3 %v9986_v32  ;;  %6328 = vmatpush.bf16.msrb.mxu1 %v10218_v3  ;;  %v10149_v32 = vld [vmem:[#allocation3 + $0xb50] sm:$0xf]  ;;  %v10151_v3 = vld [vmem:[#allocation3 + $0xb70] sm:$0xf0] }
 0x966   :  { %6342 = vmatpush.bf16.msrb.mxu2 %v10222_v31  ;;  %6315 = vmatpush.bf16.msrb.mxu0 %v10182_v54  ;;  %v10150_v44 = vor.u32 %v11282_v51, %v10149_v32  ;;  %v10154_v1 = vor.u32 %v11278_v55, %v10151_v3  ;;  %v11279_v31 = vld [vmem:[#allocation3 + $0xb5c] sm:$0xf]  ;;  %v10118_v54 = vor.u32 %v11274_v28, %v10117_v37  ;;  %v11275_v32 = vld [vmem:[#allocation3 + $0xb34] sm:$0xf0]  ;;  %v13839_v51 = vpop.f32.mrf.mxu1 }
 0x967   :  { %v10126_v3 = vor.u32 %v11275_v32, %v10125_v34  ;;  %v10093_v37 = vld [vmem:[#allocation3 + $0xad8] sm:$0xf]  ;;  %v11258_v34 = vld [vmem:[#allocation3 + $0xaac] sm:$0xf0] }
 0x968   :  { %v11267_v28 = vld [vmem:[#allocation3 + $0xaf4] sm:$0xf0] }
 0x969   :  { %6356 = vmatpush.bf16.msrb.mxu3 %v10226_v6  ;;  %6329 = vmatpush.bf16.msrb.mxu1 %v10186_v59  ;;  %v10162_v6 = vor.u32 %v11279_v31, %v10159_v15  ;;  %v10119_v59 = vld [vmem:[#allocation3 + $0xb30] sm:$0xf0]  ;;  %v10085_v31 = vld [vmem:[#allocation3 + $0xad0] sm:$0xf]  ;;  %v10094_v5 = vor.u32 %v11267_v28, %v10093_v37 }
 0x96a   :  { %6343 = vmatpush.bf16.msrb.mxu2 %v10190_v20  ;;  %6316 = vmatpush.bf16.msrb.mxu0 %v10150_v44  ;;  %v13837_v20 = vpop.f32.mrf.mxu0  ;;  %v10122_v55 = vor.u32 %v11270_v25, %v10119_v59  ;;  %v11266_v15 = vld [vmem:[#allocation3 + $0xaec] sm:$0xf0]  ;;  %v13841_v32 = vpop.f32.mrf.mxu2 }
 0x96b   :  { %v10086_v44 = vor.u32 %v11266_v15, %v10085_v31  ;;  %v10053_v59 = vld [vmem:[#allocation3 + $0xa90] sm:$0xf]  ;;  %v11259_v31 = vld [vmem:[#allocation3 + $0xab4] sm:$0xf0] }
 0x96d   :  { %6357 = vmatpush.bf16.msrb.mxu3 %v10194_v23  ;;  %6330 = vmatpush.bf16.msrb.mxu1 %v10154_v1  ;;  %v10130_v23 = vor.u32 %v11271_v10, %v10127_v19  ;;  %v10087_v1 = vld [vmem:[#allocation3 + $0xaf0] sm:$0xf0]  ;;  %v13843_v10 = vpop.f32.mrf.mxu3  ;;  %v10061_v19 = vld [vmem:[#allocation3 + $0xa98] sm:$0xf] }
 0x96e   :  { %6344 = vmatpush.bf16.msrb.mxu2 %v10158_v33  ;;  %6317 = vmatpush.bf16.msrb.mxu0 %v10118_v54  ;;  %v10090_v22 = vor.u32 %v11262_v17, %v10087_v1  ;;  %v10095_v33 = vld [vmem:[#allocation3 + $0xaf8] sm:$0xf0]  ;;  %v10054_v54 = vor.u32 %v11258_v34, %v10053_v59  ;;  %v10062_v1 = vor.u32 %v11259_v31, %v10061_v19  ;;  %v11251_v19 = vld [vmem:[#allocation3 + $0xa74] sm:$0xf0] }
 0x96f   :  { %v10098_v25 = vor.u32 %v11263_v16, %v10095_v33  ;;  %v10063_v16 = vld [vmem:[#allocation3 + $0xab8] sm:$0xf0] }
 0x971   :  { %6358 = vmatpush.bf16.msrb.mxu3 %v10162_v6  ;;  %6331 = vmatpush.bf16.msrb.mxu1 %v10122_v55  ;;  %v11254_v6 = vld [vmem:[#allocation3 + $0xa94] sm:$0xf] }
 0x972   :  { %6345 = vmatpush.bf16.msrb.mxu2 %v10126_v3  ;;  %6318 = vmatpush.bf16.msrb.mxu0 %v10086_v44  ;;  %v10055_v55 = vld [vmem:[#allocation3 + $0xab0] sm:$0xf0]  ;;  %v11250_v44 = vld [vmem:[#allocation3 + $0xa6c] sm:$0xf0] }
 0x973   :  { %v10058_v15 = vor.u32 %v11254_v6, %v10055_v55  ;;  %v10023_v6 = vld [vmem:[#allocation3 + $0xa70] sm:$0xf0]  ;;  %v10029_v55 = vld [vmem:[#allocation3 + $0xa58] sm:$0xf] }
 0x975   :  { %6359 = vmatpush.bf16.msrb.mxu3 %v10130_v23  ;;  %6332 = vmatpush.bf16.msrb.mxu1 %v10090_v22  ;;  %v11255_v23 = vld [vmem:[#allocation3 + $0xa9c] sm:$0xf]  ;;  %v11246_v22 = vld [vmem:[#allocation3 + $0xa54] sm:$0xf] }
 0x976   :  { %6346 = vmatpush.bf16.msrb.mxu2 %v10094_v5  ;;  %v10066_v33 = vor.u32 %v11255_v23, %v10063_v16  ;;  %6319 = vmatpush.bf16.msrb.mxu0 %v10054_v54  ;;  %v10022_v5 = vor.u32 %v11250_v44, %v10021_v0  ;;  %v10026_v31 = vor.u32 %v11246_v22, %v10023_v6  ;;  %v9989_v16 = vld [vmem:[#allocation3 + $0xa10] sm:$0xf]  ;;  %v9997_v44 = vld [vmem:[#allocation3 + $0xa18] sm:$0xf] }
 0x977   :  { %v9990_v0 = vor.u32 %v11242_v49, %v9989_v16 }
 0x979   :  { %6360 = vmatpush.bf16.msrb.mxu3 %v10098_v25  ;;  %6333 = vmatpush.bf16.msrb.mxu1 %v10058_v15  ;;  %v9991_v15 = vld [vmem:[#allocation3 + $0xa30] sm:$0xf0] }
 0x97a   :  { %6347 = vmatpush.bf16.msrb.mxu2 %v10062_v1  ;;  %6320 = vmatpush.bf16.msrb.mxu0 %v10022_v5  ;;  %v11243_v1 = vld [vmem:[#allocation3 + $0xa34] sm:$0xf0] }
 0x97b   :  { %v9998_v5 = vor.u32 %v11243_v1, %v9997_v44 }
 0x97d   :  { %6361 = vmatpush.bf16.msrb.mxu3 %v10066_v33  ;;  %6334 = vmatpush.bf16.msrb.mxu1 %v10026_v31 }
 0x97e   :  { %6321 = vmatpush.bf16.msrb.mxu0 %v9990_v0 }
 0x9dc   :  { %v5782_v3 = vpop.f32.mrf.mxu0  ;;  %v5796_v17 = vpop.f32.mrf.mxu1 }
 0x9dd   :  { %v5783_v37 = vadd.f32 %v5782_v3, %v13829_v50  ;;  %v5797_v28 = vadd.f32 %v5796_v17, %v13831_v27  ;;  %v10030_v50 = vor.u32 %v11251_v19, %v10029_v55  ;;  %v11247_v3 = vld [vmem:[#allocation3 + $0xa5c] sm:$0xf] }
 0x9de   :  { %v10031_v27 = vld [vmem:[#allocation3 + $0xa78] sm:$0xf0] }
 0x9df   :  { %v5829_v59 = vadd.f32 %v5783_v37, %v14786_v26  ;;  %v5830_v34 = vadd.f32 %v5797_v28, %v14787_v21  ;;  %v10034_v23 = vor.u32 %v11247_v3, %v10031_v27  ;;  %v11238_v37 = vld [vmem:[#allocation3 + $0xa14] sm:$0xf]  ;;  %6348 = vmatpush.bf16.msrb.mxu2 %v10030_v50  ;;  %v9999_v55 = vld [vmem:[#allocation3 + $0xa38] sm:$0xf0] }
 0x9e0   :  { %v9994_v33 = vor.u32 %v11238_v37, %v9991_v15 }
 0x9e1   :  { %v5837_v25 = vmul.f32 0.5, %v5829_v59  ;;  %v5845_v17 = vmul.f32 0.5, %v5830_v34  ;;  %v11239_v34 = vld [vmem:[#allocation3 + $0xa1c] sm:$0xf]  ;;  %6362 = vmatpush.bf16.msrb.mxu3 %v10034_v23 }
 0x9e2   :  { %v10002_v31 = vor.u32 %v11239_v34, %v9999_v55  ;;  %6335 = vmatpush.bf16.msrb.mxu1 %v9994_v33 }
 0x9e3   :  { %11665 = vtanh.f32 %v5837_v25  ;;  %v5810_v28 = vpop.f32.mrf.mxu2  ;;  %v5824_v54 = vpop.f32.mrf.mxu3  ;;  %6349 = vmatpush.bf16.msrb.mxu2 %v9998_v5 }
 0x9e4   :  { %11667 = vtanh.f32 %v5845_v17  ;;  %v5811_v22 = vadd.f32 %v5810_v28, %v13833_v53  ;;  %v5784_v6 = vpop.f32.mrf.mxu0  ;;  %v5798_v59 = vpop.f32.mrf.mxu1  ;;  %v5825_v27 = vadd.f32 %v5824_v54, %v13835_v9 }
 0x9e5   :  { %v5785_v19 = vadd.f32 %v5784_v6, %v13837_v20  ;;  %v5799_v3 = vadd.f32 %v5798_v59, %v13839_v51  ;;  %6363 = vmatpush.bf16.msrb.mxu3 %v10002_v31 }
 0x9e6   :  { %v5831_v49 = vadd.f32 %v5811_v22, %v14788_v8  ;;  %v5832_v16 = vadd.f32 %v5825_v27, %v14789_v12 }
 0x9e7   :  { %v5833_v25 = vadd.f32 %v5785_v19, %v14786_v26  ;;  %v5834_v53 = vadd.f32 %v5799_v3, %v14787_v21 }
 0x9e8   :  { %11669 = vtanh.f32 %v5831_v49  ;;  %v5855_v22 = vmul.f32 0.5, %v5832_v16 }
 0x9e9   :  { %v11666_v50 = vpop.eup %11665  ;;  %v5838_v17 = vmul.f32 0.5, %v5833_v25  ;;  %v5846_v20 = vmul.f32 0.5, %v5834_v53 }
 0x9ea   :  { %v11668_v51 = vpop.eup %11667  ;;  %v5841_v23 = vmul.f32 0.5, %v11666_v50 }
 0x9eb   :  { %v5849_v37 = vmul.f32 0.5, %v11668_v51  ;;  %11671 = vtanh.f32 %v5838_v17  ;;  %v5812_v28 = vpop.f32.mrf.mxu2  ;;  %v5826_v9 = vpop.f32.mrf.mxu3 }
 0x9ec   :  { %11673 = vtanh.f32 %v5846_v20  ;;  %v5813_v54 = vadd.f32 %v5812_v28, %v13841_v32  ;;  %v5827_v0 = vadd.f32 %v5826_v9, %v13843_v10  ;;  %v5843_v15 = vadd.f32 0.5, %v5841_v23 }
 0x9ed   :  { %v5851_v44 = vadd.f32 0.5, %v5849_v37 }
 0x9ee   :  { %v11670_v1 = vpop.eup %11669  ;;  %v5835_v6 = vadd.f32 %v5813_v54, %v14788_v8  ;;  %v5836_v59 = vadd.f32 %v5827_v0, %v14789_v12 }
 0x9ef   :  { %v5863_v55 = vmul.f32 %v5851_v44, %v13646_v45  ;;  %v5865_v19 = vmul.f32 %v11670_v1, %v5843_v15  ;;  %v15222_v15 = vld [vmem:[#allocation50_spill] sm:$0xff]  ;;  %v15223_v44 = vld [vmem:[#allocation51_spill] sm:$0xff] }
 0x9f0   :  { %11675 = vtanh.f32 %v5835_v6  ;;  %v5856_v33 = vmul.f32 0.5, %v5836_v59  ;;  %v15224_v1 = vld [vmem:[#allocation54_spill] sm:$0xff]  ;;  %v15226_v6 = vld [vmem:[#allocation80_spill] sm:$0xff]  ;;  %v15227_v59 = vld [vmem:[#allocation81_spill] sm:$0xff] }
 0x9f1   :  { %v11672_v34 = vpop.eup %11671  ;;  %11677 = vtanh.f32 %v5855_v22  ;;  %v13862_v31 = vadd.f32 %v5865_v19, %v5863_v55  ;;  %v15225_v22 = vld [vmem:[#allocation79_spill] sm:$0xff]  ;;  %v15231_v19 = vld [vmem:[#allocation84_spill] sm:$0xff] }
 0x9f2   :  { %v11674_v3 = vpop.eup %11673  ;;  %v5842_v5 = vmul.f32 0.5, %v11672_v34  ;;  %11679 = vtanh.f32 %v5856_v33  ;;  %v15228_v33 = vld [vmem:[#allocation82_spill] sm:$0xff]  ;;  %v15229_v34 = vld [vmem:[#allocation73_spill] sm:$0xff]  ;;  %v15230_v55 = vld [vmem:[#allocation83_spill] sm:$0xff] }
 0x9f3   :  { %v5850_v32 = vmul.f32 0.5, %v11674_v3  ;;  %11681 = vtanh.f32 %v13862_v31  ;;  %v15232_v3 = vld [vmem:[#allocation85_spill] sm:$0xff] }
 0x9f4   :  { %v5844_v10 = vadd.f32 0.5, %v5842_v5  ;;  %v15233_v5 = vld [vmem:[#allocation86_spill] sm:$0xff] }
 0x9f5   :  { %v5852_v49 = vadd.f32 0.5, %v5850_v32  ;;  %v15234_v32 = vld [vmem:[#allocation89_spill] sm:$0xff] }
 0x9f6   :  { %v11676_v27 = vpop.eup %11675 }
 0x9f7   :  { %v5864_v25 = vmul.f32 %v5852_v49, %v13650_v24  ;;  %v5866_v53 = vmul.f32 %v11676_v27, %v5844_v10  ;;  %v11678_v50 = vpop.eup %11677  ;;  %v15221_v24 = vld [vmem:[#allocation49_spill] sm:$0xff]  ;;  %v15235_v10 = vld [vmem:[#allocation90_spill] sm:$0xff]  ;;  %v15236_v49 = vld [vmem:[#allocation91_spill] sm:$0xff] }
 0x9f8   :  { %v11680_v17 = vpop.eup %11679  ;;  %v5859_v45 = vmul.f32 0.5, %v11678_v50  ;;  %v15237_v27 = vld [vmem:[#allocation92_spill] sm:$0xff]  ;;  %v15240_v50 = vld [vmem:[#allocation95_spill] sm:$0xff] }
 0x9f9   :  { %v13866_v20 = vadd.f32 %v5866_v53, %v5864_v25  ;;  %v5860_v51 = vmul.f32 0.5, %v11680_v17  ;;  %v11682_v23 = vpop.eup %11681  ;;  %v15238_v25 = vld [vmem:[#allocation93_spill] sm:$0xff]  ;;  %v15239_v53 = vld [vmem:[#allocation94_spill] sm:$0xff]  ;;  %v15241_v17 = vld [vmem:[#allocation96_spill] sm:$0xff] }
 0x9fa   :  { %v5861_v16 = vadd.f32 0.5, %v5859_v45  ;;  %v15242_v45 = vld [vmem:[#allocation99_spill] sm:$0xff] }
 0x9fb   :  { %11683 = vtanh.f32 %v13866_v20  ;;  %v5862_v37 = vadd.f32 0.5, %v5860_v51  ;;  %v15243_v51 = vld [vmem:[#allocation100_spill] sm:$0xff] }
 0x9fc   :  { %v5871_v9 = vmul.f32 %v11682_v23, %v5861_v16  ;;  %v15244_v23 = vld [vmem:[#allocation101_spill] sm:$0xff]  ;;  %v15245_v16 = vld [vmem:[#allocation102_spill] sm:$0xff] }
 0xa01   :  { %v11684_v28 = vpop.eup %11683 }
 0xa02   :  { %v5872_v54 = vmul.f32 %v11684_v28, %v5862_v37  ;;  %v15246_v37 = vld [vmem:[#allocation103_spill] sm:$0xff]  ;;  %v15247_v28 = vld [vmem:[#allocation104_spill] sm:$0xff] }
 0xa04   :  { %v13869_v0 = vpack.c.bf16 %v5872_v54, %v5871_v9  ;;  %v15248_v9 = vld [vmem:[#allocation105_spill] sm:$0xff]  ;;  %v15249_v54 = vld [vmem:[#allocation106_spill] sm:$0xff] }
 0xa06   :  { %6266 = vmatmul.bf16.vlgmr.msra.gmra.mxu0 %v13869_v0  ;;  %6280 = vmatmul.bf16.vlgmr.msra.gmra.mxu1 %v13869_v0 }
 0xa07   :  { %6294 = vmatmul.bf16.vlgmr.msra.gmra.mxu2 %v13869_v0  ;;  %6308 = vmatmul.bf16.vlgmr.msra.gmra.mxu3 %v13869_v0 }
 0xa08   :  { %6394 = vmatpush.bf16.msra.mxu0 %v12188_v36  ;;  %6408 = vmatpush.bf16.msra.mxu1 %v12190_v40 }
 0xa09   :  { %6422 = vmatpush.bf16.msra.mxu2 %v12192_v43  ;;  %6436 = vmatpush.bf16.msra.mxu3 %v12197_v52 }
 0xa0c   :  { %6395 = vmatpush.bf16.msra.mxu0 %v12208_v58  ;;  %6409 = vmatpush.bf16.msra.mxu1 %v12210_v13 }
 0xa0d   :  { %6423 = vmatpush.bf16.msra.mxu2 %v12212_v14  ;;  %6437 = vmatpush.bf16.msra.mxu3 %v12219_v18 }
 0xa10   :  { %6396 = vmatpush.bf16.msra.mxu0 %v12235_v30  ;;  %6410 = vmatpush.bf16.msra.mxu1 %v12237_v38 }
 0xa11   :  { %6424 = vmatpush.bf16.msra.mxu2 %v12239_v39  ;;  %6438 = vmatpush.bf16.msra.mxu3 %v12250_v56 }
 0xa14   :  { %6397 = vmatpush.bf16.msra.mxu0 %v12263_v29  ;;  %6411 = vmatpush.bf16.msra.mxu1 %v12265_v2 }
 0xa15   :  { %6425 = vmatpush.bf16.msra.mxu2 %v12267_v46  ;;  %6439 = vmatpush.bf16.msra.mxu3 %v12278_v62 }
 0xa16   :  { %6322 = vmatmul.bf16.vlgmr.msrb.gmra.mxu0 %v13869_v0  ;;  %6336 = vmatmul.bf16.vlgmr.msrb.gmra.mxu1 %v13869_v0 }
 0xa17   :  { %6350 = vmatmul.bf16.vlgmr.msrb.gmra.mxu2 %v13869_v0  ;;  %6364 = vmatmul.bf16.vlgmr.msrb.gmra.mxu3 %v13869_v0 }
 0xa18   :  { %6398 = vmatpush.bf16.msra.mxu0 %v12291_v7  ;;  %6412 = vmatpush.bf16.msra.mxu1 %v12293_v61 }
 0xa19   :  { %6426 = vmatpush.bf16.msra.mxu2 %v12295_v63  ;;  %6440 = vmatpush.bf16.msra.mxu3 %v12306_v47 }
 0xa1c   :  { %6399 = vmatpush.bf16.msra.mxu0 %v12319_v35  ;;  %6413 = vmatpush.bf16.msra.mxu1 %v12321_v42 }
 0xa1d   :  { %6427 = vmatpush.bf16.msra.mxu2 %v12323_v11  ;;  %6441 = vmatpush.bf16.msra.mxu3 %v12334_v48 }
 0xa20   :  { %6400 = vmatpush.bf16.msra.mxu0 %v12347_v60  ;;  %6414 = vmatpush.bf16.msra.mxu1 %v12349_v41 }
 0xa21   :  { %6428 = vmatpush.bf16.msra.mxu2 %v12351_v4  ;;  %6442 = vmatpush.bf16.msra.mxu3 %v12362_v57 }
 0xa24   :  { %6401 = vmatpush.bf16.msra.mxu0 %v15221_v24  ;;  %6415 = vmatpush.bf16.msra.mxu1 %v15222_v15  ;;  %v10277_v15 = vld [vmem:[#allocation3 + $0xc50] sm:$0xf] }
 0xa25   :  { %6429 = vmatpush.bf16.msra.mxu2 %v15223_v44  ;;  %6443 = vmatpush.bf16.msra.mxu3 %v15224_v1  ;;  %v10431_v1 = vld [vmem:[#allocation3 + $0xda8] sm:$0xf0]  ;;  %v11327_v44 = vld [vmem:[#allocation3 + $0xcdc] sm:$0xf]  ;;  %v11306_v24 = vld [vmem:[#allocation3 + $0xc2c] sm:$0xf0] }
 0xa27   :  { %6402 = vmatmul.bf16.vlgmr.msra.gmra.mxu0 %v15229_v34  ;;  %6416 = vmatmul.bf16.vlgmr.msra.gmra.mxu1 %v15229_v34 }
 0xa28   :  { %6495 = vmatpush.bf16.msrb.mxu0 %v15225_v22  ;;  %6509 = vmatpush.bf16.msrb.mxu1 %v15226_v6  ;;  %v11353_v6 = vld [vmem:[#allocation3 + $0xda4] sm:$0xf0]  ;;  %v11349_v22 = vld [vmem:[#allocation3 + $0xd8c] sm:$0xf] }
 0xa29   :  { %6523 = vmatpush.bf16.msrb.mxu2 %v15227_v59  ;;  %6537 = vmatpush.bf16.msrb.mxu3 %v15228_v33  ;;  %v15320_v59 = vld [vmem:[#allocation120_spill] sm:$0xff] }
 0xa2a   :  { %6430 = vmatmul.bf16.vlgmr.msra.gmra.mxu2 %v15229_v34  ;;  %6444 = vmatmul.bf16.vlgmr.msra.gmra.mxu3 %v15229_v34  ;;  %v15250_v34 = vld [vmem:[#allocation109_spill] sm:$0xff] }
 0xa2c   :  { %6496 = vmatpush.bf16.msrb.mxu0 %v15230_v55  ;;  %6510 = vmatpush.bf16.msrb.mxu1 %v15231_v19 }
 0xa2d   :  { %6524 = vmatpush.bf16.msrb.mxu2 %v15232_v3  ;;  %6538 = vmatpush.bf16.msrb.mxu3 %v15233_v5  ;;  %v15319_v5 = vld [vmem:[#allocation117_spill] sm:$0xff] }
 0xa30   :  { %6497 = vmatpush.bf16.msrb.mxu0 %v15234_v32  ;;  %6511 = vmatpush.bf16.msrb.mxu1 %v15235_v10  ;;  %v15318_v32 = vld [vmem:[#allocation59_spill] sm:$0xff] }
 0xa31   :  { %6525 = vmatpush.bf16.msrb.mxu2 %v15236_v49  ;;  %6539 = vmatpush.bf16.msrb.mxu3 %v15237_v27 }
 0xa34   :  { %6498 = vmatpush.bf16.msrb.mxu0 %v15238_v25  ;;  %6512 = vmatpush.bf16.msrb.mxu1 %v15239_v53  ;;  %v15294_v25 = vld [vmem:[#allocation32_spill] sm:$0xff] }
 0xa35   :  { %6526 = vmatpush.bf16.msrb.mxu2 %v15240_v50  ;;  %6540 = vmatpush.bf16.msrb.mxu3 %v15241_v17  ;;  %v15251_v50 = vld [vmem:[#allocation110_spill] sm:$0xff]  ;;  %v15252_v17 = vld [vmem:[#allocation111_spill] sm:$0xff] }
 0xa38   :  { %6499 = vmatpush.bf16.msrb.mxu0 %v15242_v45  ;;  %6513 = vmatpush.bf16.msrb.mxu1 %v15243_v51  ;;  %v15253_v45 = vld [vmem:[#allocation112_spill] sm:$0xff]  ;;  %v15254_v51 = vld [vmem:[#allocation113_spill] sm:$0xff] }
 0xa39   :  { %6527 = vmatpush.bf16.msrb.mxu2 %v15244_v23  ;;  %6541 = vmatpush.bf16.msrb.mxu3 %v15245_v16  ;;  %v15255_v23 = vld [vmem:[#allocation114_spill] sm:$0xff]  ;;  %v15256_v16 = vld [vmem:[#allocation115_spill] sm:$0xff] }
 0xa3c   :  { %6500 = vmatpush.bf16.msrb.mxu0 %v15246_v37  ;;  %6514 = vmatpush.bf16.msrb.mxu1 %v15247_v28  ;;  %v15257_v37 = vld [vmem:[#allocation116_spill] sm:$0xff]  ;;  %v15258_v28 = vld [vmem:[#allocation118_spill] sm:$0xff] }
 0xa3d   :  { %6528 = vmatpush.bf16.msrb.mxu2 %v15248_v9  ;;  %6542 = vmatpush.bf16.msrb.mxu3 %v15249_v54  ;;  %v15259_v9 = vld [vmem:[#allocation119_spill] sm:$0xff]  ;;  %v15290_v54 = vld [vmem:[#allocation70_spill] sm:$0xff] }
 0xa40   :  { %6501 = vmatpush.bf16.msrb.mxu0 %v15250_v34  ;;  %6515 = vmatpush.bf16.msrb.mxu1 %v15251_v50  ;;  %v15268_v50 = vld [vmem:[#allocation130_spill] sm:$0xff]  ;;  %v15269_v34 = vld [vmem:[#allocation132_spill] sm:$0xff] }
 0xa41   :  { %6529 = vmatpush.bf16.msrb.mxu2 %v15252_v17  ;;  %6543 = vmatpush.bf16.msrb.mxu3 %v15253_v45  ;;  %v15260_v45 = vld [vmem:[#allocation121_spill] sm:$0xff] }
 0xa42   :  { %v15267_v17 = vld [vmem:[#allocation129_spill] sm:$0xff] }
 0xa44   :  { %6502 = vmatpush.bf16.msrb.mxu0 %v15254_v51  ;;  %6516 = vmatpush.bf16.msrb.mxu1 %v15255_v23  ;;  %v15261_v51 = vld [vmem:[#allocation122_spill] sm:$0xff]  ;;  %v15262_v23 = vld [vmem:[#allocation123_spill] sm:$0xff] }
 0xa45   :  { %6530 = vmatpush.bf16.msrb.mxu2 %v15256_v16  ;;  %6544 = vmatpush.bf16.msrb.mxu3 %v15257_v37  ;;  %v15263_v16 = vld [vmem:[#allocation124_spill] sm:$0xff]  ;;  %v15264_v37 = vld [vmem:[#allocation125_spill] sm:$0xff] }
 0xa47   :  { %6503 = vmatmul.bf16.vlgmr.msrb.gmra.mxu0 %v13869_v0  ;;  %6517 = vmatmul.bf16.vlgmr.msrb.gmra.mxu1 %v13869_v0 }
 0xa48   :  { %6551 = vmatpush.bf16.msra.mxu0 %v15258_v28  ;;  %6565 = vmatpush.bf16.msra.mxu1 %v15259_v9  ;;  %v15265_v28 = vld [vmem:[#allocation126_spill] sm:$0xff]  ;;  %v15266_v9 = vld [vmem:[#allocation127_spill] sm:$0xff] }
 0xa49   :  { %6531 = vmatmul.bf16.vlgmr.msrb.gmra.mxu2 %v13869_v0  ;;  %6545 = vmatmul.bf16.vlgmr.msrb.gmra.mxu3 %v13869_v0  ;;  %v15270_v0 = vld [vmem:[#allocation133_spill] sm:$0xff] }
 0xa4a   :  { %6579 = vmatpush.bf16.msra.mxu2 %v15260_v45  ;;  %6593 = vmatpush.bf16.msra.mxu3 %v15261_v51  ;;  %v15271_v45 = vld [vmem:[#allocation134_spill] sm:$0xff]  ;;  %v15272_v51 = vld [vmem:[#allocation135_spill] sm:$0xff] }
 0xa4c   :  { %6552 = vmatpush.bf16.msra.mxu0 %v15262_v23  ;;  %6566 = vmatpush.bf16.msra.mxu1 %v15263_v16  ;;  %v15273_v23 = vld [vmem:[#allocation136_spill] sm:$0xff]  ;;  %v15274_v16 = vld [vmem:[#allocation137_spill] sm:$0xff] }
 0xa4e   :  { %6580 = vmatpush.bf16.msra.mxu2 %v15264_v37  ;;  %6594 = vmatpush.bf16.msra.mxu3 %v15265_v28  ;;  %v15275_v37 = vld [vmem:[#allocation139_spill] sm:$0xff]  ;;  %v15276_v28 = vld [vmem:[#allocation140_spill] sm:$0xff] }
 0xa50   :  { %6553 = vmatpush.bf16.msra.mxu0 %v15266_v9  ;;  %6567 = vmatpush.bf16.msra.mxu1 %v15267_v17  ;;  %v15277_v9 = vld [vmem:[#allocation142_spill] sm:$0xff]  ;;  %v15278_v17 = vld [vmem:[#allocation143_spill] sm:$0xff] }
 0xa52   :  { %6581 = vmatpush.bf16.msra.mxu2 %v15268_v50  ;;  %6595 = vmatpush.bf16.msra.mxu3 %v15269_v34  ;;  %v15279_v50 = vld [vmem:[#allocation144_spill] sm:$0xff]  ;;  %v15280_v34 = vld [vmem:[#allocation145_spill] sm:$0xff] }
 0xa54   :  { %6554 = vmatpush.bf16.msra.mxu0 %v15270_v0  ;;  %6568 = vmatpush.bf16.msra.mxu1 %v15271_v45  ;;  %v15281_v0 = vld [vmem:[#allocation146_spill] sm:$0xff]  ;;  %v15282_v45 = vld [vmem:[#allocation147_spill] sm:$0xff] }
 0xa56   :  { %6582 = vmatpush.bf16.msra.mxu2 %v15272_v51  ;;  %6596 = vmatpush.bf16.msra.mxu3 %v15273_v23  ;;  %v15283_v51 = vld [vmem:[#allocation149_spill] sm:$0xff]  ;;  %v15284_v23 = vld [vmem:[#allocation150_spill] sm:$0xff] }
 0xa58   :  { %6555 = vmatpush.bf16.msra.mxu0 %v15274_v16  ;;  %6569 = vmatpush.bf16.msra.mxu1 %v15275_v37  ;;  %v15285_v16 = vld [vmem:[#allocation151_spill] sm:$0xff]  ;;  %v15286_v37 = vld [vmem:[#allocation152_spill] sm:$0xff] }
 0xa5a   :  { %6583 = vmatpush.bf16.msra.mxu2 %v15276_v28  ;;  %6597 = vmatpush.bf16.msra.mxu3 %v15277_v9  ;;  %v15287_v28 = vld [vmem:[#allocation153_spill] sm:$0xff]  ;;  %v15288_v9 = vld [vmem:[#allocation154_spill] sm:$0xff] }
 0xa5c   :  { %6556 = vmatpush.bf16.msra.mxu0 %v15278_v17  ;;  %6570 = vmatpush.bf16.msra.mxu1 %v15279_v50  ;;  %v15289_v17 = vld [vmem:[#allocation155_spill] sm:$0xff] }
 0xa5e   :  { %6584 = vmatpush.bf16.msra.mxu2 %v15280_v34  ;;  %6598 = vmatpush.bf16.msra.mxu3 %v15281_v0 }
 0xa60   :  { %6557 = vmatpush.bf16.msra.mxu0 %v15282_v45  ;;  %6571 = vmatpush.bf16.msra.mxu1 %v15283_v51  ;;  %v15292_v45 = vld [vmem:[#allocation71_spill] sm:$0xff] }
 0xa62   :  { %6585 = vmatpush.bf16.msra.mxu2 %v15284_v23  ;;  %6599 = vmatpush.bf16.msra.mxu3 %v15285_v16 }
 0xa64   :  { %6558 = vmatpush.bf16.msra.mxu0 %v15286_v37  ;;  %6572 = vmatpush.bf16.msra.mxu1 %v15287_v28  ;;  %v15296_v37 = vld [vmem:[#allocation44_spill] sm:$0xff] }
 0xa66   :  { %6586 = vmatpush.bf16.msra.mxu2 %v15288_v9  ;;  %6600 = vmatpush.bf16.msra.mxu3 %v15289_v17 }
 0xa83   :  { %v6267_v50 = vpop.f32.mrf.mxu0  ;;  %v6281_v34 = vpop.f32.mrf.mxu1 }
 0xa84   :  { %v13984_v0 = vadd.f32 %v6267_v50, %v15290_v54  ;;  %v13987_v53 = vadd.f32 %v6281_v34, %v15292_v45  ;;  %v15302_v45 = vld [vmem:[#allocation77_spill] sm:$0xff] }
 0xa86   :  { %15291 = vst [vmem:[#allocation74_spill] sm:$0xff] %v13984_v0 }
 0xa87   :  { %15293 = vst [vmem:[#allocation75_spill] sm:$0xff] %v13987_v53  ;;  %v15304_v53 = vld [vmem:[#allocation78_spill] sm:$0xff] }
 0xa8a   :  { %v6295_v51 = vpop.f32.mrf.mxu2  ;;  %v6309_v23 = vpop.f32.mrf.mxu3 }
 0xa8b   :  { %v13990_v16 = vadd.f32 %v6295_v51, %v15294_v25  ;;  %v13993_v27 = vadd.f32 %v6309_v23, %v15296_v37  ;;  %v13995_v28 = vpop.f32.mrf.mxu0  ;;  %v13997_v9 = vpop.f32.mrf.mxu1  ;;  %v15306_v23 = vld [vmem:[#allocation87_spill] sm:$0xff] }
 0xa8c   :  { %15298 = vst [vmem:[#allocation52_spill] sm:$0xff] %v13995_v28 }
 0xa8d   :  { %15295 = vst [vmem:[#allocation166_spill] sm:$0xff] %v13990_v16 }
 0xa8e   :  { %15297 = vst [vmem:[#allocation48_spill] sm:$0xff] %v13993_v27  ;;  %v15308_v27 = vld [vmem:[#allocation35_spill] sm:$0xff] }
 0xa8f   :  { %15299 = vst [vmem:[#allocation88_spill] sm:$0xff] %v13997_v9 }
 0xa92   :  { %v13999_v17 = vpop.f32.mrf.mxu2  ;;  %v14001_v49 = vpop.f32.mrf.mxu3 }
 0xa93   :  { %15300 = vst [vmem:[#allocation53_spill] sm:$0xff] %v13999_v17  ;;  %v6323_v50 = vpop.f32.mrf.mxu0  ;;  %v6337_v54 = vpop.f32.mrf.mxu1 }
 0xa94   :  { %15301 = vst [vmem:[#allocation55_spill] sm:$0xff] %v14001_v49  ;;  %v14004_v34 = vadd.f32 %v6323_v50, %v15302_v45  ;;  %v14007_v0 = vadd.f32 %v6337_v54, %v15304_v53  ;;  %v15314_v53 = vld [vmem:[#allocation56_spill] sm:$0xff] }
 0xa96   :  { %15303 = vst [vmem:[#allocation97_spill] sm:$0xff] %v14004_v34 }
 0xa97   :  { %15305 = vst [vmem:[#allocation98_spill] sm:$0xff] %v14007_v0  ;;  %v15315_v0 = vld [vmem:[#allocation57_spill] sm:$0xff] }
 0xa9a   :  { %v6351_v25 = vpop.f32.mrf.mxu2  ;;  %v6365_v51 = vpop.f32.mrf.mxu3 }
 0xa9b   :  { %v14010_v37 = vadd.f32 %v6351_v25, %v15306_v23  ;;  %v14013_v16 = vadd.f32 %v6365_v51, %v15308_v27  ;;  %v14015_v9 = vpop.f32.mrf.mxu0  ;;  %v14017_v17 = vpop.f32.mrf.mxu1  ;;  %v15316_v23 = vld [vmem:[#allocation108_spill] sm:$0xff] }
 0xa9c   :  { %15310 = vst [vmem:[#allocation36_spill] sm:$0xff] %v14015_v9  ;;  %v15317_v9 = vld [vmem:[#allocation58_spill] sm:$0xff] }
 0xa9d   :  { %15307 = vst [vmem:[#allocation107_spill] sm:$0xff] %v14010_v37 }
 0xa9e   :  { %15309 = vst [vmem:[#allocation175_spill] sm:$0xff] %v14013_v16 }
 0xa9f   :  { %15311 = vst [vmem:[#allocation73_spill] sm:$0xff] %v14017_v17 }
 0xaa2   :  { %v14019_v49 = vpop.f32.mrf.mxu2  ;;  %v14021_v28 = vpop.f32.mrf.mxu3 }
 0xaa3   :  { %15312 = vst [vmem:[#allocation70_spill] sm:$0xff] %v14019_v49 }
 0xaa4   :  { %15313 = vst [vmem:[#allocation71_spill] sm:$0xff] %v14021_v28  ;;  %v6403_v50 = vpop.f32.mrf.mxu0  ;;  %v6417_v45 = vpop.f32.mrf.mxu1 }
 0xaa5   :  { %v6450_v54 = vadd.f32 %v6403_v50, %v15314_v53  ;;  %v6451_v34 = vadd.f32 %v6417_v45, %v15315_v0 }
 0xaa7   :  { %v6458_v10 = vmul.f32 0.5, %v6450_v54  ;;  %v6466_v25 = vmul.f32 0.5, %v6451_v34  ;;  %v11360_v54 = vld [vmem:[#allocation3 + $0xddc] sm:$0xf0] }
 0xaa9   :  { %11685 = vtanh.f32 %v6458_v10  ;;  %v10453_v10 = vld [vmem:[#allocation3 + $0xdc0] sm:$0xf] }
 0xaaa   :  { %11687 = vtanh.f32 %v6466_v25  ;;  %v10454_v19 = vor.u32 %v11360_v54, %v10453_v10 }
 0xaac   :  { %v6405_v37 = vpop.f32.mrf.mxu0  ;;  %v6419_v17 = vpop.f32.mrf.mxu1  ;;  %7036 = vmatpush.bf16.msrb.mxu0 %v10454_v19 }
 0xaad   :  { %v6431_v27 = vpop.f32.mrf.mxu2  ;;  %v6445_v51 = vpop.f32.mrf.mxu3  ;;  %v6454_v49 = vadd.f32 %v6405_v37, %v15317_v9  ;;  %v6455_v28 = vadd.f32 %v6419_v17, %v15318_v32  ;;  %v10461_v37 = vld [vmem:[#allocation3 + $0xdc8] sm:$0xf] }
 0xaae   :  { %v6452_v16 = vadd.f32 %v6431_v27, %v15316_v23  ;;  %v6453_v3 = vadd.f32 %v6445_v51, %v15319_v5  ;;  %v11356_v27 = vld [vmem:[#allocation3 + $0xdc4] sm:$0xf]  ;;  %v11361_v32 = vld [vmem:[#allocation3 + $0xde4] sm:$0xf0] }
 0xaaf   :  { %v11686_v50 = vpop.eup %11685  ;;  %v6459_v53 = vmul.f32 0.5, %v6454_v49  ;;  %v6467_v0 = vmul.f32 0.5, %v6455_v28  ;;  %v10455_v23 = vld [vmem:[#allocation3 + $0xde0] sm:$0xf0]  ;;  %v10462_v49 = vor.u32 %v11361_v32, %v10461_v37  ;;  %v11357_v28 = vld [vmem:[#allocation3 + $0xdcc] sm:$0xf] }
 0xab0   :  { %11689 = vtanh.f32 %v6452_v16  ;;  %v11688_v45 = vpop.eup %11687  ;;  %v6462_v34 = vmul.f32 0.5, %v11686_v50  ;;  %v6476_v55 = vmul.f32 0.5, %v6453_v3  ;;  %v10458_v9 = vor.u32 %v11356_v27, %v10455_v23  ;;  %v10463_v50 = vld [vmem:[#allocation3 + $0xde8] sm:$0xf0]  ;;  %v10421_v3 = vld [vmem:[#allocation3 + $0xd80] sm:$0xf] }
 0xab1   :  { %v6470_v25 = vmul.f32 0.5, %v11688_v45  ;;  %11691 = vtanh.f32 %v6459_v53  ;;  %v15321_v53 = vld [vmem:[#allocation128_spill] sm:$0xff]  ;;  %v10466_v54 = vor.u32 %v11357_v28, %v10463_v50  ;;  %v11348_v27 = vld [vmem:[#allocation3 + $0xd84] sm:$0xf]  ;;  %7064 = vmatpush.bf16.msrb.mxu2 %v10462_v49  ;;  %v10434_v28 = vor.u32 %v11349_v22, %v10431_v1  ;;  %v10389_v50 = vld [vmem:[#allocation3 + $0xd40] sm:$0xf] }
 0xab2   :  { %11693 = vtanh.f32 %v6467_v0  ;;  %v6464_v17 = vadd.f32 0.5, %v6462_v34  ;;  %7050 = vmatpush.bf16.msrb.mxu1 %v10458_v9  ;;  %v11352_v0 = vld [vmem:[#allocation3 + $0xd9c] sm:$0xf0]  ;;  %v10423_v34 = vld [vmem:[#allocation3 + $0xda0] sm:$0xf0] }
 0xab3   :  { %v6472_v16 = vadd.f32 0.5, %v6470_v25  ;;  %v10422_v23 = vor.u32 %v11352_v0, %v10421_v3  ;;  %v10429_v25 = vld [vmem:[#allocation3 + $0xd88] sm:$0xf]  ;;  %7078 = vmatpush.bf16.msrb.mxu3 %v10466_v54  ;;  %v10426_v37 = vor.u32 %v11348_v27, %v10423_v34  ;;  %v10399_v1 = vld [vmem:[#allocation3 + $0xd68] sm:$0xf0] }
 0xab4   :  { %v10430_v32 = vor.u32 %v11353_v6, %v10429_v25  ;;  %v10397_v27 = vld [vmem:[#allocation3 + $0xd48] sm:$0xf] }
 0xab5   :  { %v6433_v5 = vpop.f32.mrf.mxu2  ;;  %v6447_v51 = vpop.f32.mrf.mxu3  ;;  %7037 = vmatpush.bf16.msrb.mxu0 %v10422_v23  ;;  %v11345_v34 = vld [vmem:[#allocation3 + $0xd64] sm:$0xf0]  ;;  %v10357_v23 = vld [vmem:[#allocation3 + $0xd00] sm:$0xf] }
 0xab6   :  { %v11690_v33 = vpop.eup %11689  ;;  %v6456_v45 = vadd.f32 %v6433_v5, %v15320_v59  ;;  %v6457_v10 = vadd.f32 %v6447_v51, %v15321_v53  ;;  %v15322_v5 = vld [vmem:[#allocation163_spill] sm:$0xff]  ;;  %v11344_v53 = vld [vmem:[#allocation3 + $0xd5c] sm:$0xf0]  ;;  %7051 = vmatpush.bf16.msrb.mxu1 %v10426_v37  ;;  %7065 = vmatpush.bf16.msrb.mxu2 %v10430_v32  ;;  %v10359_v32 = vld [vmem:[#allocation3 + $0xd20] sm:$0xf0] }
 0xab7   :  { %v11692_v59 = vpop.eup %11691  ;;  %v6484_v51 = vmul.f32 %v6472_v16, %v15322_v5  ;;  %v6486_v9 = vmul.f32 %v11690_v33, %v6464_v17  ;;  %v10390_v0 = vor.u32 %v11344_v53, %v10389_v50  ;;  %7079 = vmatpush.bf16.msrb.mxu3 %v10434_v28  ;;  %v10398_v33 = vor.u32 %v11345_v34, %v10397_v27  ;;  %v11341_v17 = vld [vmem:[#allocation3 + $0xd4c] sm:$0xf]  ;;  %v11336_v37 = vld [vmem:[#allocation3 + $0xd1c] sm:$0xf0]  ;;  %v10365_v50 = vld [vmem:[#allocation3 + $0xd08] sm:$0xf] }
 0xab8   :  { %11695 = vtanh.f32 %v6456_v45  ;;  %v6477_v19 = vmul.f32 0.5, %v6457_v10  ;;  %v11694_v49 = vpop.eup %11693  ;;  %v6463_v3 = vmul.f32 0.5, %v11692_v59  ;;  %v11340_v45 = vld [vmem:[#allocation3 + $0xd44] sm:$0xf]  ;;  %v10358_v5 = vor.u32 %v11336_v37, %v10357_v23  ;;  %v15324_v53 = vld [vmem:[#allocation40_spill] sm:$0xff] }
 0xab9   :  { %11697 = vtanh.f32 %v6476_v55  ;;  %v10391_v10 = vld [vmem:[#allocation3 + $0xd60] sm:$0xf0]  ;;  %v6471_v54 = vmul.f32 0.5, %v11694_v49  ;;  %v14032_v22 = vadd.f32 %v6486_v9, %v6484_v51  ;;  %7038 = vmatpush.bf16.msrb.mxu0 %v10390_v0  ;;  %v10402_v55 = vor.u32 %v11341_v17, %v10399_v1  ;;  %v10367_v51 = vld [vmem:[#allocation3 + $0xd28] sm:$0xf0] }
 0xaba   :  { %11699 = vtanh.f32 %v6477_v19  ;;  %v10394_v6 = vor.u32 %v11340_v45, %v10391_v10  ;;  %v6465_v25 = vadd.f32 0.5, %v6463_v3  ;;  %v11332_v19 = vld [vmem:[#allocation3 + $0xd04] sm:$0xf]  ;;  %7066 = vmatpush.bf16.msrb.mxu2 %v10398_v33  ;;  %v11337_v45 = vld [vmem:[#allocation3 + $0xd24] sm:$0xf0] }
 0xabb   :  { %15323 = vst [vmem:[#allocation32_spill] sm:$0xff] %v14032_v22  ;;  %v6473_v16 = vadd.f32 0.5, %v6471_v54  ;;  %v10362_v28 = vor.u32 %v11332_v19, %v10359_v32  ;;  %v11333_v10 = vld [vmem:[#allocation3 + $0xd0c] sm:$0xf]  ;;  %7080 = vmatpush.bf16.msrb.mxu3 %v10402_v55  ;;  %v10366_v0 = vor.u32 %v11337_v45, %v10365_v50  ;;  %v10325_v27 = vld [vmem:[#allocation3 + $0xcc0] sm:$0xf]  ;;  %11701 = vtanh.f32 %v14032_v22 }
 0xabc   :  { %7052 = vmatpush.bf16.msrb.mxu1 %v10394_v6  ;;  %v10370_v54 = vor.u32 %v11333_v10, %v10367_v51  ;;  %v11328_v34 = vld [vmem:[#allocation3 + $0xcdc] sm:$0xf0]  ;;  %v11324_v17 = vld [vmem:[#allocation3 + $0xcc4] sm:$0xf]  ;;  %v10333_v33 = vld [vmem:[#allocation3 + $0xcc8] sm:$0xf] }
 0xabd   :  { %v6485_v49 = vmul.f32 %v6473_v16, %v15324_v53  ;;  %7039 = vmatpush.bf16.msrb.mxu0 %v10358_v5  ;;  %v10326_v16 = vor.u32 %v11328_v34, %v10325_v27  ;;  %v11329_v37 = vld [vmem:[#allocation3 + $0xce4] sm:$0xf0]  ;;  %v10335_v19 = vld [vmem:[#allocation3 + $0xce8] sm:$0xf0]  ;;  %v10295_v34 = vld [vmem:[#allocation3 + $0xca0] sm:$0xf0] }
 0xabe   :  { %v11696_v59 = vpop.eup %11695  ;;  %7067 = vmatpush.bf16.msrb.mxu2 %v10366_v0  ;;  %v10334_v55 = vor.u32 %v11329_v37, %v10333_v33  ;;  %v11320_v0 = vld [vmem:[#allocation3 + $0xc9c] sm:$0xf0]  ;;  %v11317_v33 = vld [vmem:[#allocation3 + $0xc8c] sm:$0xf] }
 0xabf   :  { %v6487_v3 = vmul.f32 %v11696_v59, %v6465_v25  ;;  %v11698_v9 = vpop.eup %11697  ;;  %v10327_v25 = vld [vmem:[#allocation3 + $0xce0] sm:$0xf0]  ;;  %v11325_v59 = vld [vmem:[#allocation3 + $0xccc] sm:$0xf]  ;;  %7081 = vmatpush.bf16.msrb.mxu3 %v10370_v54 }
 0xac0   :  { %v11700_v6 = vpop.eup %11699  ;;  %7053 = vmatpush.bf16.msrb.mxu1 %v10362_v28  ;;  %v10330_v23 = vor.u32 %v11324_v17, %v10327_v25  ;;  %v6480_v32 = vmul.f32 0.5, %v11698_v9  ;;  %v10338_v53 = vor.u32 %v11325_v59, %v10335_v19  ;;  %v10293_v9 = vld [vmem:[#allocation3 + $0xc80] sm:$0xf]  ;;  %v11316_v54 = vld [vmem:[#allocation3 + $0xc84] sm:$0xf] }
 0xac1   :  { %v14036_v1 = vadd.f32 %v6487_v3, %v6485_v49  ;;  %v6481_v50 = vmul.f32 0.5, %v11700_v6  ;;  %7040 = vmatpush.bf16.msrb.mxu0 %v10326_v16  ;;  %v11702_v49 = vpop.eup %11701  ;;  %v10294_v27 = vor.u32 %v11320_v0, %v10293_v9  ;;  %v10301_v17 = vld [vmem:[#allocation3 + $0xc88] sm:$0xf]  ;;  %v10298_v16 = vor.u32 %v11316_v54, %v10295_v34  ;;  %v10261_v59 = vld [vmem:[#allocation3 + $0xc40] sm:$0xf] }
 0xac2   :  { %7068 = vmatpush.bf16.msrb.mxu2 %v10334_v55  ;;  %v6482_v5 = vadd.f32 0.5, %v6480_v32  ;;  %v11321_v6 = vld [vmem:[#allocation3 + $0xca4] sm:$0xf0]  ;;  %v11312_v19 = vld [vmem:[#allocation3 + $0xc5c] sm:$0xf0] }
 0xac3   :  { %15325 = vst [vmem:[#allocation44_spill] sm:$0xff] %v14036_v1  ;;  %11703 = vtanh.f32 %v14036_v1  ;;  %v6483_v3 = vadd.f32 0.5, %v6481_v50  ;;  %7082 = vmatpush.bf16.msrb.mxu3 %v10338_v53  ;;  %v10302_v25 = vor.u32 %v11321_v6, %v10301_v17  ;;  %v11308_v55 = vld [vmem:[#allocation3 + $0xc44] sm:$0xf]  ;;  %v10262_v32 = vor.u32 %v11312_v19, %v10261_v59  ;;  %v10269_v53 = vld [vmem:[#allocation3 + $0xc48] sm:$0xf] }
 0xac4   :  { %7054 = vmatpush.bf16.msrb.mxu1 %v10330_v23  ;;  %v6492_v45 = vmul.f32 %v11702_v49, %v6482_v5  ;;  %v10303_v23 = vld [vmem:[#allocation3 + $0xca8] sm:$0xf0]  ;;  %v10263_v50 = vld [vmem:[#allocation3 + $0xc60] sm:$0xf0]  ;;  %v11313_v49 = vld [vmem:[#allocation3 + $0xc64] sm:$0xf0] }
 0xac5   :  { %7041 = vmatpush.bf16.msrb.mxu0 %v10294_v27  ;;  %v10306_v37 = vor.u32 %v11317_v33, %v10303_v23  ;;  %v10266_v5 = vor.u32 %v11308_v55, %v10263_v50  ;;  %v10229_v9 = vld [vmem:[#allocation3 + $0xc00] sm:$0xf]  ;;  %v11300_v54 = vld [vmem:[#allocation3 + $0xc04] sm:$0xf]  ;;  %v10237_v17 = vld [vmem:[#allocation3 + $0xc08] sm:$0xf] }
 0xac6   :  { %7069 = vmatpush.bf16.msrb.mxu2 %v10302_v25  ;;  %v11304_v0 = vld [vmem:[#allocation3 + $0xc1c] sm:$0xf0]  ;;  %v10231_v34 = vld [vmem:[#allocation3 + $0xc20] sm:$0xf0]  ;;  %v11305_v6 = vld [vmem:[#allocation3 + $0xc24] sm:$0xf0] }
 0xac7   :  { %7083 = vmatpush.bf16.msrb.mxu3 %v10306_v37  ;;  %v10230_v27 = vor.u32 %v11304_v0, %v10229_v9  ;;  %v10238_v25 = vor.u32 %v11305_v6, %v10237_v17  ;;  %v11301_v33 = vld [vmem:[#allocation3 + $0xc0c] sm:$0xf]  ;;  %v10469_v37 = vld [vmem:[#allocation3 + $0xdd0] sm:$0xf]  ;;  %v11358_v55 = vld [vmem:[#allocation3 + $0xdd4] sm:$0xf] }
 0xac8   :  { %7055 = vmatpush.bf16.msrb.mxu1 %v10298_v16  ;;  %v10234_v16 = vor.u32 %v11300_v54, %v10231_v34  ;;  %v10239_v23 = vld [vmem:[#allocation3 + $0xc28] sm:$0xf0]  ;;  %v11362_v19 = vld [vmem:[#allocation3 + $0xdec] sm:$0xf0]  ;;  %v10479_v9 = vld [vmem:[#allocation3 + $0xdf8] sm:$0xf0] }
 0xac9   :  { %v11704_v28 = vpop.eup %11703  ;;  %7042 = vmatpush.bf16.msrb.mxu0 %v10262_v32  ;;  %v10242_v59 = vor.u32 %v11301_v33, %v10239_v23  ;;  %v10471_v32 = vld [vmem:[#allocation3 + $0xdf0] sm:$0xf0]  ;;  %v10470_v50 = vor.u32 %v11362_v19, %v10469_v37  ;;  %v10437_v0 = vld [vmem:[#allocation3 + $0xd90] sm:$0xf]  ;;  %v11355_v33 = vld [vmem:[#allocation3 + $0xdb4] sm:$0xf0] }
 0xaca   :  { %v6493_v10 = vmul.f32 %v11704_v28, %v6483_v3  ;;  %v10270_v3 = vor.u32 %v11313_v49, %v10269_v53  ;;  %v11309_v28 = vld [vmem:[#allocation3 + $0xc4c] sm:$0xf]  ;;  %v10474_v53 = vor.u32 %v11358_v55, %v10471_v32  ;;  %v10477_v49 = vld [vmem:[#allocation3 + $0xdd8] sm:$0xf]  ;;  %v11354_v54 = vld [vmem:[#allocation3 + $0xdac] sm:$0xf0] }
 0xacb   :  { %v10438_v34 = vor.u32 %v11354_v54, %v10437_v0  ;;  %v11350_v17 = vld [vmem:[#allocation3 + $0xd94] sm:$0xf]  ;;  %v11351_v23 = vld [vmem:[#allocation3 + $0xd9c] sm:$0xf]  ;;  %v11346_v32 = vld [vmem:[#allocation3 + $0xd6c] sm:$0xf0] }
 0xacc   :  { %v14039_v51 = vpack.c.bf16 %v6493_v10, %v6492_v45  ;;  %v10271_v45 = vld [vmem:[#allocation3 + $0xc68] sm:$0xf0]  ;;  %7056 = vmatpush.bf16.msrb.mxu1 %v10266_v5  ;;  %7070 = vmatpush.bf16.msrb.mxu2 %v10270_v3  ;;  %v11363_v5 = vld [vmem:[#allocation3 + $0xdf4] sm:$0xf0]  ;;  %v11359_v3 = vld [vmem:[#allocation3 + $0xddc] sm:$0xf] }
 0xacd   :  { %v10274_v10 = vor.u32 %v11309_v28, %v10271_v45  ;;  %7043 = vmatpush.bf16.msrb.mxu0 %v10230_v27  ;;  %v14045_v28 = vpop.f32.mrf.mxu0  ;;  %v14047_v45 = vpop.f32.mrf.mxu1  ;;  %v10482_v27 = vor.u32 %v11359_v3, %v10479_v9  ;;  %v10439_v6 = vld [vmem:[#allocation3 + $0xdb0] sm:$0xf0]  ;;  %v10447_v37 = vld [vmem:[#allocation3 + $0xdb8] sm:$0xf0]  ;;  %v11347_v3 = vld [vmem:[#allocation3 + $0xd74] sm:$0xf0] }
 0xace   :  { %15326 = vst [vmem:[#allocation77_spill] sm:$0xff] %v14039_v51  ;;  %6559 = vmatmul.bf16.vlgmr.msra.gmra.mxu0 %v14039_v51  ;;  %6573 = vmatmul.bf16.vlgmr.msra.gmra.mxu1 %v14039_v51  ;;  %v10450_v55 = vor.u32 %v11351_v23, %v10447_v37  ;;  %v10415_v54 = vld [vmem:[#allocation3 + $0xd78] sm:$0xf0]  ;;  %v11334_v23 = vld [vmem:[#allocation3 + $0xd14] sm:$0xf] }
 0xacf   :  { %6587 = vmatmul.bf16.vlgmr.msra.gmra.mxu2 %v14039_v51  ;;  %6601 = vmatmul.bf16.vlgmr.msra.gmra.mxu3 %v14039_v51  ;;  %v10381_v37 = vld [vmem:[#allocation3 + $0xd18] sm:$0xf]  ;;  %v11326_v1 = vld [vmem:[#allocation3 + $0xcd4] sm:$0xf] }
 0xad0   :  { %7084 = vmatpush.bf16.msrb.mxu3 %v10274_v10  ;;  %7057 = vmatpush.bf16.msrb.mxu1 %v10234_v16  ;;  %v10478_v10 = vor.u32 %v11363_v5, %v10477_v49  ;;  %v10445_v16 = vld [vmem:[#allocation3 + $0xd98] sm:$0xf]  ;;  %v11342_v49 = vld [vmem:[#allocation3 + $0xd54] sm:$0xf] }
 0xad1   :  { %7071 = vmatpush.bf16.msrb.mxu2 %v10238_v25  ;;  %7092 = vmatpush.bf16.msra.mxu0 %v10470_v50  ;;  %v10442_v25 = vor.u32 %v11350_v17, %v10439_v6  ;;  %v10446_v19 = vor.u32 %v11355_v33, %v10445_v16  ;;  %v10413_v5 = vld [vmem:[#allocation3 + $0xd58] sm:$0xf]  ;;  %v14049_v17 = vpop.f32.mrf.mxu2  ;;  %v14051_v6 = vpop.f32.mrf.mxu3  ;;  %v10373_v16 = vld [vmem:[#allocation3 + $0xd10] sm:$0xf] }
 0xad2   :  { %v10414_v0 = vor.u32 %v11347_v3, %v10413_v5  ;;  %v11338_v33 = vld [vmem:[#allocation3 + $0xd2c] sm:$0xf0]  ;;  %v11335_v5 = vld [vmem:[#allocation3 + $0xd1c] sm:$0xf] }
 0xad3   :  { %v10383_v3 = vld [vmem:[#allocation3 + $0xd38] sm:$0xf0] }
 0xad4   :  { %7085 = vmatpush.bf16.msrb.mxu3 %v10242_v59  ;;  %7106 = vmatpush.bf16.msra.mxu1 %v10474_v53  ;;  %v10405_v59 = vld [vmem:[#allocation3 + $0xd50] sm:$0xf]  ;;  %v10407_v53 = vld [vmem:[#allocation3 + $0xd70] sm:$0xf0] }
 0xad5   :  { %7120 = vmatpush.bf16.msra.mxu2 %v10478_v10  ;;  %7093 = vmatpush.bf16.msra.mxu0 %v10438_v34  ;;  %v10406_v50 = vor.u32 %v11346_v32, %v10405_v59  ;;  %v10410_v9 = vor.u32 %v11342_v49, %v10407_v53  ;;  %v11343_v10 = vld [vmem:[#allocation3 + $0xd5c] sm:$0xf]  ;;  %v10374_v34 = vor.u32 %v11338_v33, %v10373_v16  ;;  %v11339_v59 = vld [vmem:[#allocation3 + $0xd34] sm:$0xf0]  ;;  %v14055_v32 = vpop.f32.mrf.mxu1 }
 0xad6   :  { %v10382_v53 = vor.u32 %v11339_v59, %v10381_v37  ;;  %v10349_v16 = vld [vmem:[#allocation3 + $0xcd8] sm:$0xf]  ;;  %v11322_v37 = vld [vmem:[#allocation3 + $0xcac] sm:$0xf0] }
 0xad7   :  { %v11331_v33 = vld [vmem:[#allocation3 + $0xcf4] sm:$0xf0] }
 0xad8   :  { %7134 = vmatpush.bf16.msra.mxu3 %v10482_v27  ;;  %7107 = vmatpush.bf16.msra.mxu1 %v10442_v25  ;;  %v10418_v27 = vor.u32 %v11343_v10, %v10415_v54  ;;  %v10375_v25 = vld [vmem:[#allocation3 + $0xd30] sm:$0xf0]  ;;  %v10341_v10 = vld [vmem:[#allocation3 + $0xcd0] sm:$0xf]  ;;  %v10350_v51 = vor.u32 %v11331_v33, %v10349_v16 }
 0xad9   :  { %7121 = vmatpush.bf16.msra.mxu2 %v10446_v19  ;;  %7094 = vmatpush.bf16.msra.mxu0 %v10406_v50  ;;  %v14053_v19 = vpop.f32.mrf.mxu0  ;;  %v10378_v49 = vor.u32 %v11334_v23, %v10375_v25  ;;  %v11330_v54 = vld [vmem:[#allocation3 + $0xcec] sm:$0xf0]  ;;  %v14057_v59 = vpop.f32.mrf.mxu2 }
 0xada   :  { %v10342_v50 = vor.u32 %v11330_v54, %v10341_v10  ;;  %v10309_v25 = vld [vmem:[#allocation3 + $0xc90] sm:$0xf]  ;;  %v11323_v10 = vld [vmem:[#allocation3 + $0xcb4] sm:$0xf0] }
 0xadc   :  { %7135 = vmatpush.bf16.msra.mxu3 %v10450_v55  ;;  %7108 = vmatpush.bf16.msra.mxu1 %v10410_v9  ;;  %v10386_v55 = vor.u32 %v11335_v5, %v10383_v3  ;;  %v10343_v9 = vld [vmem:[#allocation3 + $0xcf0] sm:$0xf0]  ;;  %v14059_v5 = vpop.f32.mrf.mxu3  ;;  %v10317_v3 = vld [vmem:[#allocation3 + $0xc98] sm:$0xf] }
 0xadd   :  { %7122 = vmatpush.bf16.msra.mxu2 %v10414_v0  ;;  %7095 = vmatpush.bf16.msra.mxu0 %v10374_v34  ;;  %v10346_v22 = vor.u32 %v11326_v1, %v10343_v9  ;;  %v10351_v0 = vld [vmem:[#allocation3 + $0xcf8] sm:$0xf0]  ;;  %v10310_v34 = vor.u32 %v11322_v37, %v10309_v25  ;;  %v10318_v9 = vor.u32 %v11323_v10, %v10317_v3  ;;  %v11315_v3 = vld [vmem:[#allocation3 + $0xc74] sm:$0xf0] }
 0xade   :  { %v10354_v23 = vor.u32 %v11327_v44, %v10351_v0  ;;  %v10319_v44 = vld [vmem:[#allocation3 + $0xcb8] sm:$0xf0] }
 0xae0   :  { %7136 = vmatpush.bf16.msra.mxu3 %v10418_v27  ;;  %7109 = vmatpush.bf16.msra.mxu1 %v10378_v49  ;;  %v11318_v27 = vld [vmem:[#allocation3 + $0xc94] sm:$0xf] }
 0xae1   :  { %7123 = vmatpush.bf16.msra.mxu2 %v10382_v53  ;;  %7096 = vmatpush.bf16.msra.mxu0 %v10342_v50  ;;  %v10311_v49 = vld [vmem:[#allocation3 + $0xcb0] sm:$0xf0]  ;;  %v11314_v50 = vld [vmem:[#allocation3 + $0xc6c] sm:$0xf0] }
 0xae2   :  { %v10314_v54 = vor.u32 %v11318_v27, %v10311_v49  ;;  %v10279_v27 = vld [vmem:[#allocation3 + $0xc70] sm:$0xf0]  ;;  %v10285_v49 = vld [vmem:[#allocation3 + $0xc58] sm:$0xf] }
 0xae4   :  { %7137 = vmatpush.bf16.msra.mxu3 %v10386_v55  ;;  %7110 = vmatpush.bf16.msra.mxu1 %v10346_v22  ;;  %v11319_v55 = vld [vmem:[#allocation3 + $0xc9c] sm:$0xf]  ;;  %v11310_v22 = vld [vmem:[#allocation3 + $0xc54] sm:$0xf] }
 0xae5   :  { %7124 = vmatpush.bf16.msra.mxu2 %v10350_v51  ;;  %v10322_v0 = vor.u32 %v11319_v55, %v10319_v44  ;;  %7097 = vmatpush.bf16.msra.mxu0 %v10310_v34  ;;  %v10278_v51 = vor.u32 %v11314_v50, %v10277_v15  ;;  %v10282_v10 = vor.u32 %v11310_v22, %v10279_v27  ;;  %v10245_v44 = vld [vmem:[#allocation3 + $0xc10] sm:$0xf]  ;;  %v10253_v50 = vld [vmem:[#allocation3 + $0xc18] sm:$0xf] }
 0xae6   :  { %v10246_v15 = vor.u32 %v11306_v24, %v10245_v44 }
 0xae8   :  { %7138 = vmatpush.bf16.msra.mxu3 %v10354_v23  ;;  %7111 = vmatpush.bf16.msra.mxu1 %v10314_v54  ;;  %v10247_v54 = vld [vmem:[#allocation3 + $0xc30] sm:$0xf0] }
 0xae9   :  { %7125 = vmatpush.bf16.msra.mxu2 %v10318_v9  ;;  %7098 = vmatpush.bf16.msra.mxu0 %v10278_v51  ;;  %v11307_v9 = vld [vmem:[#allocation3 + $0xc34] sm:$0xf0] }
 0xaea   :  { %v10254_v51 = vor.u32 %v11307_v9, %v10253_v50 }
 0xaec   :  { %7139 = vmatpush.bf16.msra.mxu3 %v10322_v0  ;;  %7112 = vmatpush.bf16.msra.mxu1 %v10282_v10 }
 0xaed   :  { %7099 = vmatpush.bf16.msra.mxu0 %v10246_v15 }
 0xb4b   :  { %v6560_v53 = vpop.f32.mrf.mxu0  ;;  %v6574_v1 = vpop.f32.mrf.mxu1 }
 0xb4c   :  { %v6561_v16 = vadd.f32 %v6560_v53, %v14045_v28  ;;  %v6575_v33 = vadd.f32 %v6574_v1, %v14047_v45  ;;  %v10286_v28 = vor.u32 %v11315_v3, %v10285_v49  ;;  %v11311_v53 = vld [vmem:[#allocation3 + $0xc5c] sm:$0xf] }
 0xb4d   :  { %v10287_v45 = vld [vmem:[#allocation3 + $0xc78] sm:$0xf0] }
 0xb4e   :  { %v6607_v25 = vadd.f32 %v6561_v16, %v14786_v26  ;;  %v6608_v37 = vadd.f32 %v6575_v33, %v14787_v21  ;;  %v10290_v55 = vor.u32 %v11311_v53, %v10287_v45  ;;  %v11302_v16 = vld [vmem:[#allocation3 + $0xc14] sm:$0xf]  ;;  %7126 = vmatpush.bf16.msra.mxu2 %v10286_v28  ;;  %v10255_v49 = vld [vmem:[#allocation3 + $0xc38] sm:$0xf0] }
 0xb4f   :  { %v10250_v0 = vor.u32 %v11302_v16, %v10247_v54 }
 0xb50   :  { %v6615_v23 = vmul.f32 0.5, %v6607_v25  ;;  %v6623_v1 = vmul.f32 0.5, %v6608_v37  ;;  %v11303_v37 = vld [vmem:[#allocation3 + $0xc1c] sm:$0xf]  ;;  %7140 = vmatpush.bf16.msra.mxu3 %v10290_v55 }
 0xb51   :  { %v10258_v10 = vor.u32 %v11303_v37, %v10255_v49  ;;  %7113 = vmatpush.bf16.msra.mxu1 %v10250_v0 }
 0xb52   :  { %11705 = vtanh.f32 %v6615_v23  ;;  %v6588_v33 = vpop.f32.mrf.mxu2  ;;  %v6602_v34 = vpop.f32.mrf.mxu3  ;;  %7127 = vmatpush.bf16.msra.mxu2 %v10254_v51 }
 0xb53   :  { %11707 = vtanh.f32 %v6623_v1  ;;  %v6589_v22 = vadd.f32 %v6588_v33, %v14049_v17  ;;  %v6562_v27 = vpop.f32.mrf.mxu0  ;;  %v6576_v25 = vpop.f32.mrf.mxu1  ;;  %v6603_v45 = vadd.f32 %v6602_v34, %v14051_v6 }
 0xb54   :  { %v6563_v3 = vadd.f32 %v6562_v27, %v14053_v19  ;;  %v6577_v53 = vadd.f32 %v6576_v25, %v14055_v32  ;;  %7141 = vmatpush.bf16.msra.mxu3 %v10258_v10 }
 0xb55   :  { %v6609_v24 = vadd.f32 %v6589_v22, %v14788_v8  ;;  %v6610_v44 = vadd.f32 %v6603_v45, %v14789_v12 }
 0xb56   :  { %v6611_v23 = vadd.f32 %v6563_v3, %v14786_v26  ;;  %v6612_v17 = vadd.f32 %v6577_v53, %v14787_v21 }
 0xb57   :  { %11709 = vtanh.f32 %v6609_v24  ;;  %v6633_v22 = vmul.f32 0.5, %v6610_v44 }
 0xb58   :  { %v11706_v28 = vpop.eup %11705  ;;  %v6616_v1 = vmul.f32 0.5, %v6611_v23  ;;  %v6624_v19 = vmul.f32 0.5, %v6612_v17 }
 0xb59   :  { %v11708_v32 = vpop.eup %11707  ;;  %v6619_v55 = vmul.f32 0.5, %v11706_v28 }
 0xb5a   :  { %v6627_v16 = vmul.f32 0.5, %v11708_v32  ;;  %11711 = vtanh.f32 %v6616_v1  ;;  %v6590_v33 = vpop.f32.mrf.mxu2  ;;  %v6604_v6 = vpop.f32.mrf.mxu3 }
 0xb5b   :  { %11713 = vtanh.f32 %v6624_v19  ;;  %v6591_v34 = vadd.f32 %v6590_v33, %v14057_v59  ;;  %v6605_v15 = vadd.f32 %v6604_v6, %v14059_v5  ;;  %v6621_v54 = vadd.f32 0.5, %v6619_v55 }
 0xb5c   :  { %v6629_v50 = vadd.f32 0.5, %v6627_v16 }
 0xb5d   :  { %v11710_v9 = vpop.eup %11709  ;;  %v6613_v27 = vadd.f32 %v6591_v34, %v14788_v8  ;;  %v6614_v25 = vadd.f32 %v6605_v15, %v14789_v12 }
 0xb5e   :  { %v6641_v49 = vmul.f32 %v6629_v50, %v13862_v31  ;;  %v6643_v3 = vmul.f32 %v11710_v9, %v6621_v54  ;;  %v15356_v54 = vld [vmem:[#allocation109_spill] sm:$0xff]  ;;  %v15357_v50 = vld [vmem:[#allocation110_spill] sm:$0xff]  ;;  %v15358_v9 = vld [vmem:[#allocation111_spill] sm:$0xff] }
 0xb5f   :  { %11715 = vtanh.f32 %v6613_v27  ;;  %v6634_v0 = vmul.f32 0.5, %v6614_v25  ;;  %v15360_v27 = vld [vmem:[#allocation113_spill] sm:$0xff]  ;;  %v15361_v25 = vld [vmem:[#allocation114_spill] sm:$0xff] }
 0xb60   :  { %v11712_v37 = vpop.eup %11711  ;;  %11717 = vtanh.f32 %v6633_v22  ;;  %v14078_v10 = vadd.f32 %v6643_v3, %v6641_v49  ;;  %v15359_v22 = vld [vmem:[#allocation112_spill] sm:$0xff]  ;;  %v15364_v49 = vld [vmem:[#allocation118_spill] sm:$0xff]  ;;  %v15365_v3 = vld [vmem:[#allocation119_spill] sm:$0xff] }
 0xb61   :  { %v11714_v53 = vpop.eup %11713  ;;  %v6620_v51 = vmul.f32 0.5, %v11712_v37  ;;  %11719 = vtanh.f32 %v6634_v0  ;;  %v15362_v0 = vld [vmem:[#allocation115_spill] sm:$0xff]  ;;  %v15363_v37 = vld [vmem:[#allocation116_spill] sm:$0xff] }
 0xb62   :  { %v6628_v59 = vmul.f32 0.5, %v11714_v53  ;;  %11721 = vtanh.f32 %v14078_v10  ;;  %v15366_v53 = vld [vmem:[#allocation121_spill] sm:$0xff] }
 0xb63   :  { %v6622_v5 = vadd.f32 0.5, %v6620_v51  ;;  %v15367_v51 = vld [vmem:[#allocation122_spill] sm:$0xff] }
 0xb64   :  { %v6630_v24 = vadd.f32 0.5, %v6628_v59  ;;  %v15368_v59 = vld [vmem:[#allocation123_spill] sm:$0xff] }
 0xb65   :  { %v11716_v45 = vpop.eup %11715 }
 0xb66   :  { %v6642_v23 = vmul.f32 %v6630_v24, %v13866_v20  ;;  %v6644_v17 = vmul.f32 %v11716_v45, %v6622_v5  ;;  %v11718_v28 = vpop.eup %11717  ;;  %v15355_v20 = vld [vmem:[#allocation106_spill] sm:$0xff]  ;;  %v15369_v5 = vld [vmem:[#allocation124_spill] sm:$0xff]  ;;  %v15370_v24 = vld [vmem:[#allocation125_spill] sm:$0xff] }
 0xb67   :  { %v11720_v1 = vpop.eup %11719  ;;  %v6637_v31 = vmul.f32 0.5, %v11718_v28  ;;  %v15371_v45 = vld [vmem:[#allocation126_spill] sm:$0xff] }
 0xb68   :  { %v14082_v19 = vadd.f32 %v6644_v17, %v6642_v23  ;;  %v6638_v32 = vmul.f32 0.5, %v11720_v1  ;;  %v11722_v55 = vpop.eup %11721  ;;  %v15372_v23 = vld [vmem:[#allocation127_spill] sm:$0xff]  ;;  %v15373_v17 = vld [vmem:[#allocation129_spill] sm:$0xff]  ;;  %v15374_v28 = vld [vmem:[#allocation130_spill] sm:$0xff] }
 0xb69   :  { %v6639_v44 = vadd.f32 0.5, %v6637_v31  ;;  %v15375_v1 = vld [vmem:[#allocation132_spill] sm:$0xff]  ;;  %v15376_v31 = vld [vmem:[#allocation133_spill] sm:$0xff] }
 0xb6a   :  { %11723 = vtanh.f32 %v14082_v19  ;;  %v6640_v16 = vadd.f32 0.5, %v6638_v32  ;;  %v15377_v32 = vld [vmem:[#allocation134_spill] sm:$0xff] }
 0xb6b   :  { %v6649_v6 = vmul.f32 %v11722_v55, %v6639_v44  ;;  %v15378_v55 = vld [vmem:[#allocation135_spill] sm:$0xff]  ;;  %v15379_v44 = vld [vmem:[#allocation136_spill] sm:$0xff] }
 0xb70   :  { %v11724_v33 = vpop.eup %11723 }
 0xb71   :  { %v6650_v34 = vmul.f32 %v11724_v33, %v6640_v16  ;;  %v15380_v16 = vld [vmem:[#allocation137_spill] sm:$0xff]  ;;  %v15381_v33 = vld [vmem:[#allocation139_spill] sm:$0xff] }
 0xb73   :  { %v14085_v15 = vpack.c.bf16 %v6650_v34, %v6649_v6  ;;  %v15382_v6 = vld [vmem:[#allocation140_spill] sm:$0xff]  ;;  %v15383_v34 = vld [vmem:[#allocation142_spill] sm:$0xff] }
 0xb75   :  { %7044 = vmatmul.bf16.vlgmr.msrb.gmra.mxu0 %v14085_v15  ;;  %7058 = vmatmul.bf16.vlgmr.msrb.gmra.mxu1 %v14085_v15 }
 0xb76   :  { %7072 = vmatmul.bf16.vlgmr.msrb.gmra.mxu2 %v14085_v15  ;;  %7086 = vmatmul.bf16.vlgmr.msrb.gmra.mxu3 %v14085_v15 }
 0xb77   :  { %7172 = vmatpush.bf16.msrb.mxu0 %v12188_v36  ;;  %7186 = vmatpush.bf16.msrb.mxu1 %v12190_v40  ;;  %v15327_v36 = vld [vmem:[#allocation49_spill] sm:$0xff]  ;;  %v15328_v40 = vld [vmem:[#allocation50_spill] sm:$0xff] }
 0xb78   :  { %7200 = vmatpush.bf16.msrb.mxu2 %v12192_v43  ;;  %7214 = vmatpush.bf16.msrb.mxu3 %v12197_v52  ;;  %v15329_v43 = vld [vmem:[#allocation51_spill] sm:$0xff]  ;;  %v15330_v52 = vld [vmem:[#allocation54_spill] sm:$0xff] }
 0xb7b   :  { %7173 = vmatpush.bf16.msrb.mxu0 %v12208_v58  ;;  %7187 = vmatpush.bf16.msrb.mxu1 %v12210_v13  ;;  %v15331_v58 = vld [vmem:[#allocation79_spill] sm:$0xff]  ;;  %v15332_v13 = vld [vmem:[#allocation80_spill] sm:$0xff] }
 0xb7c   :  { %7201 = vmatpush.bf16.msrb.mxu2 %v12212_v14  ;;  %7215 = vmatpush.bf16.msrb.mxu3 %v12219_v18  ;;  %v15333_v14 = vld [vmem:[#allocation81_spill] sm:$0xff]  ;;  %v15334_v18 = vld [vmem:[#allocation82_spill] sm:$0xff] }
 0xb7f   :  { %7174 = vmatpush.bf16.msrb.mxu0 %v12235_v30  ;;  %7188 = vmatpush.bf16.msrb.mxu1 %v12237_v38  ;;  %v15335_v30 = vld [vmem:[#allocation77_spill] sm:$0xff]  ;;  %v15336_v38 = vld [vmem:[#allocation83_spill] sm:$0xff] }
 0xb80   :  { %7202 = vmatpush.bf16.msrb.mxu2 %v12239_v39  ;;  %7216 = vmatpush.bf16.msrb.mxu3 %v12250_v56  ;;  %v15337_v39 = vld [vmem:[#allocation84_spill] sm:$0xff]  ;;  %v15338_v56 = vld [vmem:[#allocation85_spill] sm:$0xff] }
 0xb83   :  { %7175 = vmatpush.bf16.msrb.mxu0 %v12263_v29  ;;  %7189 = vmatpush.bf16.msrb.mxu1 %v12265_v2  ;;  %v15339_v29 = vld [vmem:[#allocation86_spill] sm:$0xff]  ;;  %v15340_v2 = vld [vmem:[#allocation89_spill] sm:$0xff] }
 0xb84   :  { %7203 = vmatpush.bf16.msrb.mxu2 %v12267_v46  ;;  %7217 = vmatpush.bf16.msrb.mxu3 %v12278_v62  ;;  %v15341_v46 = vld [vmem:[#allocation90_spill] sm:$0xff]  ;;  %v15342_v62 = vld [vmem:[#allocation91_spill] sm:$0xff] }
 0xb85   :  { %7100 = vmatmul.bf16.vlgmr.msra.gmra.mxu0 %v14085_v15  ;;  %7114 = vmatmul.bf16.vlgmr.msra.gmra.mxu1 %v14085_v15 }
 0xb86   :  { %7128 = vmatmul.bf16.vlgmr.msra.gmra.mxu2 %v14085_v15  ;;  %7142 = vmatmul.bf16.vlgmr.msra.gmra.mxu3 %v14085_v15 }
 0xb87   :  { %7176 = vmatpush.bf16.msrb.mxu0 %v12291_v7  ;;  %7190 = vmatpush.bf16.msrb.mxu1 %v12293_v61  ;;  %v15343_v7 = vld [vmem:[#allocation92_spill] sm:$0xff]  ;;  %v15344_v61 = vld [vmem:[#allocation93_spill] sm:$0xff] }
 0xb88   :  { %7204 = vmatpush.bf16.msrb.mxu2 %v12295_v63  ;;  %7218 = vmatpush.bf16.msrb.mxu3 %v12306_v47  ;;  %v15345_v63 = vld [vmem:[#allocation94_spill] sm:$0xff]  ;;  %v15346_v47 = vld [vmem:[#allocation95_spill] sm:$0xff] }
 0xb8b   :  { %7177 = vmatpush.bf16.msrb.mxu0 %v12319_v35  ;;  %7191 = vmatpush.bf16.msrb.mxu1 %v12321_v42  ;;  %v15347_v35 = vld [vmem:[#allocation96_spill] sm:$0xff]  ;;  %v15348_v42 = vld [vmem:[#allocation99_spill] sm:$0xff] }
 0xb8c   :  { %7205 = vmatpush.bf16.msrb.mxu2 %v12323_v11  ;;  %7219 = vmatpush.bf16.msrb.mxu3 %v12334_v48  ;;  %v15349_v11 = vld [vmem:[#allocation100_spill] sm:$0xff]  ;;  %v15350_v48 = vld [vmem:[#allocation101_spill] sm:$0xff] }
 0xb8f   :  { %7178 = vmatpush.bf16.msrb.mxu0 %v12347_v60  ;;  %7192 = vmatpush.bf16.msrb.mxu1 %v12349_v41  ;;  %v15351_v60 = vld [vmem:[#allocation102_spill] sm:$0xff]  ;;  %v15352_v41 = vld [vmem:[#allocation103_spill] sm:$0xff] }
 0xb90   :  { %7206 = vmatpush.bf16.msrb.mxu2 %v12351_v4  ;;  %7220 = vmatpush.bf16.msrb.mxu3 %v12362_v57  ;;  %v15353_v4 = vld [vmem:[#allocation104_spill] sm:$0xff]  ;;  %v15354_v57 = vld [vmem:[#allocation105_spill] sm:$0xff] }
 0xb93   :  { %7179 = vmatpush.bf16.msrb.mxu0 %v15327_v36  ;;  %7193 = vmatpush.bf16.msrb.mxu1 %v15328_v40  ;;  %v15385_v36 = vld [vmem:[#allocation144_spill] sm:$0xff]  ;;  %v15386_v40 = vld [vmem:[#allocation145_spill] sm:$0xff] }
 0xb94   :  { %7207 = vmatpush.bf16.msrb.mxu2 %v15329_v43  ;;  %7221 = vmatpush.bf16.msrb.mxu3 %v15330_v52  ;;  %v15387_v43 = vld [vmem:[#allocation146_spill] sm:$0xff]  ;;  %v15388_v52 = vld [vmem:[#allocation147_spill] sm:$0xff] }
 0xb96   :  { %7180 = vmatmul.bf16.vlgmr.msrb.gmra.mxu0 %v15335_v30  ;;  %7194 = vmatmul.bf16.vlgmr.msrb.gmra.mxu1 %v15335_v30 }
 0xb97   :  { %7273 = vmatpush.bf16.msra.mxu0 %v15331_v58  ;;  %7287 = vmatpush.bf16.msra.mxu1 %v15332_v13  ;;  %v15389_v58 = vld [vmem:[#allocation149_spill] sm:$0xff]  ;;  %v15390_v13 = vld [vmem:[#allocation150_spill] sm:$0xff] }
 0xb98   :  { %7301 = vmatpush.bf16.msra.mxu2 %v15333_v14  ;;  %7315 = vmatpush.bf16.msra.mxu3 %v15334_v18  ;;  %v15391_v14 = vld [vmem:[#allocation151_spill] sm:$0xff]  ;;  %v15392_v18 = vld [vmem:[#allocation152_spill] sm:$0xff] }
 0xb99   :  { %7208 = vmatmul.bf16.vlgmr.msrb.gmra.mxu2 %v15335_v30  ;;  %7222 = vmatmul.bf16.vlgmr.msrb.gmra.mxu3 %v15335_v30  ;;  %v15393_v30 = vld [vmem:[#allocation153_spill] sm:$0xff] }
 0xb9b   :  { %7274 = vmatpush.bf16.msra.mxu0 %v15336_v38  ;;  %7288 = vmatpush.bf16.msra.mxu1 %v15337_v39  ;;  %v15394_v38 = vld [vmem:[#allocation154_spill] sm:$0xff]  ;;  %v15395_v39 = vld [vmem:[#allocation155_spill] sm:$0xff] }
 0xb9c   :  { %7302 = vmatpush.bf16.msra.mxu2 %v15338_v56  ;;  %7316 = vmatpush.bf16.msra.mxu3 %v15339_v29  ;;  %v15396_v56 = vld [vmem:[#allocation31_spill] sm:$0xff] }
 0xb9d   :  { %v15397_v29 = vperm.slane %v15396_v56, 0 }
 0xb9f   :  { %7275 = vmatpush.bf16.msra.mxu0 %v15340_v2  ;;  %7289 = vmatpush.bf16.msra.mxu1 %v15341_v46  ;;  %v15398_v2 = vld [vmem:[#allocation168_spill] sm:$0xff] }
 0xba0   :  { %7303 = vmatpush.bf16.msra.mxu2 %v15342_v62  ;;  %7317 = vmatpush.bf16.msra.mxu3 %v15343_v7  ;;  %v2488_v46 = vadd.f32 %v15398_v2, %v15397_v29  ;;  %v15399_v62 = vperm.slane %v15396_v56, 1  ;;  %v15400_v7 = vld [vmem:[#allocation169_spill] sm:$0xff]  ;;  %v15424_v2 = vld [vmem:[#allocation43_spill] sm:$0xff] }
 0xba3   :  { %7276 = vmatpush.bf16.msra.mxu0 %v15344_v61  ;;  %7290 = vmatpush.bf16.msra.mxu1 %v15345_v63  ;;  %v2489_v61 = vadd.f32 %v15400_v7, %v15399_v62  ;;  %v15401_v63 = vld [vmem:[#allocation67_spill] sm:$0xff]  ;;  %v15425_v62 = vld [vmem:[#allocation46_spill] sm:$0xff] }
 0xba4   :  { %7304 = vmatpush.bf16.msra.mxu2 %v15346_v47  ;;  %7318 = vmatpush.bf16.msra.mxu3 %v15347_v35  ;;  %v3266_v47 = vadd.f32 %v15401_v63, %v2488_v46  ;;  %v15402_v35 = vld [vmem:[#allocation156_spill] sm:$0xff] }
 0xba7   :  { %7277 = vmatpush.bf16.msra.mxu0 %v15348_v42  ;;  %7291 = vmatpush.bf16.msra.mxu1 %v15349_v11  ;;  %v3267_v42 = vadd.f32 %v15402_v35, %v2489_v61  ;;  %v15426_v61 = vld [vmem:[#allocation47_spill] sm:$0xff]  ;;  %v15428_v35 = vld [vmem:[#allocation176_spill] sm:$0xff] }
 0xba8   :  { %7305 = vmatpush.bf16.msra.mxu2 %v15350_v48  ;;  %7319 = vmatpush.bf16.msra.mxu3 %v15351_v60  ;;  %v15403_v60 = vld [vmem:[#allocation37_spill] sm:$0xff] }
 0xbab   :  { %7278 = vmatpush.bf16.msra.mxu0 %v15352_v41  ;;  %7292 = vmatpush.bf16.msra.mxu1 %v15353_v4  ;;  %v4044_v41 = vadd.f32 %v15403_v60, %v3266_v47  ;;  %v15404_v4 = vld [vmem:[#allocation68_spill] sm:$0xff]  ;;  %v15427_v47 = vperm.slane %v15396_v56, 4 }
 0xbac   :  { %7306 = vmatpush.bf16.msra.mxu2 %v15354_v57  ;;  %7320 = vmatpush.bf16.msra.mxu3 %v15355_v20  ;;  %v4045_v57 = vadd.f32 %v15404_v4, %v3267_v42  ;;  %v15405_v20 = vld [vmem:[#allocation74_spill] sm:$0xff] }
 0xbad   :  { %v2492_v42 = vadd.f32 %v15428_v35, %v15427_v47  ;;  %v15451_v35 = vld [vmem:[#allocation34_spill] sm:$0xff] }
 0xbaf   :  { %7279 = vmatpush.bf16.msra.mxu0 %v15356_v54  ;;  %7293 = vmatpush.bf16.msra.mxu1 %v15357_v50  ;;  %v15406_v50 = vld [vmem:[#allocation75_spill] sm:$0xff] }
 0xbb0   :  { %7307 = vmatpush.bf16.msra.mxu2 %v15358_v9  ;;  %7321 = vmatpush.bf16.msra.mxu3 %v15359_v22  ;;  %v15407_v22 = vld [vmem:[#allocation41_spill] sm:$0xff] }
 0xbb3   :  { %7280 = vmatpush.bf16.msra.mxu0 %v15360_v27  ;;  %7294 = vmatpush.bf16.msra.mxu1 %v15361_v25  ;;  %v4822_v27 = vadd.f32 %v15407_v22, %v4044_v41  ;;  %v15408_v25 = vld [vmem:[#allocation72_spill] sm:$0xff]  ;;  %v15431_v41 = vld [vmem:[#allocation53_spill] sm:$0xff] }
 0xbb4   :  { %7308 = vmatpush.bf16.msra.mxu2 %v15362_v0  ;;  %7322 = vmatpush.bf16.msra.mxu3 %v15363_v37  ;;  %v4823_v0 = vadd.f32 %v15408_v25, %v4045_v57  ;;  %v15409_v37 = vperm.slane %v15396_v56, 2  ;;  %v15432_v57 = vld [vmem:[#allocation55_spill] sm:$0xff] }
 0xbb6   :  { %7281 = vmatmul.bf16.vlgmr.msra.gmra.mxu0 %v14085_v15  ;;  %7295 = vmatmul.bf16.vlgmr.msra.gmra.mxu1 %v14085_v15 }
 0xbb7   :  { %7329 = vmatpush.bf16.msrb.mxu0 %v15364_v49  ;;  %7343 = vmatpush.bf16.msrb.mxu1 %v15365_v3  ;;  %v15410_v49 = vld [vmem:[#allocation170_spill] sm:$0xff] }
 0xbb8   :  { %7309 = vmatmul.bf16.vlgmr.msra.gmra.mxu2 %v14085_v15  ;;  %7323 = vmatmul.bf16.vlgmr.msra.gmra.mxu3 %v14085_v15  ;;  %v15384_v15 = vld [vmem:[#allocation143_spill] sm:$0xff]  ;;  %v2490_v3 = vadd.f32 %v15410_v49, %v15409_v37 }
 0xbb9   :  { %7357 = vmatpush.bf16.msrb.mxu2 %v15366_v53  ;;  %7371 = vmatpush.bf16.msrb.mxu3 %v15367_v51  ;;  %v15411_v53 = vperm.slane %v15396_v56, 3  ;;  %v15412_v51 = vld [vmem:[#allocation171_spill] sm:$0xff] }
 0xbbb   :  { %7330 = vmatpush.bf16.msrb.mxu0 %v15368_v59  ;;  %7344 = vmatpush.bf16.msrb.mxu1 %v15369_v5  ;;  %v2491_v59 = vadd.f32 %v15412_v51, %v15411_v53  ;;  %v15413_v5 = vld [vmem:[#allocation45_spill] sm:$0xff] }
 0xbbd   :  { %7358 = vmatpush.bf16.msrb.mxu2 %v15370_v24  ;;  %7372 = vmatpush.bf16.msrb.mxu3 %v15371_v45  ;;  %v5600_v24 = vadd.f32 %v15413_v5, %v4822_v27  ;;  %v15414_v45 = vld [vmem:[#allocation76_spill] sm:$0xff] }
 0xbbe   :  { %v15434_v27 = vld [vmem:[#allocation64_spill] sm:$0xff] }
 0xbbf   :  { %7331 = vmatpush.bf16.msrb.mxu0 %v15372_v23  ;;  %7345 = vmatpush.bf16.msrb.mxu1 %v15373_v17  ;;  %v5601_v23 = vadd.f32 %v15414_v45, %v4823_v0  ;;  %v15415_v17 = vld [vmem:[#allocation157_spill] sm:$0xff] }
 0xbc1   :  { %7359 = vmatpush.bf16.msrb.mxu2 %v15374_v28  ;;  %7373 = vmatpush.bf16.msrb.mxu3 %v15375_v1  ;;  %v3268_v28 = vadd.f32 %v15415_v17, %v2490_v3  ;;  %v15416_v1 = vld [vmem:[#allocation159_spill] sm:$0xff] }
 0xbc3   :  { %7332 = vmatpush.bf16.msrb.mxu0 %v15376_v31  ;;  %7346 = vmatpush.bf16.msrb.mxu1 %v15377_v32  ;;  %v3269_v31 = vadd.f32 %v15416_v1, %v2491_v59  ;;  %v15417_v32 = vld [vmem:[#allocation52_spill] sm:$0xff]  ;;  %v15435_v59 = vld [vmem:[#allocation33_spill] sm:$0xff] }
 0xbc5   :  { %7360 = vmatpush.bf16.msrb.mxu2 %v15378_v55  ;;  %7374 = vmatpush.bf16.msrb.mxu3 %v15379_v44  ;;  %v6378_v55 = vadd.f32 %v15417_v32, %v5600_v24  ;;  %v15418_v44 = vld [vmem:[#allocation88_spill] sm:$0xff] }
 0xbc6   :  { %v15436_v24 = vld [vmem:[#allocation172_spill] sm:$0xff] }
 0xbc7   :  { %7333 = vmatpush.bf16.msrb.mxu0 %v15380_v16  ;;  %7347 = vmatpush.bf16.msrb.mxu1 %v15381_v33  ;;  %v6379_v16 = vadd.f32 %v15418_v44, %v5601_v23  ;;  %v15437_v23 = vld [vmem:[#allocation97_spill] sm:$0xff] }
 0xbc9   :  { %7361 = vmatpush.bf16.msrb.mxu2 %v15382_v6  ;;  %7375 = vmatpush.bf16.msrb.mxu3 %v15383_v34  ;;  %v15419_v34 = vld [vmem:[#allocation38_spill] sm:$0xff] }
 0xbcb   :  { %7334 = vmatpush.bf16.msrb.mxu0 %v15384_v15  ;;  %7348 = vmatpush.bf16.msrb.mxu1 %v15385_v36  ;;  %v4046_v15 = vadd.f32 %v15419_v34, %v3268_v28  ;;  %v15420_v36 = vld [vmem:[#allocation39_spill] sm:$0xff]  ;;  %v15438_v28 = vld [vmem:[#allocation98_spill] sm:$0xff]  ;;  %v15443_v34 = vperm.slane %v15396_v56, 7 }
 0xbcd   :  { %7362 = vmatpush.bf16.msrb.mxu2 %v15386_v40  ;;  %7376 = vmatpush.bf16.msrb.mxu3 %v15387_v43  ;;  %v4047_v40 = vadd.f32 %v15420_v36, %v3269_v31  ;;  %v15421_v43 = vld [vmem:[#allocation166_spill] sm:$0xff]  ;;  %v15439_v31 = vld [vmem:[#allocation167_spill] sm:$0xff] }
 0xbcf   :  { %7335 = vmatpush.bf16.msrb.mxu0 %v15388_v52  ;;  %7349 = vmatpush.bf16.msrb.mxu1 %v15389_v58  ;;  %v15422_v58 = vld [vmem:[#allocation48_spill] sm:$0xff]  ;;  %v4825_v46 = vadd.f32 %v15424_v2, %v4047_v40  ;;  %v15445_v40 = vld [vmem:[#allocation66_spill] sm:$0xff] }
 0xbd1   :  { %7363 = vmatpush.bf16.msrb.mxu2 %v15390_v13  ;;  %7377 = vmatpush.bf16.msrb.mxu3 %v15391_v14  ;;  %v5603_v63 = vadd.f32 %v15426_v61, %v4825_v46  ;;  %v15449_v46 = vld [vmem:[#allocation36_spill] sm:$0xff] }
 0xbd3   :  { %7336 = vmatpush.bf16.msrb.mxu0 %v15392_v18  ;;  %7350 = vmatpush.bf16.msrb.mxu1 %v15393_v30 }
 0xbd5   :  { %7364 = vmatpush.bf16.msrb.mxu2 %v15394_v38  ;;  %7378 = vmatpush.bf16.msrb.mxu3 %v15395_v39  ;;  %v15423_v39 = vld [vmem:[#allocation42_spill] sm:$0xff] }
 0xbd6   :  { %v4824_v29 = vadd.f32 %v15423_v39, %v4046_v15  ;;  %v15444_v15 = vld [vmem:[#allocation179_spill] sm:$0xff] }
 0xbd7   :  { %v2495_v36 = vadd.f32 %v15444_v15, %v15443_v34  ;;  %v15462_v15 = vld [vmem:[#allocation61_spill] sm:$0xff] }
 0xbd8   :  { %v5602_v7 = vadd.f32 %v15425_v62, %v4824_v29  ;;  %v15448_v29 = vld [vmem:[#allocation165_spill] sm:$0xff] }
 0xbd9   :  { %v3273_v2 = vadd.f32 %v15448_v29, %v2495_v36 }
 0xbda   :  { %v6380_v4 = vadd.f32 %v15431_v41, %v5602_v7  ;;  %v15450_v7 = vld [vmem:[#allocation73_spill] sm:$0xff]  ;;  %v15454_v41 = vld [vmem:[#allocation175_spill] sm:$0xff] }
 0xbf2   :  { %v7045_v11 = vpop.f32.mrf.mxu0  ;;  %v7059_v48 = vpop.f32.mrf.mxu1 }
 0xbf3   :  { %v14210_v54 = vadd.f32 %v7045_v11, %v15405_v20  ;;  %v14213_v9 = vadd.f32 %v7059_v48, %v15406_v50  ;;  %v15429_v11 = vperm.slane %v15396_v56, 5  ;;  %v15430_v48 = vld [vmem:[#allocation177_spill] sm:$0xff]  ;;  %v6381_v20 = vadd.f32 %v15432_v57, %v5603_v63  ;;  %v15433_v50 = vld [vmem:[#allocation164_spill] sm:$0xff] }
 0xbf4   :  { %v3270_v22 = vadd.f32 %v15433_v50, %v2492_v42 }
 0xbf5   :  { %v2493_v60 = vadd.f32 %v15430_v48, %v15429_v11  ;;  %v15452_v11 = vld [vmem:[#allocation65_spill] sm:$0xff]  ;;  %v15453_v48 = vld [vmem:[#allocation107_spill] sm:$0xff] }
 0xbf6   :  { %v4048_v5 = vadd.f32 %v15435_v59, %v3270_v22  ;;  %v15458_v59 = vld [vmem:[#allocation162_spill] sm:$0xff] }
 0xbf7   :  { %v3271_v25 = vadd.f32 %v15434_v27, %v2493_v60  ;;  %v15455_v27 = vld [vmem:[#allocation173_spill] sm:$0xff] }
 0xbf8   :  { %v4826_v32 = vadd.f32 %v15439_v31, %v4048_v5 }
 0xbf9   :  { %v7073_v33 = vpop.f32.mrf.mxu2  ;;  %v7087_v6 = vpop.f32.mrf.mxu3  ;;  %v4049_v45 = vadd.f32 %v15436_v24, %v3271_v25  ;;  %v15459_v24 = vld [vmem:[#allocation70_spill] sm:$0xff] }
 0xbfa   :  { %v14232_v52 = vadd.f32 %v7073_v33, %v15421_v43  ;;  %v14235_v13 = vadd.f32 %v7087_v6, %v15422_v58  ;;  %v7047_v14 = vpop.f32.mrf.mxu0  ;;  %v7061_v18 = vpop.f32.mrf.mxu1  ;;  %v15442_v33 = vld [vmem:[#allocation178_spill] sm:$0xff]  ;;  %v5604_v43 = vadd.f32 %v15445_v40, %v4826_v32  ;;  %v15446_v58 = vld [vmem:[#allocation69_spill] sm:$0xff] }
 0xbfb   :  { %v14237_v30 = vadd.f32 %v7047_v14, %v6378_v55  ;;  %v14239_v38 = vadd.f32 %v7061_v18, %v6379_v16  ;;  %v15440_v55 = vld [vmem:[#allocation160_spill] sm:$0xff]  ;;  %v15441_v16 = vperm.slane %v15396_v56, 6  ;;  %v15447_v18 = vld [vmem:[#allocation158_spill] sm:$0xff]  ;;  %v4051_v56 = vadd.f32 %v15452_v11, %v3273_v2 }
 0xbfc   :  { %v4827_v44 = vadd.f32 %v15440_v55, %v4049_v45  ;;  %v6382_v62 = vadd.f32 %v15449_v46, %v5604_v43  ;;  %v15464_v46 = vld [vmem:[#allocation62_spill] sm:$0xff] }
 0xbfd   :  { %v2494_v6 = vadd.f32 %v15442_v33, %v15441_v16 }
 0xbfe   :  { %v5605_v14 = vadd.f32 %v15446_v58, %v4827_v44 }
 0xbff   :  { %v3272_v39 = vadd.f32 %v15447_v18, %v2494_v6  ;;  %v15461_v6 = vld [vmem:[#allocation60_spill] sm:$0xff]  ;;  %v15463_v18 = vld [vmem:[#allocation131_spill] sm:$0xff] }
 0xc00   :  { %v6383_v61 = vadd.f32 %v15450_v7, %v5605_v14  ;;  %v15465_v7 = vld [vmem:[#allocation63_spill] sm:$0xff] }
 0xc01   :  { %v7075_v0 = vpop.f32.mrf.mxu2  ;;  %v7089_v37 = vpop.f32.mrf.mxu3  ;;  %v4050_v42 = vadd.f32 %v15451_v35, %v3272_v39 }
 0xc02   :  { %v14255_v49 = vadd.f32 %v7075_v0, %v6380_v4  ;;  %v14257_v3 = vadd.f32 %v7089_v37, %v6381_v20  ;;  %v7101_v53 = vpop.f32.mrf.mxu0  ;;  %v7115_v51 = vpop.f32.mrf.mxu1  ;;  %v15456_v0 = vld [vmem:[#allocation174_spill] sm:$0xff] }
 0xc03   :  { %v14262_v17 = vadd.f32 %v7101_v53, %v15437_v23  ;;  %v14265_v1 = vadd.f32 %v7115_v51, %v15438_v28  ;;  %v4828_v25 = vadd.f32 %v15455_v27, %v4050_v42  ;;  %v4829_v37 = vadd.f32 %v15456_v0, %v4051_v56  ;;  %v15457_v53 = vld [vmem:[#allocation161_spill] sm:$0xff]  ;;  %v15460_v23 = vld [vmem:[#allocation71_spill] sm:$0xff]  ;;  %v15466_v56 = vld [vmem:[#allocation138_spill] sm:$0xff] }
 0xc04   :  { %v10711_v0 = vld [vmem:[#allocation3 + $0xfe0] sm:$0xf0] }
 0xc05   :  { %v5606_v51 = vadd.f32 %v15457_v53, %v4828_v25  ;;  %v5607_v5 = vadd.f32 %v15458_v59, %v4829_v37  ;;  %v11420_v25 = vld [vmem:[#allocation3 + $0xfc4] sm:$0xf]  ;;  %v10717_v53 = vld [vmem:[#allocation3 + $0xfc8] sm:$0xf] }
 0xc06   :  { %v10714_v37 = vor.u32 %v11420_v25, %v10711_v0 }
 0xc07   :  { %v6384_v45 = vadd.f32 %v15459_v24, %v5606_v51  ;;  %v6385_v28 = vadd.f32 %v15460_v23, %v5607_v5  ;;  %v11425_v51 = vld [vmem:[#allocation3 + $0xfe4] sm:$0xf0] }
 0xc08   :  { %v10718_v23 = vor.u32 %v11425_v51, %v10717_v53  ;;  %7828 = vmatpush.bf16.msra.mxu1 %v10714_v37  ;;  %v10677_v51 = vld [vmem:[#allocation3 + $0xf80] sm:$0xf] }
 0xc09   :  { %v7129_v63 = vpop.f32.mrf.mxu2  ;;  %v7143_v47 = vpop.f32.mrf.mxu3 }
 0xc0a   :  { %v14284_v60 = vadd.f32 %v7129_v63, %v15453_v48  ;;  %v14287_v4 = vadd.f32 %v7143_v47, %v15454_v41  ;;  %v7103_v57 = vpop.f32.mrf.mxu0  ;;  %v7117_v20 = vpop.f32.mrf.mxu1  ;;  %v10709_v41 = vld [vmem:[#allocation3 + $0xfc0] sm:$0xf]  ;;  %7842 = vmatpush.bf16.msra.mxu2 %v10718_v23  ;;  %v10685_v23 = vld [vmem:[#allocation3 + $0xf88] sm:$0xf] }
 0xc0b   :  { %v14289_v50 = vadd.f32 %v7103_v57, %v6382_v62  ;;  %v14291_v22 = vadd.f32 %v7117_v20, %v6383_v61  ;;  %v11424_v57 = vld [vmem:[#allocation3 + $0xfdc] sm:$0xf0] }
 0xc0c   :  { %v10710_v27 = vor.u32 %v11424_v57, %v10709_v41 }
 0xc0e   :  { %7814 = vmatpush.bf16.msra.mxu0 %v10710_v27 }
 0xc11   :  { %v7131_v31 = vpop.f32.mrf.mxu2  ;;  %v7145_v32 = vpop.f32.mrf.mxu3 }
 0xc12   :  { %v14299_v55 = vadd.f32 %v7131_v31, %v6384_v45  ;;  %v14301_v44 = vadd.f32 %v7145_v32, %v6385_v28  ;;  %v11421_v28 = vld [vmem:[#allocation3 + $0xfcc] sm:$0xf] }
 0xc13   :  { %v7181_v16 = vpop.f32.mrf.mxu0  ;;  %v7195_v33 = vpop.f32.mrf.mxu1  ;;  %v10719_v31 = vld [vmem:[#allocation3 + $0xfe8] sm:$0xf0] }
 0xc14   :  { %v7228_v34 = vadd.f32 %v7181_v16, %v15461_v6  ;;  %v7229_v36 = vadd.f32 %v7195_v33, %v15462_v15  ;;  %v15467_v33 = vld [vmem:[#allocation141_spill] sm:$0xff] }
 0xc16   :  { %v7236_v40 = vmul.f32 0.5, %v7228_v34  ;;  %v7244_v43 = vmul.f32 0.5, %v7229_v36  ;;  %v15468_v34 = vld [vmem:[#allocation148_spill] sm:$0xff]  ;;  %v10722_v36 = vor.u32 %v11421_v28, %v10719_v31  ;;  %v11417_v28 = vld [vmem:[#allocation3 + $0xfa4] sm:$0xf0] }
 0xc18   :  { %11725 = vtanh.f32 %v7236_v40  ;;  %7856 = vmatpush.bf16.msra.mxu3 %v10722_v36  ;;  %v11404_v36 = vld [vmem:[#allocation3 + $0xf44] sm:$0xf] }
 0xc19   :  { %11727 = vtanh.f32 %v7244_v43 }
 0xc1b   :  { %v7183_v29 = vpop.f32.mrf.mxu0  ;;  %v7197_v2 = vpop.f32.mrf.mxu1 }
 0xc1c   :  { %v7209_v58 = vpop.f32.mrf.mxu2  ;;  %v7223_v14 = vpop.f32.mrf.mxu3  ;;  %v7232_v62 = vadd.f32 %v7183_v29, %v15464_v46  ;;  %v7233_v61 = vadd.f32 %v7197_v2, %v15465_v7 }
 0xc1d   :  { %v7230_v39 = vadd.f32 %v7209_v58, %v15463_v18  ;;  %v7231_v48 = vadd.f32 %v7223_v14, %v15466_v56  ;;  %v15469_v58 = vld [vmem:[#allocation32_spill] sm:$0xff] }
 0xc1e   :  { %v11726_v63 = vpop.eup %11725  ;;  %v7237_v47 = vmul.f32 0.5, %v7232_v62  ;;  %v7245_v35 = vmul.f32 0.5, %v7233_v61 }
 0xc1f   :  { %11729 = vtanh.f32 %v7230_v39  ;;  %v11728_v42 = vpop.eup %11727  ;;  %v7240_v11 = vmul.f32 0.5, %v11726_v63  ;;  %v7254_v16 = vmul.f32 0.5, %v7231_v48  ;;  %v15470_v63 = vld [vmem:[#allocation44_spill] sm:$0xff] }
 0xc20   :  { %v7248_v20 = vmul.f32 0.5, %v11728_v42  ;;  %11731 = vtanh.f32 %v7237_v47 }
 0xc21   :  { %11733 = vtanh.f32 %v7245_v35  ;;  %v7242_v59 = vadd.f32 0.5, %v7240_v11 }
 0xc22   :  { %v7250_v5 = vadd.f32 0.5, %v7248_v20 }
 0xc24   :  { %v7211_v24 = vpop.f32.mrf.mxu2  ;;  %v7225_v45 = vpop.f32.mrf.mxu3  ;;  %v7262_v14 = vmul.f32 %v7250_v5, %v15469_v58  ;;  %v11412_v5 = vld [vmem:[#allocation3 + $0xf84] sm:$0xf]  ;;  %v10653_v58 = vld [vmem:[#allocation3 + $0xf48] sm:$0xf] }
 0xc25   :  { %v11730_v32 = vpop.eup %11729  ;;  %v7234_v6 = vadd.f32 %v7211_v24, %v15467_v33  ;;  %v7235_v15 = vadd.f32 %v7225_v45, %v15468_v34  ;;  %v10679_v45 = vld [vmem:[#allocation3 + $0xfa0] sm:$0xf0]  ;;  %v10687_v33 = vld [vmem:[#allocation3 + $0xfa8] sm:$0xf0]  ;;  %v10645_v34 = vld [vmem:[#allocation3 + $0xf40] sm:$0xf] }
 0xc26   :  { %v11732_v43 = vpop.eup %11731  ;;  %v7264_v18 = vmul.f32 %v11730_v32, %v7242_v59  ;;  %v11416_v59 = vld [vmem:[#allocation3 + $0xf9c] sm:$0xf0]  ;;  %v10682_v31 = vor.u32 %v11412_v5, %v10679_v45  ;;  %v10686_v32 = vor.u32 %v11417_v28, %v10685_v23  ;;  %v10591_v45 = vld [vmem:[#allocation3 + $0xee8] sm:$0xf0] }
 0xc27   :  { %11735 = vtanh.f32 %v7234_v6  ;;  %v7255_v40 = vmul.f32 0.5, %v7235_v15  ;;  %v11734_v39 = vpop.eup %11733  ;;  %v7241_v29 = vmul.f32 0.5, %v11732_v43  ;;  %v10678_v24 = vor.u32 %v11416_v59, %v10677_v51  ;;  %v11408_v15 = vld [vmem:[#allocation3 + $0xf5c] sm:$0xf0]  ;;  %v10647_v43 = vld [vmem:[#allocation3 + $0xf60] sm:$0xf0] }
 0xc28   :  { %11737 = vtanh.f32 %v7254_v16  ;;  %v7249_v2 = vmul.f32 0.5, %v11734_v39  ;;  %v7266_v62 = vadd.f32 %v7264_v18, %v7262_v14  ;;  %v11413_v16 = vld [vmem:[#allocation3 + $0xf8c] sm:$0xf]  ;;  %7829 = vmatpush.bf16.msra.mxu1 %v10682_v31  ;;  %7843 = vmatpush.bf16.msra.mxu2 %v10686_v32  ;;  %v11409_v14 = vld [vmem:[#allocation3 + $0xf64] sm:$0xf0]  ;;  %v10650_v18 = vor.u32 %v11404_v36, %v10647_v43 }
 0xc29   :  { %11739 = vtanh.f32 %v7255_v40  ;;  %v7243_v46 = vadd.f32 0.5, %v7241_v29  ;;  %7815 = vmatpush.bf16.msra.mxu0 %v10678_v24  ;;  %v10690_v6 = vor.u32 %v11413_v16, %v10687_v33  ;;  %v10646_v40 = vor.u32 %v11408_v15, %v10645_v34  ;;  %v11405_v29 = vld [vmem:[#allocation3 + $0xf4c] sm:$0xf]  ;;  %v11393_v51 = vld [vmem:[#allocation3 + $0xee4] sm:$0xf0] }
 0xc2a   :  { %v7251_v7 = vadd.f32 0.5, %v7249_v2  ;;  %11741 = vtanh.f32 %v7266_v62  ;;  %v10654_v39 = vor.u32 %v11409_v14, %v10653_v58  ;;  %v10655_v2 = vld [vmem:[#allocation3 + $0xf68] sm:$0xf0]  ;;  %v10613_v62 = vld [vmem:[#allocation3 + $0xf00] sm:$0xf] }
 0xc2b   :  { %7857 = vmatpush.bf16.msra.mxu3 %v10690_v6  ;;  %v11389_v24 = vld [vmem:[#allocation3 + $0xecc] sm:$0xf]  ;;  %v10549_v32 = vld [vmem:[#allocation3 + $0xe80] sm:$0xf]  ;;  %v11380_v33 = vld [vmem:[#allocation3 + $0xe84] sm:$0xf] }
 0xc2c   :  { %v7263_v47 = vmul.f32 %v7251_v7, %v15470_v63  ;;  %7830 = vmatpush.bf16.msra.mxu1 %v10650_v18  ;;  %7844 = vmatpush.bf16.msra.mxu2 %v10654_v39  ;;  %v11400_v7 = vld [vmem:[#allocation3 + $0xf1c] sm:$0xf0]  ;;  %v10594_v31 = vor.u32 %v11389_v24, %v10591_v45  ;;  %v10551_v34 = vld [vmem:[#allocation3 + $0xea0] sm:$0xf0]  ;;  %v10557_v15 = vld [vmem:[#allocation3 + $0xe88] sm:$0xf] }
 0xc2d   :  { %v11736_v61 = vpop.eup %11735  ;;  %7816 = vmatpush.bf16.msra.mxu0 %v10646_v40  ;;  %v10614_v63 = vor.u32 %v11400_v7, %v10613_v62  ;;  %v11384_v16 = vld [vmem:[#allocation3 + $0xe9c] sm:$0xf0]  ;;  %v11385_v36 = vld [vmem:[#allocation3 + $0xea4] sm:$0xf0]  ;;  %v10554_v40 = vor.u32 %v11380_v33, %v10551_v34  ;;  %v11381_v58 = vld [vmem:[#allocation3 + $0xe8c] sm:$0xf] }
 0xc2e   :  { %v7265_v35 = vmul.f32 %v11736_v61, %v7243_v46  ;;  %v11738_v42 = vpop.eup %11737  ;;  %v10658_v46 = vor.u32 %v11405_v29, %v10655_v2  ;;  %v11396_v61 = vld [vmem:[#allocation3 + $0xf04] sm:$0xf]  ;;  %v10550_v6 = vor.u32 %v11384_v16, %v10549_v32  ;;  %v10558_v43 = vor.u32 %v11385_v36, %v10557_v15  ;;  %v10559_v14 = vld [vmem:[#allocation3 + $0xea8] sm:$0xf0]  ;;  %v10517_v39 = vld [vmem:[#allocation3 + $0xe40] sm:$0xf] }
 0xc2f   :  { %v11740_v11 = vpop.eup %11739  ;;  %v7258_v48 = vmul.f32 0.5, %v11738_v42  ;;  %v11401_v42 = vld [vmem:[#allocation3 + $0xf24] sm:$0xf0]  ;;  %v10562_v18 = vor.u32 %v11381_v58, %v10559_v14  ;;  %v11376_v29 = vld [vmem:[#allocation3 + $0xe5c] sm:$0xf0] }
 0xc30   :  { %v7267_v56 = vadd.f32 %v7265_v35, %v7263_v47  ;;  %v7259_v41 = vmul.f32 0.5, %v11740_v11  ;;  %v11742_v57 = vpop.eup %11741  ;;  %7858 = vmatpush.bf16.msra.mxu3 %v10658_v46  ;;  %v10615_v47 = vld [vmem:[#allocation3 + $0xf20] sm:$0xf0]  ;;  %v10621_v35 = vld [vmem:[#allocation3 + $0xf08] sm:$0xf]  ;;  %v10518_v46 = vor.u32 %v11376_v29, %v10517_v39 }
 0xc31   :  { %v7260_v20 = vadd.f32 0.5, %v7258_v48  ;;  %v10618_v11 = vor.u32 %v11396_v61, %v10615_v47  ;;  %v11397_v48 = vld [vmem:[#allocation3 + $0xf0c] sm:$0xf]  ;;  %7817 = vmatpush.bf16.msra.mxu0 %v10614_v63  ;;  %v11372_v2 = vld [vmem:[#allocation3 + $0xe44] sm:$0xf] }
 0xc32   :  { %11743 = vtanh.f32 %v7267_v56  ;;  %v7261_v27 = vadd.f32 0.5, %v7259_v41  ;;  %v10622_v56 = vor.u32 %v11401_v42, %v10621_v35  ;;  %v10623_v41 = vld [vmem:[#allocation3 + $0xf28] sm:$0xf0]  ;;  %v10519_v62 = vld [vmem:[#allocation3 + $0xe60] sm:$0xf0] }
 0xc33   :  { %v7270_v0 = vmul.f32 %v11742_v57, %v7260_v20  ;;  %v10626_v57 = vor.u32 %v11397_v48, %v10623_v41  ;;  %7831 = vmatpush.bf16.msra.mxu1 %v10618_v11  ;;  %v10581_v20 = vld [vmem:[#allocation3 + $0xec0] sm:$0xf]  ;;  %v14313_v23 = vpop.f32.mrf.mxu0  ;;  %v14315_v28 = vpop.f32.mrf.mxu1  ;;  %v10525_v7 = vld [vmem:[#allocation3 + $0xe48] sm:$0xf]  ;;  %v10522_v35 = vor.u32 %v11372_v2, %v10519_v62  ;;  %v11373_v11 = vld [vmem:[#allocation3 + $0xe4c] sm:$0xf] }
 0xc34   :  { %7845 = vmatpush.bf16.msra.mxu2 %v10622_v56  ;;  %v11377_v61 = vld [vmem:[#allocation3 + $0xe64] sm:$0xf0]  ;;  %v10527_v56 = vld [vmem:[#allocation3 + $0xe68] sm:$0xf0]  ;;  %v10485_v41 = vld [vmem:[#allocation3 + $0xe00] sm:$0xf] }
 0xc35   :  { %7859 = vmatpush.bf16.msra.mxu3 %v10626_v57  ;;  %v10526_v42 = vor.u32 %v11377_v61, %v10525_v7  ;;  %v10530_v48 = vor.u32 %v11373_v11, %v10527_v56  ;;  %v11368_v57 = vld [vmem:[#allocation3 + $0xe1c] sm:$0xf0]  ;;  %v11365_v24 = vld [vmem:[#allocation3 + $0xe0c] sm:$0xf]  ;;  %v11426_v16 = vld [vmem:[#allocation3 + $0xfec] sm:$0xf0] }
 0xc36   :  { %v10495_v45 = vld [vmem:[#allocation3 + $0xe28] sm:$0xf0]  ;;  %v11422_v33 = vld [vmem:[#allocation3 + $0xfd4] sm:$0xf]  ;;  %v10733_v36 = vld [vmem:[#allocation3 + $0xfd8] sm:$0xf] }
 0xc37   :  { %v10498_v32 = vor.u32 %v11365_v24, %v10495_v45  ;;  %v10735_v14 = vld [vmem:[#allocation3 + $0xff8] sm:$0xf0]  ;;  %v11418_v39 = vld [vmem:[#allocation3 + $0xfac] sm:$0xf0]  ;;  %v10695_v62 = vld [vmem:[#allocation3 + $0xfb0] sm:$0xf0] }
 0xc38   :  { %v11744_v25 = vpop.eup %11743  ;;  %v10701_v7 = vld [vmem:[#allocation3 + $0xf98] sm:$0xf]  ;;  %v10703_v11 = vld [vmem:[#allocation3 + $0xfb8] sm:$0xf0]  ;;  %v10663_v45 = vld [vmem:[#allocation3 + $0xf70] sm:$0xf0] }
 0xc39   :  { %v7271_v37 = vmul.f32 %v11744_v25, %v7261_v27  ;;  %v11392_v27 = vld [vmem:[#allocation3 + $0xedc] sm:$0xf0]  ;;  %v11388_v25 = vld [vmem:[#allocation3 + $0xec4] sm:$0xf]  ;;  %7860 = vmatpush.bf16.msra.mxu3 %v10594_v31  ;;  %v10725_v31 = vld [vmem:[#allocation3 + $0xfd0] sm:$0xf] }
 0xc3a   :  { %v10726_v34 = vor.u32 %v11426_v16, %v10725_v31  ;;  %v10669_v31 = vld [vmem:[#allocation3 + $0xf58] sm:$0xf] }
 0xc3b   :  { %v7272_v53 = vpack.c.bf16 %v7271_v37, %v7270_v0  ;;  %v10582_v0 = vor.u32 %v11392_v27, %v10581_v20  ;;  %v10583_v37 = vld [vmem:[#allocation3 + $0xee0] sm:$0xf0]  ;;  %v14317_v63 = vpop.f32.mrf.mxu2  ;;  %v14319_v47 = vpop.f32.mrf.mxu3 }
 0xc3c   :  { %v10586_v59 = vor.u32 %v11388_v25, %v10583_v37  ;;  %v11364_v20 = vld [vmem:[#allocation3 + $0xe04] sm:$0xf]  ;;  %v14321_v27 = vpop.f32.mrf.mxu0  ;;  %v14323_v25 = vpop.f32.mrf.mxu1 }
 0xc3d   :  { %7337 = vmatmul.bf16.vlgmr.msrb.gmra.mxu0 %v7272_v53  ;;  %7351 = vmatmul.bf16.vlgmr.msrb.gmra.mxu1 %v7272_v53  ;;  %v10487_v37 = vld [vmem:[#allocation3 + $0xe20] sm:$0xf0] }
 0xc3e   :  { %7365 = vmatmul.bf16.vlgmr.msrb.gmra.mxu2 %v7272_v53  ;;  %7379 = vmatmul.bf16.vlgmr.msrb.gmra.mxu3 %v7272_v53  ;;  %v10589_v53 = vld [vmem:[#allocation3 + $0xec8] sm:$0xf] }
 0xc3f   :  { %v10590_v5 = vor.u32 %v11393_v51, %v10589_v53  ;;  %7818 = vmatpush.bf16.msra.mxu0 %v10582_v0  ;;  %7832 = vmatpush.bf16.msra.mxu1 %v10586_v59  ;;  %v10486_v0 = vor.u32 %v11368_v57, %v10485_v41  ;;  %v10493_v53 = vld [vmem:[#allocation3 + $0xe08] sm:$0xf]  ;;  %v10490_v59 = vor.u32 %v11364_v20, %v10487_v37  ;;  %v10661_v37 = vld [vmem:[#allocation3 + $0xf50] sm:$0xf] }
 0xc40   :  { %7861 = vmatpush.bf16.msra.mxu3 %v10562_v18  ;;  %v11369_v51 = vld [vmem:[#allocation3 + $0xe24] sm:$0xf0]  ;;  %v10693_v18 = vld [vmem:[#allocation3 + $0xf90] sm:$0xf] }
 0xc41   :  { %7846 = vmatpush.bf16.msra.mxu2 %v10590_v5  ;;  %v10494_v5 = vor.u32 %v11369_v51, %v10493_v53  ;;  %v10694_v2 = vor.u32 %v11418_v39, %v10693_v18  ;;  %v11410_v53 = vld [vmem:[#allocation3 + $0xf6c] sm:$0xf0]  ;;  %v11406_v51 = vld [vmem:[#allocation3 + $0xf54] sm:$0xf] }
 0xc42   :  { %v10662_v24 = vor.u32 %v11410_v53, %v10661_v37  ;;  %v10666_v16 = vor.u32 %v11406_v51, %v10663_v45  ;;  %v10631_v39 = vld [vmem:[#allocation3 + $0xf30] sm:$0xf0]  ;;  %v10597_v51 = vld [vmem:[#allocation3 + $0xed0] sm:$0xf] }
 0xc43   :  { %7819 = vmatpush.bf16.msra.mxu0 %v10550_v6  ;;  %7833 = vmatpush.bf16.msra.mxu1 %v10554_v40  ;;  %v10727_v6 = vld [vmem:[#allocation3 + $0xff0] sm:$0xf0]  ;;  %v11427_v40 = vld [vmem:[#allocation3 + $0xff4] sm:$0xf0]  ;;  %v14325_v56 = vpop.f32.mrf.mxu2 }
 0xc44   :  { %7862 = vmatpush.bf16.msra.mxu3 %v10530_v48  ;;  %v10730_v15 = vor.u32 %v11422_v33, %v10727_v6  ;;  %v10734_v58 = vor.u32 %v11427_v40, %v10733_v36  ;;  %v14327_v48 = vpop.f32.mrf.mxu3  ;;  %v11407_v6 = vld [vmem:[#allocation3 + $0xf5c] sm:$0xf] }
 0xc45   :  { %7847 = vmatpush.bf16.msra.mxu2 %v10558_v43  ;;  %v11423_v43 = vld [vmem:[#allocation3 + $0xfdc] sm:$0xf] }
 0xc46   :  { %v10738_v29 = vor.u32 %v11423_v43, %v10735_v14  ;;  %v11402_v43 = vld [vmem:[#allocation3 + $0xf2c] sm:$0xf0] }
 0xc47   :  { %7820 = vmatpush.bf16.msra.mxu0 %v10518_v46  ;;  %7834 = vmatpush.bf16.msra.mxu1 %v10522_v35  ;;  %v11414_v46 = vld [vmem:[#allocation3 + $0xf94] sm:$0xf]  ;;  %v11419_v35 = vld [vmem:[#allocation3 + $0xfb4] sm:$0xf0] }
 0xc48   :  { %7863 = vmatpush.bf16.msra.mxu3 %v10498_v32  ;;  %v10698_v61 = vor.u32 %v11414_v46, %v10695_v62  ;;  %v10702_v41 = vor.u32 %v11419_v35, %v10701_v7  ;;  %v11411_v32 = vld [vmem:[#allocation3 + $0xf74] sm:$0xf0]  ;;  %v11399_v62 = vld [vmem:[#allocation3 + $0xf1c] sm:$0xf] }
 0xc49   :  { %7848 = vmatpush.bf16.msra.mxu2 %v10526_v42  ;;  %v11415_v42 = vld [vmem:[#allocation3 + $0xf9c] sm:$0xf]  ;;  %v10670_v33 = vor.u32 %v11411_v32, %v10669_v31  ;;  %v11403_v46 = vld [vmem:[#allocation3 + $0xf34] sm:$0xf0]  ;;  %v10599_v31 = vld [vmem:[#allocation3 + $0xef0] sm:$0xf0] }
 0xc4a   :  { %v10706_v57 = vor.u32 %v11415_v42, %v10703_v11  ;;  %v10639_v7 = vld [vmem:[#allocation3 + $0xf38] sm:$0xf0]  ;;  %v10605_v32 = vld [vmem:[#allocation3 + $0xed8] sm:$0xf] }
 0xc4b   :  { %7821 = vmatpush.bf16.msra.mxu0 %v10486_v0  ;;  %7835 = vmatpush.bf16.msra.mxu1 %v10490_v59  ;;  %v10642_v11 = vor.u32 %v11399_v62, %v10639_v7 }
 0xc4c   :  { %7912 = vmatpush.bf16.msrb.mxu3 %v10738_v29  ;;  %v10637_v29 = vld [vmem:[#allocation3 + $0xf18] sm:$0xf] }
 0xc4d   :  { %7849 = vmatpush.bf16.msra.mxu2 %v10494_v5  ;;  %v10638_v42 = vor.u32 %v11403_v46, %v10637_v29  ;;  %v11383_v46 = vld [vmem:[#allocation3 + $0xe9c] sm:$0xf] }
 0xc4f   :  { %7870 = vmatpush.bf16.msrb.mxu0 %v10726_v34  ;;  %7884 = vmatpush.bf16.msrb.mxu1 %v10730_v15  ;;  %v10671_v34 = vld [vmem:[#allocation3 + $0xf78] sm:$0xf0] }
 0xc50   :  { %7913 = vmatpush.bf16.msrb.mxu3 %v10706_v57  ;;  %v10674_v40 = vor.u32 %v11407_v6, %v10671_v34  ;;  %v10607_v6 = vld [vmem:[#allocation3 + $0xef8] sm:$0xf0]  ;;  %v10565_v34 = vld [vmem:[#allocation3 + $0xe90] sm:$0xf] }
 0xc51   :  { %7898 = vmatpush.bf16.msrb.mxu2 %v10734_v58 }
 0xc53   :  { %7871 = vmatpush.bf16.msrb.mxu0 %v10694_v2  ;;  %7885 = vmatpush.bf16.msrb.mxu1 %v10698_v61 }
 0xc54   :  { %7914 = vmatpush.bf16.msrb.mxu3 %v10674_v40  ;;  %v11386_v40 = vld [vmem:[#allocation3 + $0xeac] sm:$0xf0] }
 0xc55   :  { %7899 = vmatpush.bf16.msrb.mxu2 %v10702_v41 }
 0xc57   :  { %7872 = vmatpush.bf16.msrb.mxu0 %v10662_v24  ;;  %7886 = vmatpush.bf16.msrb.mxu1 %v10666_v16 }
 0xc58   :  { %7915 = vmatpush.bf16.msrb.mxu3 %v10642_v11  ;;  %v10533_v11 = vld [vmem:[#allocation3 + $0xe50] sm:$0xf] }
 0xc59   :  { %7900 = vmatpush.bf16.msrb.mxu2 %v10670_v33 }
 0xc5d   :  { %7901 = vmatpush.bf16.msrb.mxu2 %v10638_v42  ;;  %v10575_v42 = vld [vmem:[#allocation3 + $0xeb8] sm:$0xf0] }
 0xcba   :  { %v7338_v20 = vpop.f32.mrf.mxu0  ;;  %v7352_v0 = vpop.f32.mrf.mxu1 }
 0xcbb   :  { %v7339_v59 = vadd.f32 %v7338_v20, %v14313_v23  ;;  %v7353_v5 = vadd.f32 %v7352_v0, %v14315_v28  ;;  %v10629_v23 = vld [vmem:[#allocation3 + $0xf10] sm:$0xf]  ;;  %v11398_v28 = vld [vmem:[#allocation3 + $0xf14] sm:$0xf] }
 0xcbc   :  { %v10630_v18 = vor.u32 %v11402_v43, %v10629_v23  ;;  %v10634_v2 = vor.u32 %v11398_v28, %v10631_v39  ;;  %v11382_v23 = vld [vmem:[#allocation3 + $0xe94] sm:$0xf] }
 0xcbd   :  { %v7385_v15 = vadd.f32 %v7339_v59, %v14786_v26  ;;  %v7386_v36 = vadd.f32 %v7353_v5, %v14787_v21  ;;  %v11394_v59 = vld [vmem:[#allocation3 + $0xeec] sm:$0xf0]  ;;  %v11390_v5 = vld [vmem:[#allocation3 + $0xed4] sm:$0xf] }
 0xcbe   :  { %7873 = vmatpush.bf16.msrb.mxu0 %v10630_v18  ;;  %7887 = vmatpush.bf16.msrb.mxu1 %v10634_v2  ;;  %v10598_v45 = vor.u32 %v11394_v59, %v10597_v51  ;;  %v11387_v2 = vld [vmem:[#allocation3 + $0xeb4] sm:$0xf0]  ;;  %v10578_v59 = vor.u32 %v11383_v46, %v10575_v42 }
 0xcbf   :  { %v7393_v58 = vmul.f32 0.5, %v7385_v15  ;;  %v7401_v14 = vmul.f32 0.5, %v7386_v36 }
 0xcc1   :  { %11745 = vtanh.f32 %v7393_v58  ;;  %v7366_v61 = vpop.f32.mrf.mxu2  ;;  %v7380_v35 = vpop.f32.mrf.mxu3 }
 0xcc2   :  { %11747 = vtanh.f32 %v7401_v14  ;;  %v7367_v41 = vadd.f32 %v7366_v61, %v14317_v63  ;;  %v7381_v57 = vadd.f32 %v7380_v35, %v14319_v47  ;;  %v7340_v20 = vpop.f32.mrf.mxu0  ;;  %v7354_v0 = vpop.f32.mrf.mxu1  ;;  %v11395_v63 = vld [vmem:[#allocation3 + $0xef4] sm:$0xf0]  ;;  %7874 = vmatpush.bf16.msrb.mxu0 %v10598_v45  ;;  %v10567_v14 = vld [vmem:[#allocation3 + $0xeb0] sm:$0xf0] }
 0xcc3   :  { %v7341_v37 = vadd.f32 %v7340_v20, %v14321_v27  ;;  %v7355_v53 = vadd.f32 %v7354_v0, %v14323_v25  ;;  %v10602_v27 = vor.u32 %v11390_v5, %v10599_v31  ;;  %v10606_v33 = vor.u32 %v11395_v63, %v10605_v32  ;;  %v11391_v25 = vld [vmem:[#allocation3 + $0xedc] sm:$0xf]  ;;  %v11378_v0 = vld [vmem:[#allocation3 + $0xe6c] sm:$0xf0]  ;;  %v10541_v45 = vld [vmem:[#allocation3 + $0xe58] sm:$0xf] }
 0xcc4   :  { %v7387_v24 = vadd.f32 %v7367_v41, %v14788_v8  ;;  %v7388_v15 = vadd.f32 %v7381_v57, %v14789_v12  ;;  %v10610_v36 = vor.u32 %v11391_v25, %v10607_v6  ;;  %v10570_v29 = vor.u32 %v11382_v23, %v10567_v14  ;;  %v10501_v25 = vld [vmem:[#allocation3 + $0xe10] sm:$0xf]  ;;  %v10509_v23 = vld [vmem:[#allocation3 + $0xe18] sm:$0xf] }
 0xcc5   :  { %v7389_v47 = vadd.f32 %v7341_v37, %v14786_v26  ;;  %v7390_v16 = vadd.f32 %v7355_v53, %v14787_v21  ;;  %7888 = vmatpush.bf16.msrb.mxu1 %v10602_v27  ;;  %v10566_v26 = vor.u32 %v11386_v40, %v10565_v34  ;;  %v10573_v21 = vld [vmem:[#allocation3 + $0xe98] sm:$0xf]  ;;  %7902 = vmatpush.bf16.msrb.mxu2 %v10606_v33  ;;  %v11374_v37 = vld [vmem:[#allocation3 + $0xe54] sm:$0xf]  ;;  %v11370_v6 = vld [vmem:[#allocation3 + $0xe2c] sm:$0xf0] }
 0xcc6   :  { %11749 = vtanh.f32 %v7387_v24  ;;  %7916 = vmatpush.bf16.msrb.mxu3 %v10610_v36  ;;  %v10574_v35 = vor.u32 %v11387_v2, %v10573_v21  ;;  %v7411_v41 = vmul.f32 0.5, %v7388_v15  ;;  %v10534_v5 = vor.u32 %v11378_v0, %v10533_v11  ;;  %v10535_v24 = vld [vmem:[#allocation3 + $0xe70] sm:$0xf0] }
 0xcc7   :  { %v11746_v43 = vpop.eup %11745  ;;  %v7394_v28 = vmul.f32 0.5, %v7389_v47  ;;  %v7402_v58 = vmul.f32 0.5, %v7390_v16  ;;  %7875 = vmatpush.bf16.msrb.mxu0 %v10566_v26  ;;  %v10538_v47 = vor.u32 %v11374_v37, %v10535_v24  ;;  %v11375_v16 = vld [vmem:[#allocation3 + $0xe5c] sm:$0xf]  ;;  %v11366_v34 = vld [vmem:[#allocation3 + $0xe14] sm:$0xf] }
 0xcc8   :  { %v11748_v18 = vpop.eup %11747  ;;  %v7397_v39 = vmul.f32 0.5, %v11746_v43  ;;  %v10503_v40 = vld [vmem:[#allocation3 + $0xe30] sm:$0xf0]  ;;  %v11367_v26 = vld [vmem:[#allocation3 + $0xe1c] sm:$0xf] }
 0xcc9   :  { %v7405_v62 = vmul.f32 0.5, %v11748_v18  ;;  %11751 = vtanh.f32 %v7394_v28  ;;  %v7368_v7 = vpop.f32.mrf.mxu2  ;;  %v7382_v61 = vpop.f32.mrf.mxu3  ;;  %7889 = vmatpush.bf16.msrb.mxu1 %v10570_v29  ;;  %7903 = vmatpush.bf16.msrb.mxu2 %v10574_v35  ;;  %v10506_v28 = vor.u32 %v11366_v34, %v10503_v40 }
 0xcca   :  { %11753 = vtanh.f32 %v7402_v58  ;;  %v7369_v57 = vadd.f32 %v7368_v7, %v14325_v56  ;;  %v7383_v20 = vadd.f32 %v7382_v61, %v14327_v48  ;;  %v7399_v53 = vadd.f32 0.5, %v7397_v39  ;;  %v11379_v56 = vld [vmem:[#allocation3 + $0xe74] sm:$0xf0]  ;;  %v10543_v48 = vld [vmem:[#allocation3 + $0xe78] sm:$0xf0]  ;;  %7917 = vmatpush.bf16.msrb.mxu3 %v10578_v59 }
 0xccb   :  { %v7407_v51 = vadd.f32 0.5, %v7405_v62  ;;  %v10542_v27 = vor.u32 %v11379_v56, %v10541_v45  ;;  %v10546_v33 = vor.u32 %v11375_v16, %v10543_v48  ;;  %7876 = vmatpush.bf16.msrb.mxu0 %v10534_v5  ;;  %v11371_v58 = vld [vmem:[#allocation3 + $0xe34] sm:$0xf0]  ;;  %v10511_v39 = vld [vmem:[#allocation3 + $0xe38] sm:$0xf0] }
 0xccc   :  { %v11750_v31 = vpop.eup %11749  ;;  %v7391_v32 = vadd.f32 %v7369_v57, %v14788_v8  ;;  %v7392_v63 = vadd.f32 %v7383_v20, %v14789_v12  ;;  %v10502_v12 = vor.u32 %v11370_v6, %v10501_v25  ;;  %v10510_v18 = vor.u32 %v11371_v58, %v10509_v23 }
 0xccd   :  { %v7419_v15 = vmul.f32 %v7407_v51, %v14078_v10  ;;  %v7421_v43 = vmul.f32 %v11750_v31, %v7399_v53  ;;  %7890 = vmatpush.bf16.msrb.mxu1 %v10538_v47  ;;  %7904 = vmatpush.bf16.msrb.mxu2 %v10542_v27  ;;  %v10514_v10 = vor.u32 %v11367_v26, %v10511_v39 }
 0xcce   :  { %11755 = vtanh.f32 %v7391_v32  ;;  %v7412_v36 = vmul.f32 0.5, %v7392_v63  ;;  %7918 = vmatpush.bf16.msrb.mxu3 %v10546_v33 }
 0xccf   :  { %v11752_v8 = vpop.eup %11751  ;;  %11757 = vtanh.f32 %v7411_v41  ;;  %v7423_v46 = vadd.f32 %v7421_v43, %v7419_v15  ;;  %7877 = vmatpush.bf16.msrb.mxu0 %v10502_v12 }
 0xcd0   :  { %v11754_v14 = vpop.eup %11753  ;;  %v7398_v21 = vmul.f32 0.5, %v11752_v8  ;;  %11759 = vtanh.f32 %v7412_v36 }
 0xcd1   :  { %v7406_v29 = vmul.f32 0.5, %v11754_v14  ;;  %7891 = vmatpush.bf16.msrb.mxu1 %v10506_v28  ;;  %7905 = vmatpush.bf16.msrb.mxu2 %v10510_v18  ;;  %11761 = vtanh.f32 %v7423_v46 }
 0xcd2   :  { %v7400_v2 = vadd.f32 0.5, %v7398_v21  ;;  %7919 = vmatpush.bf16.msrb.mxu3 %v10514_v10 }
 0xcd3   :  { %v7408_v62 = vadd.f32 0.5, %v7406_v29 }
 0xcd4   :  { %v11756_v7 = vpop.eup %11755 }
 0xcd5   :  { %v7420_v61 = vmul.f32 %v7408_v62, %v14082_v19  ;;  %v7422_v35 = vmul.f32 %v11756_v7, %v7400_v2  ;;  %v11758_v42 = vpop.eup %11757 }
 0xcd6   :  { %v11760_v11 = vpop.eup %11759  ;;  %v7415_v57 = vmul.f32 0.5, %v11758_v42 }
 0xcd7   :  { %v7424_v41 = vadd.f32 %v7422_v35, %v7420_v61  ;;  %v7416_v20 = vmul.f32 0.5, %v11760_v11  ;;  %v11762_v0 = vpop.eup %11761 }
 0xcd8   :  { %v7417_v37 = vadd.f32 0.5, %v7415_v57 }
 0xcd9   :  { %11763 = vtanh.f32 %v7424_v41  ;;  %v7418_v53 = vadd.f32 0.5, %v7416_v20 }
 0xcda   :  { %v7427_v59 = vmul.f32 %v11762_v0, %v7417_v37 }
 0xcdf   :  { %v11764_v51 = vpop.eup %11763 }
 0xce0   :  { %v7428_v5 = vmul.f32 %v11764_v51, %v7418_v53 }
 0xce2   :  { %v7429_v24 = vpack.c.bf16 %v7428_v5, %v7427_v59 }
 0xce4   :  { %7822 = vmatmul.bf16.vlgmr.msra.gmra.mxu0 %v7429_v24  ;;  %7836 = vmatmul.bf16.vlgmr.msra.gmra.mxu1 %v7429_v24 }
 0xce5   :  { %7850 = vmatmul.bf16.vlgmr.msra.gmra.mxu2 %v7429_v24  ;;  %7864 = vmatmul.bf16.vlgmr.msra.gmra.mxu3 %v7429_v24 }
 0xcf4   :  { %7878 = vmatmul.bf16.vlgmr.msrb.gmra.mxu0 %v7429_v24  ;;  %7892 = vmatmul.bf16.vlgmr.msrb.gmra.mxu1 %v7429_v24 }
 0xcf5   :  { %7906 = vmatmul.bf16.vlgmr.msrb.gmra.mxu2 %v7429_v24  ;;  %7920 = vmatmul.bf16.vlgmr.msrb.gmra.mxu3 %v7429_v24 }
 0xd61   :  { %v7823_v19 = vpop.f32.mrf.mxu0  ;;  %v7837_v45 = vpop.f32.mrf.mxu1 }
 0xd62   :  { %v7926_v31 = vadd.f32 %v7823_v19, %v14210_v54  ;;  %v7927_v32 = vadd.f32 %v7837_v45, %v14213_v9 }
 0xd64   :  { %7942 = vst [vmem:[#allocation19] sm:$0xff] %v7926_v31 }
 0xd65   :  { %7943 = vst [vmem:[#allocation19 + $0x8] sm:$0xff] %v7927_v32 }
 0xd68   :  { %v7851_v63 = vpop.f32.mrf.mxu2  ;;  %v7865_v47 = vpop.f32.mrf.mxu3 }
 0xd69   :  { %v7928_v56 = vadd.f32 %v7851_v63, %v14232_v52  ;;  %v7929_v16 = vadd.f32 %v7865_v47, %v14235_v13  ;;  %v7825_v48 = vpop.f32.mrf.mxu0  ;;  %v7839_v27 = vpop.f32.mrf.mxu1 }
 0xd6a   :  { %v7934_v33 = vadd.f32 %v7825_v48, %v14237_v30  ;;  %v7935_v25 = vadd.f32 %v7839_v27, %v14239_v38 }
 0xd6b   :  { %7944 = vst [vmem:[#allocation19 + $0x10] sm:$0xff] %v7928_v56 }
 0xd6c   :  { %7945 = vst [vmem:[#allocation19 + $0x18] sm:$0xff] %v7929_v16 }
 0xd6d   :  { %7950 = vst [vmem:[#allocation19 + $0x40] sm:$0xff] %v7934_v33 }
 0xd6e   :  { %7951 = vst [vmem:[#allocation19 + $0x48] sm:$0xff] %v7935_v25 }
 0xd70   :  { %v7853_v54 = vpop.f32.mrf.mxu2  ;;  %v7867_v9 = vpop.f32.mrf.mxu3 }
 0xd71   :  { %v7936_v6 = vadd.f32 %v7853_v54, %v14255_v49  ;;  %v7937_v34 = vadd.f32 %v7867_v9, %v14257_v3  ;;  %v7879_v15 = vpop.f32.mrf.mxu0  ;;  %v7893_v52 = vpop.f32.mrf.mxu1 }
 0xd72   :  { %v7930_v13 = vadd.f32 %v7879_v15, %v14262_v17  ;;  %v7931_v36 = vadd.f32 %v7893_v52, %v14265_v1 }
 0xd73   :  { %7952 = vst [vmem:[#allocation19 + $0x50] sm:$0xff] %v7936_v6 }
 0xd74   :  { %7953 = vst [vmem:[#allocation19 + $0x58] sm:$0xff] %v7937_v34 }
 0xd75   :  { %7946 = vst [vmem:[#allocation19 + $0x20] sm:$0xff] %v7930_v13 }
 0xd76   :  { %7947 = vst [vmem:[#allocation19 + $0x28] sm:$0xff] %v7931_v36 }
 0xd78   :  { %v7907_v30 = vpop.f32.mrf.mxu2  ;;  %v7921_v38 = vpop.f32.mrf.mxu3 }
 0xd79   :  { %v7932_v40 = vadd.f32 %v7907_v30, %v14284_v60  ;;  %v7933_v23 = vadd.f32 %v7921_v38, %v14287_v4  ;;  %v7881_v8 = vpop.f32.mrf.mxu0  ;;  %v7895_v49 = vpop.f32.mrf.mxu1 }
 0xd7a   :  { %v7938_v3 = vadd.f32 %v7881_v8, %v14289_v50  ;;  %v7939_v43 = vadd.f32 %v7895_v49, %v14291_v22 }
 0xd7b   :  { %7948 = vst [vmem:[#allocation19 + $0x30] sm:$0xff] %v7932_v40 }
 0xd7c   :  { %7949 = vst [vmem:[#allocation19 + $0x38] sm:$0xff] %v7933_v23 }
 0xd7d   :  { %7954 = vst [vmem:[#allocation19 + $0x60] sm:$0xff] %v7938_v3 }
 0xd7e   :  { %7955 = vst [vmem:[#allocation19 + $0x68] sm:$0xff] %v7939_v43 }
 0xd80   :  { %v7909_v17 = vpop.f32.mrf.mxu2  ;;  %v7923_v1 = vpop.f32.mrf.mxu3 }
 0xd81   :  { %v7940_v60 = vadd.f32 %v7909_v17, %v14299_v55  ;;  %v7941_v4 = vadd.f32 %v7923_v1, %v14301_v44 }
 0xd83   :  { %7956 = vst [vmem:[#allocation19 + $0x70] sm:$0xff] %v7940_v60 }
 0xd84   :  { %7957 = vst [vmem:[#allocation19 + $0x78] sm:$0xff] %v7941_v4 }
 0xd85   :  { %7970 = dma.vmem_to_hbm [thread:$0]  %s7963_s27, 2048, %s7965_s5, [#allocation7], %s12034_s30, %s12034_s30, %s12035_s10  }
 0xd86   :  { %12017 = dma.done.wait [#allocation7], 2048  }
 0xd87   :  { %12018 = vsyncadd [#allocation7], 4294965248 }
 0xd88   :  { %7975 = vsyncpa [#allocation6], 1 }
 0xd89   :  { %7976 = vsyncpa [#allocation9], 1 }
 0xd8a   :  { %7977 = vsyncpa [#allocation12], 1 }
 0xd8b   :  { %7978 = vsyncpa [#allocation15], 1 }
 0xd8c   :  { %7979 = vsyncpa [#allocation18], 1 }
 0xd8d   :  { %7980 = vsyncpa [#allocation7], 1 }
 0xd8e   :  { %7981 = vsyncmov [#allocation4] }
 0xd91   :  { %s7982_s9 = vpop.sfrf %7981 }
 0xd92   :  { %p10739_p0 = scmp.ne.s32.totalorder %s7982_s9, 0 }
 0xd94   :  { %7986 = shalt.err (%p10739_p0)  }

</bundles_post_ra>
